<compile_context>
chip_gen: v7x
topology: tpu7x:2x2x1
jax: 0.10.0
libtpu: 0.0.40
codegen_flags: <defaults>
</compile_context>

<pallas_src>
import functools

import jax
import jax.numpy as jnp
from jax.experimental import pallas as pl
from jax.experimental.pallas import tpu as pltpu

NUM_HEADS = 4
DIM = 8                       # Net(dim=8)
EMB_DIM = 4 * DIM             # 32
HEAD_DIM = EMB_DIM // NUM_HEADS  # 8

_VMEM = pl.BlockSpec(memory_space=pltpu.MemorySpace.VMEM)
_SMEM = pl.BlockSpec(memory_space=pltpu.MemorySpace.SMEM)


# ----------------------------------------------------------------------------------------------
# GELU: exact erf GELU when the backend lowers erf; tanh approximation otherwise.
# The probe is lazy (runs at model-build time, outside any trace) instead of at import.
# ----------------------------------------------------------------------------------------------
_HAS_ERF = None


def _has_erf():
    """Lazily probe (eagerly, outside any jit/pallas trace) whether lax.erf lowers in Mosaic."""
    global _HAS_ERF
    if _HAS_ERF is None:
        def _k(x_ref, o_ref):
            o_ref[...] = jax.lax.erf(x_ref[...])
        try:
            jax.block_until_ready(
                pl.pallas_call(_k, out_shape=jax.ShapeDtypeStruct((8, 128), jnp.float32))(
                    jnp.zeros((8, 128), jnp.float32)))
            _HAS_ERF = True
        except Exception:  # noqa: BLE001
            _HAS_ERF = False
    return _HAS_ERF


def _gelu(v, use_erf):
    if use_erf:
        # exact GELU — matches torch.nn.GELU() default
        return 0.5 * v * (1.0 + jax.lax.erf(v * 0.7071067811865476))
    # TODO(synk): erf did not lower on this backend; tanh-approx GELU used (<~1e-3 abs diff).
    return 0.5 * v * (1.0 + jnp.tanh(0.7978845608028654 * (v + 0.044715 * v * v * v)))


def _small_k_mm(w, x):
    """(Co, Ci) @ (Ci, N) for tiny Ci (2-3) as unrolled VPU broadcast multiply-adds."""
    out = w[:, 0:1] * x[0:1, :]
    for c in range(1, w.shape[1]):
        out = out + w[:, c:c + 1] * x[c:c + 1, :]
    return out


# ----------------------------------------------------------------------------------------------
# The single fused kernel: whole Net forward, per-batch loop fully unrolled (B is tiny & static)
# ----------------------------------------------------------------------------------------------
def _net_kernel(xph_ref, xfq_ref,                     # data
                w_in_ref, s_in_ref, t_in_ref,         # in_layer conv + folded BN
                w_e1_ref, b_e1_ref,                   # embedding 1x1 conv
                wdw0_ref, wdw1_ref, wdw2_ref, wdw3_ref,  # depthwise convs (softmax-mixed)
                s_emb_ref, t_emb_ref,                 # embedding folded BN
                g1_ref, bt1_ref,                      # LayerNorm 1
                wq_ref, bq_ref, wk_ref, bk_ref, wv_ref, bv_ref,  # split qkv projection
                wpr_ref, bpr_ref,                     # attention output proj
                g2_ref, bt2_ref,                      # LayerNorm 2
                wf1_ref, bf1_ref, wf2_ref, bf2_ref,   # FFN
                wfq1_ref, bfq1_ref, wfq2_ref, bfq2_ref,  # frequency branch convs
                wt1_ref, wt2_ref, wfc_ref, bfc_ref,   # fusion weights + classifier
                addw_ref,                             # SMEM: normalized Add weights (4,)
                o_ref,                                # out (4, B)
                se_ref, so_ref, asm_ref,              # VMEM scratch
                *, batch, n_tok, use_erf):
    f32 = jnp.float32
    gelu = functools.partial(_gelu, use_erf=use_erf)

    # Load every weight once; they are reused for all batch elements.
    w_in = w_in_ref[...]                    # (15, 8, 3)  tap-major
    s_in = s_in_ref[...]; t_in = t_in_ref[...]
    w_e1 = w_e1_ref[...]; b_e1 = b_e1_ref[...]
    wdw = (wdw0_ref[...], wdw1_ref[...], wdw2_ref[...], wdw3_ref[...])
    s_emb = s_emb_ref[...]; t_emb = t_emb_ref[...]
    g1 = g1_ref[...]; bt1 = bt1_ref[...]
    wq = wq_ref[...]; bq = bq_ref[...]
    wk = wk_ref[...]; bk = bk_ref[...]
    wv = wv_ref[...]; bv = bv_ref[...]
    wpr = wpr_ref[...]; bpr = bpr_ref[...]
    g2 = g2_ref[...]; bt2 = bt2_ref[...]
    wf1 = wf1_ref[...]; bf1 = bf1_ref[...]
    wf2 = wf2_ref[...]; bf2 = bf2_ref[...]
    wfq1 = wfq1_ref[...]; bfq1 = bfq1_ref[...]      # (3, 16, 2), (16, 1)
    wfq2 = wfq2_ref[...]; bfq2 = bfq2_ref[...]      # (3, 32, 16), (32, 1)
    wt1 = wt1_ref[...]; wt2 = wt2_ref[...]
    wfc = wfc_ref[...]; bfc = bfc_ref[...]
    a10 = addw_ref[0]; a11 = addw_ref[1]
    a20 = addw_ref[2]; a21 = addw_ref[3]

    def layernorm(v, g, b):
        # channel-wise LayerNorm of a channels-first (C, N) tile (PyTorch LayerNorm(dim))
        mu = jnp.mean(v, axis=0, keepdims=True)
        vc = v - mu
        var = jnp.mean(vc * vc, axis=0, keepdims=True)
        return vc * jax.lax.rsqrt(var + 1e-5) * g + b

    lf = xfq_ref.shape[2]       # 18
    l1 = lf - 2                 # 16  (Conv1d(2,16,3), no padding)
    l2 = l1 - 2                 # 14  (Conv1d(16,32,3), no padding)
    c1 = wfq1.shape[1]          # 16

    for b in range(batch):
        # =========================== time branch ===========================
        xb = xph_ref[b]                                    # (4, 3, W): stride-4 phases of the
        #                                                    padded multi-scale input signal
        # in_layer Conv1d(3->8, k=15, s=2) evaluated separately at even / odd output positions
        # (so the later stride-2 depthwise convs need no strided access), fused with the
        # eval-BatchNorm affine, GELU and the embedding 1x1 conv (all pointwise in position).
        h_par = []
        for par in (0, 2):
            acc = jnp.zeros((DIM, n_tok), f32)
            for j in range(15):
                idx = j + par
                ph = idx % 4
                sh = idx // 4
                acc = acc + _small_k_mm(w_in[j], xb[ph, :, sh:sh + n_tok])
            g_act = gelu(acc * s_in + t_in)
            h_par.append(jnp.dot(w_e1, g_act, preferred_element_type=f32) + b_e1)

        # Zero-padded even/odd views of the embedding-conv1 output (pad 4 at full resolution
        # == pad 2 per parity): used as the common input of all 4 depthwise branches.
        se_ref[...] = jnp.zeros(se_ref.shape, f32)
        so_ref[...] = jnp.zeros(so_ref.shape, f32)
        se_ref[:, 2:2 + n_tok] = h_par[0]
        so_ref[:, 2:2 + n_tok] = h_par[1]

        # 4 depthwise stride-2 convs (k = 3,5,7,9, softmax mix folded into the taps),
        # lane-major (N on lanes), taps unrolled as VPU multiply-adds.
        for i in range(4):
            acc = jnp.zeros((DIM, n_tok), f32)
            for j in range(2 * i + 3):
                d = j + 3 - i                       # offset into the pad-4 full-resolution axis
                src = se_ref if d % 2 == 0 else so_ref
                a = d // 2
                acc = acc + wdw[i][:, j:j + 1] * src[:, a:a + n_tok]
            asm_ref[DIM * i:DIM * (i + 1), :] = acc
        x0 = gelu(asm_ref[...] * s_emb + t_emb)            # (32, n_tok) channels-first

        # ---------------- BA_FFN block (dropout = identity in eval) ----------------
        xn = layernorm(x0, g1, bt1)
        q_all = jnp.dot(wq, xn, preferred_element_type=f32) + bq      # (H, N)
        k_all = jnp.dot(wk, xn, preferred_element_type=f32) + bk      # (H*D, N)
        v_all = jnp.dot(wv, xn, preferred_element_type=f32) + bv      # (H*D, N)
        qm = jnp.max(q_all, axis=-1, keepdims=True)                   # softmax over tokens
        qe = jnp.exp(q_all - qm)
        scores = qe / jnp.sum(qe, axis=-1, keepdims=True)             # (H, N)
        for h in range(NUM_HEADS):
            sc = scores[h:h + 1, :]
            kh = k_all[HEAD_DIM * h:HEAD_DIM * (h + 1), :]
            vh = v_all[HEAD_DIM * h:HEAD_DIM * (h + 1), :]
            ctx = jnp.sum(kh * sc, axis=-1, keepdims=True)            # (D, 1)
            asm_ref[HEAD_DIM * h:HEAD_DIM * (h + 1), :] = jnp.maximum(vh, 0.0) * ctx
        attn = jnp.dot(wpr, asm_ref[...], preferred_element_type=f32) + bpr
        x1 = a10 * attn + a11 * x0                                    # Add() #1
        xn2 = layernorm(x1, g2, bt2)
        ff = gelu(jnp.dot(wf1, xn2, preferred_element_type=f32) + bf1)
        ff = jnp.dot(wf2, ff, preferred_element_type=f32) + bf2
        x2 = a20 * ff + a21 * x1                                      # Add() #2
        time_feat = jnp.mean(x2, axis=-1, keepdims=True)              # AdaptiveAvgPool1d(1)

        # =========================== frequency branch ===========================
        xf = xfq_ref[b]                                               # (2, 18)
        acc1 = jnp.zeros((c1, l1), f32)
        for j in range(3):
            acc1 = acc1 + _small_k_mm(wfq1[j], xf[:, j:j + l1])
        y1 = jnp.maximum(acc1 + bfq1, 0.0)                            # (16, 16)
        acc2 = jnp.zeros((EMB_DIM, l2), f32)
        for j in range(3):
            acc2 = acc2 + jnp.dot(wfq2[j], y1[:, j:j + l2], preferred_element_type=f32)
        y2 = jnp.maximum(acc2 + bfq2, 0.0)                            # (32, 14)
        freq_feat = jnp.mean(y2, axis=-1, keepdims=True)              # (32, 1)

        # =========================== fusion + classifier ===========================
        fused = wt1 * time_feat + wt2 * freq_feat                     # (32, 1)
        logits = jnp.dot(wfc, fused, preferred_element_type=f32) + bfc  # (4, 1)
        o_ref[:, b:b + 1] = logits


# ----------------------------------------------------------------------------------------------
# Pure-layout / parameter-folding glue (tiny XLA ops, no extra pallas launches)
# ----------------------------------------------------------------------------------------------
def moving_average(x, k):
    # nn.AvgPool1d(kernel_size=k, stride=k, padding=0)
    b, c, l = x.shape
    lk = l // k
    return x[:, :, : lk * k].reshape(b, c, lk, k).mean(axis=-1)


def _bn_fold(gamma, beta, eps=1e-5):
    # eval-mode BatchNorm1d with default running stats (mean=0, var=1)
    # TODO(synk): a trained checkpoint would need its real running_mean/var folded here.
    return gamma / jnp.sqrt(1.0 + eps), beta


def _add_weights(w_raw, eps=1e-12):
    # Add module: w = relu(w); weight = w / (sum(w) + eps)
    wr = jnp.maximum(w_raw, 0.0)
    return (wr / (jnp.sum(wr) + eps)).astype(jnp.float32)


# ----------------------------------------------------------------------------------------------
# Forward pass of Net: a single fused pallas_call
# ----------------------------------------------------------------------------------------------
def net_forward(params, x, *, use_erf=False):
    p = params
    x = x.astype(jnp.float32)
    bsz = x.shape[0]
    x_time = x[:, :3, :]
    x_freq = x[:, 3:, :18]

    # ---- time-branch input prep: multi-scale moving averages, conv padding, and a stride-4
    #      phase split so every stride-2 conv tap inside the kernel is a static, contiguous,
    #      lane-major slice (no im2col patch tensors, no strided in-kernel access). ----
    xs = jnp.concatenate([moving_average(x_time, k) for k in (2, 4, 8)], axis=2)
    ls = xs.shape[2]
    n_conv = (ls + 2 * 7 - 15) // 2 + 1     # in_layer Conv1d(k=15, s=2, p=7) output length
    assert n_conv % 2 == 0, "fused kernel assumes an even in_layer output length"
    n_tok = n_conv // 2                     # tokens after the stride-2 embedding convs
    total = ls + 14
    xs_pad = jnp.pad(xs, ((0, 0), (0, 0), (7, 7 + (-total) % 4)))
    xph = jnp.stack([xs_pad[:, :, r::4] for r in range(4)], axis=1)   # (B, 4, 3, W)

    # ---- parameter preprocessing (exact algebraic folds) ----
    s_in, t_in = _bn_fold(p["in_bn_g"], p["in_bn_b"])
    s_in = s_in.reshape(DIM, 1); t_in = t_in.reshape(DIM, 1)
    w_in = jnp.transpose(p["in_conv_w"], (2, 0, 1))                   # (15, 8, 3) tap-major
    w_e1 = p["emb_c1_w"][:, :, 0]
    b_e1 = p["emb_c1_b"].reshape(DIM, 1)
    mix = jax.nn.softmax(p["emb_mix_w"])                              # (4,)
    wdw = [p[f"emb_dw{i}_w"][:, 0, :] * mix[i] for i in range(4)]     # softmax mix folded in
    s_emb, t_emb = _bn_fold(p["emb_bn_g"], p["emb_bn_b"])
    s_emb = s_emb.reshape(EMB_DIM, 1); t_emb = t_emb.reshape(EMB_DIM, 1)
    g1 = p["ln1_g"].reshape(EMB_DIM, 1); bt1 = p["ln1_b"].reshape(EMB_DIM, 1)
    g2 = p["ln2_g"].reshape(EMB_DIM, 1); bt2 = p["ln2_b"].reshape(EMB_DIM, 1)
    # split the fused qkv projection so per-head q/k/v live in 8-aligned row blocks
    qkv_w = p["qkv_w"][:, :, 0].reshape(NUM_HEADS, 1 + 2 * HEAD_DIM, EMB_DIM)
    qkv_b = p["qkv_b"].reshape(NUM_HEADS, 1 + 2 * HEAD_DIM)
    wq = qkv_w[:, 0, :]                                               # (4, 32)
    wk = qkv_w[:, 1:1 + HEAD_DIM, :].reshape(EMB_DIM, EMB_DIM)        # row = h*D + d
    wv = qkv_w[:, 1 + HEAD_DIM:, :].reshape(EMB_DIM, EMB_DIM)
    bq = qkv_b[:, 0].reshape(NUM_HEADS, 1)
    bk = qkv_b[:, 1:1 + HEAD_DIM].reshape(EMB_DIM, 1)
    bv = qkv_b[:, 1 + HEAD_DIM:].reshape(EMB_DIM, 1)
    wpr = p["proj_w"][:, :, 0]; bpr = p["proj_b"].reshape(EMB_DIM, 1)
    wf1 = p["ffn1_w"][:, :, 0]; bf1 = p["ffn1_b"].reshape(-1, 1)
    wf2 = p["ffn2_w"][:, :, 0]; bf2 = p["ffn2_b"].reshape(EMB_DIM, 1)
    wfq1 = jnp.transpose(p["fq1_w"], (2, 0, 1)); bfq1 = p["fq1_b"].reshape(-1, 1)
    wfq2 = jnp.transpose(p["fq2_w"], (2, 0, 1)); bfq2 = p["fq2_b"].reshape(-1, 1)
    wt1 = p["weight1"].reshape(EMB_DIM, 1); wt2 = p["weight2"].reshape(EMB_DIM, 1)
    wfc = p["fc_w"]; bfc = p["fc_b"].reshape(-1, 1)
    addw = jnp.concatenate([_add_weights(p["add1_w"]), _add_weights(p["add2_w"])])  # (4,)

    # NOTE: order must match the _net_kernel signature.
    vmem_args = [xph, x_freq,
                 w_in, s_in, t_in,
                 w_e1, b_e1,
                 wdw[0], wdw[1], wdw[2], wdw[3],
                 s_emb, t_emb,
                 g1, bt1,
                 wq, bq, wk, bk, wv, bv,
                 wpr, bpr,
                 g2, bt2,
                 wf1, bf1, wf2, bf2,
                 wfq1, bfq1, wfq2, bfq2,
                 wt1, wt2, wfc, bfc]

    out_t = pl.pallas_call(
        functools.partial(_net_kernel, batch=bsz, n_tok=n_tok, use_erf=use_erf),
        out_shape=jax.ShapeDtypeStruct((4, bsz), jnp.float32),
        in_specs=[_VMEM] * len(vmem_args) + [_SMEM],
        out_specs=_VMEM,
        scratch_shapes=[pltpu.VMEM((DIM, n_tok + 4), jnp.float32),   # padded even positions
                        pltpu.VMEM((DIM, n_tok + 4), jnp.float32),   # padded odd positions
                        pltpu.VMEM((EMB_DIM, n_tok), jnp.float32)],  # channel assembly buffer
    )(*vmem_args, addw)

    return out_t.T                                                    # (B, 4)


# ----------------------------------------------------------------------------------------------
# Parameters (deterministic synthetic init; matches the module's __init__ shapes)
# ----------------------------------------------------------------------------------------------
def init_params(key):
    ks = jax.random.split(key, 24)
    rnd = lambda k, shape, s=0.1: (jax.random.normal(k, shape) * s).astype(jnp.float32)
    p = {}
    # in_layer: ConvBNReLU(3 -> 8, k=15, s=2): Conv1d(bias=False) + BN + GELU
    p["in_conv_w"] = rnd(ks[0], (DIM, 3, 15))
    p["in_bn_g"] = jnp.ones((DIM,), jnp.float32)
    p["in_bn_b"] = jnp.zeros((DIM,), jnp.float32)
    # LFEL.Embedding(8 -> 32, stride=2, n=4)
    p["emb_c1_w"] = rnd(ks[1], (DIM, DIM, 1))
    p["emb_c1_b"] = rnd(ks[2], (DIM,), 0.05)
    p["emb_mix_w"] = jnp.ones((4,), jnp.float32)
    for i in range(4):
        p[f"emb_dw{i}_w"] = rnd(ks[3 + i], (DIM, 1, 2 * i + 3))
    p["emb_bn_g"] = jnp.ones((EMB_DIM,), jnp.float32)
    p["emb_bn_b"] = jnp.zeros((EMB_DIM,), jnp.float32)
    # BA_FFN_Block(dim=32, ffn_dim=8, heads=4)
    p["ln1_g"] = jnp.ones((EMB_DIM,), jnp.float32)
    p["ln1_b"] = jnp.zeros((EMB_DIM,), jnp.float32)
    p["qkv_w"] = rnd(ks[7], (NUM_HEADS * (1 + 2 * HEAD_DIM), EMB_DIM, 1))
    p["qkv_b"] = rnd(ks[8], (NUM_HEADS * (1 + 2 * HEAD_DIM),), 0.05)
    p["proj_w"] = rnd(ks[9], (EMB_DIM, EMB_DIM, 1))
    p["proj_b"] = rnd(ks[10], (EMB_DIM,), 0.05)
    p["add1_w"] = jnp.ones((2,), jnp.float32)
    p["ln2_g"] = jnp.ones((EMB_DIM,), jnp.float32)
    p["ln2_b"] = jnp.zeros((EMB_DIM,), jnp.float32)
    p["ffn1_w"] = rnd(ks[11], (EMB_DIM // 4, EMB_DIM, 1))
    p["ffn1_b"] = rnd(ks[12], (EMB_DIM // 4,), 0.05)
    p["ffn2_w"] = rnd(ks[13], (EMB_DIM, EMB_DIM // 4, 1))
    p["ffn2_b"] = rnd(ks[14], (EMB_DIM,), 0.05)
    p["add2_w"] = jnp.ones((2,), jnp.float32)
    # frequency branch: Conv1d(2,16,3) -> ReLU -> Conv1d(16,32,3) -> ReLU -> pool
    p["fq1_w"] = rnd(ks[15], (16, 2, 3))
    p["fq1_b"] = rnd(ks[16], (16,), 0.05)
    p["fq2_w"] = rnd(ks[17], (32, 16, 3))
    p["fq2_b"] = rnd(ks[18], (32,), 0.05)
    # fusion weights and classifier head
    p["weight1"] = jnp.full((1, 32, 1), 0.25, jnp.float32)
    p["weight2"] = jnp.full((1, 32, 1), 0.75, jnp.float32)
    p["fc_w"] = rnd(ks[19], (4, 32))
    p["fc_b"] = jnp.zeros((4,), jnp.float32)
    return p


if __name__ == "__main__":
    root = jax.random.PRNGKey(0)
    k_params, k_x = jax.random.split(root)
    params = init_params(k_params)
    B, L = 2, 64
    x = jax.random.normal(k_x, (B, 5, L), dtype=jnp.float32)

    use_erf = _has_erf()                       # lazy probe, outside any trace
    fwd = jax.jit(functools.partial(net_forward, use_erf=use_erf))
    y = fwd(params, x)
    jax.block_until_ready(y)
    assert y.shape == (B, 4) and y.dtype == jnp.float32
    print("KERNEL_OK")
</pallas_src>

<mosaic_0001>
module attributes {stable_mosaic.version = 11 : i64} {
  func.func @_k(%arg0: memref<8x128xf32, #tpu.memory_space<vmem>>, %arg1: memref<8x128xf32, #tpu.memory_space<vmem>>) attributes {dimension_semantics = [], scalar_prefetch = 0 : i64, scratch_operands = 0 : i64, tpu.core_type = #tpu.core_type<tc>} {
    %c0 = arith.constant 0 : index
    %c0_0 = arith.constant 0 : index
    %0 = vector.load %arg0[%c0, %c0_0] : memref<8x128xf32, #tpu.memory_space<vmem>>, vector<8x128xf32>
    %1 = math.erf %0 : vector<8x128xf32>
    %c0_1 = arith.constant 0 : index
    %c0_2 = arith.constant 0 : index
    %2 = vector.load %arg1[%c0_1, %c0_2] : memref<8x128xf32, #tpu.memory_space<vmem>>, vector<8x128xf32>
    tpu.vector_store %arg1[%c0_1, %c0_2], %1 {strides = array<i32>} : memref<8x128xf32, #tpu.memory_space<vmem>>, vector<8x128xf32>,
    return
  }
}

module attributes {stable_mosaic.version = 11 : i64} {
  func.func @_net_kernel(%arg0: memref<2x4x3x18xf32, #tpu.memory_space<vmem>>, %arg1: memref<2x2x18xf32, #tpu.memory_space<vmem>>, %arg2: memref<15x8x3xf32, #tpu.memory_space<vmem>>, %arg3: memref<8x1xf32, #tpu.memory_space<vmem>>, %arg4: memref<8x1xf32, #tpu.memory_space<vmem>>, %arg5: memref<8x8xf32, #tpu.memory_space<vmem>>, %arg6: memref<8x1xf32, #tpu.memory_space<vmem>>, %arg7: memref<8x3xf32, #tpu.memory_space<vmem>>, %arg8: memref<8x5xf32, #tpu.memory_space<vmem>>, %arg9: memref<8x7xf32, #tpu.memory_space<vmem>>, %arg10: memref<8x9xf32, #tpu.memory_space<vmem>>, %arg11: memref<32x1xf32, #tpu.memory_space<vmem>>, %arg12: memref<32x1xf32, #tpu.memory_space<vmem>>, %arg13: memref<32x1xf32, #tpu.memory_space<vmem>>, %arg14: memref<32x1xf32, #tpu.memory_space<vmem>>, %arg15: memref<4x32xf32, #tpu.memory_space<vmem>>, %arg16: memref<4x1xf32, #tpu.memory_space<vmem>>, %arg17: memref<32x32xf32, #tpu.memory_space<vmem>>, %arg18: memref<32x1xf32, #tpu.memory_space<vmem>>, %arg19: memref<32x32xf32, #tpu.memory_space<vmem>>, %arg20: memref<32x1xf32, #tpu.memory_space<vmem>>, %arg21: memref<32x32xf32, #tpu.memory_space<vmem>>, %arg22: memref<32x1xf32, #tpu.memory_space<vmem>>, %arg23: memref<32x1xf32, #tpu.memory_space<vmem>>, %arg24: memref<32x1xf32, #tpu.memory_space<vmem>>, %arg25: memref<8x32xf32, #tpu.memory_space<vmem>>, %arg26: memref<8x1xf32, #tpu.memory_space<vmem>>, %arg27: memref<32x8xf32, #tpu.memory_space<vmem>>, %arg28: memref<32x1xf32, #tpu.memory_space<vmem>>, %arg29: memref<3x16x2xf32, #tpu.memory_space<vmem>>, %arg30: memref<16x1xf32, #tpu.memory_space<vmem>>, %arg31: memref<3x32x16xf32, #tpu.memory_space<vmem>>, %arg32: memref<32x1xf32, #tpu.memory_space<vmem>>, %arg33: memref<32x1xf32, #tpu.memory_space<vmem>>, %arg34: memref<32x1xf32, #tpu.memory_space<vmem>>, %arg35: memref<4x32xf32, #tpu.memory_space<vmem>>, %arg36: memref<4x1xf32, #tpu.memory_space<vmem>>, %arg37: memref<4xf32, #tpu.memory_space<smem>>, %arg38: memref<4x2xf32, #tpu.memory_space<vmem>>, %arg39: memref<8x18xf32, #tpu.memory_space<vmem>>, %arg40: memref<8x18xf32, #tpu.memory_space<vmem>>, %arg41: memref<32x14xf32, #tpu.memory_space<vmem>>) attributes {dimension_semantics = [], scalar_prefetch = 0 : i64, scratch_operands = 3 : i64, tpu.core_type = #tpu.core_type<tc>} {
    %c0 = arith.constant 0 : index
    %c0_0 = arith.constant 0 : index
    %c0_1 = arith.constant 0 : index
    %0 = vector.load %arg2[%c0, %c0_0, %c0_1] : memref<15x8x3xf32, #tpu.memory_space<vmem>>, vector<15x8x3xf32>
    %c0_2 = arith.constant 0 : index
    %c0_3 = arith.constant 0 : index
    %1 = vector.load %arg3[%c0_2, %c0_3] : memref<8x1xf32, #tpu.memory_space<vmem>>, vector<8x1xf32>
    %c0_4 = arith.constant 0 : index
    %c0_5 = arith.constant 0 : index
    %2 = vector.load %arg4[%c0_4, %c0_5] : memref<8x1xf32, #tpu.memory_space<vmem>>, vector<8x1xf32>
    %c0_6 = arith.constant 0 : index
    %c0_7 = arith.constant 0 : index
    %3 = vector.load %arg5[%c0_6, %c0_7] : memref<8x8xf32, #tpu.memory_space<vmem>>, vector<8x8xf32>
    %c0_8 = arith.constant 0 : index
    %c0_9 = arith.constant 0 : index
    %4 = vector.load %arg6[%c0_8, %c0_9] : memref<8x1xf32, #tpu.memory_space<vmem>>, vector<8x1xf32>
    %c0_10 = arith.constant 0 : index
    %c0_11 = arith.constant 0 : index
    %5 = vector.load %arg7[%c0_10, %c0_11] : memref<8x3xf32, #tpu.memory_space<vmem>>, vector<8x3xf32>
    %c0_12 = arith.constant 0 : index
    %c0_13 = arith.constant 0 : index
    %6 = vector.load %arg8[%c0_12, %c0_13] : memref<8x5xf32, #tpu.memory_space<vmem>>, vector<8x5xf32>
    %c0_14 = arith.constant 0 : index
    %c0_15 = arith.constant 0 : index
    %7 = vector.load %arg9[%c0_14, %c0_15] : memref<8x7xf32, #tpu.memory_space<vmem>>, vector<8x7xf32>
    %c0_16 = arith.constant 0 : index
    %c0_17 = arith.constant 0 : index
    %8 = vector.load %arg10[%c0_16, %c0_17] : memref<8x9xf32, #tpu.memory_space<vmem>>, vector<8x9xf32>
    %c0_18 = arith.constant 0 : index
    %c0_19 = arith.constant 0 : index
    %9 = vector.load %arg11[%c0_18, %c0_19] : memref<32x1xf32, #tpu.memory_space<vmem>>, vector<32x1xf32>
    %c0_20 = arith.constant 0 : index
    %c0_21 = arith.constant 0 : index
    %10 = vector.load %arg12[%c0_20, %c0_21] : memref<32x1xf32, #tpu.memory_space<vmem>>, vector<32x1xf32>
    %c0_22 = arith.constant 0 : index
    %c0_23 = arith.constant 0 : index
    %11 = vector.load %arg13[%c0_22, %c0_23] : memref<32x1xf32, #tpu.memory_space<vmem>>, vector<32x1xf32>
    %c0_24 = arith.constant 0 : index
    %c0_25 = arith.constant 0 : index
    %12 = vector.load %arg14[%c0_24, %c0_25] : memref<32x1xf32, #tpu.memory_space<vmem>>, vector<32x1xf32>
    %c0_26 = arith.constant 0 : index
    %c0_27 = arith.constant 0 : index
    %13 = vector.load %arg15[%c0_26, %c0_27] : memref<4x32xf32, #tpu.memory_space<vmem>>, vector<4x32xf32>
    %c0_28 = arith.constant 0 : index
    %c0_29 = arith.constant 0 : index
    %14 = vector.load %arg16[%c0_28, %c0_29] : memref<4x1xf32, #tpu.memory_space<vmem>>, vector<4x1xf32>
    %c0_30 = arith.constant 0 : index
    %c0_31 = arith.constant 0 : index
    %15 = vector.load %arg17[%c0_30, %c0_31] : memref<32x32xf32, #tpu.memory_space<vmem>>, vector<32x32xf32>
    %c0_32 = arith.constant 0 : index
    %c0_33 = arith.constant 0 : index
    %16 = vector.load %arg18[%c0_32, %c0_33] : memref<32x1xf32, #tpu.memory_space<vmem>>, vector<32x1xf32>
    %c0_34 = arith.constant 0 : index
    %c0_35 = arith.constant 0 : index
    %17 = vector.load %arg19[%c0_34, %c0_35] : memref<32x32xf32, #tpu.memory_space<vmem>>, vector<32x32xf32>
    %c0_36 = arith.constant 0 : index
    %c0_37 = arith.constant 0 : index
    %18 = vector.load %arg20[%c0_36, %c0_37] : memref<32x1xf32, #tpu.memory_space<vmem>>, vector<32x1xf32>
    %c0_38 = arith.constant 0 : index
    %c0_39 = arith.constant 0 : index
    %19 = vector.load %arg21[%c0_38, %c0_39] : memref<32x32xf32, #tpu.memory_space<vmem>>, vector<32x32xf32>
    %c0_40 = arith.constant 0 : index
    %c0_41 = arith.constant 0 : index
    %20 = vector.load %arg22[%c0_40, %c0_41] : memref<32x1xf32, #tpu.memory_space<vmem>>, vector<32x1xf32>
    %c0_42 = arith.constant 0 : index
    %c0_43 = arith.constant 0 : index
    %21 = vector.load %arg23[%c0_42, %c0_43] : memref<32x1xf32, #tpu.memory_space<vmem>>, vector<32x1xf32>
    %c0_44 = arith.constant 0 : index
    %c0_45 = arith.constant 0 : index
    %22 = vector.load %arg24[%c0_44, %c0_45] : memref<32x1xf32, #tpu.memory_space<vmem>>, vector<32x1xf32>
    %c0_46 = arith.constant 0 : index
    %c0_47 = arith.constant 0 : index
    %23 = vector.load %arg25[%c0_46, %c0_47] : memref<8x32xf32, #tpu.memory_space<vmem>>, vector<8x32xf32>
    %c0_48 = arith.constant 0 : index
    %c0_49 = arith.constant 0 : index
    %24 = vector.load %arg26[%c0_48, %c0_49] : memref<8x1xf32, #tpu.memory_space<vmem>>, vector<8x1xf32>
    %c0_50 = arith.constant 0 : index
    %c0_51 = arith.constant 0 : index
    %25 = vector.load %arg27[%c0_50, %c0_51] : memref<32x8xf32, #tpu.memory_space<vmem>>, vector<32x8xf32>
    %c0_52 = arith.constant 0 : index
    %c0_53 = arith.constant 0 : index
    %26 = vector.load %arg28[%c0_52, %c0_53] : memref<32x1xf32, #tpu.memory_space<vmem>>, vector<32x1xf32>
    %c0_54 = arith.constant 0 : index
    %c0_55 = arith.constant 0 : index
    %c0_56 = arith.constant 0 : index
    %27 = vector.load %arg29[%c0_54, %c0_55, %c0_56] : memref<3x16x2xf32, #tpu.memory_space<vmem>>, vector<3x16x2xf32>
    %c0_57 = arith.constant 0 : index
    %c0_58 = arith.constant 0 : index
    %28 = vector.load %arg30[%c0_57, %c0_58] : memref<16x1xf32, #tpu.memory_space<vmem>>, vector<16x1xf32>
    %c0_59 = arith.constant 0 : index
    %c0_60 = arith.constant 0 : index
    %c0_61 = arith.constant 0 : index
    %29 = vector.load %arg31[%c0_59, %c0_60, %c0_61] : memref<3x32x16xf32, #tpu.memory_space<vmem>>, vector<3x32x16xf32>
    %c0_62 = arith.constant 0 : index
    %c0_63 = arith.constant 0 : index
    %30 = vector.load %arg32[%c0_62, %c0_63] : memref<32x1xf32, #tpu.memory_space<vmem>>, vector<32x1xf32>
    %c0_64 = arith.constant 0 : index
    %c0_65 = arith.constant 0 : index
    %31 = vector.load %arg33[%c0_64, %c0_65] : memref<32x1xf32, #tpu.memory_space<vmem>>, vector<32x1xf32>
    %c0_66 = arith.constant 0 : index
    %c0_67 = arith.constant 0 : index
    %32 = vector.load %arg34[%c0_66, %c0_67] : memref<32x1xf32, #tpu.memory_space<vmem>>, vector<32x1xf32>
    %c0_68 = arith.constant 0 : index
    %c0_69 = arith.constant 0 : index
    %33 = vector.load %arg35[%c0_68, %c0_69] : memref<4x32xf32, #tpu.memory_space<vmem>>, vector<4x32xf32>
    %c0_70 = arith.constant 0 : index
    %c0_71 = arith.constant 0 : index
    %34 = vector.load %arg36[%c0_70, %c0_71] : memref<4x1xf32, #tpu.memory_space<vmem>>, vector<4x1xf32>
    %c0_72 = arith.constant 0 : index
    %35 = memref.load %arg37[%c0_72] : memref<4xf32, #tpu.memory_space<smem>>
    %c1 = arith.constant 1 : index
    %36 = memref.load %arg37[%c1] : memref<4xf32, #tpu.memory_space<smem>>
    %c2 = arith.constant 2 : index
    %37 = memref.load %arg37[%c2] : memref<4xf32, #tpu.memory_space<smem>>
    %c3 = arith.constant 3 : index
    %38 = memref.load %arg37[%c3] : memref<4xf32, #tpu.memory_space<smem>>
    %c0_73 = arith.constant 0 : index
    %c0_74 = arith.constant 0 : index
    %c0_75 = arith.constant 0 : index
    %c0_76 = arith.constant 0 : index
    %39 = vector.load %arg0[%c0_73, %c0_74, %c0_75, %c0_76] : memref<2x4x3x18xf32, #tpu.memory_space<vmem>>, vector<1x4x3x18xf32>
    %40 = vector.shape_cast %39 : vector<1x4x3x18xf32> to vector<4x3x18xf32>
    %cst = arith.constant 0.000000e+00 : f32
    %41 = vector.broadcast %cst : f32 to vector<8x14xf32>
    %42 = vector.extract_strided_slice %0 {offsets = [0, 0, 0], sizes = [1, 8, 3], strides = [1, 1, 1]} : vector<15x8x3xf32> to vector<1x8x3xf32>
    %43 = vector.shape_cast %42 : vector<1x8x3xf32> to vector<8x3xf32>
    %44 = vector.extract_strided_slice %40 {offsets = [0, 0, 0], sizes = [1, 3, 14], strides = [1, 1, 1]} : vector<4x3x18xf32> to vector<1x3x14xf32>
    %45 = vector.shape_cast %44 : vector<1x3x14xf32> to vector<3x14xf32>
    %46 = vector.extract_strided_slice %43 {offsets = [0, 0], sizes = [8, 1], strides = [1, 1]} : vector<8x3xf32> to vector<8x1xf32>
    %47 = vector.extract_strided_slice %45 {offsets = [0, 0], sizes = [1, 14], strides = [1, 1]} : vector<3x14xf32> to vector<1x14xf32>
    %48 = vector.broadcast %46 : vector<8x1xf32> to vector<8x14xf32>
    %49 = vector.broadcast %47 : vector<1x14xf32> to vector<8x14xf32>
    %50 = arith.mulf %48, %49 : vector<8x14xf32>
    %51 = vector.extract_strided_slice %43 {offsets = [0, 1], sizes = [8, 1], strides = [1, 1]} : vector<8x3xf32> to vector<8x1xf32>
    %52 = vector.extract_strided_slice %45 {offsets = [1, 0], sizes = [1, 14], strides = [1, 1]} : vector<3x14xf32> to vector<1x14xf32>
    %53 = vector.broadcast %51 : vector<8x1xf32> to vector<8x14xf32>
    %54 = vector.broadcast %52 : vector<1x14xf32> to vector<8x14xf32>
    %55 = arith.mulf %53, %54 : vector<8x14xf32>
    %56 = arith.addf %50, %55 : vector<8x14xf32>
    %57 = vector.extract_strided_slice %43 {offsets = [0, 2], sizes = [8, 1], strides = [1, 1]} : vector<8x3xf32> to vector<8x1xf32>
    %58 = vector.extract_strided_slice %45 {offsets = [2, 0], sizes = [1, 14], strides = [1, 1]} : vector<3x14xf32> to vector<1x14xf32>
    %59 = vector.broadcast %57 : vector<8x1xf32> to vector<8x14xf32>
    %60 = vector.broadcast %58 : vector<1x14xf32> to vector<8x14xf32>
    %61 = arith.mulf %59, %60 : vector<8x14xf32>
    %62 = arith.addf %56, %61 : vector<8x14xf32>
    %63 = arith.addf %41, %62 : vector<8x14xf32>
    %64 = vector.extract_strided_slice %0 {offsets = [1, 0, 0], sizes = [1, 8, 3], strides = [1, 1, 1]} : vector<15x8x3xf32> to vector<1x8x3xf32>
    %65 = vector.shape_cast %64 : vector<1x8x3xf32> to vector<8x3xf32>
    %66 = vector.extract_strided_slice %40 {offsets = [1, 0, 0], sizes = [1, 3, 14], strides = [1, 1, 1]} : vector<4x3x18xf32> to vector<1x3x14xf32>
    %67 = vector.shape_cast %66 : vector<1x3x14xf32> to vector<3x14xf32>
    %68 = vector.extract_strided_slice %65 {offsets = [0, 0], sizes = [8, 1], strides = [1, 1]} : vector<8x3xf32> to vector<8x1xf32>
    %69 = vector.extract_strided_slice %67 {offsets = [0, 0], sizes = [1, 14], strides = [1, 1]} : vector<3x14xf32> to vector<1x14xf32>
    %70 = vector.broadcast %68 : vector<8x1xf32> to vector<8x14xf32>
    %71 = vector.broadcast %69 : vector<1x14xf32> to vector<8x14xf32>
    %72 = arith.mulf %70, %71 : vector<8x14xf32>
    %73 = vector.extract_strided_slice %65 {offsets = [0, 1], sizes = [8, 1], strides = [1, 1]} : vector<8x3xf32> to vector<8x1xf32>
    %74 = vector.extract_strided_slice %67 {offsets = [1, 0], sizes = [1, 14], strides = [1, 1]} : vector<3x14xf32> to vector<1x14xf32>
    %75 = vector.broadcast %73 : vector<8x1xf32> to vector<8x14xf32>
    %76 = vector.broadcast %74 : vector<1x14xf32> to vector<8x14xf32>
    %77 = arith.mulf %75, %76 : vector<8x14xf32>
    %78 = arith.addf %72, %77 : vector<8x14xf32>
    %79 = vector.extract_strided_slice %65 {offsets = [0, 2], sizes = [8, 1], strides = [1, 1]} : vector<8x3xf32> to vector<8x1xf32>
    %80 = vector.extract_strided_slice %67 {offsets = [2, 0], sizes = [1, 14], strides = [1, 1]} : vector<3x14xf32> to vector<1x14xf32>
    %81 = vector.broadcast %79 : vector<8x1xf32> to vector<8x14xf32>
    %82 = vector.broadcast %80 : vector<1x14xf32> to vector<8x14xf32>
    %83 = arith.mulf %81, %82 : vector<8x14xf32>
    %84 = arith.addf %78, %83 : vector<8x14xf32>
    %85 = arith.addf %63, %84 : vector<8x14xf32>
    %86 = vector.extract_strided_slice %0 {offsets = [2, 0, 0], sizes = [1, 8, 3], strides = [1, 1, 1]} : vector<15x8x3xf32> to vector<1x8x3xf32>
    %87 = vector.shape_cast %86 : vector<1x8x3xf32> to vector<8x3xf32>
    %88 = vector.extract_strided_slice %40 {offsets = [2, 0, 0], sizes = [1, 3, 14], strides = [1, 1, 1]} : vector<4x3x18xf32> to vector<1x3x14xf32>
    %89 = vector.shape_cast %88 : vector<1x3x14xf32> to vector<3x14xf32>
    %90 = vector.extract_strided_slice %87 {offsets = [0, 0], sizes = [8, 1], strides = [1, 1]} : vector<8x3xf32> to vector<8x1xf32>
    %91 = vector.extract_strided_slice %89 {offsets = [0, 0], sizes = [1, 14], strides = [1, 1]} : vector<3x14xf32> to vector<1x14xf32>
    %92 = vector.broadcast %90 : vector<8x1xf32> to vector<8x14xf32>
    %93 = vector.broadcast %91 : vector<1x14xf32> to vector<8x14xf32>
    %94 = arith.mulf %92, %93 : vector<8x14xf32>
    %95 = vector.extract_strided_slice %87 {offsets = [0, 1], sizes = [8, 1], strides = [1, 1]} : vector<8x3xf32> to vector<8x1xf32>
    %96 = vector.extract_strided_slice %89 {offsets = [1, 0], sizes = [1, 14], strides = [1, 1]} : vector<3x14xf32> to vector<1x14xf32>
    %97 = vector.broadcast %95 : vector<8x1xf32> to vector<8x14xf32>
    %98 = vector.broadcast %96 : vector<1x14xf32> to vector<8x14xf32>
    %99 = arith.mulf %97, %98 : vector<8x14xf32>
    %100 = arith.addf %94, %99 : vector<8x14xf32>
    %101 = vector.extract_strided_slice %87 {offsets = [0, 2], sizes = [8, 1], strides = [1, 1]} : vector<8x3xf32> to vector<8x1xf32>
    %102 = vector.extract_strided_slice %89 {offsets = [2, 0], sizes = [1, 14], strides = [1, 1]} : vector<3x14xf32> to vector<1x14xf32>
    %103 = vector.broadcast %101 : vector<8x1xf32> to vector<8x14xf32>
    %104 = vector.broadcast %102 : vector<1x14xf32> to vector<8x14xf32>
    %105 = arith.mulf %103, %104 : vector<8x14xf32>
    %106 = arith.addf %100, %105 : vector<8x14xf32>
    %107 = arith.addf %85, %106 : vector<8x14xf32>
    %108 = vector.extract_strided_slice %0 {offsets = [3, 0, 0], sizes = [1, 8, 3], strides = [1, 1, 1]} : vector<15x8x3xf32> to vector<1x8x3xf32>
    %109 = vector.shape_cast %108 : vector<1x8x3xf32> to vector<8x3xf32>
    %110 = vector.extract_strided_slice %40 {offsets = [3, 0, 0], sizes = [1, 3, 14], strides = [1, 1, 1]} : vector<4x3x18xf32> to vector<1x3x14xf32>
    %111 = vector.shape_cast %110 : vector<1x3x14xf32> to vector<3x14xf32>
    %112 = vector.extract_strided_slice %109 {offsets = [0, 0], sizes = [8, 1], strides = [1, 1]} : vector<8x3xf32> to vector<8x1xf32>
    %113 = vector.extract_strided_slice %111 {offsets = [0, 0], sizes = [1, 14], strides = [1, 1]} : vector<3x14xf32> to vector<1x14xf32>
    %114 = vector.broadcast %112 : vector<8x1xf32> to vector<8x14xf32>
    %115 = vector.broadcast %113 : vector<1x14xf32> to vector<8x14xf32>
    %116 = arith.mulf %114, %115 : vector<8x14xf32>
    %117 = vector.extract_strided_slice %109 {offsets = [0, 1], sizes = [8, 1], strides = [1, 1]} : vector<8x3xf32> to vector<8x1xf32>
    %118 = vector.extract_strided_slice %111 {offsets = [1, 0], sizes = [1, 14], strides = [1, 1]} : vector<3x14xf32> to vector<1x14xf32>
    %119 = vector.broadcast %117 : vector<8x1xf32> to vector<8x14xf32>
    %120 = vector.broadcast %118 : vector<1x14xf32> to vector<8x14xf32>
    %121 = arith.mulf %119, %120 : vector<8x14xf32>
    %122 = arith.addf %116, %121 : vector<8x14xf32>
    %123 = vector.extract_strided_slice %109 {offsets = [0, 2], sizes = [8, 1], strides = [1, 1]} : vector<8x3xf32> to vector<8x1xf32>
    %124 = vector.extract_strided_slice %111 {offsets = [2, 0], sizes = [1, 14], strides = [1, 1]} : vector<3x14xf32> to vector<1x14xf32>
    %125 = vector.broadcast %123 : vector<8x1xf32> to vector<8x14xf32>
    %126 = vector.broadcast %124 : vector<1x14xf32> to vector<8x14xf32>
    %127 = arith.mulf %125, %126 : vector<8x14xf32>
    %128 = arith.addf %122, %127 : vector<8x14xf32>
    %129 = arith.addf %107, %128 : vector<8x14xf32>
    %130 = vector.extract_strided_slice %0 {offsets = [4, 0, 0], sizes = [1, 8, 3], strides = [1, 1, 1]} : vector<15x8x3xf32> to vector<1x8x3xf32>
    %131 = vector.shape_cast %130 : vector<1x8x3xf32> to vector<8x3xf32>
    %132 = vector.extract_strided_slice %40 {offsets = [0, 0, 1], sizes = [1, 3, 14], strides = [1, 1, 1]} : vector<4x3x18xf32> to vector<1x3x14xf32>
    %133 = vector.shape_cast %132 : vector<1x3x14xf32> to vector<3x14xf32>
    %134 = vector.extract_strided_slice %131 {offsets = [0, 0], sizes = [8, 1], strides = [1, 1]} : vector<8x3xf32> to vector<8x1xf32>
    %135 = vector.extract_strided_slice %133 {offsets = [0, 0], sizes = [1, 14], strides = [1, 1]} : vector<3x14xf32> to vector<1x14xf32>
    %136 = vector.broadcast %134 : vector<8x1xf32> to vector<8x14xf32>
    %137 = vector.broadcast %135 : vector<1x14xf32> to vector<8x14xf32>
    %138 = arith.mulf %136, %137 : vector<8x14xf32>
    %139 = vector.extract_strided_slice %131 {offsets = [0, 1], sizes = [8, 1], strides = [1, 1]} : vector<8x3xf32> to vector<8x1xf32>
    %140 = vector.extract_strided_slice %133 {offsets = [1, 0], sizes = [1, 14], strides = [1, 1]} : vector<3x14xf32> to vector<1x14xf32>
    %141 = vector.broadcast %139 : vector<8x1xf32> to vector<8x14xf32>
    %142 = vector.broadcast %140 : vector<1x14xf32> to vector<8x14xf32>
    %143 = arith.mulf %141, %142 : vector<8x14xf32>
    %144 = arith.addf %138, %143 : vector<8x14xf32>
    %145 = vector.extract_strided_slice %131 {offsets = [0, 2], sizes = [8, 1], strides = [1, 1]} : vector<8x3xf32> to vector<8x1xf32>
    %146 = vector.extract_strided_slice %133 {offsets = [2, 0], sizes = [1, 14], strides = [1, 1]} : vector<3x14xf32> to vector<1x14xf32>
    %147 = vector.broadcast %145 : vector<8x1xf32> to vector<8x14xf32>
    %148 = vector.broadcast %146 : vector<1x14xf32> to vector<8x14xf32>
    %149 = arith.mulf %147, %148 : vector<8x14xf32>
    %150 = arith.addf %144, %149 : vector<8x14xf32>
    %151 = arith.addf %129, %150 : vector<8x14xf32>
    %152 = vector.extract_strided_slice %0 {offsets = [5, 0, 0], sizes = [1, 8, 3], strides = [1, 1, 1]} : vector<15x8x3xf32> to vector<1x8x3xf32>
    %153 = vector.shape_cast %152 : vector<1x8x3xf32> to vector<8x3xf32>
    %154 = vector.extract_strided_slice %40 {offsets = [1, 0, 1], sizes = [1, 3, 14], strides = [1, 1, 1]} : vector<4x3x18xf32> to vector<1x3x14xf32>
    %155 = vector.shape_cast %154 : vector<1x3x14xf32> to vector<3x14xf32>
    %156 = vector.extract_strided_slice %153 {offsets = [0, 0], sizes = [8, 1], strides = [1, 1]} : vector<8x3xf32> to vector<8x1xf32>
    %157 = vector.extract_strided_slice %155 {offsets = [0, 0], sizes = [1, 14], strides = [1, 1]} : vector<3x14xf32> to vector<1x14xf32>
    %158 = vector.broadcast %156 : vector<8x1xf32> to vector<8x14xf32>
    %159 = vector.broadcast %157 : vector<1x14xf32> to vector<8x14xf32>
    %160 = arith.mulf %158, %159 : vector<8x14xf32>
    %161 = vector.extract_strided_slice %153 {offsets = [0, 1], sizes = [8, 1], strides = [1, 1]} : vector<8x3xf32> to vector<8x1xf32>
    %162 = vector.extract_strided_slice %155 {offsets = [1, 0], sizes = [1, 14], strides = [1, 1]} : vector<3x14xf32> to vector<1x14xf32>
    %163 = vector.broadcast %161 : vector<8x1xf32> to vector<8x14xf32>
    %164 = vector.broadcast %162 : vector<1x14xf32> to vector<8x14xf32>
    %165 = arith.mulf %163, %164 : vector<8x14xf32>
    %166 = arith.addf %160, %165 : vector<8x14xf32>
    %167 = vector.extract_strided_slice %153 {offsets = [0, 2], sizes = [8, 1], strides = [1, 1]} : vector<8x3xf32> to vector<8x1xf32>
    %168 = vector.extract_strided_slice %155 {offsets = [2, 0], sizes = [1, 14], strides = [1, 1]} : vector<3x14xf32> to vector<1x14xf32>
    %169 = vector.broadcast %167 : vector<8x1xf32> to vector<8x14xf32>
    %170 = vector.broadcast %168 : vector<1x14xf32> to vector<8x14xf32>
    %171 = arith.mulf %169, %170 : vector<8x14xf32>
    %172 = arith.addf %166, %171 : vector<8x14xf32>
    %173 = arith.addf %151, %172 : vector<8x14xf32>
    %174 = vector.extract_strided_slice %0 {offsets = [6, 0, 0], sizes = [1, 8, 3], strides = [1, 1, 1]} : vector<15x8x3xf32> to vector<1x8x3xf32>
    %175 = vector.shape_cast %174 : vector<1x8x3xf32> to vector<8x3xf32>
    %176 = vector.extract_strided_slice %40 {offsets = [2, 0, 1], sizes = [1, 3, 14], strides = [1, 1, 1]} : vector<4x3x18xf32> to vector<1x3x14xf32>
    %177 = vector.shape_cast %176 : vector<1x3x14xf32> to vector<3x14xf32>
    %178 = vector.extract_strided_slice %175 {offsets = [0, 0], sizes = [8, 1], strides = [1, 1]} : vector<8x3xf32> to vector<8x1xf32>
    %179 = vector.extract_strided_slice %177 {offsets = [0, 0], sizes = [1, 14], strides = [1, 1]} : vector<3x14xf32> to vector<1x14xf32>
    %180 = vector.broadcast %178 : vector<8x1xf32> to vector<8x14xf32>
    %181 = vector.broadcast %179 : vector<1x14xf32> to vector<8x14xf32>
    %182 = arith.mulf %180, %181 : vector<8x14xf32>
    %183 = vector.extract_strided_slice %175 {offsets = [0, 1], sizes = [8, 1], strides = [1, 1]} : vector<8x3xf32> to vector<8x1xf32>
    %184 = vector.extract_strided_slice %177 {offsets = [1, 0], sizes = [1, 14], strides = [1, 1]} : vector<3x14xf32> to vector<1x14xf32>
    %185 = vector.broadcast %183 : vector<8x1xf32> to vector<8x14xf32>
    %186 = vector.broadcast %184 : vector<1x14xf32> to vector<8x14xf32>
    %187 = arith.mulf %185, %186 : vector<8x14xf32>
    %188 = arith.addf %182, %187 : vector<8x14xf32>
    %189 = vector.extract_strided_slice %175 {offsets = [0, 2], sizes = [8, 1], strides = [1, 1]} : vector<8x3xf32> to vector<8x1xf32>
    %190 = vector.extract_strided_slice %177 {offsets = [2, 0], sizes = [1, 14], strides = [1, 1]} : vector<3x14xf32> to vector<1x14xf32>
    %191 = vector.broadcast %189 : vector<8x1xf32> to vector<8x14xf32>
    %192 = vector.broadcast %190 : vector<1x14xf32> to vector<8x14xf32>
    %193 = arith.mulf %191, %192 : vector<8x14xf32>
    %194 = arith.addf %188, %193 : vector<8x14xf32>
    %195 = arith.addf %173, %194 : vector<8x14xf32>
    %196 = vector.extract_strided_slice %0 {offsets = [7, 0, 0], sizes = [1, 8, 3], strides = [1, 1, 1]} : vector<15x8x3xf32> to vector<1x8x3xf32>
    %197 = vector.shape_cast %196 : vector<1x8x3xf32> to vector<8x3xf32>
    %198 = vector.extract_strided_slice %40 {offsets = [3, 0, 1], sizes = [1, 3, 14], strides = [1, 1, 1]} : vector<4x3x18xf32> to vector<1x3x14xf32>
    %199 = vector.shape_cast %198 : vector<1x3x14xf32> to vector<3x14xf32>
    %200 = vector.extract_strided_slice %197 {offsets = [0, 0], sizes = [8, 1], strides = [1, 1]} : vector<8x3xf32> to vector<8x1xf32>
    %201 = vector.extract_strided_slice %199 {offsets = [0, 0], sizes = [1, 14], strides = [1, 1]} : vector<3x14xf32> to vector<1x14xf32>
    %202 = vector.broadcast %200 : vector<8x1xf32> to vector<8x14xf32>
    %203 = vector.broadcast %201 : vector<1x14xf32> to vector<8x14xf32>
    %204 = arith.mulf %202, %203 : vector<8x14xf32>
    %205 = vector.extract_strided_slice %197 {offsets = [0, 1], sizes = [8, 1], strides = [1, 1]} : vector<8x3xf32> to vector<8x1xf32>
    %206 = vector.extract_strided_slice %199 {offsets = [1, 0], sizes = [1, 14], strides = [1, 1]} : vector<3x14xf32> to vector<1x14xf32>
    %207 = vector.broadcast %205 : vector<8x1xf32> to vector<8x14xf32>
    %208 = vector.broadcast %206 : vector<1x14xf32> to vector<8x14xf32>
    %209 = arith.mulf %207, %208 : vector<8x14xf32>
    %210 = arith.addf %204, %209 : vector<8x14xf32>
    %211 = vector.extract_strided_slice %197 {offsets = [0, 2], sizes = [8, 1], strides = [1, 1]} : vector<8x3xf32> to vector<8x1xf32>
    %212 = vector.extract_strided_slice %199 {offsets = [2, 0], sizes = [1, 14], strides = [1, 1]} : vector<3x14xf32> to vector<1x14xf32>
    %213 = vector.broadcast %211 : vector<8x1xf32> to vector<8x14xf32>
    %214 = vector.broadcast %212 : vector<1x14xf32> to vector<8x14xf32>
    %215 = arith.mulf %213, %214 : vector<8x14xf32>
    %216 = arith.addf %210, %215 : vector<8x14xf32>
    %217 = arith.addf %195, %216 : vector<8x14xf32>
    %218 = vector.extract_strided_slice %0 {offsets = [8, 0, 0], sizes = [1, 8, 3], strides = [1, 1, 1]} : vector<15x8x3xf32> to vector<1x8x3xf32>
    %219 = vector.shape_cast %218 : vector<1x8x3xf32> to vector<8x3xf32>
    %220 = vector.extract_strided_slice %40 {offsets = [0, 0, 2], sizes = [1, 3, 14], strides = [1, 1, 1]} : vector<4x3x18xf32> to vector<1x3x14xf32>
    %221 = vector.shape_cast %220 : vector<1x3x14xf32> to vector<3x14xf32>
    %222 = vector.extract_strided_slice %219 {offsets = [0, 0], sizes = [8, 1], strides = [1, 1]} : vector<8x3xf32> to vector<8x1xf32>
    %223 = vector.extract_strided_slice %221 {offsets = [0, 0], sizes = [1, 14], strides = [1, 1]} : vector<3x14xf32> to vector<1x14xf32>
    %224 = vector.broadcast %222 : vector<8x1xf32> to vector<8x14xf32>
    %225 = vector.broadcast %223 : vector<1x14xf32> to vector<8x14xf32>
    %226 = arith.mulf %224, %225 : vector<8x14xf32>
    %227 = vector.extract_strided_slice %219 {offsets = [0, 1], sizes = [8, 1], strides = [1, 1]} : vector<8x3xf32> to vector<8x1xf32>
    %228 = vector.extract_strided_slice %221 {offsets = [1, 0], sizes = [1, 14], strides = [1, 1]} : vector<3x14xf32> to vector<1x14xf32>
    %229 = vector.broadcast %227 : vector<8x1xf32> to vector<8x14xf32>
    %230 = vector.broadcast %228 : vector<1x14xf32> to vector<8x14xf32>
    %231 = arith.mulf %229, %230 : vector<8x14xf32>
    %232 = arith.addf %226, %231 : vector<8x14xf32>
    %233 = vector.extract_strided_slice %219 {offsets = [0, 2], sizes = [8, 1], strides = [1, 1]} : vector<8x3xf32> to vector<8x1xf32>
    %234 = vector.extract_strided_slice %221 {offsets = [2, 0], sizes = [1, 14], strides = [1, 1]} : vector<3x14xf32> to vector<1x14xf32>
    %235 = vector.broadcast %233 : vector<8x1xf32> to vector<8x14xf32>
    %236 = vector.broadcast %234 : vector<1x14xf32> to vector<8x14xf32>
    %237 = arith.mulf %235, %236 : vector<8x14xf32>
    %238 = arith.addf %232, %237 : vector<8x14xf32>
    %239 = arith.addf %217, %238 : vector<8x14xf32>
    %240 = vector.extract_strided_slice %0 {offsets = [9, 0, 0], sizes = [1, 8, 3], strides = [1, 1, 1]} : vector<15x8x3xf32> to vector<1x8x3xf32>
    %241 = vector.shape_cast %240 : vector<1x8x3xf32> to vector<8x3xf32>
    %242 = vector.extract_strided_slice %40 {offsets = [1, 0, 2], sizes = [1, 3, 14], strides = [1, 1, 1]} : vector<4x3x18xf32> to vector<1x3x14xf32>
    %243 = vector.shape_cast %242 : vector<1x3x14xf32> to vector<3x14xf32>
    %244 = vector.extract_strided_slice %241 {offsets = [0, 0], sizes = [8, 1], strides = [1, 1]} : vector<8x3xf32> to vector<8x1xf32>
    %245 = vector.extract_strided_slice %243 {offsets = [0, 0], sizes = [1, 14], strides = [1, 1]} : vector<3x14xf32> to vector<1x14xf32>
    %246 = vector.broadcast %244 : vector<8x1xf32> to vector<8x14xf32>
    %247 = vector.broadcast %245 : vector<1x14xf32> to vector<8x14xf32>
    %248 = arith.mulf %246, %247 : vector<8x14xf32>
    %249 = vector.extract_strided_slice %241 {offsets = [0, 1], sizes = [8, 1], strides = [1, 1]} : vector<8x3xf32> to vector<8x1xf32>
    %250 = vector.extract_strided_slice %243 {offsets = [1, 0], sizes = [1, 14], strides = [1, 1]} : vector<3x14xf32> to vector<1x14xf32>
    %251 = vector.broadcast %249 : vector<8x1xf32> to vector<8x14xf32>
    %252 = vector.broadcast %250 : vector<1x14xf32> to vector<8x14xf32>
    %253 = arith.mulf %251, %252 : vector<8x14xf32>
    %254 = arith.addf %248, %253 : vector<8x14xf32>
    %255 = vector.extract_strided_slice %241 {offsets = [0, 2], sizes = [8, 1], strides = [1, 1]} : vector<8x3xf32> to vector<8x1xf32>
    %256 = vector.extract_strided_slice %243 {offsets = [2, 0], sizes = [1, 14], strides = [1, 1]} : vector<3x14xf32> to vector<1x14xf32>
    %257 = vector.broadcast %255 : vector<8x1xf32> to vector<8x14xf32>
    %258 = vector.broadcast %256 : vector<1x14xf32> to vector<8x14xf32>
    %259 = arith.mulf %257, %258 : vector<8x14xf32>
    %260 = arith.addf %254, %259 : vector<8x14xf32>
    %261 = arith.addf %239, %260 : vector<8x14xf32>
    %262 = vector.extract_strided_slice %0 {offsets = [10, 0, 0], sizes = [1, 8, 3], strides = [1, 1, 1]} : vector<15x8x3xf32> to vector<1x8x3xf32>
    %263 = vector.shape_cast %262 : vector<1x8x3xf32> to vector<8x3xf32>
    %264 = vector.extract_strided_slice %40 {offsets = [2, 0, 2], sizes = [1, 3, 14], strides = [1, 1, 1]} : vector<4x3x18xf32> to vector<1x3x14xf32>
    %265 = vector.shape_cast %264 : vector<1x3x14xf32> to vector<3x14xf32>
    %266 = vector.extract_strided_slice %263 {offsets = [0, 0], sizes = [8, 1], strides = [1, 1]} : vector<8x3xf32> to vector<8x1xf32>
    %267 = vector.extract_strided_slice %265 {offsets = [0, 0], sizes = [1, 14], strides = [1, 1]} : vector<3x14xf32> to vector<1x14xf32>
    %268 = vector.broadcast %266 : vector<8x1xf32> to vector<8x14xf32>
    %269 = vector.broadcast %267 : vector<1x14xf32> to vector<8x14xf32>
    %270 = arith.mulf %268, %269 : vector<8x14xf32>
    %271 = vector.extract_strided_slice %263 {offsets = [0, 1], sizes = [8, 1], strides = [1, 1]} : vector<8x3xf32> to vector<8x1xf32>
    %272 = vector.extract_strided_slice %265 {offsets = [1, 0], sizes = [1, 14], strides = [1, 1]} : vector<3x14xf32> to vector<1x14xf32>
    %273 = vector.broadcast %271 : vector<8x1xf32> to vector<8x14xf32>
    %274 = vector.broadcast %272 : vector<1x14xf32> to vector<8x14xf32>
    %275 = arith.mulf %273, %274 : vector<8x14xf32>
    %276 = arith.addf %270, %275 : vector<8x14xf32>
    %277 = vector.extract_strided_slice %263 {offsets = [0, 2], sizes = [8, 1], strides = [1, 1]} : vector<8x3xf32> to vector<8x1xf32>
    %278 = vector.extract_strided_slice %265 {offsets = [2, 0], sizes = [1, 14], strides = [1, 1]} : vector<3x14xf32> to vector<1x14xf32>
    %279 = vector.broadcast %277 : vector<8x1xf32> to vector<8x14xf32>
    %280 = vector.broadcast %278 : vector<1x14xf32> to vector<8x14xf32>
    %281 = arith.mulf %279, %280 : vector<8x14xf32>
    %282 = arith.addf %276, %281 : vector<8x14xf32>
    %283 = arith.addf %261, %282 : vector<8x14xf32>
    %284 = vector.extract_strided_slice %0 {offsets = [11, 0, 0], sizes = [1, 8, 3], strides = [1, 1, 1]} : vector<15x8x3xf32> to vector<1x8x3xf32>
    %285 = vector.shape_cast %284 : vector<1x8x3xf32> to vector<8x3xf32>
    %286 = vector.extract_strided_slice %40 {offsets = [3, 0, 2], sizes = [1, 3, 14], strides = [1, 1, 1]} : vector<4x3x18xf32> to vector<1x3x14xf32>
    %287 = vector.shape_cast %286 : vector<1x3x14xf32> to vector<3x14xf32>
    %288 = vector.extract_strided_slice %285 {offsets = [0, 0], sizes = [8, 1], strides = [1, 1]} : vector<8x3xf32> to vector<8x1xf32>
    %289 = vector.extract_strided_slice %287 {offsets = [0, 0], sizes = [1, 14], strides = [1, 1]} : vector<3x14xf32> to vector<1x14xf32>
    %290 = vector.broadcast %288 : vector<8x1xf32> to vector<8x14xf32>
    %291 = vector.broadcast %289 : vector<1x14xf32> to vector<8x14xf32>
    %292 = arith.mulf %290, %291 : vector<8x14xf32>
    %293 = vector.extract_strided_slice %285 {offsets = [0, 1], sizes = [8, 1], strides = [1, 1]} : vector<8x3xf32> to vector<8x1xf32>
    %294 = vector.extract_strided_slice %287 {offsets = [1, 0], sizes = [1, 14], strides = [1, 1]} : vector<3x14xf32> to vector<1x14xf32>
    %295 = vector.broadcast %293 : vector<8x1xf32> to vector<8x14xf32>
    %296 = vector.broadcast %294 : vector<1x14xf32> to vector<8x14xf32>
    %297 = arith.mulf %295, %296 : vector<8x14xf32>
    %298 = arith.addf %292, %297 : vector<8x14xf32>
    %299 = vector.extract_strided_slice %285 {offsets = [0, 2], sizes = [8, 1], strides = [1, 1]} : vector<8x3xf32> to vector<8x1xf32>
    %300 = vector.extract_strided_slice %287 {offsets = [2, 0], sizes = [1, 14], strides = [1, 1]} : vector<3x14xf32> to vector<1x14xf32>
    %301 = vector.broadcast %299 : vector<8x1xf32> to vector<8x14xf32>
    %302 = vector.broadcast %300 : vector<1x14xf32> to vector<8x14xf32>
    %303 = arith.mulf %301, %302 : vector<8x14xf32>
    %304 = arith.addf %298, %303 : vector<8x14xf32>
    %305 = arith.addf %283, %304 : vector<8x14xf32>
    %306 = vector.extract_strided_slice %0 {offsets = [12, 0, 0], sizes = [1, 8, 3], strides = [1, 1, 1]} : vector<15x8x3xf32> to vector<1x8x3xf32>
    %307 = vector.shape_cast %306 : vector<1x8x3xf32> to vector<8x3xf32>
    %308 = vector.extract_strided_slice %40 {offsets = [0, 0, 3], sizes = [1, 3, 14], strides = [1, 1, 1]} : vector<4x3x18xf32> to vector<1x3x14xf32>
    %309 = vector.shape_cast %308 : vector<1x3x14xf32> to vector<3x14xf32>
    %310 = vector.extract_strided_slice %307 {offsets = [0, 0], sizes = [8, 1], strides = [1, 1]} : vector<8x3xf32> to vector<8x1xf32>
    %311 = vector.extract_strided_slice %309 {offsets = [0, 0], sizes = [1, 14], strides = [1, 1]} : vector<3x14xf32> to vector<1x14xf32>
    %312 = vector.broadcast %310 : vector<8x1xf32> to vector<8x14xf32>
    %313 = vector.broadcast %311 : vector<1x14xf32> to vector<8x14xf32>
    %314 = arith.mulf %312, %313 : vector<8x14xf32>
    %315 = vector.extract_strided_slice %307 {offsets = [0, 1], sizes = [8, 1], strides = [1, 1]} : vector<8x3xf32> to vector<8x1xf32>
    %316 = vector.extract_strided_slice %309 {offsets = [1, 0], sizes = [1, 14], strides = [1, 1]} : vector<3x14xf32> to vector<1x14xf32>
    %317 = vector.broadcast %315 : vector<8x1xf32> to vector<8x14xf32>
    %318 = vector.broadcast %316 : vector<1x14xf32> to vector<8x14xf32>
    %319 = arith.mulf %317, %318 : vector<8x14xf32>
    %320 = arith.addf %314, %319 : vector<8x14xf32>
    %321 = vector.extract_strided_slice %307 {offsets = [0, 2], sizes = [8, 1], strides = [1, 1]} : vector<8x3xf32> to vector<8x1xf32>
    %322 = vector.extract_strided_slice %309 {offsets = [2, 0], sizes = [1, 14], strides = [1, 1]} : vector<3x14xf32> to vector<1x14xf32>
    %323 = vector.broadcast %321 : vector<8x1xf32> to vector<8x14xf32>
    %324 = vector.broadcast %322 : vector<1x14xf32> to vector<8x14xf32>
    %325 = arith.mulf %323, %324 : vector<8x14xf32>
    %326 = arith.addf %320, %325 : vector<8x14xf32>
    %327 = arith.addf %305, %326 : vector<8x14xf32>
    %328 = vector.extract_strided_slice %0 {offsets = [13, 0, 0], sizes = [1, 8, 3], strides = [1, 1, 1]} : vector<15x8x3xf32> to vector<1x8x3xf32>
    %329 = vector.shape_cast %328 : vector<1x8x3xf32> to vector<8x3xf32>
    %330 = vector.extract_strided_slice %40 {offsets = [1, 0, 3], sizes = [1, 3, 14], strides = [1, 1, 1]} : vector<4x3x18xf32> to vector<1x3x14xf32>
    %331 = vector.shape_cast %330 : vector<1x3x14xf32> to vector<3x14xf32>
    %332 = vector.extract_strided_slice %329 {offsets = [0, 0], sizes = [8, 1], strides = [1, 1]} : vector<8x3xf32> to vector<8x1xf32>
    %333 = vector.extract_strided_slice %331 {offsets = [0, 0], sizes = [1, 14], strides = [1, 1]} : vector<3x14xf32> to vector<1x14xf32>
    %334 = vector.broadcast %332 : vector<8x1xf32> to vector<8x14xf32>
    %335 = vector.broadcast %333 : vector<1x14xf32> to vector<8x14xf32>
    %336 = arith.mulf %334, %335 : vector<8x14xf32>
    %337 = vector.extract_strided_slice %329 {offsets = [0, 1], sizes = [8, 1], strides = [1, 1]} : vector<8x3xf32> to vector<8x1xf32>
    %338 = vector.extract_strided_slice %331 {offsets = [1, 0], sizes = [1, 14], strides = [1, 1]} : vector<3x14xf32> to vector<1x14xf32>
    %339 = vector.broadcast %337 : vector<8x1xf32> to vector<8x14xf32>
    %340 = vector.broadcast %338 : vector<1x14xf32> to vector<8x14xf32>
    %341 = arith.mulf %339, %340 : vector<8x14xf32>
    %342 = arith.addf %336, %341 : vector<8x14xf32>
    %343 = vector.extract_strided_slice %329 {offsets = [0, 2], sizes = [8, 1], strides = [1, 1]} : vector<8x3xf32> to vector<8x1xf32>
    %344 = vector.extract_strided_slice %331 {offsets = [2, 0], sizes = [1, 14], strides = [1, 1]} : vector<3x14xf32> to vector<1x14xf32>
    %345 = vector.broadcast %343 : vector<8x1xf32> to vector<8x14xf32>
    %346 = vector.broadcast %344 : vector<1x14xf32> to vector<8x14xf32>
    %347 = arith.mulf %345, %346 : vector<8x14xf32>
    %348 = arith.addf %342, %347 : vector<8x14xf32>
    %349 = arith.addf %327, %348 : vector<8x14xf32>
    %350 = vector.extract_strided_slice %0 {offsets = [14, 0, 0], sizes = [1, 8, 3], strides = [1, 1, 1]} : vector<15x8x3xf32> to vector<1x8x3xf32>
    %351 = vector.shape_cast %350 : vector<1x8x3xf32> to vector<8x3xf32>
    %352 = vector.extract_strided_slice %40 {offsets = [2, 0, 3], sizes = [1, 3, 14], strides = [1, 1, 1]} : vector<4x3x18xf32> to vector<1x3x14xf32>
    %353 = vector.shape_cast %352 : vector<1x3x14xf32> to vector<3x14xf32>
    %354 = vector.extract_strided_slice %351 {offsets = [0, 0], sizes = [8, 1], strides = [1, 1]} : vector<8x3xf32> to vector<8x1xf32>
    %355 = vector.extract_strided_slice %353 {offsets = [0, 0], sizes = [1, 14], strides = [1, 1]} : vector<3x14xf32> to vector<1x14xf32>
    %356 = vector.broadcast %354 : vector<8x1xf32> to vector<8x14xf32>
    %357 = vector.broadcast %355 : vector<1x14xf32> to vector<8x14xf32>
    %358 = arith.mulf %356, %357 : vector<8x14xf32>
    %359 = vector.extract_strided_slice %351 {offsets = [0, 1], sizes = [8, 1], strides = [1, 1]} : vector<8x3xf32> to vector<8x1xf32>
    %360 = vector.extract_strided_slice %353 {offsets = [1, 0], sizes = [1, 14], strides = [1, 1]} : vector<3x14xf32> to vector<1x14xf32>
    %361 = vector.broadcast %359 : vector<8x1xf32> to vector<8x14xf32>
    %362 = vector.broadcast %360 : vector<1x14xf32> to vector<8x14xf32>
    %363 = arith.mulf %361, %362 : vector<8x14xf32>
    %364 = arith.addf %358, %363 : vector<8x14xf32>
    %365 = vector.extract_strided_slice %351 {offsets = [0, 2], sizes = [8, 1], strides = [1, 1]} : vector<8x3xf32> to vector<8x1xf32>
    %366 = vector.extract_strided_slice %353 {offsets = [2, 0], sizes = [1, 14], strides = [1, 1]} : vector<3x14xf32> to vector<1x14xf32>
    %367 = vector.broadcast %365 : vector<8x1xf32> to vector<8x14xf32>
    %368 = vector.broadcast %366 : vector<1x14xf32> to vector<8x14xf32>
    %369 = arith.mulf %367, %368 : vector<8x14xf32>
    %370 = arith.addf %364, %369 : vector<8x14xf32>
    %371 = arith.addf %349, %370 : vector<8x14xf32>
    %372 = vector.broadcast %1 : vector<8x1xf32> to vector<8x14xf32>
    %373 = arith.mulf %371, %372 : vector<8x14xf32>
    %374 = vector.broadcast %2 : vector<8x1xf32> to vector<8x14xf32>
    %375 = arith.addf %373, %374 : vector<8x14xf32>
    %cst_77 = arith.constant 5.000000e-01 : f32
    %376 = vector.broadcast %cst_77 : f32 to vector<8x14xf32>
    %377 = arith.mulf %376, %375 : vector<8x14xf32>
    %cst_78 = arith.constant 4.471500e-02 : f32
    %378 = vector.broadcast %cst_78 : f32 to vector<8x14xf32>
    %379 = arith.mulf %378, %375 : vector<8x14xf32>
    %380 = arith.mulf %379, %375 : vector<8x14xf32>
    %381 = arith.mulf %380, %375 : vector<8x14xf32>
    %382 = arith.addf %375, %381 : vector<8x14xf32>
    %cst_79 = arith.constant 0.797884583 : f32
    %383 = vector.broadcast %cst_79 : f32 to vector<8x14xf32>
    %384 = arith.mulf %383, %382 : vector<8x14xf32>
    %385 = math.tanh %384 : vector<8x14xf32>
    %cst_80 = arith.constant 1.000000e+00 : f32
    %386 = vector.broadcast %cst_80 : f32 to vector<8x14xf32>
    %387 = arith.addf %386, %385 : vector<8x14xf32>
    %388 = arith.mulf %377, %387 : vector<8x14xf32>
    %cst_81 = arith.constant dense<0.000000e+00> : vector<8x14xf32>
    %389 = tpu.matmul %3, %388, %cst_81 {dimension_numbers = #tpu.dot_dimension_numbers<[1], [0], [0], [1], [0, 0, 1, 1], [], []>} : vector<8x8xf32>, vector<8x14xf32>, vector<8x14xf32> -> vector<8x14xf32>
    %390 = vector.broadcast %4 : vector<8x1xf32> to vector<8x14xf32>
    %391 = arith.addf %389, %390 : vector<8x14xf32>
    %cst_82 = arith.constant 0.000000e+00 : f32
    %392 = vector.broadcast %cst_82 : f32 to vector<8x14xf32>
    %393 = vector.extract_strided_slice %0 {offsets = [0, 0, 0], sizes = [1, 8, 3], strides = [1, 1, 1]} : vector<15x8x3xf32> to vector<1x8x3xf32>
    %394 = vector.shape_cast %393 : vector<1x8x3xf32> to vector<8x3xf32>
    %395 = vector.extract_strided_slice %40 {offsets = [2, 0, 0], sizes = [1, 3, 14], strides = [1, 1, 1]} : vector<4x3x18xf32> to vector<1x3x14xf32>
    %396 = vector.shape_cast %395 : vector<1x3x14xf32> to vector<3x14xf32>
    %397 = vector.extract_strided_slice %394 {offsets = [0, 0], sizes = [8, 1], strides = [1, 1]} : vector<8x3xf32> to vector<8x1xf32>
    %398 = vector.extract_strided_slice %396 {offsets = [0, 0], sizes = [1, 14], strides = [1, 1]} : vector<3x14xf32> to vector<1x14xf32>
    %399 = vector.broadcast %397 : vector<8x1xf32> to vector<8x14xf32>
    %400 = vector.broadcast %398 : vector<1x14xf32> to vector<8x14xf32>
    %401 = arith.mulf %399, %400 : vector<8x14xf32>
    %402 = vector.extract_strided_slice %394 {offsets = [0, 1], sizes = [8, 1], strides = [1, 1]} : vector<8x3xf32> to vector<8x1xf32>
    %403 = vector.extract_strided_slice %396 {offsets = [1, 0], sizes = [1, 14], strides = [1, 1]} : vector<3x14xf32> to vector<1x14xf32>
    %404 = vector.broadcast %402 : vector<8x1xf32> to vector<8x14xf32>
    %405 = vector.broadcast %403 : vector<1x14xf32> to vector<8x14xf32>
    %406 = arith.mulf %404, %405 : vector<8x14xf32>
    %407 = arith.addf %401, %406 : vector<8x14xf32>
    %408 = vector.extract_strided_slice %394 {offsets = [0, 2], sizes = [8, 1], strides = [1, 1]} : vector<8x3xf32> to vector<8x1xf32>
    %409 = vector.extract_strided_slice %396 {offsets = [2, 0], sizes = [1, 14], strides = [1, 1]} : vector<3x14xf32> to vector<1x14xf32>
    %410 = vector.broadcast %408 : vector<8x1xf32> to vector<8x14xf32>
    %411 = vector.broadcast %409 : vector<1x14xf32> to vector<8x14xf32>
    %412 = arith.mulf %410, %411 : vector<8x14xf32>
    %413 = arith.addf %407, %412 : vector<8x14xf32>
    %414 = arith.addf %392, %413 : vector<8x14xf32>
    %415 = vector.extract_strided_slice %0 {offsets = [1, 0, 0], sizes = [1, 8, 3], strides = [1, 1, 1]} : vector<15x8x3xf32> to vector<1x8x3xf32>
    %416 = vector.shape_cast %415 : vector<1x8x3xf32> to vector<8x3xf32>
    %417 = vector.extract_strided_slice %40 {offsets = [3, 0, 0], sizes = [1, 3, 14], strides = [1, 1, 1]} : vector<4x3x18xf32> to vector<1x3x14xf32>
    %418 = vector.shape_cast %417 : vector<1x3x14xf32> to vector<3x14xf32>
    %419 = vector.extract_strided_slice %416 {offsets = [0, 0], sizes = [8, 1], strides = [1, 1]} : vector<8x3xf32> to vector<8x1xf32>
    %420 = vector.extract_strided_slice %418 {offsets = [0, 0], sizes = [1, 14], strides = [1, 1]} : vector<3x14xf32> to vector<1x14xf32>
    %421 = vector.broadcast %419 : vector<8x1xf32> to vector<8x14xf32>
    %422 = vector.broadcast %420 : vector<1x14xf32> to vector<8x14xf32>
    %423 = arith.mulf %421, %422 : vector<8x14xf32>
    %424 = vector.extract_strided_slice %416 {offsets = [0, 1], sizes = [8, 1], strides = [1, 1]} : vector<8x3xf32> to vector<8x1xf32>
    %425 = vector.extract_strided_slice %418 {offsets = [1, 0], sizes = [1, 14], strides = [1, 1]} : vector<3x14xf32> to vector<1x14xf32>
    %426 = vector.broadcast %424 : vector<8x1xf32> to vector<8x14xf32>
    %427 = vector.broadcast %425 : vector<1x14xf32> to vector<8x14xf32>
    %428 = arith.mulf %426, %427 : vector<8x14xf32>
    %429 = arith.addf %423, %428 : vector<8x14xf32>
    %430 = vector.extract_strided_slice %416 {offsets = [0, 2], sizes = [8, 1], strides = [1, 1]} : vector<8x3xf32> to vector<8x1xf32>
    %431 = vector.extract_strided_slice %418 {offsets = [2, 0], sizes = [1, 14], strides = [1, 1]} : vector<3x14xf32> to vector<1x14xf32>
    %432 = vector.broadcast %430 : vector<8x1xf32> to vector<8x14xf32>
    %433 = vector.broadcast %431 : vector<1x14xf32> to vector<8x14xf32>
    %434 = arith.mulf %432, %433 : vector<8x14xf32>
    %435 = arith.addf %429, %434 : vector<8x14xf32>
    %436 = arith.addf %414, %435 : vector<8x14xf32>
    %437 = vector.extract_strided_slice %0 {offsets = [2, 0, 0], sizes = [1, 8, 3], strides = [1, 1, 1]} : vector<15x8x3xf32> to vector<1x8x3xf32>
    %438 = vector.shape_cast %437 : vector<1x8x3xf32> to vector<8x3xf32>
    %439 = vector.extract_strided_slice %40 {offsets = [0, 0, 1], sizes = [1, 3, 14], strides = [1, 1, 1]} : vector<4x3x18xf32> to vector<1x3x14xf32>
    %440 = vector.shape_cast %439 : vector<1x3x14xf32> to vector<3x14xf32>
    %441 = vector.extract_strided_slice %438 {offsets = [0, 0], sizes = [8, 1], strides = [1, 1]} : vector<8x3xf32> to vector<8x1xf32>
    %442 = vector.extract_strided_slice %440 {offsets = [0, 0], sizes = [1, 14], strides = [1, 1]} : vector<3x14xf32> to vector<1x14xf32>
    %443 = vector.broadcast %441 : vector<8x1xf32> to vector<8x14xf32>
    %444 = vector.broadcast %442 : vector<1x14xf32> to vector<8x14xf32>
    %445 = arith.mulf %443, %444 : vector<8x14xf32>
    %446 = vector.extract_strided_slice %438 {offsets = [0, 1], sizes = [8, 1], strides = [1, 1]} : vector<8x3xf32> to vector<8x1xf32>
    %447 = vector.extract_strided_slice %440 {offsets = [1, 0], sizes = [1, 14], strides = [1, 1]} : vector<3x14xf32> to vector<1x14xf32>
    %448 = vector.broadcast %446 : vector<8x1xf32> to vector<8x14xf32>
    %449 = vector.broadcast %447 : vector<1x14xf32> to vector<8x14xf32>
    %450 = arith.mulf %448, %449 : vector<8x14xf32>
    %451 = arith.addf %445, %450 : vector<8x14xf32>
    %452 = vector.extract_strided_slice %438 {offsets = [0, 2], sizes = [8, 1], strides = [1, 1]} : vector<8x3xf32> to vector<8x1xf32>
    %453 = vector.extract_strided_slice %440 {offsets = [2, 0], sizes = [1, 14], strides = [1, 1]} : vector<3x14xf32> to vector<1x14xf32>
    %454 = vector.broadcast %452 : vector<8x1xf32> to vector<8x14xf32>
    %455 = vector.broadcast %453 : vector<1x14xf32> to vector<8x14xf32>
    %456 = arith.mulf %454, %455 : vector<8x14xf32>
    %457 = arith.addf %451, %456 : vector<8x14xf32>
    %458 = arith.addf %436, %457 : vector<8x14xf32>
    %459 = vector.extract_strided_slice %0 {offsets = [3, 0, 0], sizes = [1, 8, 3], strides = [1, 1, 1]} : vector<15x8x3xf32> to vector<1x8x3xf32>
    %460 = vector.shape_cast %459 : vector<1x8x3xf32> to vector<8x3xf32>
    %461 = vector.extract_strided_slice %40 {offsets = [1, 0, 1], sizes = [1, 3, 14], strides = [1, 1, 1]} : vector<4x3x18xf32> to vector<1x3x14xf32>
    %462 = vector.shape_cast %461 : vector<1x3x14xf32> to vector<3x14xf32>
    %463 = vector.extract_strided_slice %460 {offsets = [0, 0], sizes = [8, 1], strides = [1, 1]} : vector<8x3xf32> to vector<8x1xf32>
    %464 = vector.extract_strided_slice %462 {offsets = [0, 0], sizes = [1, 14], strides = [1, 1]} : vector<3x14xf32> to vector<1x14xf32>
    %465 = vector.broadcast %463 : vector<8x1xf32> to vector<8x14xf32>
    %466 = vector.broadcast %464 : vector<1x14xf32> to vector<8x14xf32>
    %467 = arith.mulf %465, %466 : vector<8x14xf32>
    %468 = vector.extract_strided_slice %460 {offsets = [0, 1], sizes = [8, 1], strides = [1, 1]} : vector<8x3xf32> to vector<8x1xf32>
    %469 = vector.extract_strided_slice %462 {offsets = [1, 0], sizes = [1, 14], strides = [1, 1]} : vector<3x14xf32> to vector<1x14xf32>
    %470 = vector.broadcast %468 : vector<8x1xf32> to vector<8x14xf32>
    %471 = vector.broadcast %469 : vector<1x14xf32> to vector<8x14xf32>
    %472 = arith.mulf %470, %471 : vector<8x14xf32>
    %473 = arith.addf %467, %472 : vector<8x14xf32>
    %474 = vector.extract_strided_slice %460 {offsets = [0, 2], sizes = [8, 1], strides = [1, 1]} : vector<8x3xf32> to vector<8x1xf32>
    %475 = vector.extract_strided_slice %462 {offsets = [2, 0], sizes = [1, 14], strides = [1, 1]} : vector<3x14xf32> to vector<1x14xf32>
    %476 = vector.broadcast %474 : vector<8x1xf32> to vector<8x14xf32>
    %477 = vector.broadcast %475 : vector<1x14xf32> to vector<8x14xf32>
    %478 = arith.mulf %476, %477 : vector<8x14xf32>
    %479 = arith.addf %473, %478 : vector<8x14xf32>
    %480 = arith.addf %458, %479 : vector<8x14xf32>
    %481 = vector.extract_strided_slice %0 {offsets = [4, 0, 0], sizes = [1, 8, 3], strides = [1, 1, 1]} : vector<15x8x3xf32> to vector<1x8x3xf32>
    %482 = vector.shape_cast %481 : vector<1x8x3xf32> to vector<8x3xf32>
    %483 = vector.extract_strided_slice %40 {offsets = [2, 0, 1], sizes = [1, 3, 14], strides = [1, 1, 1]} : vector<4x3x18xf32> to vector<1x3x14xf32>
    %484 = vector.shape_cast %483 : vector<1x3x14xf32> to vector<3x14xf32>
    %485 = vector.extract_strided_slice %482 {offsets = [0, 0], sizes = [8, 1], strides = [1, 1]} : vector<8x3xf32> to vector<8x1xf32>
    %486 = vector.extract_strided_slice %484 {offsets = [0, 0], sizes = [1, 14], strides = [1, 1]} : vector<3x14xf32> to vector<1x14xf32>
    %487 = vector.broadcast %485 : vector<8x1xf32> to vector<8x14xf32>
    %488 = vector.broadcast %486 : vector<1x14xf32> to vector<8x14xf32>
    %489 = arith.mulf %487, %488 : vector<8x14xf32>
    %490 = vector.extract_strided_slice %482 {offsets = [0, 1], sizes = [8, 1], strides = [1, 1]} : vector<8x3xf32> to vector<8x1xf32>
    %491 = vector.extract_strided_slice %484 {offsets = [1, 0], sizes = [1, 14], strides = [1, 1]} : vector<3x14xf32> to vector<1x14xf32>
    %492 = vector.broadcast %490 : vector<8x1xf32> to vector<8x14xf32>
    %493 = vector.broadcast %491 : vector<1x14xf32> to vector<8x14xf32>
    %494 = arith.mulf %492, %493 : vector<8x14xf32>
    %495 = arith.addf %489, %494 : vector<8x14xf32>
    %496 = vector.extract_strided_slice %482 {offsets = [0, 2], sizes = [8, 1], strides = [1, 1]} : vector<8x3xf32> to vector<8x1xf32>
    %497 = vector.extract_strided_slice %484 {offsets = [2, 0], sizes = [1, 14], strides = [1, 1]} : vector<3x14xf32> to vector<1x14xf32>
    %498 = vector.broadcast %496 : vector<8x1xf32> to vector<8x14xf32>
    %499 = vector.broadcast %497 : vector<1x14xf32> to vector<8x14xf32>
    %500 = arith.mulf %498, %499 : vector<8x14xf32>
    %501 = arith.addf %495, %500 : vector<8x14xf32>
    %502 = arith.addf %480, %501 : vector<8x14xf32>
    %503 = vector.extract_strided_slice %0 {offsets = [5, 0, 0], sizes = [1, 8, 3], strides = [1, 1, 1]} : vector<15x8x3xf32> to vector<1x8x3xf32>
    %504 = vector.shape_cast %503 : vector<1x8x3xf32> to vector<8x3xf32>
    %505 = vector.extract_strided_slice %40 {offsets = [3, 0, 1], sizes = [1, 3, 14], strides = [1, 1, 1]} : vector<4x3x18xf32> to vector<1x3x14xf32>
    %506 = vector.shape_cast %505 : vector<1x3x14xf32> to vector<3x14xf32>
    %507 = vector.extract_strided_slice %504 {offsets = [0, 0], sizes = [8, 1], strides = [1, 1]} : vector<8x3xf32> to vector<8x1xf32>
    %508 = vector.extract_strided_slice %506 {offsets = [0, 0], sizes = [1, 14], strides = [1, 1]} : vector<3x14xf32> to vector<1x14xf32>
    %509 = vector.broadcast %507 : vector<8x1xf32> to vector<8x14xf32>
    %510 = vector.broadcast %508 : vector<1x14xf32> to vector<8x14xf32>
    %511 = arith.mulf %509, %510 : vector<8x14xf32>
    %512 = vector.extract_strided_slice %504 {offsets = [0, 1], sizes = [8, 1], strides = [1, 1]} : vector<8x3xf32> to vector<8x1xf32>
    %513 = vector.extract_strided_slice %506 {offsets = [1, 0], sizes = [1, 14], strides = [1, 1]} : vector<3x14xf32> to vector<1x14xf32>
    %514 = vector.broadcast %512 : vector<8x1xf32> to vector<8x14xf32>
    %515 = vector.broadcast %513 : vector<1x14xf32> to vector<8x14xf32>
    %516 = arith.mulf %514, %515 : vector<8x14xf32>
    %517 = arith.addf %511, %516 : vector<8x14xf32>
    %518 = vector.extract_strided_slice %504 {offsets = [0, 2], sizes = [8, 1], strides = [1, 1]} : vector<8x3xf32> to vector<8x1xf32>
    %519 = vector.extract_strided_slice %506 {offsets = [2, 0], sizes = [1, 14], strides = [1, 1]} : vector<3x14xf32> to vector<1x14xf32>
    %520 = vector.broadcast %518 : vector<8x1xf32> to vector<8x14xf32>
    %521 = vector.broadcast %519 : vector<1x14xf32> to vector<8x14xf32>
    %522 = arith.mulf %520, %521 : vector<8x14xf32>
    %523 = arith.addf %517, %522 : vector<8x14xf32>
    %524 = arith.addf %502, %523 : vector<8x14xf32>
    %525 = vector.extract_strided_slice %0 {offsets = [6, 0, 0], sizes = [1, 8, 3], strides = [1, 1, 1]} : vector<15x8x3xf32> to vector<1x8x3xf32>
    %526 = vector.shape_cast %525 : vector<1x8x3xf32> to vector<8x3xf32>
    %527 = vector.extract_strided_slice %40 {offsets = [0, 0, 2], sizes = [1, 3, 14], strides = [1, 1, 1]} : vector<4x3x18xf32> to vector<1x3x14xf32>
    %528 = vector.shape_cast %527 : vector<1x3x14xf32> to vector<3x14xf32>
    %529 = vector.extract_strided_slice %526 {offsets = [0, 0], sizes = [8, 1], strides = [1, 1]} : vector<8x3xf32> to vector<8x1xf32>
    %530 = vector.extract_strided_slice %528 {offsets = [0, 0], sizes = [1, 14], strides = [1, 1]} : vector<3x14xf32> to vector<1x14xf32>
    %531 = vector.broadcast %529 : vector<8x1xf32> to vector<8x14xf32>
    %532 = vector.broadcast %530 : vector<1x14xf32> to vector<8x14xf32>
    %533 = arith.mulf %531, %532 : vector<8x14xf32>
    %534 = vector.extract_strided_slice %526 {offsets = [0, 1], sizes = [8, 1], strides = [1, 1]} : vector<8x3xf32> to vector<8x1xf32>
    %535 = vector.extract_strided_slice %528 {offsets = [1, 0], sizes = [1, 14], strides = [1, 1]} : vector<3x14xf32> to vector<1x14xf32>
    %536 = vector.broadcast %534 : vector<8x1xf32> to vector<8x14xf32>
    %537 = vector.broadcast %535 : vector<1x14xf32> to vector<8x14xf32>
    %538 = arith.mulf %536, %537 : vector<8x14xf32>
    %539 = arith.addf %533, %538 : vector<8x14xf32>
    %540 = vector.extract_strided_slice %526 {offsets = [0, 2], sizes = [8, 1], strides = [1, 1]} : vector<8x3xf32> to vector<8x1xf32>
    %541 = vector.extract_strided_slice %528 {offsets = [2, 0], sizes = [1, 14], strides = [1, 1]} : vector<3x14xf32> to vector<1x14xf32>
    %542 = vector.broadcast %540 : vector<8x1xf32> to vector<8x14xf32>
    %543 = vector.broadcast %541 : vector<1x14xf32> to vector<8x14xf32>
    %544 = arith.mulf %542, %543 : vector<8x14xf32>
    %545 = arith.addf %539, %544 : vector<8x14xf32>
    %546 = arith.addf %524, %545 : vector<8x14xf32>
    %547 = vector.extract_strided_slice %0 {offsets = [7, 0, 0], sizes = [1, 8, 3], strides = [1, 1, 1]} : vector<15x8x3xf32> to vector<1x8x3xf32>
    %548 = vector.shape_cast %547 : vector<1x8x3xf32> to vector<8x3xf32>
    %549 = vector.extract_strided_slice %40 {offsets = [1, 0, 2], sizes = [1, 3, 14], strides = [1, 1, 1]} : vector<4x3x18xf32> to vector<1x3x14xf32>
    %550 = vector.shape_cast %549 : vector<1x3x14xf32> to vector<3x14xf32>
    %551 = vector.extract_strided_slice %548 {offsets = [0, 0], sizes = [8, 1], strides = [1, 1]} : vector<8x3xf32> to vector<8x1xf32>
    %552 = vector.extract_strided_slice %550 {offsets = [0, 0], sizes = [1, 14], strides = [1, 1]} : vector<3x14xf32> to vector<1x14xf32>
    %553 = vector.broadcast %551 : vector<8x1xf32> to vector<8x14xf32>
    %554 = vector.broadcast %552 : vector<1x14xf32> to vector<8x14xf32>
    %555 = arith.mulf %553, %554 : vector<8x14xf32>
    %556 = vector.extract_strided_slice %548 {offsets = [0, 1], sizes = [8, 1], strides = [1, 1]} : vector<8x3xf32> to vector<8x1xf32>
    %557 = vector.extract_strided_slice %550 {offsets = [1, 0], sizes = [1, 14], strides = [1, 1]} : vector<3x14xf32> to vector<1x14xf32>
    %558 = vector.broadcast %556 : vector<8x1xf32> to vector<8x14xf32>
    %559 = vector.broadcast %557 : vector<1x14xf32> to vector<8x14xf32>
    %560 = arith.mulf %558, %559 : vector<8x14xf32>
    %561 = arith.addf %555, %560 : vector<8x14xf32>
    %562 = vector.extract_strided_slice %548 {offsets = [0, 2], sizes = [8, 1], strides = [1, 1]} : vector<8x3xf32> to vector<8x1xf32>
    %563 = vector.extract_strided_slice %550 {offsets = [2, 0], sizes = [1, 14], strides = [1, 1]} : vector<3x14xf32> to vector<1x14xf32>
    %564 = vector.broadcast %562 : vector<8x1xf32> to vector<8x14xf32>
    %565 = vector.broadcast %563 : vector<1x14xf32> to vector<8x14xf32>
    %566 = arith.mulf %564, %565 : vector<8x14xf32>
    %567 = arith.addf %561, %566 : vector<8x14xf32>
    %568 = arith.addf %546, %567 : vector<8x14xf32>
    %569 = vector.extract_strided_slice %0 {offsets = [8, 0, 0], sizes = [1, 8, 3], strides = [1, 1, 1]} : vector<15x8x3xf32> to vector<1x8x3xf32>
    %570 = vector.shape_cast %569 : vector<1x8x3xf32> to vector<8x3xf32>
    %571 = vector.extract_strided_slice %40 {offsets = [2, 0, 2], sizes = [1, 3, 14], strides = [1, 1, 1]} : vector<4x3x18xf32> to vector<1x3x14xf32>
    %572 = vector.shape_cast %571 : vector<1x3x14xf32> to vector<3x14xf32>
    %573 = vector.extract_strided_slice %570 {offsets = [0, 0], sizes = [8, 1], strides = [1, 1]} : vector<8x3xf32> to vector<8x1xf32>
    %574 = vector.extract_strided_slice %572 {offsets = [0, 0], sizes = [1, 14], strides = [1, 1]} : vector<3x14xf32> to vector<1x14xf32>
    %575 = vector.broadcast %573 : vector<8x1xf32> to vector<8x14xf32>
    %576 = vector.broadcast %574 : vector<1x14xf32> to vector<8x14xf32>
    %577 = arith.mulf %575, %576 : vector<8x14xf32>
    %578 = vector.extract_strided_slice %570 {offsets = [0, 1], sizes = [8, 1], strides = [1, 1]} : vector<8x3xf32> to vector<8x1xf32>
    %579 = vector.extract_strided_slice %572 {offsets = [1, 0], sizes = [1, 14], strides = [1, 1]} : vector<3x14xf32> to vector<1x14xf32>
    %580 = vector.broadcast %578 : vector<8x1xf32> to vector<8x14xf32>
    %581 = vector.broadcast %579 : vector<1x14xf32> to vector<8x14xf32>
    %582 = arith.mulf %580, %581 : vector<8x14xf32>
    %583 = arith.addf %577, %582 : vector<8x14xf32>
    %584 = vector.extract_strided_slice %570 {offsets = [0, 2], sizes = [8, 1], strides = [1, 1]} : vector<8x3xf32> to vector<8x1xf32>
    %585 = vector.extract_strided_slice %572 {offsets = [2, 0], sizes = [1, 14], strides = [1, 1]} : vector<3x14xf32> to vector<1x14xf32>
    %586 = vector.broadcast %584 : vector<8x1xf32> to vector<8x14xf32>
    %587 = vector.broadcast %585 : vector<1x14xf32> to vector<8x14xf32>
    %588 = arith.mulf %586, %587 : vector<8x14xf32>
    %589 = arith.addf %583, %588 : vector<8x14xf32>
    %590 = arith.addf %568, %589 : vector<8x14xf32>
    %591 = vector.extract_strided_slice %0 {offsets = [9, 0, 0], sizes = [1, 8, 3], strides = [1, 1, 1]} : vector<15x8x3xf32> to vector<1x8x3xf32>
    %592 = vector.shape_cast %591 : vector<1x8x3xf32> to vector<8x3xf32>
    %593 = vector.extract_strided_slice %40 {offsets = [3, 0, 2], sizes = [1, 3, 14], strides = [1, 1, 1]} : vector<4x3x18xf32> to vector<1x3x14xf32>
    %594 = vector.shape_cast %593 : vector<1x3x14xf32> to vector<3x14xf32>
    %595 = vector.extract_strided_slice %592 {offsets = [0, 0], sizes = [8, 1], strides = [1, 1]} : vector<8x3xf32> to vector<8x1xf32>
    %596 = vector.extract_strided_slice %594 {offsets = [0, 0], sizes = [1, 14], strides = [1, 1]} : vector<3x14xf32> to vector<1x14xf32>
    %597 = vector.broadcast %595 : vector<8x1xf32> to vector<8x14xf32>
    %598 = vector.broadcast %596 : vector<1x14xf32> to vector<8x14xf32>
    %599 = arith.mulf %597, %598 : vector<8x14xf32>
    %600 = vector.extract_strided_slice %592 {offsets = [0, 1], sizes = [8, 1], strides = [1, 1]} : vector<8x3xf32> to vector<8x1xf32>
    %601 = vector.extract_strided_slice %594 {offsets = [1, 0], sizes = [1, 14], strides = [1, 1]} : vector<3x14xf32> to vector<1x14xf32>
    %602 = vector.broadcast %600 : vector<8x1xf32> to vector<8x14xf32>
    %603 = vector.broadcast %601 : vector<1x14xf32> to vector<8x14xf32>
    %604 = arith.mulf %602, %603 : vector<8x14xf32>
    %605 = arith.addf %599, %604 : vector<8x14xf32>
    %606 = vector.extract_strided_slice %592 {offsets = [0, 2], sizes = [8, 1], strides = [1, 1]} : vector<8x3xf32> to vector<8x1xf32>
    %607 = vector.extract_strided_slice %594 {offsets = [2, 0], sizes = [1, 14], strides = [1, 1]} : vector<3x14xf32> to vector<1x14xf32>
    %608 = vector.broadcast %606 : vector<8x1xf32> to vector<8x14xf32>
    %609 = vector.broadcast %607 : vector<1x14xf32> to vector<8x14xf32>
    %610 = arith.mulf %608, %609 : vector<8x14xf32>
    %611 = arith.addf %605, %610 : vector<8x14xf32>
    %612 = arith.addf %590, %611 : vector<8x14xf32>
    %613 = vector.extract_strided_slice %0 {offsets = [10, 0, 0], sizes = [1, 8, 3], strides = [1, 1, 1]} : vector<15x8x3xf32> to vector<1x8x3xf32>
    %614 = vector.shape_cast %613 : vector<1x8x3xf32> to vector<8x3xf32>
    %615 = vector.extract_strided_slice %40 {offsets = [0, 0, 3], sizes = [1, 3, 14], strides = [1, 1, 1]} : vector<4x3x18xf32> to vector<1x3x14xf32>
    %616 = vector.shape_cast %615 : vector<1x3x14xf32> to vector<3x14xf32>
    %617 = vector.extract_strided_slice %614 {offsets = [0, 0], sizes = [8, 1], strides = [1, 1]} : vector<8x3xf32> to vector<8x1xf32>
    %618 = vector.extract_strided_slice %616 {offsets = [0, 0], sizes = [1, 14], strides = [1, 1]} : vector<3x14xf32> to vector<1x14xf32>
    %619 = vector.broadcast %617 : vector<8x1xf32> to vector<8x14xf32>
    %620 = vector.broadcast %618 : vector<1x14xf32> to vector<8x14xf32>
    %621 = arith.mulf %619, %620 : vector<8x14xf32>
    %622 = vector.extract_strided_slice %614 {offsets = [0, 1], sizes = [8, 1], strides = [1, 1]} : vector<8x3xf32> to vector<8x1xf32>
    %623 = vector.extract_strided_slice %616 {offsets = [1, 0], sizes = [1, 14], strides = [1, 1]} : vector<3x14xf32> to vector<1x14xf32>
    %624 = vector.broadcast %622 : vector<8x1xf32> to vector<8x14xf32>
    %625 = vector.broadcast %623 : vector<1x14xf32> to vector<8x14xf32>
    %626 = arith.mulf %624, %625 : vector<8x14xf32>
    %627 = arith.addf %621, %626 : vector<8x14xf32>
    %628 = vector.extract_strided_slice %614 {offsets = [0, 2], sizes = [8, 1], strides = [1, 1]} : vector<8x3xf32> to vector<8x1xf32>
    %629 = vector.extract_strided_slice %616 {offsets = [2, 0], sizes = [1, 14], strides = [1, 1]} : vector<3x14xf32> to vector<1x14xf32>
    %630 = vector.broadcast %628 : vector<8x1xf32> to vector<8x14xf32>
    %631 = vector.broadcast %629 : vector<1x14xf32> to vector<8x14xf32>
    %632 = arith.mulf %630, %631 : vector<8x14xf32>
    %633 = arith.addf %627, %632 : vector<8x14xf32>
    %634 = arith.addf %612, %633 : vector<8x14xf32>
    %635 = vector.extract_strided_slice %0 {offsets = [11, 0, 0], sizes = [1, 8, 3], strides = [1, 1, 1]} : vector<15x8x3xf32> to vector<1x8x3xf32>
    %636 = vector.shape_cast %635 : vector<1x8x3xf32> to vector<8x3xf32>
    %637 = vector.extract_strided_slice %40 {offsets = [1, 0, 3], sizes = [1, 3, 14], strides = [1, 1, 1]} : vector<4x3x18xf32> to vector<1x3x14xf32>
    %638 = vector.shape_cast %637 : vector<1x3x14xf32> to vector<3x14xf32>
    %639 = vector.extract_strided_slice %636 {offsets = [0, 0], sizes = [8, 1], strides = [1, 1]} : vector<8x3xf32> to vector<8x1xf32>
    %640 = vector.extract_strided_slice %638 {offsets = [0, 0], sizes = [1, 14], strides = [1, 1]} : vector<3x14xf32> to vector<1x14xf32>
    %641 = vector.broadcast %639 : vector<8x1xf32> to vector<8x14xf32>
    %642 = vector.broadcast %640 : vector<1x14xf32> to vector<8x14xf32>
    %643 = arith.mulf %641, %642 : vector<8x14xf32>
    %644 = vector.extract_strided_slice %636 {offsets = [0, 1], sizes = [8, 1], strides = [1, 1]} : vector<8x3xf32> to vector<8x1xf32>
    %645 = vector.extract_strided_slice %638 {offsets = [1, 0], sizes = [1, 14], strides = [1, 1]} : vector<3x14xf32> to vector<1x14xf32>
    %646 = vector.broadcast %644 : vector<8x1xf32> to vector<8x14xf32>
    %647 = vector.broadcast %645 : vector<1x14xf32> to vector<8x14xf32>
    %648 = arith.mulf %646, %647 : vector<8x14xf32>
    %649 = arith.addf %643, %648 : vector<8x14xf32>
    %650 = vector.extract_strided_slice %636 {offsets = [0, 2], sizes = [8, 1], strides = [1, 1]} : vector<8x3xf32> to vector<8x1xf32>
    %651 = vector.extract_strided_slice %638 {offsets = [2, 0], sizes = [1, 14], strides = [1, 1]} : vector<3x14xf32> to vector<1x14xf32>
    %652 = vector.broadcast %650 : vector<8x1xf32> to vector<8x14xf32>
    %653 = vector.broadcast %651 : vector<1x14xf32> to vector<8x14xf32>
    %654 = arith.mulf %652, %653 : vector<8x14xf32>
    %655 = arith.addf %649, %654 : vector<8x14xf32>
    %656 = arith.addf %634, %655 : vector<8x14xf32>
    %657 = vector.extract_strided_slice %0 {offsets = [12, 0, 0], sizes = [1, 8, 3], strides = [1, 1, 1]} : vector<15x8x3xf32> to vector<1x8x3xf32>
    %658 = vector.shape_cast %657 : vector<1x8x3xf32> to vector<8x3xf32>
    %659 = vector.extract_strided_slice %40 {offsets = [2, 0, 3], sizes = [1, 3, 14], strides = [1, 1, 1]} : vector<4x3x18xf32> to vector<1x3x14xf32>
    %660 = vector.shape_cast %659 : vector<1x3x14xf32> to vector<3x14xf32>
    %661 = vector.extract_strided_slice %658 {offsets = [0, 0], sizes = [8, 1], strides = [1, 1]} : vector<8x3xf32> to vector<8x1xf32>
    %662 = vector.extract_strided_slice %660 {offsets = [0, 0], sizes = [1, 14], strides = [1, 1]} : vector<3x14xf32> to vector<1x14xf32>
    %663 = vector.broadcast %661 : vector<8x1xf32> to vector<8x14xf32>
    %664 = vector.broadcast %662 : vector<1x14xf32> to vector<8x14xf32>
    %665 = arith.mulf %663, %664 : vector<8x14xf32>
    %666 = vector.extract_strided_slice %658 {offsets = [0, 1], sizes = [8, 1], strides = [1, 1]} : vector<8x3xf32> to vector<8x1xf32>
    %667 = vector.extract_strided_slice %660 {offsets = [1, 0], sizes = [1, 14], strides = [1, 1]} : vector<3x14xf32> to vector<1x14xf32>
    %668 = vector.broadcast %666 : vector<8x1xf32> to vector<8x14xf32>
    %669 = vector.broadcast %667 : vector<1x14xf32> to vector<8x14xf32>
    %670 = arith.mulf %668, %669 : vector<8x14xf32>
    %671 = arith.addf %665, %670 : vector<8x14xf32>
    %672 = vector.extract_strided_slice %658 {offsets = [0, 2], sizes = [8, 1], strides = [1, 1]} : vector<8x3xf32> to vector<8x1xf32>
    %673 = vector.extract_strided_slice %660 {offsets = [2, 0], sizes = [1, 14], strides = [1, 1]} : vector<3x14xf32> to vector<1x14xf32>
    %674 = vector.broadcast %672 : vector<8x1xf32> to vector<8x14xf32>
    %675 = vector.broadcast %673 : vector<1x14xf32> to vector<8x14xf32>
    %676 = arith.mulf %674, %675 : vector<8x14xf32>
    %677 = arith.addf %671, %676 : vector<8x14xf32>
    %678 = arith.addf %656, %677 : vector<8x14xf32>
    %679 = vector.extract_strided_slice %0 {offsets = [13, 0, 0], sizes = [1, 8, 3], strides = [1, 1, 1]} : vector<15x8x3xf32> to vector<1x8x3xf32>
    %680 = vector.shape_cast %679 : vector<1x8x3xf32> to vector<8x3xf32>
    %681 = vector.extract_strided_slice %40 {offsets = [3, 0, 3], sizes = [1, 3, 14], strides = [1, 1, 1]} : vector<4x3x18xf32> to vector<1x3x14xf32>
    %682 = vector.shape_cast %681 : vector<1x3x14xf32> to vector<3x14xf32>
    %683 = vector.extract_strided_slice %680 {offsets = [0, 0], sizes = [8, 1], strides = [1, 1]} : vector<8x3xf32> to vector<8x1xf32>
    %684 = vector.extract_strided_slice %682 {offsets = [0, 0], sizes = [1, 14], strides = [1, 1]} : vector<3x14xf32> to vector<1x14xf32>
    %685 = vector.broadcast %683 : vector<8x1xf32> to vector<8x14xf32>
    %686 = vector.broadcast %684 : vector<1x14xf32> to vector<8x14xf32>
    %687 = arith.mulf %685, %686 : vector<8x14xf32>
    %688 = vector.extract_strided_slice %680 {offsets = [0, 1], sizes = [8, 1], strides = [1, 1]} : vector<8x3xf32> to vector<8x1xf32>
    %689 = vector.extract_strided_slice %682 {offsets = [1, 0], sizes = [1, 14], strides = [1, 1]} : vector<3x14xf32> to vector<1x14xf32>
    %690 = vector.broadcast %688 : vector<8x1xf32> to vector<8x14xf32>
    %691 = vector.broadcast %689 : vector<1x14xf32> to vector<8x14xf32>
    %692 = arith.mulf %690, %691 : vector<8x14xf32>
    %693 = arith.addf %687, %692 : vector<8x14xf32>
    %694 = vector.extract_strided_slice %680 {offsets = [0, 2], sizes = [8, 1], strides = [1, 1]} : vector<8x3xf32> to vector<8x1xf32>
    %695 = vector.extract_strided_slice %682 {offsets = [2, 0], sizes = [1, 14], strides = [1, 1]} : vector<3x14xf32> to vector<1x14xf32>
    %696 = vector.broadcast %694 : vector<8x1xf32> to vector<8x14xf32>
    %697 = vector.broadcast %695 : vector<1x14xf32> to vector<8x14xf32>
    %698 = arith.mulf %696, %697 : vector<8x14xf32>
    %699 = arith.addf %693, %698 : vector<8x14xf32>
    %700 = arith.addf %678, %699 : vector<8x14xf32>
    %701 = vector.extract_strided_slice %0 {offsets = [14, 0, 0], sizes = [1, 8, 3], strides = [1, 1, 1]} : vector<15x8x3xf32> to vector<1x8x3xf32>
    %702 = vector.shape_cast %701 : vector<1x8x3xf32> to vector<8x3xf32>
    %703 = vector.extract_strided_slice %40 {offsets = [0, 0, 4], sizes = [1, 3, 14], strides = [1, 1, 1]} : vector<4x3x18xf32> to vector<1x3x14xf32>
    %704 = vector.shape_cast %703 : vector<1x3x14xf32> to vector<3x14xf32>
    %705 = vector.extract_strided_slice %702 {offsets = [0, 0], sizes = [8, 1], strides = [1, 1]} : vector<8x3xf32> to vector<8x1xf32>
    %706 = vector.extract_strided_slice %704 {offsets = [0, 0], sizes = [1, 14], strides = [1, 1]} : vector<3x14xf32> to vector<1x14xf32>
    %707 = vector.broadcast %705 : vector<8x1xf32> to vector<8x14xf32>
    %708 = vector.broadcast %706 : vector<1x14xf32> to vector<8x14xf32>
    %709 = arith.mulf %707, %708 : vector<8x14xf32>
    %710 = vector.extract_strided_slice %702 {offsets = [0, 1], sizes = [8, 1], strides = [1, 1]} : vector<8x3xf32> to vector<8x1xf32>
    %711 = vector.extract_strided_slice %704 {offsets = [1, 0], sizes = [1, 14], strides = [1, 1]} : vector<3x14xf32> to vector<1x14xf32>
    %712 = vector.broadcast %710 : vector<8x1xf32> to vector<8x14xf32>
    %713 = vector.broadcast %711 : vector<1x14xf32> to vector<8x14xf32>
    %714 = arith.mulf %712, %713 : vector<8x14xf32>
    %715 = arith.addf %709, %714 : vector<8x14xf32>
    %716 = vector.extract_strided_slice %702 {offsets = [0, 2], sizes = [8, 1], strides = [1, 1]} : vector<8x3xf32> to vector<8x1xf32>
    %717 = vector.extract_strided_slice %704 {offsets = [2, 0], sizes = [1, 14], strides = [1, 1]} : vector<3x14xf32> to vector<1x14xf32>
    %718 = vector.broadcast %716 : vector<8x1xf32> to vector<8x14xf32>
    %719 = vector.broadcast %717 : vector<1x14xf32> to vector<8x14xf32>
    %720 = arith.mulf %718, %719 : vector<8x14xf32>
    %721 = arith.addf %715, %720 : vector<8x14xf32>
    %722 = arith.addf %700, %721 : vector<8x14xf32>
    %723 = vector.broadcast %1 : vector<8x1xf32> to vector<8x14xf32>
    %724 = arith.mulf %722, %723 : vector<8x14xf32>
    %725 = vector.broadcast %2 : vector<8x1xf32> to vector<8x14xf32>
    %726 = arith.addf %724, %725 : vector<8x14xf32>
    %cst_83 = arith.constant 5.000000e-01 : f32
    %727 = vector.broadcast %cst_83 : f32 to vector<8x14xf32>
    %728 = arith.mulf %727, %726 : vector<8x14xf32>
    %cst_84 = arith.constant 4.471500e-02 : f32
    %729 = vector.broadcast %cst_84 : f32 to vector<8x14xf32>
    %730 = arith.mulf %729, %726 : vector<8x14xf32>
    %731 = arith.mulf %730, %726 : vector<8x14xf32>
    %732 = arith.mulf %731, %726 : vector<8x14xf32>
    %733 = arith.addf %726, %732 : vector<8x14xf32>
    %cst_85 = arith.constant 0.797884583 : f32
    %734 = vector.broadcast %cst_85 : f32 to vector<8x14xf32>
    %735 = arith.mulf %734, %733 : vector<8x14xf32>
    %736 = math.tanh %735 : vector<8x14xf32>
    %cst_86 = arith.constant 1.000000e+00 : f32
    %737 = vector.broadcast %cst_86 : f32 to vector<8x14xf32>
    %738 = arith.addf %737, %736 : vector<8x14xf32>
    %739 = arith.mulf %728, %738 : vector<8x14xf32>
    %cst_87 = arith.constant dense<0.000000e+00> : vector<8x14xf32>
    %740 = tpu.matmul %3, %739, %cst_87 {dimension_numbers = #tpu.dot_dimension_numbers<[1], [0], [0], [1], [0, 0, 1, 1], [], []>} : vector<8x8xf32>, vector<8x14xf32>, vector<8x14xf32> -> vector<8x14xf32>
    %741 = vector.broadcast %4 : vector<8x1xf32> to vector<8x14xf32>
    %742 = arith.addf %740, %741 : vector<8x14xf32>
    %cst_88 = arith.constant 0.000000e+00 : f32
    %743 = vector.broadcast %cst_88 : f32 to vector<8x18xf32>
    %c0_89 = arith.constant 0 : index
    %c0_90 = arith.constant 0 : index
    %744 = vector.load %arg39[%c0_89, %c0_90] : memref<8x18xf32, #tpu.memory_space<vmem>>, vector<8x18xf32>
    tpu.vector_store %arg39[%c0_89, %c0_90], %743 {strides = array<i32>} : memref<8x18xf32, #tpu.memory_space<vmem>>, vector<8x18xf32>,
    %cst_91 = arith.constant 0.000000e+00 : f32
    %745 = vector.broadcast %cst_91 : f32 to vector<8x18xf32>
    %c0_92 = arith.constant 0 : index
    %c0_93 = arith.constant 0 : index
    %746 = vector.load %arg40[%c0_92, %c0_93] : memref<8x18xf32, #tpu.memory_space<vmem>>, vector<8x18xf32>
    tpu.vector_store %arg40[%c0_92, %c0_93], %745 {strides = array<i32>} : memref<8x18xf32, #tpu.memory_space<vmem>>, vector<8x18xf32>,
    %c0_94 = arith.constant 0 : index
    %c2_95 = arith.constant 2 : index
    %747 = vector.load %arg39[%c0_94, %c2_95] : memref<8x18xf32, #tpu.memory_space<vmem>>, vector<8x14xf32>
    tpu.vector_store %arg39[%c0_94, %c2_95], %391 {strides = array<i32>} : memref<8x18xf32, #tpu.memory_space<vmem>>, vector<8x14xf32>,
    %c0_96 = arith.constant 0 : index
    %c2_97 = arith.constant 2 : index
    %748 = vector.load %arg40[%c0_96, %c2_97] : memref<8x18xf32, #tpu.memory_space<vmem>>, vector<8x14xf32>
    tpu.vector_store %arg40[%c0_96, %c2_97], %742 {strides = array<i32>} : memref<8x18xf32, #tpu.memory_space<vmem>>, vector<8x14xf32>,
    %cst_98 = arith.constant 0.000000e+00 : f32
    %749 = vector.broadcast %cst_98 : f32 to vector<8x14xf32>
    %750 = vector.extract_strided_slice %5 {offsets = [0, 0], sizes = [8, 1], strides = [1, 1]} : vector<8x3xf32> to vector<8x1xf32>
    %c0_99 = arith.constant 0 : index
    %c1_100 = arith.constant 1 : index
    %751 = vector.load %arg40[%c0_99, %c1_100] : memref<8x18xf32, #tpu.memory_space<vmem>>, vector<8x14xf32>
    %752 = vector.broadcast %750 : vector<8x1xf32> to vector<8x14xf32>
    %753 = arith.mulf %752, %751 : vector<8x14xf32>
    %754 = arith.addf %749, %753 : vector<8x14xf32>
    %755 = vector.extract_strided_slice %5 {offsets = [0, 1], sizes = [8, 1], strides = [1, 1]} : vector<8x3xf32> to vector<8x1xf32>
    %c0_101 = arith.constant 0 : index
    %c2_102 = arith.constant 2 : index
    %756 = vector.load %arg39[%c0_101, %c2_102] : memref<8x18xf32, #tpu.memory_space<vmem>>, vector<8x14xf32>
    %757 = vector.broadcast %755 : vector<8x1xf32> to vector<8x14xf32>
    %758 = arith.mulf %757, %756 : vector<8x14xf32>
    %759 = arith.addf %754, %758 : vector<8x14xf32>
    %760 = vector.extract_strided_slice %5 {offsets = [0, 2], sizes = [8, 1], strides = [1, 1]} : vector<8x3xf32> to vector<8x1xf32>
    %c0_103 = arith.constant 0 : index
    %c2_104 = arith.constant 2 : index
    %761 = vector.load %arg40[%c0_103, %c2_104] : memref<8x18xf32, #tpu.memory_space<vmem>>, vector<8x14xf32>
    %762 = vector.broadcast %760 : vector<8x1xf32> to vector<8x14xf32>
    %763 = arith.mulf %762, %761 : vector<8x14xf32>
    %764 = arith.addf %759, %763 : vector<8x14xf32>
    %c0_105 = arith.constant 0 : index
    %c0_106 = arith.constant 0 : index
    %765 = vector.load %arg41[%c0_105, %c0_106] : memref<32x14xf32, #tpu.memory_space<vmem>>, vector<8x14xf32>
    tpu.vector_store %arg41[%c0_105, %c0_106], %764 {strides = array<i32>} : memref<32x14xf32, #tpu.memory_space<vmem>>, vector<8x14xf32>,
    %cst_107 = arith.constant 0.000000e+00 : f32
    %766 = vector.broadcast %cst_107 : f32 to vector<8x14xf32>
    %767 = vector.extract_strided_slice %6 {offsets = [0, 0], sizes = [8, 1], strides = [1, 1]} : vector<8x5xf32> to vector<8x1xf32>
    %c0_108 = arith.constant 0 : index
    %c1_109 = arith.constant 1 : index
    %768 = vector.load %arg39[%c0_108, %c1_109] : memref<8x18xf32, #tpu.memory_space<vmem>>, vector<8x14xf32>
    %769 = vector.broadcast %767 : vector<8x1xf32> to vector<8x14xf32>
    %770 = arith.mulf %769, %768 : vector<8x14xf32>
    %771 = arith.addf %766, %770 : vector<8x14xf32>
    %772 = vector.extract_strided_slice %6 {offsets = [0, 1], sizes = [8, 1], strides = [1, 1]} : vector<8x5xf32> to vector<8x1xf32>
    %c0_110 = arith.constant 0 : index
    %c1_111 = arith.constant 1 : index
    %773 = vector.load %arg40[%c0_110, %c1_111] : memref<8x18xf32, #tpu.memory_space<vmem>>, vector<8x14xf32>
    %774 = vector.broadcast %772 : vector<8x1xf32> to vector<8x14xf32>
    %775 = arith.mulf %774, %773 : vector<8x14xf32>
    %776 = arith.addf %771, %775 : vector<8x14xf32>
    %777 = vector.extract_strided_slice %6 {offsets = [0, 2], sizes = [8, 1], strides = [1, 1]} : vector<8x5xf32> to vector<8x1xf32>
    %c0_112 = arith.constant 0 : index
    %c2_113 = arith.constant 2 : index
    %778 = vector.load %arg39[%c0_112, %c2_113] : memref<8x18xf32, #tpu.memory_space<vmem>>, vector<8x14xf32>
    %779 = vector.broadcast %777 : vector<8x1xf32> to vector<8x14xf32>
    %780 = arith.mulf %779, %778 : vector<8x14xf32>
    %781 = arith.addf %776, %780 : vector<8x14xf32>
    %782 = vector.extract_strided_slice %6 {offsets = [0, 3], sizes = [8, 1], strides = [1, 1]} : vector<8x5xf32> to vector<8x1xf32>
    %c0_114 = arith.constant 0 : index
    %c2_115 = arith.constant 2 : index
    %783 = vector.load %arg40[%c0_114, %c2_115] : memref<8x18xf32, #tpu.memory_space<vmem>>, vector<8x14xf32>
    %784 = vector.broadcast %782 : vector<8x1xf32> to vector<8x14xf32>
    %785 = arith.mulf %784, %783 : vector<8x14xf32>
    %786 = arith.addf %781, %785 : vector<8x14xf32>
    %787 = vector.extract_strided_slice %6 {offsets = [0, 4], sizes = [8, 1], strides = [1, 1]} : vector<8x5xf32> to vector<8x1xf32>
    %c0_116 = arith.constant 0 : index
    %c3_117 = arith.constant 3 : index
    %788 = vector.load %arg39[%c0_116, %c3_117] : memref<8x18xf32, #tpu.memory_space<vmem>>, vector<8x14xf32>
    %789 = vector.broadcast %787 : vector<8x1xf32> to vector<8x14xf32>
    %790 = arith.mulf %789, %788 : vector<8x14xf32>
    %791 = arith.addf %786, %790 : vector<8x14xf32>
    %c8 = arith.constant 8 : index
    %c0_118 = arith.constant 0 : index
    %792 = vector.load %arg41[%c8, %c0_118] : memref<32x14xf32, #tpu.memory_space<vmem>>, vector<8x14xf32>
    tpu.vector_store %arg41[%c8, %c0_118], %791 {strides = array<i32>} : memref<32x14xf32, #tpu.memory_space<vmem>>, vector<8x14xf32>,
    %cst_119 = arith.constant 0.000000e+00 : f32
    %793 = vector.broadcast %cst_119 : f32 to vector<8x14xf32>
    %794 = vector.extract_strided_slice %7 {offsets = [0, 0], sizes = [8, 1], strides = [1, 1]} : vector<8x7xf32> to vector<8x1xf32>
    %c0_120 = arith.constant 0 : index
    %c0_121 = arith.constant 0 : index
    %795 = vector.load %arg40[%c0_120, %c0_121] : memref<8x18xf32, #tpu.memory_space<vmem>>, vector<8x14xf32>
    %796 = vector.broadcast %794 : vector<8x1xf32> to vector<8x14xf32>
    %797 = arith.mulf %796, %795 : vector<8x14xf32>
    %798 = arith.addf %793, %797 : vector<8x14xf32>
    %799 = vector.extract_strided_slice %7 {offsets = [0, 1], sizes = [8, 1], strides = [1, 1]} : vector<8x7xf32> to vector<8x1xf32>
    %c0_122 = arith.constant 0 : index
    %c1_123 = arith.constant 1 : index
    %800 = vector.load %arg39[%c0_122, %c1_123] : memref<8x18xf32, #tpu.memory_space<vmem>>, vector<8x14xf32>
    %801 = vector.broadcast %799 : vector<8x1xf32> to vector<8x14xf32>
    %802 = arith.mulf %801, %800 : vector<8x14xf32>
    %803 = arith.addf %798, %802 : vector<8x14xf32>
    %804 = vector.extract_strided_slice %7 {offsets = [0, 2], sizes = [8, 1], strides = [1, 1]} : vector<8x7xf32> to vector<8x1xf32>
    %c0_124 = arith.constant 0 : index
    %c1_125 = arith.constant 1 : index
    %805 = vector.load %arg40[%c0_124, %c1_125] : memref<8x18xf32, #tpu.memory_space<vmem>>, vector<8x14xf32>
    %806 = vector.broadcast %804 : vector<8x1xf32> to vector<8x14xf32>
    %807 = arith.mulf %806, %805 : vector<8x14xf32>
    %808 = arith.addf %803, %807 : vector<8x14xf32>
    %809 = vector.extract_strided_slice %7 {offsets = [0, 3], sizes = [8, 1], strides = [1, 1]} : vector<8x7xf32> to vector<8x1xf32>
    %c0_126 = arith.constant 0 : index
    %c2_127 = arith.constant 2 : index
    %810 = vector.load %arg39[%c0_126, %c2_127] : memref<8x18xf32, #tpu.memory_space<vmem>>, vector<8x14xf32>
    %811 = vector.broadcast %809 : vector<8x1xf32> to vector<8x14xf32>
    %812 = arith.mulf %811, %810 : vector<8x14xf32>
    %813 = arith.addf %808, %812 : vector<8x14xf32>
    %814 = vector.extract_strided_slice %7 {offsets = [0, 4], sizes = [8, 1], strides = [1, 1]} : vector<8x7xf32> to vector<8x1xf32>
    %c0_128 = arith.constant 0 : index
    %c2_129 = arith.constant 2 : index
    %815 = vector.load %arg40[%c0_128, %c2_129] : memref<8x18xf32, #tpu.memory_space<vmem>>, vector<8x14xf32>
    %816 = vector.broadcast %814 : vector<8x1xf32> to vector<8x14xf32>
    %817 = arith.mulf %816, %815 : vector<8x14xf32>
    %818 = arith.addf %813, %817 : vector<8x14xf32>
    %819 = vector.extract_strided_slice %7 {offsets = [0, 5], sizes = [8, 1], strides = [1, 1]} : vector<8x7xf32> to vector<8x1xf32>
    %c0_130 = arith.constant 0 : index
    %c3_131 = arith.constant 3 : index
    %820 = vector.load %arg39[%c0_130, %c3_131] : memref<8x18xf32, #tpu.memory_space<vmem>>, vector<8x14xf32>
    %821 = vector.broadcast %819 : vector<8x1xf32> to vector<8x14xf32>
    %822 = arith.mulf %821, %820 : vector<8x14xf32>
    %823 = arith.addf %818, %822 : vector<8x14xf32>
    %824 = vector.extract_strided_slice %7 {offsets = [0, 6], sizes = [8, 1], strides = [1, 1]} : vector<8x7xf32> to vector<8x1xf32>
    %c0_132 = arith.constant 0 : index
    %c3_133 = arith.constant 3 : index
    %825 = vector.load %arg40[%c0_132, %c3_133] : memref<8x18xf32, #tpu.memory_space<vmem>>, vector<8x14xf32>
    %826 = vector.broadcast %824 : vector<8x1xf32> to vector<8x14xf32>
    %827 = arith.mulf %826, %825 : vector<8x14xf32>
    %828 = arith.addf %823, %827 : vector<8x14xf32>
    %c16 = arith.constant 16 : index
    %c0_134 = arith.constant 0 : index
    %829 = vector.load %arg41[%c16, %c0_134] : memref<32x14xf32, #tpu.memory_space<vmem>>, vector<8x14xf32>
    tpu.vector_store %arg41[%c16, %c0_134], %828 {strides = array<i32>} : memref<32x14xf32, #tpu.memory_space<vmem>>, vector<8x14xf32>,
    %cst_135 = arith.constant 0.000000e+00 : f32
    %830 = vector.broadcast %cst_135 : f32 to vector<8x14xf32>
    %831 = vector.extract_strided_slice %8 {offsets = [0, 0], sizes = [8, 1], strides = [1, 1]} : vector<8x9xf32> to vector<8x1xf32>
    %c0_136 = arith.constant 0 : index
    %c0_137 = arith.constant 0 : index
    %832 = vector.load %arg39[%c0_136, %c0_137] : memref<8x18xf32, #tpu.memory_space<vmem>>, vector<8x14xf32>
    %833 = vector.broadcast %831 : vector<8x1xf32> to vector<8x14xf32>
    %834 = arith.mulf %833, %832 : vector<8x14xf32>
    %835 = arith.addf %830, %834 : vector<8x14xf32>
    %836 = vector.extract_strided_slice %8 {offsets = [0, 1], sizes = [8, 1], strides = [1, 1]} : vector<8x9xf32> to vector<8x1xf32>
    %c0_138 = arith.constant 0 : index
    %c0_139 = arith.constant 0 : index
    %837 = vector.load %arg40[%c0_138, %c0_139] : memref<8x18xf32, #tpu.memory_space<vmem>>, vector<8x14xf32>
    %838 = vector.broadcast %836 : vector<8x1xf32> to vector<8x14xf32>
    %839 = arith.mulf %838, %837 : vector<8x14xf32>
    %840 = arith.addf %835, %839 : vector<8x14xf32>
    %841 = vector.extract_strided_slice %8 {offsets = [0, 2], sizes = [8, 1], strides = [1, 1]} : vector<8x9xf32> to vector<8x1xf32>
    %c0_140 = arith.constant 0 : index
    %c1_141 = arith.constant 1 : index
    %842 = vector.load %arg39[%c0_140, %c1_141] : memref<8x18xf32, #tpu.memory_space<vmem>>, vector<8x14xf32>
    %843 = vector.broadcast %841 : vector<8x1xf32> to vector<8x14xf32>
    %844 = arith.mulf %843, %842 : vector<8x14xf32>
    %845 = arith.addf %840, %844 : vector<8x14xf32>
    %846 = vector.extract_strided_slice %8 {offsets = [0, 3], sizes = [8, 1], strides = [1, 1]} : vector<8x9xf32> to vector<8x1xf32>
    %c0_142 = arith.constant 0 : index
    %c1_143 = arith.constant 1 : index
    %847 = vector.load %arg40[%c0_142, %c1_143] : memref<8x18xf32, #tpu.memory_space<vmem>>, vector<8x14xf32>
    %848 = vector.broadcast %846 : vector<8x1xf32> to vector<8x14xf32>
    %849 = arith.mulf %848, %847 : vector<8x14xf32>
    %850 = arith.addf %845, %849 : vector<8x14xf32>
    %851 = vector.extract_strided_slice %8 {offsets = [0, 4], sizes = [8, 1], strides = [1, 1]} : vector<8x9xf32> to vector<8x1xf32>
    %c0_144 = arith.constant 0 : index
    %c2_145 = arith.constant 2 : index
    %852 = vector.load %arg39[%c0_144, %c2_145] : memref<8x18xf32, #tpu.memory_space<vmem>>, vector<8x14xf32>
    %853 = vector.broadcast %851 : vector<8x1xf32> to vector<8x14xf32>
    %854 = arith.mulf %853, %852 : vector<8x14xf32>
    %855 = arith.addf %850, %854 : vector<8x14xf32>
    %856 = vector.extract_strided_slice %8 {offsets = [0, 5], sizes = [8, 1], strides = [1, 1]} : vector<8x9xf32> to vector<8x1xf32>
    %c0_146 = arith.constant 0 : index
    %c2_147 = arith.constant 2 : index
    %857 = vector.load %arg40[%c0_146, %c2_147] : memref<8x18xf32, #tpu.memory_space<vmem>>, vector<8x14xf32>
    %858 = vector.broadcast %856 : vector<8x1xf32> to vector<8x14xf32>
    %859 = arith.mulf %858, %857 : vector<8x14xf32>
    %860 = arith.addf %855, %859 : vector<8x14xf32>
    %861 = vector.extract_strided_slice %8 {offsets = [0, 6], sizes = [8, 1], strides = [1, 1]} : vector<8x9xf32> to vector<8x1xf32>
    %c0_148 = arith.constant 0 : index
    %c3_149 = arith.constant 3 : index
    %862 = vector.load %arg39[%c0_148, %c3_149] : memref<8x18xf32, #tpu.memory_space<vmem>>, vector<8x14xf32>
    %863 = vector.broadcast %861 : vector<8x1xf32> to vector<8x14xf32>
    %864 = arith.mulf %863, %862 : vector<8x14xf32>
    %865 = arith.addf %860, %864 : vector<8x14xf32>
    %866 = vector.extract_strided_slice %8 {offsets = [0, 7], sizes = [8, 1], strides = [1, 1]} : vector<8x9xf32> to vector<8x1xf32>
    %c0_150 = arith.constant 0 : index
    %c3_151 = arith.constant 3 : index
    %867 = vector.load %arg40[%c0_150, %c3_151] : memref<8x18xf32, #tpu.memory_space<vmem>>, vector<8x14xf32>
    %868 = vector.broadcast %866 : vector<8x1xf32> to vector<8x14xf32>
    %869 = arith.mulf %868, %867 : vector<8x14xf32>
    %870 = arith.addf %865, %869 : vector<8x14xf32>
    %871 = vector.extract_strided_slice %8 {offsets = [0, 8], sizes = [8, 1], strides = [1, 1]} : vector<8x9xf32> to vector<8x1xf32>
    %c0_152 = arith.constant 0 : index
    %c4 = arith.constant 4 : index
    %872 = vector.load %arg39[%c0_152, %c4] : memref<8x18xf32, #tpu.memory_space<vmem>>, vector<8x14xf32>
    %873 = vector.broadcast %871 : vector<8x1xf32> to vector<8x14xf32>
    %874 = arith.mulf %873, %872 : vector<8x14xf32>
    %875 = arith.addf %870, %874 : vector<8x14xf32>
    %c24 = arith.constant 24 : index
    %c0_153 = arith.constant 0 : index
    %876 = vector.load %arg41[%c24, %c0_153] : memref<32x14xf32, #tpu.memory_space<vmem>>, vector<8x14xf32>
    tpu.vector_store %arg41[%c24, %c0_153], %875 {strides = array<i32>} : memref<32x14xf32, #tpu.memory_space<vmem>>, vector<8x14xf32>,
    %c0_154 = arith.constant 0 : index
    %c0_155 = arith.constant 0 : index
    %877 = vector.load %arg41[%c0_154, %c0_155] : memref<32x14xf32, #tpu.memory_space<vmem>>, vector<32x14xf32>
    %878 = vector.broadcast %9 : vector<32x1xf32> to vector<32x14xf32>
    %879 = arith.mulf %877, %878 : vector<32x14xf32>
    %880 = vector.broadcast %10 : vector<32x1xf32> to vector<32x14xf32>
    %881 = arith.addf %879, %880 : vector<32x14xf32>
    %cst_156 = arith.constant 5.000000e-01 : f32
    %882 = vector.broadcast %cst_156 : f32 to vector<32x14xf32>
    %883 = arith.mulf %882, %881 : vector<32x14xf32>
    %cst_157 = arith.constant 4.471500e-02 : f32
    %884 = vector.broadcast %cst_157 : f32 to vector<32x14xf32>
    %885 = arith.mulf %884, %881 : vector<32x14xf32>
    %886 = arith.mulf %885, %881 : vector<32x14xf32>
    %887 = arith.mulf %886, %881 : vector<32x14xf32>
    %888 = arith.addf %881, %887 : vector<32x14xf32>
    %cst_158 = arith.constant 0.797884583 : f32
    %889 = vector.broadcast %cst_158 : f32 to vector<32x14xf32>
    %890 = arith.mulf %889, %888 : vector<32x14xf32>
    %891 = math.tanh %890 : vector<32x14xf32>
    %cst_159 = arith.constant 1.000000e+00 : f32
    %892 = vector.broadcast %cst_159 : f32 to vector<32x14xf32>
    %893 = arith.addf %892, %891 : vector<32x14xf32>
    %894 = arith.mulf %883, %893 : vector<32x14xf32>
    %cst_160 = arith.constant dense<0.000000e+00> : vector<14xf32>
    %895 = vector.multi_reduction <add>, %894, %cst_160 [0] : vector<32x14xf32> to vector<14xf32>
    %896 = vector.shape_cast %895 : vector<14xf32> to vector<1x14xf32>
    %cst_161 = arith.constant 3.200000e+01 : f32
    %897 = vector.broadcast %cst_161 : f32 to vector<1x14xf32>
    %898 = arith.divf %896, %897 : vector<1x14xf32>
    %899 = vector.broadcast %898 : vector<1x14xf32> to vector<32x14xf32>
    %900 = arith.subf %894, %899 : vector<32x14xf32>
    %901 = arith.mulf %900, %900 : vector<32x14xf32>
    %cst_162 = arith.constant dense<0.000000e+00> : vector<14xf32>
    %902 = vector.multi_reduction <add>, %901, %cst_162 [0] : vector<32x14xf32> to vector<14xf32>
    %903 = vector.shape_cast %902 : vector<14xf32> to vector<1x14xf32>
    %cst_163 = arith.constant 3.200000e+01 : f32
    %904 = vector.broadcast %cst_163 : f32 to vector<1x14xf32>
    %905 = arith.divf %903, %904 : vector<1x14xf32>
    %cst_164 = arith.constant 9.99999974E-6 : f32
    %906 = vector.broadcast %cst_164 : f32 to vector<1x14xf32>
    %907 = arith.addf %905, %906 : vector<1x14xf32>
    %908 = math.rsqrt %907 : vector<1x14xf32>
    %909 = vector.broadcast %908 : vector<1x14xf32> to vector<32x14xf32>
    %910 = arith.mulf %900, %909 : vector<32x14xf32>
    %911 = vector.broadcast %11 : vector<32x1xf32> to vector<32x14xf32>
    %912 = arith.mulf %910, %911 : vector<32x14xf32>
    %913 = vector.broadcast %12 : vector<32x1xf32> to vector<32x14xf32>
    %914 = arith.addf %912, %913 : vector<32x14xf32>
    %cst_165 = arith.constant dense<0.000000e+00> : vector<4x14xf32>
    %915 = tpu.matmul %13, %914, %cst_165 {dimension_numbers = #tpu.dot_dimension_numbers<[1], [0], [0], [1], [0, 0, 1, 1], [], []>} : vector<4x32xf32>, vector<32x14xf32>, vector<4x14xf32> -> vector<4x14xf32>
    %916 = vector.broadcast %14 : vector<4x1xf32> to vector<4x14xf32>
    %917 = arith.addf %915, %916 : vector<4x14xf32>
    %cst_166 = arith.constant dense<0.000000e+00> : vector<32x14xf32>
    %918 = tpu.matmul %15, %914, %cst_166 {dimension_numbers = #tpu.dot_dimension_numbers<[1], [0], [0], [1], [0, 0, 1, 1], [], []>} : vector<32x32xf32>, vector<32x14xf32>, vector<32x14xf32> -> vector<32x14xf32>
    %919 = vector.broadcast %16 : vector<32x1xf32> to vector<32x14xf32>
    %920 = arith.addf %918, %919 : vector<32x14xf32>
    %cst_167 = arith.constant dense<0.000000e+00> : vector<32x14xf32>
    %921 = tpu.matmul %17, %914, %cst_167 {dimension_numbers = #tpu.dot_dimension_numbers<[1], [0], [0], [1], [0, 0, 1, 1], [], []>} : vector<32x32xf32>, vector<32x14xf32>, vector<32x14xf32> -> vector<32x14xf32>
    %922 = vector.broadcast %18 : vector<32x1xf32> to vector<32x14xf32>
    %923 = arith.addf %921, %922 : vector<32x14xf32>
    %cst_168 = arith.constant dense<0xFF800000> : vector<4xf32>
    %924 = vector.multi_reduction <maximumf>, %917, %cst_168 [1] : vector<4x14xf32> to vector<4xf32>
    %925 = vector.shape_cast %924 : vector<4xf32> to vector<4x1xf32>
    %926 = vector.broadcast %925 : vector<4x1xf32> to vector<4x14xf32>
    %927 = arith.subf %917, %926 : vector<4x14xf32>
    %928 = math.exp %927 : vector<4x14xf32>
    %cst_169 = arith.constant dense<0.000000e+00> : vector<4xf32>
    %929 = vector.multi_reduction <add>, %928, %cst_169 [1] : vector<4x14xf32> to vector<4xf32>
    %930 = vector.shape_cast %929 : vector<4xf32> to vector<4x1xf32>
    %931 = vector.broadcast %930 : vector<4x1xf32> to vector<4x14xf32>
    %932 = arith.divf %928, %931 : vector<4x14xf32>
    %933 = vector.extract_strided_slice %932 {offsets = [0, 0], sizes = [1, 14], strides = [1, 1]} : vector<4x14xf32> to vector<1x14xf32>
    %934 = vector.extract_strided_slice %920 {offsets = [0, 0], sizes = [8, 14], strides = [1, 1]} : vector<32x14xf32> to vector<8x14xf32>
    %935 = vector.extract_strided_slice %923 {offsets = [0, 0], sizes = [8, 14], strides = [1, 1]} : vector<32x14xf32> to vector<8x14xf32>
    %936 = vector.broadcast %933 : vector<1x14xf32> to vector<8x14xf32>
    %937 = arith.mulf %934, %936 : vector<8x14xf32>
    %cst_170 = arith.constant dense<0.000000e+00> : vector<8xf32>
    %938 = vector.multi_reduction <add>, %937, %cst_170 [1] : vector<8x14xf32> to vector<8xf32>
    %939 = vector.shape_cast %938 : vector<8xf32> to vector<8x1xf32>
    %cst_171 = arith.constant 0.000000e+00 : f32
    %940 = vector.broadcast %cst_171 : f32 to vector<8x14xf32>
    %941 = arith.maximumf %935, %940 : vector<8x14xf32>
    %942 = vector.broadcast %939 : vector<8x1xf32> to vector<8x14xf32>
    %943 = arith.mulf %941, %942 : vector<8x14xf32>
    %c0_172 = arith.constant 0 : index
    %c0_173 = arith.constant 0 : index
    %944 = vector.load %arg41[%c0_172, %c0_173] : memref<32x14xf32, #tpu.memory_space<vmem>>, vector<8x14xf32>
    tpu.vector_store %arg41[%c0_172, %c0_173], %943 {strides = array<i32>} : memref<32x14xf32, #tpu.memory_space<vmem>>, vector<8x14xf32>,
    %945 = vector.extract_strided_slice %932 {offsets = [1, 0], sizes = [1, 14], strides = [1, 1]} : vector<4x14xf32> to vector<1x14xf32>
    %946 = vector.extract_strided_slice %920 {offsets = [8, 0], sizes = [8, 14], strides = [1, 1]} : vector<32x14xf32> to vector<8x14xf32>
    %947 = vector.extract_strided_slice %923 {offsets = [8, 0], sizes = [8, 14], strides = [1, 1]} : vector<32x14xf32> to vector<8x14xf32>
    %948 = vector.broadcast %945 : vector<1x14xf32> to vector<8x14xf32>
    %949 = arith.mulf %946, %948 : vector<8x14xf32>
    %cst_174 = arith.constant dense<0.000000e+00> : vector<8xf32>
    %950 = vector.multi_reduction <add>, %949, %cst_174 [1] : vector<8x14xf32> to vector<8xf32>
    %951 = vector.shape_cast %950 : vector<8xf32> to vector<8x1xf32>
    %cst_175 = arith.constant 0.000000e+00 : f32
    %952 = vector.broadcast %cst_175 : f32 to vector<8x14xf32>
    %953 = arith.maximumf %947, %952 : vector<8x14xf32>
    %954 = vector.broadcast %951 : vector<8x1xf32> to vector<8x14xf32>
    %955 = arith.mulf %953, %954 : vector<8x14xf32>
    %c8_176 = arith.constant 8 : index
    %c0_177 = arith.constant 0 : index
    %956 = vector.load %arg41[%c8_176, %c0_177] : memref<32x14xf32, #tpu.memory_space<vmem>>, vector<8x14xf32>
    tpu.vector_store %arg41[%c8_176, %c0_177], %955 {strides = array<i32>} : memref<32x14xf32, #tpu.memory_space<vmem>>, vector<8x14xf32>,
    %957 = vector.extract_strided_slice %932 {offsets = [2, 0], sizes = [1, 14], strides = [1, 1]} : vector<4x14xf32> to vector<1x14xf32>
    %958 = vector.extract_strided_slice %920 {offsets = [16, 0], sizes = [8, 14], strides = [1, 1]} : vector<32x14xf32> to vector<8x14xf32>
    %959 = vector.extract_strided_slice %923 {offsets = [16, 0], sizes = [8, 14], strides = [1, 1]} : vector<32x14xf32> to vector<8x14xf32>
    %960 = vector.broadcast %957 : vector<1x14xf32> to vector<8x14xf32>
    %961 = arith.mulf %958, %960 : vector<8x14xf32>
    %cst_178 = arith.constant dense<0.000000e+00> : vector<8xf32>
    %962 = vector.multi_reduction <add>, %961, %cst_178 [1] : vector<8x14xf32> to vector<8xf32>
    %963 = vector.shape_cast %962 : vector<8xf32> to vector<8x1xf32>
    %cst_179 = arith.constant 0.000000e+00 : f32
    %964 = vector.broadcast %cst_179 : f32 to vector<8x14xf32>
    %965 = arith.maximumf %959, %964 : vector<8x14xf32>
    %966 = vector.broadcast %963 : vector<8x1xf32> to vector<8x14xf32>
    %967 = arith.mulf %965, %966 : vector<8x14xf32>
    %c16_180 = arith.constant 16 : index
    %c0_181 = arith.constant 0 : index
    %968 = vector.load %arg41[%c16_180, %c0_181] : memref<32x14xf32, #tpu.memory_space<vmem>>, vector<8x14xf32>
    tpu.vector_store %arg41[%c16_180, %c0_181], %967 {strides = array<i32>} : memref<32x14xf32, #tpu.memory_space<vmem>>, vector<8x14xf32>,
    %969 = vector.extract_strided_slice %932 {offsets = [3, 0], sizes = [1, 14], strides = [1, 1]} : vector<4x14xf32> to vector<1x14xf32>
    %970 = vector.extract_strided_slice %920 {offsets = [24, 0], sizes = [8, 14], strides = [1, 1]} : vector<32x14xf32> to vector<8x14xf32>
    %971 = vector.extract_strided_slice %923 {offsets = [24, 0], sizes = [8, 14], strides = [1, 1]} : vector<32x14xf32> to vector<8x14xf32>
    %972 = vector.broadcast %969 : vector<1x14xf32> to vector<8x14xf32>
    %973 = arith.mulf %970, %972 : vector<8x14xf32>
    %cst_182 = arith.constant dense<0.000000e+00> : vector<8xf32>
    %974 = vector.multi_reduction <add>, %973, %cst_182 [1] : vector<8x14xf32> to vector<8xf32>
    %975 = vector.shape_cast %974 : vector<8xf32> to vector<8x1xf32>
    %cst_183 = arith.constant 0.000000e+00 : f32
    %976 = vector.broadcast %cst_183 : f32 to vector<8x14xf32>
    %977 = arith.maximumf %971, %976 : vector<8x14xf32>
    %978 = vector.broadcast %975 : vector<8x1xf32> to vector<8x14xf32>
    %979 = arith.mulf %977, %978 : vector<8x14xf32>
    %c24_184 = arith.constant 24 : index
    %c0_185 = arith.constant 0 : index
    %980 = vector.load %arg41[%c24_184, %c0_185] : memref<32x14xf32, #tpu.memory_space<vmem>>, vector<8x14xf32>
    tpu.vector_store %arg41[%c24_184, %c0_185], %979 {strides = array<i32>} : memref<32x14xf32, #tpu.memory_space<vmem>>, vector<8x14xf32>,
    %c0_186 = arith.constant 0 : index
    %c0_187 = arith.constant 0 : index
    %981 = vector.load %arg41[%c0_186, %c0_187] : memref<32x14xf32, #tpu.memory_space<vmem>>, vector<32x14xf32>
    %cst_188 = arith.constant dense<0.000000e+00> : vector<32x14xf32>
    %982 = tpu.matmul %19, %981, %cst_188 {dimension_numbers = #tpu.dot_dimension_numbers<[1], [0], [0], [1], [0, 0, 1, 1], [], []>} : vector<32x32xf32>, vector<32x14xf32>, vector<32x14xf32> -> vector<32x14xf32>
    %983 = vector.broadcast %20 : vector<32x1xf32> to vector<32x14xf32>
    %984 = arith.addf %982, %983 : vector<32x14xf32>
    %985 = vector.broadcast %35 : f32 to vector<32x14xf32>
    %986 = arith.mulf %985, %984 : vector<32x14xf32>
    %987 = vector.broadcast %36 : f32 to vector<32x14xf32>
    %988 = arith.mulf %987, %894 : vector<32x14xf32>
    %989 = arith.addf %986, %988 : vector<32x14xf32>
    %cst_189 = arith.constant dense<0.000000e+00> : vector<14xf32>
    %990 = vector.multi_reduction <add>, %989, %cst_189 [0] : vector<32x14xf32> to vector<14xf32>
    %991 = vector.shape_cast %990 : vector<14xf32> to vector<1x14xf32>
    %cst_190 = arith.constant 3.200000e+01 : f32
    %992 = vector.broadcast %cst_190 : f32 to vector<1x14xf32>
    %993 = arith.divf %991, %992 : vector<1x14xf32>
    %994 = vector.broadcast %993 : vector<1x14xf32> to vector<32x14xf32>
    %995 = arith.subf %989, %994 : vector<32x14xf32>
    %996 = arith.mulf %995, %995 : vector<32x14xf32>
    %cst_191 = arith.constant dense<0.000000e+00> : vector<14xf32>
    %997 = vector.multi_reduction <add>, %996, %cst_191 [0] : vector<32x14xf32> to vector<14xf32>
    %998 = vector.shape_cast %997 : vector<14xf32> to vector<1x14xf32>
    %cst_192 = arith.constant 3.200000e+01 : f32
    %999 = vector.broadcast %cst_192 : f32 to vector<1x14xf32>
    %1000 = arith.divf %998, %999 : vector<1x14xf32>
    %cst_193 = arith.constant 9.99999974E-6 : f32
    %1001 = vector.broadcast %cst_193 : f32 to vector<1x14xf32>
    %1002 = arith.addf %1000, %1001 : vector<1x14xf32>
    %1003 = math.rsqrt %1002 : vector<1x14xf32>
    %1004 = vector.broadcast %1003 : vector<1x14xf32> to vector<32x14xf32>
    %1005 = arith.mulf %995, %1004 : vector<32x14xf32>
    %1006 = vector.broadcast %21 : vector<32x1xf32> to vector<32x14xf32>
    %1007 = arith.mulf %1005, %1006 : vector<32x14xf32>
    %1008 = vector.broadcast %22 : vector<32x1xf32> to vector<32x14xf32>
    %1009 = arith.addf %1007, %1008 : vector<32x14xf32>
    %cst_194 = arith.constant dense<0.000000e+00> : vector<8x14xf32>
    %1010 = tpu.matmul %23, %1009, %cst_194 {dimension_numbers = #tpu.dot_dimension_numbers<[1], [0], [0], [1], [0, 0, 1, 1], [], []>} : vector<8x32xf32>, vector<32x14xf32>, vector<8x14xf32> -> vector<8x14xf32>
    %1011 = vector.broadcast %24 : vector<8x1xf32> to vector<8x14xf32>
    %1012 = arith.addf %1010, %1011 : vector<8x14xf32>
    %cst_195 = arith.constant 5.000000e-01 : f32
    %1013 = vector.broadcast %cst_195 : f32 to vector<8x14xf32>
    %1014 = arith.mulf %1013, %1012 : vector<8x14xf32>
    %cst_196 = arith.constant 4.471500e-02 : f32
    %1015 = vector.broadcast %cst_196 : f32 to vector<8x14xf32>
    %1016 = arith.mulf %1015, %1012 : vector<8x14xf32>
    %1017 = arith.mulf %1016, %1012 : vector<8x14xf32>
    %1018 = arith.mulf %1017, %1012 : vector<8x14xf32>
    %1019 = arith.addf %1012, %1018 : vector<8x14xf32>
    %cst_197 = arith.constant 0.797884583 : f32
    %1020 = vector.broadcast %cst_197 : f32 to vector<8x14xf32>
    %1021 = arith.mulf %1020, %1019 : vector<8x14xf32>
    %1022 = math.tanh %1021 : vector<8x14xf32>
    %cst_198 = arith.constant 1.000000e+00 : f32
    %1023 = vector.broadcast %cst_198 : f32 to vector<8x14xf32>
    %1024 = arith.addf %1023, %1022 : vector<8x14xf32>
    %1025 = arith.mulf %1014, %1024 : vector<8x14xf32>
    %cst_199 = arith.constant dense<0.000000e+00> : vector<32x14xf32>
    %1026 = tpu.matmul %25, %1025, %cst_199 {dimension_numbers = #tpu.dot_dimension_numbers<[1], [0], [0], [1], [0, 0, 1, 1], [], []>} : vector<32x8xf32>, vector<8x14xf32>, vector<32x14xf32> -> vector<32x14xf32>
    %1027 = vector.broadcast %26 : vector<32x1xf32> to vector<32x14xf32>
    %1028 = arith.addf %1026, %1027 : vector<32x14xf32>
    %1029 = vector.broadcast %37 : f32 to vector<32x14xf32>
    %1030 = arith.mulf %1029, %1028 : vector<32x14xf32>
    %1031 = vector.broadcast %38 : f32 to vector<32x14xf32>
    %1032 = arith.mulf %1031, %989 : vector<32x14xf32>
    %1033 = arith.addf %1030, %1032 : vector<32x14xf32>
    %cst_200 = arith.constant dense<0.000000e+00> : vector<32xf32>
    %1034 = vector.multi_reduction <add>, %1033, %cst_200 [1] : vector<32x14xf32> to vector<32xf32>
    %1035 = vector.shape_cast %1034 : vector<32xf32> to vector<32x1xf32>
    %cst_201 = arith.constant 1.400000e+01 : f32
    %1036 = vector.broadcast %cst_201 : f32 to vector<32x1xf32>
    %1037 = arith.divf %1035, %1036 : vector<32x1xf32>
    %c0_202 = arith.constant 0 : index
    %c0_203 = arith.constant 0 : index
    %c0_204 = arith.constant 0 : index
    %1038 = vector.load %arg1[%c0_202, %c0_203, %c0_204] : memref<2x2x18xf32, #tpu.memory_space<vmem>>, vector<1x2x18xf32>
    %1039 = vector.shape_cast %1038 : vector<1x2x18xf32> to vector<2x18xf32>
    %cst_205 = arith.constant 0.000000e+00 : f32
    %1040 = vector.broadcast %cst_205 : f32 to vector<16x16xf32>
    %1041 = vector.extract_strided_slice %27 {offsets = [0, 0, 0], sizes = [1, 16, 2], strides = [1, 1, 1]} : vector<3x16x2xf32> to vector<1x16x2xf32>
    %1042 = vector.shape_cast %1041 : vector<1x16x2xf32> to vector<16x2xf32>
    %1043 = vector.extract_strided_slice %1039 {offsets = [0, 0], sizes = [2, 16], strides = [1, 1]} : vector<2x18xf32> to vector<2x16xf32>
    %1044 = vector.extract_strided_slice %1042 {offsets = [0, 0], sizes = [16, 1], strides = [1, 1]} : vector<16x2xf32> to vector<16x1xf32>
    %1045 = vector.extract_strided_slice %1043 {offsets = [0, 0], sizes = [1, 16], strides = [1, 1]} : vector<2x16xf32> to vector<1x16xf32>
    %1046 = vector.broadcast %1044 : vector<16x1xf32> to vector<16x16xf32>
    %1047 = vector.broadcast %1045 : vector<1x16xf32> to vector<16x16xf32>
    %1048 = arith.mulf %1046, %1047 : vector<16x16xf32>
    %1049 = vector.extract_strided_slice %1042 {offsets = [0, 1], sizes = [16, 1], strides = [1, 1]} : vector<16x2xf32> to vector<16x1xf32>
    %1050 = vector.extract_strided_slice %1043 {offsets = [1, 0], sizes = [1, 16], strides = [1, 1]} : vector<2x16xf32> to vector<1x16xf32>
    %1051 = vector.broadcast %1049 : vector<16x1xf32> to vector<16x16xf32>
    %1052 = vector.broadcast %1050 : vector<1x16xf32> to vector<16x16xf32>
    %1053 = arith.mulf %1051, %1052 : vector<16x16xf32>
    %1054 = arith.addf %1048, %1053 : vector<16x16xf32>
    %1055 = arith.addf %1040, %1054 : vector<16x16xf32>
    %1056 = vector.extract_strided_slice %27 {offsets = [1, 0, 0], sizes = [1, 16, 2], strides = [1, 1, 1]} : vector<3x16x2xf32> to vector<1x16x2xf32>
    %1057 = vector.shape_cast %1056 : vector<1x16x2xf32> to vector<16x2xf32>
    %1058 = vector.extract_strided_slice %1039 {offsets = [0, 1], sizes = [2, 16], strides = [1, 1]} : vector<2x18xf32> to vector<2x16xf32>
    %1059 = vector.extract_strided_slice %1057 {offsets = [0, 0], sizes = [16, 1], strides = [1, 1]} : vector<16x2xf32> to vector<16x1xf32>
    %1060 = vector.extract_strided_slice %1058 {offsets = [0, 0], sizes = [1, 16], strides = [1, 1]} : vector<2x16xf32> to vector<1x16xf32>
    %1061 = vector.broadcast %1059 : vector<16x1xf32> to vector<16x16xf32>
    %1062 = vector.broadcast %1060 : vector<1x16xf32> to vector<16x16xf32>
    %1063 = arith.mulf %1061, %1062 : vector<16x16xf32>
    %1064 = vector.extract_strided_slice %1057 {offsets = [0, 1], sizes = [16, 1], strides = [1, 1]} : vector<16x2xf32> to vector<16x1xf32>
    %1065 = vector.extract_strided_slice %1058 {offsets = [1, 0], sizes = [1, 16], strides = [1, 1]} : vector<2x16xf32> to vector<1x16xf32>
    %1066 = vector.broadcast %1064 : vector<16x1xf32> to vector<16x16xf32>
    %1067 = vector.broadcast %1065 : vector<1x16xf32> to vector<16x16xf32>
    %1068 = arith.mulf %1066, %1067 : vector<16x16xf32>
    %1069 = arith.addf %1063, %1068 : vector<16x16xf32>
    %1070 = arith.addf %1055, %1069 : vector<16x16xf32>
    %1071 = vector.extract_strided_slice %27 {offsets = [2, 0, 0], sizes = [1, 16, 2], strides = [1, 1, 1]} : vector<3x16x2xf32> to vector<1x16x2xf32>
    %1072 = vector.shape_cast %1071 : vector<1x16x2xf32> to vector<16x2xf32>
    %1073 = vector.extract_strided_slice %1039 {offsets = [0, 2], sizes = [2, 16], strides = [1, 1]} : vector<2x18xf32> to vector<2x16xf32>
    %1074 = vector.extract_strided_slice %1072 {offsets = [0, 0], sizes = [16, 1], strides = [1, 1]} : vector<16x2xf32> to vector<16x1xf32>
    %1075 = vector.extract_strided_slice %1073 {offsets = [0, 0], sizes = [1, 16], strides = [1, 1]} : vector<2x16xf32> to vector<1x16xf32>
    %1076 = vector.broadcast %1074 : vector<16x1xf32> to vector<16x16xf32>
    %1077 = vector.broadcast %1075 : vector<1x16xf32> to vector<16x16xf32>
    %1078 = arith.mulf %1076, %1077 : vector<16x16xf32>
    %1079 = vector.extract_strided_slice %1072 {offsets = [0, 1], sizes = [16, 1], strides = [1, 1]} : vector<16x2xf32> to vector<16x1xf32>
    %1080 = vector.extract_strided_slice %1073 {offsets = [1, 0], sizes = [1, 16], strides = [1, 1]} : vector<2x16xf32> to vector<1x16xf32>
    %1081 = vector.broadcast %1079 : vector<16x1xf32> to vector<16x16xf32>
    %1082 = vector.broadcast %1080 : vector<1x16xf32> to vector<16x16xf32>
    %1083 = arith.mulf %1081, %1082 : vector<16x16xf32>
    %1084 = arith.addf %1078, %1083 : vector<16x16xf32>
    %1085 = arith.addf %1070, %1084 : vector<16x16xf32>
    %1086 = vector.broadcast %28 : vector<16x1xf32> to vector<16x16xf32>
    %1087 = arith.addf %1085, %1086 : vector<16x16xf32>
    %cst_206 = arith.constant 0.000000e+00 : f32
    %1088 = vector.broadcast %cst_206 : f32 to vector<16x16xf32>
    %1089 = arith.maximumf %1087, %1088 : vector<16x16xf32>
    %cst_207 = arith.constant 0.000000e+00 : f32
    %1090 = vector.broadcast %cst_207 : f32 to vector<32x14xf32>
    %1091 = vector.extract_strided_slice %29 {offsets = [0, 0, 0], sizes = [1, 32, 16], strides = [1, 1, 1]} : vector<3x32x16xf32> to vector<1x32x16xf32>
    %1092 = vector.shape_cast %1091 : vector<1x32x16xf32> to vector<32x16xf32>
    %1093 = vector.extract_strided_slice %1089 {offsets = [0, 0], sizes = [16, 14], strides = [1, 1]} : vector<16x16xf32> to vector<16x14xf32>
    %cst_208 = arith.constant dense<0.000000e+00> : vector<32x14xf32>
    %1094 = tpu.matmul %1092, %1093, %cst_208 {dimension_numbers = #tpu.dot_dimension_numbers<[1], [0], [0], [1], [0, 0, 1, 1], [], []>} : vector<32x16xf32>, vector<16x14xf32>, vector<32x14xf32> -> vector<32x14xf32>
    %1095 = arith.addf %1090, %1094 : vector<32x14xf32>
    %1096 = vector.extract_strided_slice %29 {offsets = [1, 0, 0], sizes = [1, 32, 16], strides = [1, 1, 1]} : vector<3x32x16xf32> to vector<1x32x16xf32>
    %1097 = vector.shape_cast %1096 : vector<1x32x16xf32> to vector<32x16xf32>
    %1098 = vector.extract_strided_slice %1089 {offsets = [0, 1], sizes = [16, 14], strides = [1, 1]} : vector<16x16xf32> to vector<16x14xf32>
    %cst_209 = arith.constant dense<0.000000e+00> : vector<32x14xf32>
    %1099 = tpu.matmul %1097, %1098, %cst_209 {dimension_numbers = #tpu.dot_dimension_numbers<[1], [0], [0], [1], [0, 0, 1, 1], [], []>} : vector<32x16xf32>, vector<16x14xf32>, vector<32x14xf32> -> vector<32x14xf32>
    %1100 = arith.addf %1095, %1099 : vector<32x14xf32>
    %1101 = vector.extract_strided_slice %29 {offsets = [2, 0, 0], sizes = [1, 32, 16], strides = [1, 1, 1]} : vector<3x32x16xf32> to vector<1x32x16xf32>
    %1102 = vector.shape_cast %1101 : vector<1x32x16xf32> to vector<32x16xf32>
    %1103 = vector.extract_strided_slice %1089 {offsets = [0, 2], sizes = [16, 14], strides = [1, 1]} : vector<16x16xf32> to vector<16x14xf32>
    %cst_210 = arith.constant dense<0.000000e+00> : vector<32x14xf32>
    %1104 = tpu.matmul %1102, %1103, %cst_210 {dimension_numbers = #tpu.dot_dimension_numbers<[1], [0], [0], [1], [0, 0, 1, 1], [], []>} : vector<32x16xf32>, vector<16x14xf32>, vector<32x14xf32> -> vector<32x14xf32>
    %1105 = arith.addf %1100, %1104 : vector<32x14xf32>
    %1106 = vector.broadcast %30 : vector<32x1xf32> to vector<32x14xf32>
    %1107 = arith.addf %1105, %1106 : vector<32x14xf32>
    %cst_211 = arith.constant 0.000000e+00 : f32
    %1108 = vector.broadcast %cst_211 : f32 to vector<32x14xf32>
    %1109 = arith.maximumf %1107, %1108 : vector<32x14xf32>
    %cst_212 = arith.constant dense<0.000000e+00> : vector<32xf32>
    %1110 = vector.multi_reduction <add>, %1109, %cst_212 [1] : vector<32x14xf32> to vector<32xf32>
    %1111 = vector.shape_cast %1110 : vector<32xf32> to vector<32x1xf32>
    %cst_213 = arith.constant 1.400000e+01 : f32
    %1112 = vector.broadcast %cst_213 : f32 to vector<32x1xf32>
    %1113 = arith.divf %1111, %1112 : vector<32x1xf32>
    %1114 = arith.mulf %31, %1037 : vector<32x1xf32>
    %1115 = arith.mulf %32, %1113 : vector<32x1xf32>
    %1116 = arith.addf %1114, %1115 : vector<32x1xf32>
    %cst_214 = arith.constant dense<0.000000e+00> : vector<4x1xf32>
    %1117 = tpu.matmul %33, %1116, %cst_214 {dimension_numbers = #tpu.dot_dimension_numbers<[1], [0], [0], [1], [0, 0, 1, 1], [], []>} : vector<4x32xf32>, vector<32x1xf32>, vector<4x1xf32> -> vector<4x1xf32>
    %1118 = arith.addf %1117, %34 : vector<4x1xf32>
    %c0_215 = arith.constant 0 : index
    %c0_216 = arith.constant 0 : index
    %1119 = vector.load %arg38[%c0_215, %c0_216] : memref<4x2xf32, #tpu.memory_space<vmem>>, vector<4x1xf32>
    tpu.vector_store %arg38[%c0_215, %c0_216], %1118 {strides = array<i32>} : memref<4x2xf32, #tpu.memory_space<vmem>>, vector<4x1xf32>,
    %c1_217 = arith.constant 1 : index
    %c0_218 = arith.constant 0 : index
    %c0_219 = arith.constant 0 : index
    %c0_220 = arith.constant 0 : index
    %1120 = vector.load %arg0[%c1_217, %c0_218, %c0_219, %c0_220] : memref<2x4x3x18xf32, #tpu.memory_space<vmem>>, vector<1x4x3x18xf32>
    %1121 = vector.shape_cast %1120 : vector<1x4x3x18xf32> to vector<4x3x18xf32>
    %cst_221 = arith.constant 0.000000e+00 : f32
    %1122 = vector.broadcast %cst_221 : f32 to vector<8x14xf32>
    %1123 = vector.extract_strided_slice %0 {offsets = [0, 0, 0], sizes = [1, 8, 3], strides = [1, 1, 1]} : vector<15x8x3xf32> to vector<1x8x3xf32>
    %1124 = vector.shape_cast %1123 : vector<1x8x3xf32> to vector<8x3xf32>
    %1125 = vector.extract_strided_slice %1121 {offsets = [0, 0, 0], sizes = [1, 3, 14], strides = [1, 1, 1]} : vector<4x3x18xf32> to vector<1x3x14xf32>
    %1126 = vector.shape_cast %1125 : vector<1x3x14xf32> to vector<3x14xf32>
    %1127 = vector.extract_strided_slice %1124 {offsets = [0, 0], sizes = [8, 1], strides = [1, 1]} : vector<8x3xf32> to vector<8x1xf32>
    %1128 = vector.extract_strided_slice %1126 {offsets = [0, 0], sizes = [1, 14], strides = [1, 1]} : vector<3x14xf32> to vector<1x14xf32>
    %1129 = vector.broadcast %1127 : vector<8x1xf32> to vector<8x14xf32>
    %1130 = vector.broadcast %1128 : vector<1x14xf32> to vector<8x14xf32>
    %1131 = arith.mulf %1129, %1130 : vector<8x14xf32>
    %1132 = vector.extract_strided_slice %1124 {offsets = [0, 1], sizes = [8, 1], strides = [1, 1]} : vector<8x3xf32> to vector<8x1xf32>
    %1133 = vector.extract_strided_slice %1126 {offsets = [1, 0], sizes = [1, 14], strides = [1, 1]} : vector<3x14xf32> to vector<1x14xf32>
    %1134 = vector.broadcast %1132 : vector<8x1xf32> to vector<8x14xf32>
    %1135 = vector.broadcast %1133 : vector<1x14xf32> to vector<8x14xf32>
    %1136 = arith.mulf %1134, %1135 : vector<8x14xf32>
    %1137 = arith.addf %1131, %1136 : vector<8x14xf32>
    %1138 = vector.extract_strided_slice %1124 {offsets = [0, 2], sizes = [8, 1], strides = [1, 1]} : vector<8x3xf32> to vector<8x1xf32>
    %1139 = vector.extract_strided_slice %1126 {offsets = [2, 0], sizes = [1, 14], strides = [1, 1]} : vector<3x14xf32> to vector<1x14xf32>
    %1140 = vector.broadcast %1138 : vector<8x1xf32> to vector<8x14xf32>
    %1141 = vector.broadcast %1139 : vector<1x14xf32> to vector<8x14xf32>
    %1142 = arith.mulf %1140, %1141 : vector<8x14xf32>
    %1143 = arith.addf %1137, %1142 : vector<8x14xf32>
    %1144 = arith.addf %1122, %1143 : vector<8x14xf32>
    %1145 = vector.extract_strided_slice %0 {offsets = [1, 0, 0], sizes = [1, 8, 3], strides = [1, 1, 1]} : vector<15x8x3xf32> to vector<1x8x3xf32>
    %1146 = vector.shape_cast %1145 : vector<1x8x3xf32> to vector<8x3xf32>
    %1147 = vector.extract_strided_slice %1121 {offsets = [1, 0, 0], sizes = [1, 3, 14], strides = [1, 1, 1]} : vector<4x3x18xf32> to vector<1x3x14xf32>
    %1148 = vector.shape_cast %1147 : vector<1x3x14xf32> to vector<3x14xf32>
    %1149 = vector.extract_strided_slice %1146 {offsets = [0, 0], sizes = [8, 1], strides = [1, 1]} : vector<8x3xf32> to vector<8x1xf32>
    %1150 = vector.extract_strided_slice %1148 {offsets = [0, 0], sizes = [1, 14], strides = [1, 1]} : vector<3x14xf32> to vector<1x14xf32>
    %1151 = vector.broadcast %1149 : vector<8x1xf32> to vector<8x14xf32>
    %1152 = vector.broadcast %1150 : vector<1x14xf32> to vector<8x14xf32>
    %1153 = arith.mulf %1151, %1152 : vector<8x14xf32>
    %1154 = vector.extract_strided_slice %1146 {offsets = [0, 1], sizes = [8, 1], strides = [1, 1]} : vector<8x3xf32> to vector<8x1xf32>
    %1155 = vector.extract_strided_slice %1148 {offsets = [1, 0], sizes = [1, 14], strides = [1, 1]} : vector<3x14xf32> to vector<1x14xf32>
    %1156 = vector.broadcast %1154 : vector<8x1xf32> to vector<8x14xf32>
    %1157 = vector.broadcast %1155 : vector<1x14xf32> to vector<8x14xf32>
    %1158 = arith.mulf %1156, %1157 : vector<8x14xf32>
    %1159 = arith.addf %1153, %1158 : vector<8x14xf32>
    %1160 = vector.extract_strided_slice %1146 {offsets = [0, 2], sizes = [8, 1], strides = [1, 1]} : vector<8x3xf32> to vector<8x1xf32>
    %1161 = vector.extract_strided_slice %1148 {offsets = [2, 0], sizes = [1, 14], strides = [1, 1]} : vector<3x14xf32> to vector<1x14xf32>
    %1162 = vector.broadcast %1160 : vector<8x1xf32> to vector<8x14xf32>
    %1163 = vector.broadcast %1161 : vector<1x14xf32> to vector<8x14xf32>
    %1164 = arith.mulf %1162, %1163 : vector<8x14xf32>
    %1165 = arith.addf %1159, %1164 : vector<8x14xf32>
    %1166 = arith.addf %1144, %1165 : vector<8x14xf32>
    %1167 = vector.extract_strided_slice %0 {offsets = [2, 0, 0], sizes = [1, 8, 3], strides = [1, 1, 1]} : vector<15x8x3xf32> to vector<1x8x3xf32>
    %1168 = vector.shape_cast %1167 : vector<1x8x3xf32> to vector<8x3xf32>
    %1169 = vector.extract_strided_slice %1121 {offsets = [2, 0, 0], sizes = [1, 3, 14], strides = [1, 1, 1]} : vector<4x3x18xf32> to vector<1x3x14xf32>
    %1170 = vector.shape_cast %1169 : vector<1x3x14xf32> to vector<3x14xf32>
    %1171 = vector.extract_strided_slice %1168 {offsets = [0, 0], sizes = [8, 1], strides = [1, 1]} : vector<8x3xf32> to vector<8x1xf32>
    %1172 = vector.extract_strided_slice %1170 {offsets = [0, 0], sizes = [1, 14], strides = [1, 1]} : vector<3x14xf32> to vector<1x14xf32>
    %1173 = vector.broadcast %1171 : vector<8x1xf32> to vector<8x14xf32>
    %1174 = vector.broadcast %1172 : vector<1x14xf32> to vector<8x14xf32>
    %1175 = arith.mulf %1173, %1174 : vector<8x14xf32>
    %1176 = vector.extract_strided_slice %1168 {offsets = [0, 1], sizes = [8, 1], strides = [1, 1]} : vector<8x3xf32> to vector<8x1xf32>
    %1177 = vector.extract_strided_slice %1170 {offsets = [1, 0], sizes = [1, 14], strides = [1, 1]} : vector<3x14xf32> to vector<1x14xf32>
    %1178 = vector.broadcast %1176 : vector<8x1xf32> to vector<8x14xf32>
    %1179 = vector.broadcast %1177 : vector<1x14xf32> to vector<8x14xf32>
    %1180 = arith.mulf %1178, %1179 : vector<8x14xf32>
    %1181 = arith.addf %1175, %1180 : vector<8x14xf32>
    %1182 = vector.extract_strided_slice %1168 {offsets = [0, 2], sizes = [8, 1], strides = [1, 1]} : vector<8x3xf32> to vector<8x1xf32>
    %1183 = vector.extract_strided_slice %1170 {offsets = [2, 0], sizes = [1, 14], strides = [1, 1]} : vector<3x14xf32> to vector<1x14xf32>
    %1184 = vector.broadcast %1182 : vector<8x1xf32> to vector<8x14xf32>
    %1185 = vector.broadcast %1183 : vector<1x14xf32> to vector<8x14xf32>
    %1186 = arith.mulf %1184, %1185 : vector<8x14xf32>
    %1187 = arith.addf %1181, %1186 : vector<8x14xf32>
    %1188 = arith.addf %1166, %1187 : vector<8x14xf32>
    %1189 = vector.extract_strided_slice %0 {offsets = [3, 0, 0], sizes = [1, 8, 3], strides = [1, 1, 1]} : vector<15x8x3xf32> to vector<1x8x3xf32>
    %1190 = vector.shape_cast %1189 : vector<1x8x3xf32> to vector<8x3xf32>
    %1191 = vector.extract_strided_slice %1121 {offsets = [3, 0, 0], sizes = [1, 3, 14], strides = [1, 1, 1]} : vector<4x3x18xf32> to vector<1x3x14xf32>
    %1192 = vector.shape_cast %1191 : vector<1x3x14xf32> to vector<3x14xf32>
    %1193 = vector.extract_strided_slice %1190 {offsets = [0, 0], sizes = [8, 1], strides = [1, 1]} : vector<8x3xf32> to vector<8x1xf32>
    %1194 = vector.extract_strided_slice %1192 {offsets = [0, 0], sizes = [1, 14], strides = [1, 1]} : vector<3x14xf32> to vector<1x14xf32>
    %1195 = vector.broadcast %1193 : vector<8x1xf32> to vector<8x14xf32>
    %1196 = vector.broadcast %1194 : vector<1x14xf32> to vector<8x14xf32>
    %1197 = arith.mulf %1195, %1196 : vector<8x14xf32>
    %1198 = vector.extract_strided_slice %1190 {offsets = [0, 1], sizes = [8, 1], strides = [1, 1]} : vector<8x3xf32> to vector<8x1xf32>
    %1199 = vector.extract_strided_slice %1192 {offsets = [1, 0], sizes = [1, 14], strides = [1, 1]} : vector<3x14xf32> to vector<1x14xf32>
    %1200 = vector.broadcast %1198 : vector<8x1xf32> to vector<8x14xf32>
    %1201 = vector.broadcast %1199 : vector<1x14xf32> to vector<8x14xf32>
    %1202 = arith.mulf %1200, %1201 : vector<8x14xf32>
    %1203 = arith.addf %1197, %1202 : vector<8x14xf32>
    %1204 = vector.extract_strided_slice %1190 {offsets = [0, 2], sizes = [8, 1], strides = [1, 1]} : vector<8x3xf32> to vector<8x1xf32>
    %1205 = vector.extract_strided_slice %1192 {offsets = [2, 0], sizes = [1, 14], strides = [1, 1]} : vector<3x14xf32> to vector<1x14xf32>
    %1206 = vector.broadcast %1204 : vector<8x1xf32> to vector<8x14xf32>
    %1207 = vector.broadcast %1205 : vector<1x14xf32> to vector<8x14xf32>
    %1208 = arith.mulf %1206, %1207 : vector<8x14xf32>
    %1209 = arith.addf %1203, %1208 : vector<8x14xf32>
    %1210 = arith.addf %1188, %1209 : vector<8x14xf32>
    %1211 = vector.extract_strided_slice %0 {offsets = [4, 0, 0], sizes = [1, 8, 3], strides = [1, 1, 1]} : vector<15x8x3xf32> to vector<1x8x3xf32>
    %1212 = vector.shape_cast %1211 : vector<1x8x3xf32> to vector<8x3xf32>
    %1213 = vector.extract_strided_slice %1121 {offsets = [0, 0, 1], sizes = [1, 3, 14], strides = [1, 1, 1]} : vector<4x3x18xf32> to vector<1x3x14xf32>
    %1214 = vector.shape_cast %1213 : vector<1x3x14xf32> to vector<3x14xf32>
    %1215 = vector.extract_strided_slice %1212 {offsets = [0, 0], sizes = [8, 1], strides = [1, 1]} : vector<8x3xf32> to vector<8x1xf32>
    %1216 = vector.extract_strided_slice %1214 {offsets = [0, 0], sizes = [1, 14], strides = [1, 1]} : vector<3x14xf32> to vector<1x14xf32>
    %1217 = vector.broadcast %1215 : vector<8x1xf32> to vector<8x14xf32>
    %1218 = vector.broadcast %1216 : vector<1x14xf32> to vector<8x14xf32>
    %1219 = arith.mulf %1217, %1218 : vector<8x14xf32>
    %1220 = vector.extract_strided_slice %1212 {offsets = [0, 1], sizes = [8, 1], strides = [1, 1]} : vector<8x3xf32> to vector<8x1xf32>
    %1221 = vector.extract_strided_slice %1214 {offsets = [1, 0], sizes = [1, 14], strides = [1, 1]} : vector<3x14xf32> to vector<1x14xf32>
    %1222 = vector.broadcast %1220 : vector<8x1xf32> to vector<8x14xf32>
    %1223 = vector.broadcast %1221 : vector<1x14xf32> to vector<8x14xf32>
    %1224 = arith.mulf %1222, %1223 : vector<8x14xf32>
    %1225 = arith.addf %1219, %1224 : vector<8x14xf32>
    %1226 = vector.extract_strided_slice %1212 {offsets = [0, 2], sizes = [8, 1], strides = [1, 1]} : vector<8x3xf32> to vector<8x1xf32>
    %1227 = vector.extract_strided_slice %1214 {offsets = [2, 0], sizes = [1, 14], strides = [1, 1]} : vector<3x14xf32> to vector<1x14xf32>
    %1228 = vector.broadcast %1226 : vector<8x1xf32> to vector<8x14xf32>
    %1229 = vector.broadcast %1227 : vector<1x14xf32> to vector<8x14xf32>
    %1230 = arith.mulf %1228, %1229 : vector<8x14xf32>
    %1231 = arith.addf %1225, %1230 : vector<8x14xf32>
    %1232 = arith.addf %1210, %1231 : vector<8x14xf32>
    %1233 = vector.extract_strided_slice %0 {offsets = [5, 0, 0], sizes = [1, 8, 3], strides = [1, 1, 1]} : vector<15x8x3xf32> to vector<1x8x3xf32>
    %1234 = vector.shape_cast %1233 : vector<1x8x3xf32> to vector<8x3xf32>
    %1235 = vector.extract_strided_slice %1121 {offsets = [1, 0, 1], sizes = [1, 3, 14], strides = [1, 1, 1]} : vector<4x3x18xf32> to vector<1x3x14xf32>
    %1236 = vector.shape_cast %1235 : vector<1x3x14xf32> to vector<3x14xf32>
    %1237 = vector.extract_strided_slice %1234 {offsets = [0, 0], sizes = [8, 1], strides = [1, 1]} : vector<8x3xf32> to vector<8x1xf32>
    %1238 = vector.extract_strided_slice %1236 {offsets = [0, 0], sizes = [1, 14], strides = [1, 1]} : vector<3x14xf32> to vector<1x14xf32>
    %1239 = vector.broadcast %1237 : vector<8x1xf32> to vector<8x14xf32>
    %1240 = vector.broadcast %1238 : vector<1x14xf32> to vector<8x14xf32>
    %1241 = arith.mulf %1239, %1240 : vector<8x14xf32>
    %1242 = vector.extract_strided_slice %1234 {offsets = [0, 1], sizes = [8, 1], strides = [1, 1]} : vector<8x3xf32> to vector<8x1xf32>
    %1243 = vector.extract_strided_slice %1236 {offsets = [1, 0], sizes = [1, 14], strides = [1, 1]} : vector<3x14xf32> to vector<1x14xf32>
    %1244 = vector.broadcast %1242 : vector<8x1xf32> to vector<8x14xf32>
    %1245 = vector.broadcast %1243 : vector<1x14xf32> to vector<8x14xf32>
    %1246 = arith.mulf %1244, %1245 : vector<8x14xf32>
    %1247 = arith.addf %1241, %1246 : vector<8x14xf32>
    %1248 = vector.extract_strided_slice %1234 {offsets = [0, 2], sizes = [8, 1], strides = [1, 1]} : vector<8x3xf32> to vector<8x1xf32>
    %1249 = vector.extract_strided_slice %1236 {offsets = [2, 0], sizes = [1, 14], strides = [1, 1]} : vector<3x14xf32> to vector<1x14xf32>
    %1250 = vector.broadcast %1248 : vector<8x1xf32> to vector<8x14xf32>
    %1251 = vector.broadcast %1249 : vector<1x14xf32> to vector<8x14xf32>
    %1252 = arith.mulf %1250, %1251 : vector<8x14xf32>
    %1253 = arith.addf %1247, %1252 : vector<8x14xf32>
    %1254 = arith.addf %1232, %1253 : vector<8x14xf32>
    %1255 = vector.extract_strided_slice %0 {offsets = [6, 0, 0], sizes = [1, 8, 3], strides = [1, 1, 1]} : vector<15x8x3xf32> to vector<1x8x3xf32>
    %1256 = vector.shape_cast %1255 : vector<1x8x3xf32> to vector<8x3xf32>
    %1257 = vector.extract_strided_slice %1121 {offsets = [2, 0, 1], sizes = [1, 3, 14], strides = [1, 1, 1]} : vector<4x3x18xf32> to vector<1x3x14xf32>
    %1258 = vector.shape_cast %1257 : vector<1x3x14xf32> to vector<3x14xf32>
    %1259 = vector.extract_strided_slice %1256 {offsets = [0, 0], sizes = [8, 1], strides = [1, 1]} : vector<8x3xf32> to vector<8x1xf32>
    %1260 = vector.extract_strided_slice %1258 {offsets = [0, 0], sizes = [1, 14], strides = [1, 1]} : vector<3x14xf32> to vector<1x14xf32>
    %1261 = vector.broadcast %1259 : vector<8x1xf32> to vector<8x14xf32>
    %1262 = vector.broadcast %1260 : vector<1x14xf32> to vector<8x14xf32>
    %1263 = arith.mulf %1261, %1262 : vector<8x14xf32>
    %1264 = vector.extract_strided_slice %1256 {offsets = [0, 1], sizes = [8, 1], strides = [1, 1]} : vector<8x3xf32> to vector<8x1xf32>
    %1265 = vector.extract_strided_slice %1258 {offsets = [1, 0], sizes = [1, 14], strides = [1, 1]} : vector<3x14xf32> to vector<1x14xf32>
    %1266 = vector.broadcast %1264 : vector<8x1xf32> to vector<8x14xf32>
    %1267 = vector.broadcast %1265 : vector<1x14xf32> to vector<8x14xf32>
    %1268 = arith.mulf %1266, %1267 : vector<8x14xf32>
    %1269 = arith.addf %1263, %1268 : vector<8x14xf32>
    %1270 = vector.extract_strided_slice %1256 {offsets = [0, 2], sizes = [8, 1], strides = [1, 1]} : vector<8x3xf32> to vector<8x1xf32>
    %1271 = vector.extract_strided_slice %1258 {offsets = [2, 0], sizes = [1, 14], strides = [1, 1]} : vector<3x14xf32> to vector<1x14xf32>
    %1272 = vector.broadcast %1270 : vector<8x1xf32> to vector<8x14xf32>
    %1273 = vector.broadcast %1271 : vector<1x14xf32> to vector<8x14xf32>
    %1274 = arith.mulf %1272, %1273 : vector<8x14xf32>
    %1275 = arith.addf %1269, %1274 : vector<8x14xf32>
    %1276 = arith.addf %1254, %1275 : vector<8x14xf32>
    %1277 = vector.extract_strided_slice %0 {offsets = [7, 0, 0], sizes = [1, 8, 3], strides = [1, 1, 1]} : vector<15x8x3xf32> to vector<1x8x3xf32>
    %1278 = vector.shape_cast %1277 : vector<1x8x3xf32> to vector<8x3xf32>
    %1279 = vector.extract_strided_slice %1121 {offsets = [3, 0, 1], sizes = [1, 3, 14], strides = [1, 1, 1]} : vector<4x3x18xf32> to vector<1x3x14xf32>
    %1280 = vector.shape_cast %1279 : vector<1x3x14xf32> to vector<3x14xf32>
    %1281 = vector.extract_strided_slice %1278 {offsets = [0, 0], sizes = [8, 1], strides = [1, 1]} : vector<8x3xf32> to vector<8x1xf32>
    %1282 = vector.extract_strided_slice %1280 {offsets = [0, 0], sizes = [1, 14], strides = [1, 1]} : vector<3x14xf32> to vector<1x14xf32>
    %1283 = vector.broadcast %1281 : vector<8x1xf32> to vector<8x14xf32>
    %1284 = vector.broadcast %1282 : vector<1x14xf32> to vector<8x14xf32>
    %1285 = arith.mulf %1283, %1284 : vector<8x14xf32>
    %1286 = vector.extract_strided_slice %1278 {offsets = [0, 1], sizes = [8, 1], strides = [1, 1]} : vector<8x3xf32> to vector<8x1xf32>
    %1287 = vector.extract_strided_slice %1280 {offsets = [1, 0], sizes = [1, 14], strides = [1, 1]} : vector<3x14xf32> to vector<1x14xf32>
    %1288 = vector.broadcast %1286 : vector<8x1xf32> to vector<8x14xf32>
    %1289 = vector.broadcast %1287 : vector<1x14xf32> to vector<8x14xf32>
    %1290 = arith.mulf %1288, %1289 : vector<8x14xf32>
    %1291 = arith.addf %1285, %1290 : vector<8x14xf32>
    %1292 = vector.extract_strided_slice %1278 {offsets = [0, 2], sizes = [8, 1], strides = [1, 1]} : vector<8x3xf32> to vector<8x1xf32>
    %1293 = vector.extract_strided_slice %1280 {offsets = [2, 0], sizes = [1, 14], strides = [1, 1]} : vector<3x14xf32> to vector<1x14xf32>
    %1294 = vector.broadcast %1292 : vector<8x1xf32> to vector<8x14xf32>
    %1295 = vector.broadcast %1293 : vector<1x14xf32> to vector<8x14xf32>
    %1296 = arith.mulf %1294, %1295 : vector<8x14xf32>
    %1297 = arith.addf %1291, %1296 : vector<8x14xf32>
    %1298 = arith.addf %1276, %1297 : vector<8x14xf32>
    %1299 = vector.extract_strided_slice %0 {offsets = [8, 0, 0], sizes = [1, 8, 3], strides = [1, 1, 1]} : vector<15x8x3xf32> to vector<1x8x3xf32>
    %1300 = vector.shape_cast %1299 : vector<1x8x3xf32> to vector<8x3xf32>
    %1301 = vector.extract_strided_slice %1121 {offsets = [0, 0, 2], sizes = [1, 3, 14], strides = [1, 1, 1]} : vector<4x3x18xf32> to vector<1x3x14xf32>
    %1302 = vector.shape_cast %1301 : vector<1x3x14xf32> to vector<3x14xf32>
    %1303 = vector.extract_strided_slice %1300 {offsets = [0, 0], sizes = [8, 1], strides = [1, 1]} : vector<8x3xf32> to vector<8x1xf32>
    %1304 = vector.extract_strided_slice %1302 {offsets = [0, 0], sizes = [1, 14], strides = [1, 1]} : vector<3x14xf32> to vector<1x14xf32>
    %1305 = vector.broadcast %1303 : vector<8x1xf32> to vector<8x14xf32>
    %1306 = vector.broadcast %1304 : vector<1x14xf32> to vector<8x14xf32>
    %1307 = arith.mulf %1305, %1306 : vector<8x14xf32>
    %1308 = vector.extract_strided_slice %1300 {offsets = [0, 1], sizes = [8, 1], strides = [1, 1]} : vector<8x3xf32> to vector<8x1xf32>
    %1309 = vector.extract_strided_slice %1302 {offsets = [1, 0], sizes = [1, 14], strides = [1, 1]} : vector<3x14xf32> to vector<1x14xf32>
    %1310 = vector.broadcast %1308 : vector<8x1xf32> to vector<8x14xf32>
    %1311 = vector.broadcast %1309 : vector<1x14xf32> to vector<8x14xf32>
    %1312 = arith.mulf %1310, %1311 : vector<8x14xf32>
    %1313 = arith.addf %1307, %1312 : vector<8x14xf32>
    %1314 = vector.extract_strided_slice %1300 {offsets = [0, 2], sizes = [8, 1], strides = [1, 1]} : vector<8x3xf32> to vector<8x1xf32>
    %1315 = vector.extract_strided_slice %1302 {offsets = [2, 0], sizes = [1, 14], strides = [1, 1]} : vector<3x14xf32> to vector<1x14xf32>
    %1316 = vector.broadcast %1314 : vector<8x1xf32> to vector<8x14xf32>
    %1317 = vector.broadcast %1315 : vector<1x14xf32> to vector<8x14xf32>
    %1318 = arith.mulf %1316, %1317 : vector<8x14xf32>
    %1319 = arith.addf %1313, %1318 : vector<8x14xf32>
    %1320 = arith.addf %1298, %1319 : vector<8x14xf32>
    %1321 = vector.extract_strided_slice %0 {offsets = [9, 0, 0], sizes = [1, 8, 3], strides = [1, 1, 1]} : vector<15x8x3xf32> to vector<1x8x3xf32>
    %1322 = vector.shape_cast %1321 : vector<1x8x3xf32> to vector<8x3xf32>
    %1323 = vector.extract_strided_slice %1121 {offsets = [1, 0, 2], sizes = [1, 3, 14], strides = [1, 1, 1]} : vector<4x3x18xf32> to vector<1x3x14xf32>
    %1324 = vector.shape_cast %1323 : vector<1x3x14xf32> to vector<3x14xf32>
    %1325 = vector.extract_strided_slice %1322 {offsets = [0, 0], sizes = [8, 1], strides = [1, 1]} : vector<8x3xf32> to vector<8x1xf32>
    %1326 = vector.extract_strided_slice %1324 {offsets = [0, 0], sizes = [1, 14], strides = [1, 1]} : vector<3x14xf32> to vector<1x14xf32>
    %1327 = vector.broadcast %1325 : vector<8x1xf32> to vector<8x14xf32>
    %1328 = vector.broadcast %1326 : vector<1x14xf32> to vector<8x14xf32>
    %1329 = arith.mulf %1327, %1328 : vector<8x14xf32>
    %1330 = vector.extract_strided_slice %1322 {offsets = [0, 1], sizes = [8, 1], strides = [1, 1]} : vector<8x3xf32> to vector<8x1xf32>
    %1331 = vector.extract_strided_slice %1324 {offsets = [1, 0], sizes = [1, 14], strides = [1, 1]} : vector<3x14xf32> to vector<1x14xf32>
    %1332 = vector.broadcast %1330 : vector<8x1xf32> to vector<8x14xf32>
    %1333 = vector.broadcast %1331 : vector<1x14xf32> to vector<8x14xf32>
    %1334 = arith.mulf %1332, %1333 : vector<8x14xf32>
    %1335 = arith.addf %1329, %1334 : vector<8x14xf32>
    %1336 = vector.extract_strided_slice %1322 {offsets = [0, 2], sizes = [8, 1], strides = [1, 1]} : vector<8x3xf32> to vector<8x1xf32>
    %1337 = vector.extract_strided_slice %1324 {offsets = [2, 0], sizes = [1, 14], strides = [1, 1]} : vector<3x14xf32> to vector<1x14xf32>
    %1338 = vector.broadcast %1336 : vector<8x1xf32> to vector<8x14xf32>
    %1339 = vector.broadcast %1337 : vector<1x14xf32> to vector<8x14xf32>
    %1340 = arith.mulf %1338, %1339 : vector<8x14xf32>
    %1341 = arith.addf %1335, %1340 : vector<8x14xf32>
    %1342 = arith.addf %1320, %1341 : vector<8x14xf32>
    %1343 = vector.extract_strided_slice %0 {offsets = [10, 0, 0], sizes = [1, 8, 3], strides = [1, 1, 1]} : vector<15x8x3xf32> to vector<1x8x3xf32>
    %1344 = vector.shape_cast %1343 : vector<1x8x3xf32> to vector<8x3xf32>
    %1345 = vector.extract_strided_slice %1121 {offsets = [2, 0, 2], sizes = [1, 3, 14], strides = [1, 1, 1]} : vector<4x3x18xf32> to vector<1x3x14xf32>
    %1346 = vector.shape_cast %1345 : vector<1x3x14xf32> to vector<3x14xf32>
    %1347 = vector.extract_strided_slice %1344 {offsets = [0, 0], sizes = [8, 1], strides = [1, 1]} : vector<8x3xf32> to vector<8x1xf32>
    %1348 = vector.extract_strided_slice %1346 {offsets = [0, 0], sizes = [1, 14], strides = [1, 1]} : vector<3x14xf32> to vector<1x14xf32>
    %1349 = vector.broadcast %1347 : vector<8x1xf32> to vector<8x14xf32>
    %1350 = vector.broadcast %1348 : vector<1x14xf32> to vector<8x14xf32>
    %1351 = arith.mulf %1349, %1350 : vector<8x14xf32>
    %1352 = vector.extract_strided_slice %1344 {offsets = [0, 1], sizes = [8, 1], strides = [1, 1]} : vector<8x3xf32> to vector<8x1xf32>
    %1353 = vector.extract_strided_slice %1346 {offsets = [1, 0], sizes = [1, 14], strides = [1, 1]} : vector<3x14xf32> to vector<1x14xf32>
    %1354 = vector.broadcast %1352 : vector<8x1xf32> to vector<8x14xf32>
    %1355 = vector.broadcast %1353 : vector<1x14xf32> to vector<8x14xf32>
    %1356 = arith.mulf %1354, %1355 : vector<8x14xf32>
    %1357 = arith.addf %1351, %1356 : vector<8x14xf32>
    %1358 = vector.extract_strided_slice %1344 {offsets = [0, 2], sizes = [8, 1], strides = [1, 1]} : vector<8x3xf32> to vector<8x1xf32>
    %1359 = vector.extract_strided_slice %1346 {offsets = [2, 0], sizes = [1, 14], strides = [1, 1]} : vector<3x14xf32> to vector<1x14xf32>
    %1360 = vector.broadcast %1358 : vector<8x1xf32> to vector<8x14xf32>
    %1361 = vector.broadcast %1359 : vector<1x14xf32> to vector<8x14xf32>
    %1362 = arith.mulf %1360, %1361 : vector<8x14xf32>
    %1363 = arith.addf %1357, %1362 : vector<8x14xf32>
    %1364 = arith.addf %1342, %1363 : vector<8x14xf32>
    %1365 = vector.extract_strided_slice %0 {offsets = [11, 0, 0], sizes = [1, 8, 3], strides = [1, 1, 1]} : vector<15x8x3xf32> to vector<1x8x3xf32>
    %1366 = vector.shape_cast %1365 : vector<1x8x3xf32> to vector<8x3xf32>
    %1367 = vector.extract_strided_slice %1121 {offsets = [3, 0, 2], sizes = [1, 3, 14], strides = [1, 1, 1]} : vector<4x3x18xf32> to vector<1x3x14xf32>
    %1368 = vector.shape_cast %1367 : vector<1x3x14xf32> to vector<3x14xf32>
    %1369 = vector.extract_strided_slice %1366 {offsets = [0, 0], sizes = [8, 1], strides = [1, 1]} : vector<8x3xf32> to vector<8x1xf32>
    %1370 = vector.extract_strided_slice %1368 {offsets = [0, 0], sizes = [1, 14], strides = [1, 1]} : vector<3x14xf32> to vector<1x14xf32>
    %1371 = vector.broadcast %1369 : vector<8x1xf32> to vector<8x14xf32>
    %1372 = vector.broadcast %1370 : vector<1x14xf32> to vector<8x14xf32>
    %1373 = arith.mulf %1371, %1372 : vector<8x14xf32>
    %1374 = vector.extract_strided_slice %1366 {offsets = [0, 1], sizes = [8, 1], strides = [1, 1]} : vector<8x3xf32> to vector<8x1xf32>
    %1375 = vector.extract_strided_slice %1368 {offsets = [1, 0], sizes = [1, 14], strides = [1, 1]} : vector<3x14xf32> to vector<1x14xf32>
    %1376 = vector.broadcast %1374 : vector<8x1xf32> to vector<8x14xf32>
    %1377 = vector.broadcast %1375 : vector<1x14xf32> to vector<8x14xf32>
    %1378 = arith.mulf %1376, %1377 : vector<8x14xf32>
    %1379 = arith.addf %1373, %1378 : vector<8x14xf32>
    %1380 = vector.extract_strided_slice %1366 {offsets = [0, 2], sizes = [8, 1], strides = [1, 1]} : vector<8x3xf32> to vector<8x1xf32>
    %1381 = vector.extract_strided_slice %1368 {offsets = [2, 0], sizes = [1, 14], strides = [1, 1]} : vector<3x14xf32> to vector<1x14xf32>
    %1382 = vector.broadcast %1380 : vector<8x1xf32> to vector<8x14xf32>
    %1383 = vector.broadcast %1381 : vector<1x14xf32> to vector<8x14xf32>
    %1384 = arith.mulf %1382, %1383 : vector<8x14xf32>
    %1385 = arith.addf %1379, %1384 : vector<8x14xf32>
    %1386 = arith.addf %1364, %1385 : vector<8x14xf32>
    %1387 = vector.extract_strided_slice %0 {offsets = [12, 0, 0], sizes = [1, 8, 3], strides = [1, 1, 1]} : vector<15x8x3xf32> to vector<1x8x3xf32>
    %1388 = vector.shape_cast %1387 : vector<1x8x3xf32> to vector<8x3xf32>
    %1389 = vector.extract_strided_slice %1121 {offsets = [0, 0, 3], sizes = [1, 3, 14], strides = [1, 1, 1]} : vector<4x3x18xf32> to vector<1x3x14xf32>
    %1390 = vector.shape_cast %1389 : vector<1x3x14xf32> to vector<3x14xf32>
    %1391 = vector.extract_strided_slice %1388 {offsets = [0, 0], sizes = [8, 1], strides = [1, 1]} : vector<8x3xf32> to vector<8x1xf32>
    %1392 = vector.extract_strided_slice %1390 {offsets = [0, 0], sizes = [1, 14], strides = [1, 1]} : vector<3x14xf32> to vector<1x14xf32>
    %1393 = vector.broadcast %1391 : vector<8x1xf32> to vector<8x14xf32>
    %1394 = vector.broadcast %1392 : vector<1x14xf32> to vector<8x14xf32>
    %1395 = arith.mulf %1393, %1394 : vector<8x14xf32>
    %1396 = vector.extract_strided_slice %1388 {offsets = [0, 1], sizes = [8, 1], strides = [1, 1]} : vector<8x3xf32> to vector<8x1xf32>
    %1397 = vector.extract_strided_slice %1390 {offsets = [1, 0], sizes = [1, 14], strides = [1, 1]} : vector<3x14xf32> to vector<1x14xf32>
    %1398 = vector.broadcast %1396 : vector<8x1xf32> to vector<8x14xf32>
    %1399 = vector.broadcast %1397 : vector<1x14xf32> to vector<8x14xf32>
    %1400 = arith.mulf %1398, %1399 : vector<8x14xf32>
    %1401 = arith.addf %1395, %1400 : vector<8x14xf32>
    %1402 = vector.extract_strided_slice %1388 {offsets = [0, 2], sizes = [8, 1], strides = [1, 1]} : vector<8x3xf32> to vector<8x1xf32>
    %1403 = vector.extract_strided_slice %1390 {offsets = [2, 0], sizes = [1, 14], strides = [1, 1]} : vector<3x14xf32> to vector<1x14xf32>
    %1404 = vector.broadcast %1402 : vector<8x1xf32> to vector<8x14xf32>
    %1405 = vector.broadcast %1403 : vector<1x14xf32> to vector<8x14xf32>
    %1406 = arith.mulf %1404, %1405 : vector<8x14xf32>
    %1407 = arith.addf %1401, %1406 : vector<8x14xf32>
    %1408 = arith.addf %1386, %1407 : vector<8x14xf32>
    %1409 = vector.extract_strided_slice %0 {offsets = [13, 0, 0], sizes = [1, 8, 3], strides = [1, 1, 1]} : vector<15x8x3xf32> to vector<1x8x3xf32>
    %1410 = vector.shape_cast %1409 : vector<1x8x3xf32> to vector<8x3xf32>
    %1411 = vector.extract_strided_slice %1121 {offsets = [1, 0, 3], sizes = [1, 3, 14], strides = [1, 1, 1]} : vector<4x3x18xf32> to vector<1x3x14xf32>
    %1412 = vector.shape_cast %1411 : vector<1x3x14xf32> to vector<3x14xf32>
    %1413 = vector.extract_strided_slice %1410 {offsets = [0, 0], sizes = [8, 1], strides = [1, 1]} : vector<8x3xf32> to vector<8x1xf32>
    %1414 = vector.extract_strided_slice %1412 {offsets = [0, 0], sizes = [1, 14], strides = [1, 1]} : vector<3x14xf32> to vector<1x14xf32>
    %1415 = vector.broadcast %1413 : vector<8x1xf32> to vector<8x14xf32>
    %1416 = vector.broadcast %1414 : vector<1x14xf32> to vector<8x14xf32>
    %1417 = arith.mulf %1415, %1416 : vector<8x14xf32>
    %1418 = vector.extract_strided_slice %1410 {offsets = [0, 1], sizes = [8, 1], strides = [1, 1]} : vector<8x3xf32> to vector<8x1xf32>
    %1419 = vector.extract_strided_slice %1412 {offsets = [1, 0], sizes = [1, 14], strides = [1, 1]} : vector<3x14xf32> to vector<1x14xf32>
    %1420 = vector.broadcast %1418 : vector<8x1xf32> to vector<8x14xf32>
    %1421 = vector.broadcast %1419 : vector<1x14xf32> to vector<8x14xf32>
    %1422 = arith.mulf %1420, %1421 : vector<8x14xf32>
    %1423 = arith.addf %1417, %1422 : vector<8x14xf32>
    %1424 = vector.extract_strided_slice %1410 {offsets = [0, 2], sizes = [8, 1], strides = [1, 1]} : vector<8x3xf32> to vector<8x1xf32>
    %1425 = vector.extract_strided_slice %1412 {offsets = [2, 0], sizes = [1, 14], strides = [1, 1]} : vector<3x14xf32> to vector<1x14xf32>
    %1426 = vector.broadcast %1424 : vector<8x1xf32> to vector<8x14xf32>
    %1427 = vector.broadcast %1425 : vector<1x14xf32> to vector<8x14xf32>
    %1428 = arith.mulf %1426, %1427 : vector<8x14xf32>
    %1429 = arith.addf %1423, %1428 : vector<8x14xf32>
    %1430 = arith.addf %1408, %1429 : vector<8x14xf32>
    %1431 = vector.extract_strided_slice %0 {offsets = [14, 0, 0], sizes = [1, 8, 3], strides = [1, 1, 1]} : vector<15x8x3xf32> to vector<1x8x3xf32>
    %1432 = vector.shape_cast %1431 : vector<1x8x3xf32> to vector<8x3xf32>
    %1433 = vector.extract_strided_slice %1121 {offsets = [2, 0, 3], sizes = [1, 3, 14], strides = [1, 1, 1]} : vector<4x3x18xf32> to vector<1x3x14xf32>
    %1434 = vector.shape_cast %1433 : vector<1x3x14xf32> to vector<3x14xf32>
    %1435 = vector.extract_strided_slice %1432 {offsets = [0, 0], sizes = [8, 1], strides = [1, 1]} : vector<8x3xf32> to vector<8x1xf32>
    %1436 = vector.extract_strided_slice %1434 {offsets = [0, 0], sizes = [1, 14], strides = [1, 1]} : vector<3x14xf32> to vector<1x14xf32>
    %1437 = vector.broadcast %1435 : vector<8x1xf32> to vector<8x14xf32>
    %1438 = vector.broadcast %1436 : vector<1x14xf32> to vector<8x14xf32>
    %1439 = arith.mulf %1437, %1438 : vector<8x14xf32>
    %1440 = vector.extract_strided_slice %1432 {offsets = [0, 1], sizes = [8, 1], strides = [1, 1]} : vector<8x3xf32> to vector<8x1xf32>
    %1441 = vector.extract_strided_slice %1434 {offsets = [1, 0], sizes = [1, 14], strides = [1, 1]} : vector<3x14xf32> to vector<1x14xf32>
    %1442 = vector.broadcast %1440 : vector<8x1xf32> to vector<8x14xf32>
    %1443 = vector.broadcast %1441 : vector<1x14xf32> to vector<8x14xf32>
    %1444 = arith.mulf %1442, %1443 : vector<8x14xf32>
    %1445 = arith.addf %1439, %1444 : vector<8x14xf32>
    %1446 = vector.extract_strided_slice %1432 {offsets = [0, 2], sizes = [8, 1], strides = [1, 1]} : vector<8x3xf32> to vector<8x1xf32>
    %1447 = vector.extract_strided_slice %1434 {offsets = [2, 0], sizes = [1, 14], strides = [1, 1]} : vector<3x14xf32> to vector<1x14xf32>
    %1448 = vector.broadcast %1446 : vector<8x1xf32> to vector<8x14xf32>
    %1449 = vector.broadcast %1447 : vector<1x14xf32> to vector<8x14xf32>
    %1450 = arith.mulf %1448, %1449 : vector<8x14xf32>
    %1451 = arith.addf %1445, %1450 : vector<8x14xf32>
    %1452 = arith.addf %1430, %1451 : vector<8x14xf32>
    %1453 = vector.broadcast %1 : vector<8x1xf32> to vector<8x14xf32>
    %1454 = arith.mulf %1452, %1453 : vector<8x14xf32>
    %1455 = vector.broadcast %2 : vector<8x1xf32> to vector<8x14xf32>
    %1456 = arith.addf %1454, %1455 : vector<8x14xf32>
    %cst_222 = arith.constant 5.000000e-01 : f32
    %1457 = vector.broadcast %cst_222 : f32 to vector<8x14xf32>
    %1458 = arith.mulf %1457, %1456 : vector<8x14xf32>
    %cst_223 = arith.constant 4.471500e-02 : f32
    %1459 = vector.broadcast %cst_223 : f32 to vector<8x14xf32>
    %1460 = arith.mulf %1459, %1456 : vector<8x14xf32>
    %1461 = arith.mulf %1460, %1456 : vector<8x14xf32>
    %1462 = arith.mulf %1461, %1456 : vector<8x14xf32>
    %1463 = arith.addf %1456, %1462 : vector<8x14xf32>
    %cst_224 = arith.constant 0.797884583 : f32
    %1464 = vector.broadcast %cst_224 : f32 to vector<8x14xf32>
    %1465 = arith.mulf %1464, %1463 : vector<8x14xf32>
    %1466 = math.tanh %1465 : vector<8x14xf32>
    %cst_225 = arith.constant 1.000000e+00 : f32
    %1467 = vector.broadcast %cst_225 : f32 to vector<8x14xf32>
    %1468 = arith.addf %1467, %1466 : vector<8x14xf32>
    %1469 = arith.mulf %1458, %1468 : vector<8x14xf32>
    %cst_226 = arith.constant dense<0.000000e+00> : vector<8x14xf32>
    %1470 = tpu.matmul %3, %1469, %cst_226 {dimension_numbers = #tpu.dot_dimension_numbers<[1], [0], [0], [1], [0, 0, 1, 1], [], []>} : vector<8x8xf32>, vector<8x14xf32>, vector<8x14xf32> -> vector<8x14xf32>
    %1471 = vector.broadcast %4 : vector<8x1xf32> to vector<8x14xf32>
    %1472 = arith.addf %1470, %1471 : vector<8x14xf32>
    %cst_227 = arith.constant 0.000000e+00 : f32
    %1473 = vector.broadcast %cst_227 : f32 to vector<8x14xf32>
    %1474 = vector.extract_strided_slice %0 {offsets = [0, 0, 0], sizes = [1, 8, 3], strides = [1, 1, 1]} : vector<15x8x3xf32> to vector<1x8x3xf32>
    %1475 = vector.shape_cast %1474 : vector<1x8x3xf32> to vector<8x3xf32>
    %1476 = vector.extract_strided_slice %1121 {offsets = [2, 0, 0], sizes = [1, 3, 14], strides = [1, 1, 1]} : vector<4x3x18xf32> to vector<1x3x14xf32>
    %1477 = vector.shape_cast %1476 : vector<1x3x14xf32> to vector<3x14xf32>
    %1478 = vector.extract_strided_slice %1475 {offsets = [0, 0], sizes = [8, 1], strides = [1, 1]} : vector<8x3xf32> to vector<8x1xf32>
    %1479 = vector.extract_strided_slice %1477 {offsets = [0, 0], sizes = [1, 14], strides = [1, 1]} : vector<3x14xf32> to vector<1x14xf32>
    %1480 = vector.broadcast %1478 : vector<8x1xf32> to vector<8x14xf32>
    %1481 = vector.broadcast %1479 : vector<1x14xf32> to vector<8x14xf32>
    %1482 = arith.mulf %1480, %1481 : vector<8x14xf32>
    %1483 = vector.extract_strided_slice %1475 {offsets = [0, 1], sizes = [8, 1], strides = [1, 1]} : vector<8x3xf32> to vector<8x1xf32>
    %1484 = vector.extract_strided_slice %1477 {offsets = [1, 0], sizes = [1, 14], strides = [1, 1]} : vector<3x14xf32> to vector<1x14xf32>
    %1485 = vector.broadcast %1483 : vector<8x1xf32> to vector<8x14xf32>
    %1486 = vector.broadcast %1484 : vector<1x14xf32> to vector<8x14xf32>
    %1487 = arith.mulf %1485, %1486 : vector<8x14xf32>
    %1488 = arith.addf %1482, %1487 : vector<8x14xf32>
    %1489 = vector.extract_strided_slice %1475 {offsets = [0, 2], sizes = [8, 1], strides = [1, 1]} : vector<8x3xf32> to vector<8x1xf32>
    %1490 = vector.extract_strided_slice %1477 {offsets = [2, 0], sizes = [1, 14], strides = [1, 1]} : vector<3x14xf32> to vector<1x14xf32>
    %1491 = vector.broadcast %1489 : vector<8x1xf32> to vector<8x14xf32>
    %1492 = vector.broadcast %1490 : vector<1x14xf32> to vector<8x14xf32>
    %1493 = arith.mulf %1491, %1492 : vector<8x14xf32>
    %1494 = arith.addf %1488, %1493 : vector<8x14xf32>
    %1495 = arith.addf %1473, %1494 : vector<8x14xf32>
    %1496 = vector.extract_strided_slice %0 {offsets = [1, 0, 0], sizes = [1, 8, 3], strides = [1, 1, 1]} : vector<15x8x3xf32> to vector<1x8x3xf32>
    %1497 = vector.shape_cast %1496 : vector<1x8x3xf32> to vector<8x3xf32>
    %1498 = vector.extract_strided_slice %1121 {offsets = [3, 0, 0], sizes = [1, 3, 14], strides = [1, 1, 1]} : vector<4x3x18xf32> to vector<1x3x14xf32>
    %1499 = vector.shape_cast %1498 : vector<1x3x14xf32> to vector<3x14xf32>
    %1500 = vector.extract_strided_slice %1497 {offsets = [0, 0], sizes = [8, 1], strides = [1, 1]} : vector<8x3xf32> to vector<8x1xf32>
    %1501 = vector.extract_strided_slice %1499 {offsets = [0, 0], sizes = [1, 14], strides = [1, 1]} : vector<3x14xf32> to vector<1x14xf32>
    %1502 = vector.broadcast %1500 : vector<8x1xf32> to vector<8x14xf32>
    %1503 = vector.broadcast %1501 : vector<1x14xf32> to vector<8x14xf32>
    %1504 = arith.mulf %1502, %1503 : vector<8x14xf32>
    %1505 = vector.extract_strided_slice %1497 {offsets = [0, 1], sizes = [8, 1], strides = [1, 1]} : vector<8x3xf32> to vector<8x1xf32>
    %1506 = vector.extract_strided_slice %1499 {offsets = [1, 0], sizes = [1, 14], strides = [1, 1]} : vector<3x14xf32> to vector<1x14xf32>
    %1507 = vector.broadcast %1505 : vector<8x1xf32> to vector<8x14xf32>
    %1508 = vector.broadcast %1506 : vector<1x14xf32> to vector<8x14xf32>
    %1509 = arith.mulf %1507, %1508 : vector<8x14xf32>
    %1510 = arith.addf %1504, %1509 : vector<8x14xf32>
    %1511 = vector.extract_strided_slice %1497 {offsets = [0, 2], sizes = [8, 1], strides = [1, 1]} : vector<8x3xf32> to vector<8x1xf32>
    %1512 = vector.extract_strided_slice %1499 {offsets = [2, 0], sizes = [1, 14], strides = [1, 1]} : vector<3x14xf32> to vector<1x14xf32>
    %1513 = vector.broadcast %1511 : vector<8x1xf32> to vector<8x14xf32>
    %1514 = vector.broadcast %1512 : vector<1x14xf32> to vector<8x14xf32>
    %1515 = arith.mulf %1513, %1514 : vector<8x14xf32>
    %1516 = arith.addf %1510, %1515 : vector<8x14xf32>
    %1517 = arith.addf %1495, %1516 : vector<8x14xf32>
    %1518 = vector.extract_strided_slice %0 {offsets = [2, 0, 0], sizes = [1, 8, 3], strides = [1, 1, 1]} : vector<15x8x3xf32> to vector<1x8x3xf32>
    %1519 = vector.shape_cast %1518 : vector<1x8x3xf32> to vector<8x3xf32>
    %1520 = vector.extract_strided_slice %1121 {offsets = [0, 0, 1], sizes = [1, 3, 14], strides = [1, 1, 1]} : vector<4x3x18xf32> to vector<1x3x14xf32>
    %1521 = vector.shape_cast %1520 : vector<1x3x14xf32> to vector<3x14xf32>
    %1522 = vector.extract_strided_slice %1519 {offsets = [0, 0], sizes = [8, 1], strides = [1, 1]} : vector<8x3xf32> to vector<8x1xf32>
    %1523 = vector.extract_strided_slice %1521 {offsets = [0, 0], sizes = [1, 14], strides = [1, 1]} : vector<3x14xf32> to vector<1x14xf32>
    %1524 = vector.broadcast %1522 : vector<8x1xf32> to vector<8x14xf32>
    %1525 = vector.broadcast %1523 : vector<1x14xf32> to vector<8x14xf32>
    %1526 = arith.mulf %1524, %1525 : vector<8x14xf32>
    %1527 = vector.extract_strided_slice %1519 {offsets = [0, 1], sizes = [8, 1], strides = [1, 1]} : vector<8x3xf32> to vector<8x1xf32>
    %1528 = vector.extract_strided_slice %1521 {offsets = [1, 0], sizes = [1, 14], strides = [1, 1]} : vector<3x14xf32> to vector<1x14xf32>
    %1529 = vector.broadcast %1527 : vector<8x1xf32> to vector<8x14xf32>
    %1530 = vector.broadcast %1528 : vector<1x14xf32> to vector<8x14xf32>
    %1531 = arith.mulf %1529, %1530 : vector<8x14xf32>
    %1532 = arith.addf %1526, %1531 : vector<8x14xf32>
    %1533 = vector.extract_strided_slice %1519 {offsets = [0, 2], sizes = [8, 1], strides = [1, 1]} : vector<8x3xf32> to vector<8x1xf32>
    %1534 = vector.extract_strided_slice %1521 {offsets = [2, 0], sizes = [1, 14], strides = [1, 1]} : vector<3x14xf32> to vector<1x14xf32>
    %1535 = vector.broadcast %1533 : vector<8x1xf32> to vector<8x14xf32>
    %1536 = vector.broadcast %1534 : vector<1x14xf32> to vector<8x14xf32>
    %1537 = arith.mulf %1535, %1536 : vector<8x14xf32>
    %1538 = arith.addf %1532, %1537 : vector<8x14xf32>
    %1539 = arith.addf %1517, %1538 : vector<8x14xf32>
    %1540 = vector.extract_strided_slice %0 {offsets = [3, 0, 0], sizes = [1, 8, 3], strides = [1, 1, 1]} : vector<15x8x3xf32> to vector<1x8x3xf32>
    %1541 = vector.shape_cast %1540 : vector<1x8x3xf32> to vector<8x3xf32>
    %1542 = vector.extract_strided_slice %1121 {offsets = [1, 0, 1], sizes = [1, 3, 14], strides = [1, 1, 1]} : vector<4x3x18xf32> to vector<1x3x14xf32>
    %1543 = vector.shape_cast %1542 : vector<1x3x14xf32> to vector<3x14xf32>
    %1544 = vector.extract_strided_slice %1541 {offsets = [0, 0], sizes = [8, 1], strides = [1, 1]} : vector<8x3xf32> to vector<8x1xf32>
    %1545 = vector.extract_strided_slice %1543 {offsets = [0, 0], sizes = [1, 14], strides = [1, 1]} : vector<3x14xf32> to vector<1x14xf32>
    %1546 = vector.broadcast %1544 : vector<8x1xf32> to vector<8x14xf32>
    %1547 = vector.broadcast %1545 : vector<1x14xf32> to vector<8x14xf32>
    %1548 = arith.mulf %1546, %1547 : vector<8x14xf32>
    %1549 = vector.extract_strided_slice %1541 {offsets = [0, 1], sizes = [8, 1], strides = [1, 1]} : vector<8x3xf32> to vector<8x1xf32>
    %1550 = vector.extract_strided_slice %1543 {offsets = [1, 0], sizes = [1, 14], strides = [1, 1]} : vector<3x14xf32> to vector<1x14xf32>
    %1551 = vector.broadcast %1549 : vector<8x1xf32> to vector<8x14xf32>
    %1552 = vector.broadcast %1550 : vector<1x14xf32> to vector<8x14xf32>
    %1553 = arith.mulf %1551, %1552 : vector<8x14xf32>
    %1554 = arith.addf %1548, %1553 : vector<8x14xf32>
    %1555 = vector.extract_strided_slice %1541 {offsets = [0, 2], sizes = [8, 1], strides = [1, 1]} : vector<8x3xf32> to vector<8x1xf32>
    %1556 = vector.extract_strided_slice %1543 {offsets = [2, 0], sizes = [1, 14], strides = [1, 1]} : vector<3x14xf32> to vector<1x14xf32>
    %1557 = vector.broadcast %1555 : vector<8x1xf32> to vector<8x14xf32>
    %1558 = vector.broadcast %1556 : vector<1x14xf32> to vector<8x14xf32>
    %1559 = arith.mulf %1557, %1558 : vector<8x14xf32>
    %1560 = arith.addf %1554, %1559 : vector<8x14xf32>
    %1561 = arith.addf %1539, %1560 : vector<8x14xf32>
    %1562 = vector.extract_strided_slice %0 {offsets = [4, 0, 0], sizes = [1, 8, 3], strides = [1, 1, 1]} : vector<15x8x3xf32> to vector<1x8x3xf32>
    %1563 = vector.shape_cast %1562 : vector<1x8x3xf32> to vector<8x3xf32>
    %1564 = vector.extract_strided_slice %1121 {offsets = [2, 0, 1], sizes = [1, 3, 14], strides = [1, 1, 1]} : vector<4x3x18xf32> to vector<1x3x14xf32>
    %1565 = vector.shape_cast %1564 : vector<1x3x14xf32> to vector<3x14xf32>
    %1566 = vector.extract_strided_slice %1563 {offsets = [0, 0], sizes = [8, 1], strides = [1, 1]} : vector<8x3xf32> to vector<8x1xf32>
    %1567 = vector.extract_strided_slice %1565 {offsets = [0, 0], sizes = [1, 14], strides = [1, 1]} : vector<3x14xf32> to vector<1x14xf32>
    %1568 = vector.broadcast %1566 : vector<8x1xf32> to vector<8x14xf32>
    %1569 = vector.broadcast %1567 : vector<1x14xf32> to vector<8x14xf32>
    %1570 = arith.mulf %1568, %1569 : vector<8x14xf32>
    %1571 = vector.extract_strided_slice %1563 {offsets = [0, 1], sizes = [8, 1], strides = [1, 1]} : vector<8x3xf32> to vector<8x1xf32>
    %1572 = vector.extract_strided_slice %1565 {offsets = [1, 0], sizes = [1, 14], strides = [1, 1]} : vector<3x14xf32> to vector<1x14xf32>
    %1573 = vector.broadcast %1571 : vector<8x1xf32> to vector<8x14xf32>
    %1574 = vector.broadcast %1572 : vector<1x14xf32> to vector<8x14xf32>
    %1575 = arith.mulf %1573, %1574 : vector<8x14xf32>
    %1576 = arith.addf %1570, %1575 : vector<8x14xf32>
    %1577 = vector.extract_strided_slice %1563 {offsets = [0, 2], sizes = [8, 1], strides = [1, 1]} : vector<8x3xf32> to vector<8x1xf32>
    %1578 = vector.extract_strided_slice %1565 {offsets = [2, 0], sizes = [1, 14], strides = [1, 1]} : vector<3x14xf32> to vector<1x14xf32>
    %1579 = vector.broadcast %1577 : vector<8x1xf32> to vector<8x14xf32>
    %1580 = vector.broadcast %1578 : vector<1x14xf32> to vector<8x14xf32>
    %1581 = arith.mulf %1579, %1580 : vector<8x14xf32>
    %1582 = arith.addf %1576, %1581 : vector<8x14xf32>
    %1583 = arith.addf %1561, %1582 : vector<8x14xf32>
    %1584 = vector.extract_strided_slice %0 {offsets = [5, 0, 0], sizes = [1, 8, 3], strides = [1, 1, 1]} : vector<15x8x3xf32> to vector<1x8x3xf32>
    %1585 = vector.shape_cast %1584 : vector<1x8x3xf32> to vector<8x3xf32>
    %1586 = vector.extract_strided_slice %1121 {offsets = [3, 0, 1], sizes = [1, 3, 14], strides = [1, 1, 1]} : vector<4x3x18xf32> to vector<1x3x14xf32>
    %1587 = vector.shape_cast %1586 : vector<1x3x14xf32> to vector<3x14xf32>
    %1588 = vector.extract_strided_slice %1585 {offsets = [0, 0], sizes = [8, 1], strides = [1, 1]} : vector<8x3xf32> to vector<8x1xf32>
    %1589 = vector.extract_strided_slice %1587 {offsets = [0, 0], sizes = [1, 14], strides = [1, 1]} : vector<3x14xf32> to vector<1x14xf32>
    %1590 = vector.broadcast %1588 : vector<8x1xf32> to vector<8x14xf32>
    %1591 = vector.broadcast %1589 : vector<1x14xf32> to vector<8x14xf32>
    %1592 = arith.mulf %1590, %1591 : vector<8x14xf32>
    %1593 = vector.extract_strided_slice %1585 {offsets = [0, 1], sizes = [8, 1], strides = [1, 1]} : vector<8x3xf32> to vector<8x1xf32>
    %1594 = vector.extract_strided_slice %1587 {offsets = [1, 0], sizes = [1, 14], strides = [1, 1]} : vector<3x14xf32> to vector<1x14xf32>
    %1595 = vector.broadcast %1593 : vector<8x1xf32> to vector<8x14xf32>
    %1596 = vector.broadcast %1594 : vector<1x14xf32> to vector<8x14xf32>
    %1597 = arith.mulf %1595, %1596 : vector<8x14xf32>
    %1598 = arith.addf %1592, %1597 : vector<8x14xf32>
    %1599 = vector.extract_strided_slice %1585 {offsets = [0, 2], sizes = [8, 1], strides = [1, 1]} : vector<8x3xf32> to vector<8x1xf32>
    %1600 = vector.extract_strided_slice %1587 {offsets = [2, 0], sizes = [1, 14], strides = [1, 1]} : vector<3x14xf32> to vector<1x14xf32>
    %1601 = vector.broadcast %1599 : vector<8x1xf32> to vector<8x14xf32>
    %1602 = vector.broadcast %1600 : vector<1x14xf32> to vector<8x14xf32>
    %1603 = arith.mulf %1601, %1602 : vector<8x14xf32>
    %1604 = arith.addf %1598, %1603 : vector<8x14xf32>
    %1605 = arith.addf %1583, %1604 : vector<8x14xf32>
    %1606 = vector.extract_strided_slice %0 {offsets = [6, 0, 0], sizes = [1, 8, 3], strides = [1, 1, 1]} : vector<15x8x3xf32> to vector<1x8x3xf32>
    %1607 = vector.shape_cast %1606 : vector<1x8x3xf32> to vector<8x3xf32>
    %1608 = vector.extract_strided_slice %1121 {offsets = [0, 0, 2], sizes = [1, 3, 14], strides = [1, 1, 1]} : vector<4x3x18xf32> to vector<1x3x14xf32>
    %1609 = vector.shape_cast %1608 : vector<1x3x14xf32> to vector<3x14xf32>
    %1610 = vector.extract_strided_slice %1607 {offsets = [0, 0], sizes = [8, 1], strides = [1, 1]} : vector<8x3xf32> to vector<8x1xf32>
    %1611 = vector.extract_strided_slice %1609 {offsets = [0, 0], sizes = [1, 14], strides = [1, 1]} : vector<3x14xf32> to vector<1x14xf32>
    %1612 = vector.broadcast %1610 : vector<8x1xf32> to vector<8x14xf32>
    %1613 = vector.broadcast %1611 : vector<1x14xf32> to vector<8x14xf32>
    %1614 = arith.mulf %1612, %1613 : vector<8x14xf32>
    %1615 = vector.extract_strided_slice %1607 {offsets = [0, 1], sizes = [8, 1], strides = [1, 1]} : vector<8x3xf32> to vector<8x1xf32>
    %1616 = vector.extract_strided_slice %1609 {offsets = [1, 0], sizes = [1, 14], strides = [1, 1]} : vector<3x14xf32> to vector<1x14xf32>
    %1617 = vector.broadcast %1615 : vector<8x1xf32> to vector<8x14xf32>
    %1618 = vector.broadcast %1616 : vector<1x14xf32> to vector<8x14xf32>
    %1619 = arith.mulf %1617, %1618 : vector<8x14xf32>
    %1620 = arith.addf %1614, %1619 : vector<8x14xf32>
    %1621 = vector.extract_strided_slice %1607 {offsets = [0, 2], sizes = [8, 1], strides = [1, 1]} : vector<8x3xf32> to vector<8x1xf32>
    %1622 = vector.extract_strided_slice %1609 {offsets = [2, 0], sizes = [1, 14], strides = [1, 1]} : vector<3x14xf32> to vector<1x14xf32>
    %1623 = vector.broadcast %1621 : vector<8x1xf32> to vector<8x14xf32>
    %1624 = vector.broadcast %1622 : vector<1x14xf32> to vector<8x14xf32>
    %1625 = arith.mulf %1623, %1624 : vector<8x14xf32>
    %1626 = arith.addf %1620, %1625 : vector<8x14xf32>
    %1627 = arith.addf %1605, %1626 : vector<8x14xf32>
    %1628 = vector.extract_strided_slice %0 {offsets = [7, 0, 0], sizes = [1, 8, 3], strides = [1, 1, 1]} : vector<15x8x3xf32> to vector<1x8x3xf32>
    %1629 = vector.shape_cast %1628 : vector<1x8x3xf32> to vector<8x3xf32>
    %1630 = vector.extract_strided_slice %1121 {offsets = [1, 0, 2], sizes = [1, 3, 14], strides = [1, 1, 1]} : vector<4x3x18xf32> to vector<1x3x14xf32>
    %1631 = vector.shape_cast %1630 : vector<1x3x14xf32> to vector<3x14xf32>
    %1632 = vector.extract_strided_slice %1629 {offsets = [0, 0], sizes = [8, 1], strides = [1, 1]} : vector<8x3xf32> to vector<8x1xf32>
    %1633 = vector.extract_strided_slice %1631 {offsets = [0, 0], sizes = [1, 14], strides = [1, 1]} : vector<3x14xf32> to vector<1x14xf32>
    %1634 = vector.broadcast %1632 : vector<8x1xf32> to vector<8x14xf32>
    %1635 = vector.broadcast %1633 : vector<1x14xf32> to vector<8x14xf32>
    %1636 = arith.mulf %1634, %1635 : vector<8x14xf32>
    %1637 = vector.extract_strided_slice %1629 {offsets = [0, 1], sizes = [8, 1], strides = [1, 1]} : vector<8x3xf32> to vector<8x1xf32>
    %1638 = vector.extract_strided_slice %1631 {offsets = [1, 0], sizes = [1, 14], strides = [1, 1]} : vector<3x14xf32> to vector<1x14xf32>
    %1639 = vector.broadcast %1637 : vector<8x1xf32> to vector<8x14xf32>
    %1640 = vector.broadcast %1638 : vector<1x14xf32> to vector<8x14xf32>
    %1641 = arith.mulf %1639, %1640 : vector<8x14xf32>
    %1642 = arith.addf %1636, %1641 : vector<8x14xf32>
    %1643 = vector.extract_strided_slice %1629 {offsets = [0, 2], sizes = [8, 1], strides = [1, 1]} : vector<8x3xf32> to vector<8x1xf32>
    %1644 = vector.extract_strided_slice %1631 {offsets = [2, 0], sizes = [1, 14], strides = [1, 1]} : vector<3x14xf32> to vector<1x14xf32>
    %1645 = vector.broadcast %1643 : vector<8x1xf32> to vector<8x14xf32>
    %1646 = vector.broadcast %1644 : vector<1x14xf32> to vector<8x14xf32>
    %1647 = arith.mulf %1645, %1646 : vector<8x14xf32>
    %1648 = arith.addf %1642, %1647 : vector<8x14xf32>
    %1649 = arith.addf %1627, %1648 : vector<8x14xf32>
    %1650 = vector.extract_strided_slice %0 {offsets = [8, 0, 0], sizes = [1, 8, 3], strides = [1, 1, 1]} : vector<15x8x3xf32> to vector<1x8x3xf32>
    %1651 = vector.shape_cast %1650 : vector<1x8x3xf32> to vector<8x3xf32>
    %1652 = vector.extract_strided_slice %1121 {offsets = [2, 0, 2], sizes = [1, 3, 14], strides = [1, 1, 1]} : vector<4x3x18xf32> to vector<1x3x14xf32>
    %1653 = vector.shape_cast %1652 : vector<1x3x14xf32> to vector<3x14xf32>
    %1654 = vector.extract_strided_slice %1651 {offsets = [0, 0], sizes = [8, 1], strides = [1, 1]} : vector<8x3xf32> to vector<8x1xf32>
    %1655 = vector.extract_strided_slice %1653 {offsets = [0, 0], sizes = [1, 14], strides = [1, 1]} : vector<3x14xf32> to vector<1x14xf32>
    %1656 = vector.broadcast %1654 : vector<8x1xf32> to vector<8x14xf32>
    %1657 = vector.broadcast %1655 : vector<1x14xf32> to vector<8x14xf32>
    %1658 = arith.mulf %1656, %1657 : vector<8x14xf32>
    %1659 = vector.extract_strided_slice %1651 {offsets = [0, 1], sizes = [8, 1], strides = [1, 1]} : vector<8x3xf32> to vector<8x1xf32>
    %1660 = vector.extract_strided_slice %1653 {offsets = [1, 0], sizes = [1, 14], strides = [1, 1]} : vector<3x14xf32> to vector<1x14xf32>
    %1661 = vector.broadcast %1659 : vector<8x1xf32> to vector<8x14xf32>
    %1662 = vector.broadcast %1660 : vector<1x14xf32> to vector<8x14xf32>
    %1663 = arith.mulf %1661, %1662 : vector<8x14xf32>
    %1664 = arith.addf %1658, %1663 : vector<8x14xf32>
    %1665 = vector.extract_strided_slice %1651 {offsets = [0, 2], sizes = [8, 1], strides = [1, 1]} : vector<8x3xf32> to vector<8x1xf32>
    %1666 = vector.extract_strided_slice %1653 {offsets = [2, 0], sizes = [1, 14], strides = [1, 1]} : vector<3x14xf32> to vector<1x14xf32>
    %1667 = vector.broadcast %1665 : vector<8x1xf32> to vector<8x14xf32>
    %1668 = vector.broadcast %1666 : vector<1x14xf32> to vector<8x14xf32>
    %1669 = arith.mulf %1667, %1668 : vector<8x14xf32>
    %1670 = arith.addf %1664, %1669 : vector<8x14xf32>
    %1671 = arith.addf %1649, %1670 : vector<8x14xf32>
    %1672 = vector.extract_strided_slice %0 {offsets = [9, 0, 0], sizes = [1, 8, 3], strides = [1, 1, 1]} : vector<15x8x3xf32> to vector<1x8x3xf32>
    %1673 = vector.shape_cast %1672 : vector<1x8x3xf32> to vector<8x3xf32>
    %1674 = vector.extract_strided_slice %1121 {offsets = [3, 0, 2], sizes = [1, 3, 14], strides = [1, 1, 1]} : vector<4x3x18xf32> to vector<1x3x14xf32>
    %1675 = vector.shape_cast %1674 : vector<1x3x14xf32> to vector<3x14xf32>
    %1676 = vector.extract_strided_slice %1673 {offsets = [0, 0], sizes = [8, 1], strides = [1, 1]} : vector<8x3xf32> to vector<8x1xf32>
    %1677 = vector.extract_strided_slice %1675 {offsets = [0, 0], sizes = [1, 14], strides = [1, 1]} : vector<3x14xf32> to vector<1x14xf32>
    %1678 = vector.broadcast %1676 : vector<8x1xf32> to vector<8x14xf32>
    %1679 = vector.broadcast %1677 : vector<1x14xf32> to vector<8x14xf32>
    %1680 = arith.mulf %1678, %1679 : vector<8x14xf32>
    %1681 = vector.extract_strided_slice %1673 {offsets = [0, 1], sizes = [8, 1], strides = [1, 1]} : vector<8x3xf32> to vector<8x1xf32>
    %1682 = vector.extract_strided_slice %1675 {offsets = [1, 0], sizes = [1, 14], strides = [1, 1]} : vector<3x14xf32> to vector<1x14xf32>
    %1683 = vector.broadcast %1681 : vector<8x1xf32> to vector<8x14xf32>
    %1684 = vector.broadcast %1682 : vector<1x14xf32> to vector<8x14xf32>
    %1685 = arith.mulf %1683, %1684 : vector<8x14xf32>
    %1686 = arith.addf %1680, %1685 : vector<8x14xf32>
    %1687 = vector.extract_strided_slice %1673 {offsets = [0, 2], sizes = [8, 1], strides = [1, 1]} : vector<8x3xf32> to vector<8x1xf32>
    %1688 = vector.extract_strided_slice %1675 {offsets = [2, 0], sizes = [1, 14], strides = [1, 1]} : vector<3x14xf32> to vector<1x14xf32>
    %1689 = vector.broadcast %1687 : vector<8x1xf32> to vector<8x14xf32>
    %1690 = vector.broadcast %1688 : vector<1x14xf32> to vector<8x14xf32>
    %1691 = arith.mulf %1689, %1690 : vector<8x14xf32>
    %1692 = arith.addf %1686, %1691 : vector<8x14xf32>
    %1693 = arith.addf %1671, %1692 : vector<8x14xf32>
    %1694 = vector.extract_strided_slice %0 {offsets = [10, 0, 0], sizes = [1, 8, 3], strides = [1, 1, 1]} : vector<15x8x3xf32> to vector<1x8x3xf32>
    %1695 = vector.shape_cast %1694 : vector<1x8x3xf32> to vector<8x3xf32>
    %1696 = vector.extract_strided_slice %1121 {offsets = [0, 0, 3], sizes = [1, 3, 14], strides = [1, 1, 1]} : vector<4x3x18xf32> to vector<1x3x14xf32>
    %1697 = vector.shape_cast %1696 : vector<1x3x14xf32> to vector<3x14xf32>
    %1698 = vector.extract_strided_slice %1695 {offsets = [0, 0], sizes = [8, 1], strides = [1, 1]} : vector<8x3xf32> to vector<8x1xf32>
    %1699 = vector.extract_strided_slice %1697 {offsets = [0, 0], sizes = [1, 14], strides = [1, 1]} : vector<3x14xf32> to vector<1x14xf32>
    %1700 = vector.broadcast %1698 : vector<8x1xf32> to vector<8x14xf32>
    %1701 = vector.broadcast %1699 : vector<1x14xf32> to vector<8x14xf32>
    %1702 = arith.mulf %1700, %1701 : vector<8x14xf32>
    %1703 = vector.extract_strided_slice %1695 {offsets = [0, 1], sizes = [8, 1], strides = [1, 1]} : vector<8x3xf32> to vector<8x1xf32>
    %1704 = vector.extract_strided_slice %1697 {offsets = [1, 0], sizes = [1, 14], strides = [1, 1]} : vector<3x14xf32> to vector<1x14xf32>
    %1705 = vector.broadcast %1703 : vector<8x1xf32> to vector<8x14xf32>
    %1706 = vector.broadcast %1704 : vector<1x14xf32> to vector<8x14xf32>
    %1707 = arith.mulf %1705, %1706 : vector<8x14xf32>
    %1708 = arith.addf %1702, %1707 : vector<8x14xf32>
    %1709 = vector.extract_strided_slice %1695 {offsets = [0, 2], sizes = [8, 1], strides = [1, 1]} : vector<8x3xf32> to vector<8x1xf32>
    %1710 = vector.extract_strided_slice %1697 {offsets = [2, 0], sizes = [1, 14], strides = [1, 1]} : vector<3x14xf32> to vector<1x14xf32>
    %1711 = vector.broadcast %1709 : vector<8x1xf32> to vector<8x14xf32>
    %1712 = vector.broadcast %1710 : vector<1x14xf32> to vector<8x14xf32>
    %1713 = arith.mulf %1711, %1712 : vector<8x14xf32>
    %1714 = arith.addf %1708, %1713 : vector<8x14xf32>
    %1715 = arith.addf %1693, %1714 : vector<8x14xf32>
    %1716 = vector.extract_strided_slice %0 {offsets = [11, 0, 0], sizes = [1, 8, 3], strides = [1, 1, 1]} : vector<15x8x3xf32> to vector<1x8x3xf32>
    %1717 = vector.shape_cast %1716 : vector<1x8x3xf32> to vector<8x3xf32>
    %1718 = vector.extract_strided_slice %1121 {offsets = [1, 0, 3], sizes = [1, 3, 14], strides = [1, 1, 1]} : vector<4x3x18xf32> to vector<1x3x14xf32>
    %1719 = vector.shape_cast %1718 : vector<1x3x14xf32> to vector<3x14xf32>
    %1720 = vector.extract_strided_slice %1717 {offsets = [0, 0], sizes = [8, 1], strides = [1, 1]} : vector<8x3xf32> to vector<8x1xf32>
    %1721 = vector.extract_strided_slice %1719 {offsets = [0, 0], sizes = [1, 14], strides = [1, 1]} : vector<3x14xf32> to vector<1x14xf32>
    %1722 = vector.broadcast %1720 : vector<8x1xf32> to vector<8x14xf32>
    %1723 = vector.broadcast %1721 : vector<1x14xf32> to vector<8x14xf32>
    %1724 = arith.mulf %1722, %1723 : vector<8x14xf32>
    %1725 = vector.extract_strided_slice %1717 {offsets = [0, 1], sizes = [8, 1], strides = [1, 1]} : vector<8x3xf32> to vector<8x1xf32>
    %1726 = vector.extract_strided_slice %1719 {offsets = [1, 0], sizes = [1, 14], strides = [1, 1]} : vector<3x14xf32> to vector<1x14xf32>
    %1727 = vector.broadcast %1725 : vector<8x1xf32> to vector<8x14xf32>
    %1728 = vector.broadcast %1726 : vector<1x14xf32> to vector<8x14xf32>
    %1729 = arith.mulf %1727, %1728 : vector<8x14xf32>
    %1730 = arith.addf %1724, %1729 : vector<8x14xf32>
    %1731 = vector.extract_strided_slice %1717 {offsets = [0, 2], sizes = [8, 1], strides = [1, 1]} : vector<8x3xf32> to vector<8x1xf32>
    %1732 = vector.extract_strided_slice %1719 {offsets = [2, 0], sizes = [1, 14], strides = [1, 1]} : vector<3x14xf32> to vector<1x14xf32>
    %1733 = vector.broadcast %1731 : vector<8x1xf32> to vector<8x14xf32>
    %1734 = vector.broadcast %1732 : vector<1x14xf32> to vector<8x14xf32>
    %1735 = arith.mulf %1733, %1734 : vector<8x14xf32>
    %1736 = arith.addf %1730, %1735 : vector<8x14xf32>
    %1737 = arith.addf %1715, %1736 : vector<8x14xf32>
    %1738 = vector.extract_strided_slice %0 {offsets = [12, 0, 0], sizes = [1, 8, 3], strides = [1, 1, 1]} : vector<15x8x3xf32> to vector<1x8x3xf32>
    %1739 = vector.shape_cast %1738 : vector<1x8x3xf32> to vector<8x3xf32>
    %1740 = vector.extract_strided_slice %1121 {offsets = [2, 0, 3], sizes = [1, 3, 14], strides = [1, 1, 1]} : vector<4x3x18xf32> to vector<1x3x14xf32>
    %1741 = vector.shape_cast %1740 : vector<1x3x14xf32> to vector<3x14xf32>
    %1742 = vector.extract_strided_slice %1739 {offsets = [0, 0], sizes = [8, 1], strides = [1, 1]} : vector<8x3xf32> to vector<8x1xf32>
    %1743 = vector.extract_strided_slice %1741 {offsets = [0, 0], sizes = [1, 14], strides = [1, 1]} : vector<3x14xf32> to vector<1x14xf32>
    %1744 = vector.broadcast %1742 : vector<8x1xf32> to vector<8x14xf32>
    %1745 = vector.broadcast %1743 : vector<1x14xf32> to vector<8x14xf32>
    %1746 = arith.mulf %1744, %1745 : vector<8x14xf32>
    %1747 = vector.extract_strided_slice %1739 {offsets = [0, 1], sizes = [8, 1], strides = [1, 1]} : vector<8x3xf32> to vector<8x1xf32>
    %1748 = vector.extract_strided_slice %1741 {offsets = [1, 0], sizes = [1, 14], strides = [1, 1]} : vector<3x14xf32> to vector<1x14xf32>
    %1749 = vector.broadcast %1747 : vector<8x1xf32> to vector<8x14xf32>
    %1750 = vector.broadcast %1748 : vector<1x14xf32> to vector<8x14xf32>
    %1751 = arith.mulf %1749, %1750 : vector<8x14xf32>
    %1752 = arith.addf %1746, %1751 : vector<8x14xf32>
    %1753 = vector.extract_strided_slice %1739 {offsets = [0, 2], sizes = [8, 1], strides = [1, 1]} : vector<8x3xf32> to vector<8x1xf32>
    %1754 = vector.extract_strided_slice %1741 {offsets = [2, 0], sizes = [1, 14], strides = [1, 1]} : vector<3x14xf32> to vector<1x14xf32>
    %1755 = vector.broadcast %1753 : vector<8x1xf32> to vector<8x14xf32>
    %1756 = vector.broadcast %1754 : vector<1x14xf32> to vector<8x14xf32>
    %1757 = arith.mulf %1755, %1756 : vector<8x14xf32>
    %1758 = arith.addf %1752, %1757 : vector<8x14xf32>
    %1759 = arith.addf %1737, %1758 : vector<8x14xf32>
    %1760 = vector.extract_strided_slice %0 {offsets = [13, 0, 0], sizes = [1, 8, 3], strides = [1, 1, 1]} : vector<15x8x3xf32> to vector<1x8x3xf32>
    %1761 = vector.shape_cast %1760 : vector<1x8x3xf32> to vector<8x3xf32>
    %1762 = vector.extract_strided_slice %1121 {offsets = [3, 0, 3], sizes = [1, 3, 14], strides = [1, 1, 1]} : vector<4x3x18xf32> to vector<1x3x14xf32>
    %1763 = vector.shape_cast %1762 : vector<1x3x14xf32> to vector<3x14xf32>
    %1764 = vector.extract_strided_slice %1761 {offsets = [0, 0], sizes = [8, 1], strides = [1, 1]} : vector<8x3xf32> to vector<8x1xf32>
    %1765 = vector.extract_strided_slice %1763 {offsets = [0, 0], sizes = [1, 14], strides = [1, 1]} : vector<3x14xf32> to vector<1x14xf32>
    %1766 = vector.broadcast %1764 : vector<8x1xf32> to vector<8x14xf32>
    %1767 = vector.broadcast %1765 : vector<1x14xf32> to vector<8x14xf32>
    %1768 = arith.mulf %1766, %1767 : vector<8x14xf32>
    %1769 = vector.extract_strided_slice %1761 {offsets = [0, 1], sizes = [8, 1], strides = [1, 1]} : vector<8x3xf32> to vector<8x1xf32>
    %1770 = vector.extract_strided_slice %1763 {offsets = [1, 0], sizes = [1, 14], strides = [1, 1]} : vector<3x14xf32> to vector<1x14xf32>
    %1771 = vector.broadcast %1769 : vector<8x1xf32> to vector<8x14xf32>
    %1772 = vector.broadcast %1770 : vector<1x14xf32> to vector<8x14xf32>
    %1773 = arith.mulf %1771, %1772 : vector<8x14xf32>
    %1774 = arith.addf %1768, %1773 : vector<8x14xf32>
    %1775 = vector.extract_strided_slice %1761 {offsets = [0, 2], sizes = [8, 1], strides = [1, 1]} : vector<8x3xf32> to vector<8x1xf32>
    %1776 = vector.extract_strided_slice %1763 {offsets = [2, 0], sizes = [1, 14], strides = [1, 1]} : vector<3x14xf32> to vector<1x14xf32>
    %1777 = vector.broadcast %1775 : vector<8x1xf32> to vector<8x14xf32>
    %1778 = vector.broadcast %1776 : vector<1x14xf32> to vector<8x14xf32>
    %1779 = arith.mulf %1777, %1778 : vector<8x14xf32>
    %1780 = arith.addf %1774, %1779 : vector<8x14xf32>
    %1781 = arith.addf %1759, %1780 : vector<8x14xf32>
    %1782 = vector.extract_strided_slice %0 {offsets = [14, 0, 0], sizes = [1, 8, 3], strides = [1, 1, 1]} : vector<15x8x3xf32> to vector<1x8x3xf32>
    %1783 = vector.shape_cast %1782 : vector<1x8x3xf32> to vector<8x3xf32>
    %1784 = vector.extract_strided_slice %1121 {offsets = [0, 0, 4], sizes = [1, 3, 14], strides = [1, 1, 1]} : vector<4x3x18xf32> to vector<1x3x14xf32>
    %1785 = vector.shape_cast %1784 : vector<1x3x14xf32> to vector<3x14xf32>
    %1786 = vector.extract_strided_slice %1783 {offsets = [0, 0], sizes = [8, 1], strides = [1, 1]} : vector<8x3xf32> to vector<8x1xf32>
    %1787 = vector.extract_strided_slice %1785 {offsets = [0, 0], sizes = [1, 14], strides = [1, 1]} : vector<3x14xf32> to vector<1x14xf32>
    %1788 = vector.broadcast %1786 : vector<8x1xf32> to vector<8x14xf32>
    %1789 = vector.broadcast %1787 : vector<1x14xf32> to vector<8x14xf32>
    %1790 = arith.mulf %1788, %1789 : vector<8x14xf32>
    %1791 = vector.extract_strided_slice %1783 {offsets = [0, 1], sizes = [8, 1], strides = [1, 1]} : vector<8x3xf32> to vector<8x1xf32>
    %1792 = vector.extract_strided_slice %1785 {offsets = [1, 0], sizes = [1, 14], strides = [1, 1]} : vector<3x14xf32> to vector<1x14xf32>
    %1793 = vector.broadcast %1791 : vector<8x1xf32> to vector<8x14xf32>
    %1794 = vector.broadcast %1792 : vector<1x14xf32> to vector<8x14xf32>
    %1795 = arith.mulf %1793, %1794 : vector<8x14xf32>
    %1796 = arith.addf %1790, %1795 : vector<8x14xf32>
    %1797 = vector.extract_strided_slice %1783 {offsets = [0, 2], sizes = [8, 1], strides = [1, 1]} : vector<8x3xf32> to vector<8x1xf32>
    %1798 = vector.extract_strided_slice %1785 {offsets = [2, 0], sizes = [1, 14], strides = [1, 1]} : vector<3x14xf32> to vector<1x14xf32>
    %1799 = vector.broadcast %1797 : vector<8x1xf32> to vector<8x14xf32>
    %1800 = vector.broadcast %1798 : vector<1x14xf32> to vector<8x14xf32>
    %1801 = arith.mulf %1799, %1800 : vector<8x14xf32>
    %1802 = arith.addf %1796, %1801 : vector<8x14xf32>
    %1803 = arith.addf %1781, %1802 : vector<8x14xf32>
    %1804 = vector.broadcast %1 : vector<8x1xf32> to vector<8x14xf32>
    %1805 = arith.mulf %1803, %1804 : vector<8x14xf32>
    %1806 = vector.broadcast %2 : vector<8x1xf32> to vector<8x14xf32>
    %1807 = arith.addf %1805, %1806 : vector<8x14xf32>
    %cst_228 = arith.constant 5.000000e-01 : f32
    %1808 = vector.broadcast %cst_228 : f32 to vector<8x14xf32>
    %1809 = arith.mulf %1808, %1807 : vector<8x14xf32>
    %cst_229 = arith.constant 4.471500e-02 : f32
    %1810 = vector.broadcast %cst_229 : f32 to vector<8x14xf32>
    %1811 = arith.mulf %1810, %1807 : vector<8x14xf32>
    %1812 = arith.mulf %1811, %1807 : vector<8x14xf32>
    %1813 = arith.mulf %1812, %1807 : vector<8x14xf32>
    %1814 = arith.addf %1807, %1813 : vector<8x14xf32>
    %cst_230 = arith.constant 0.797884583 : f32
    %1815 = vector.broadcast %cst_230 : f32 to vector<8x14xf32>
    %1816 = arith.mulf %1815, %1814 : vector<8x14xf32>
    %1817 = math.tanh %1816 : vector<8x14xf32>
    %cst_231 = arith.constant 1.000000e+00 : f32
    %1818 = vector.broadcast %cst_231 : f32 to vector<8x14xf32>
    %1819 = arith.addf %1818, %1817 : vector<8x14xf32>
    %1820 = arith.mulf %1809, %1819 : vector<8x14xf32>
    %cst_232 = arith.constant dense<0.000000e+00> : vector<8x14xf32>
    %1821 = tpu.matmul %3, %1820, %cst_232 {dimension_numbers = #tpu.dot_dimension_numbers<[1], [0], [0], [1], [0, 0, 1, 1], [], []>} : vector<8x8xf32>, vector<8x14xf32>, vector<8x14xf32> -> vector<8x14xf32>
    %1822 = vector.broadcast %4 : vector<8x1xf32> to vector<8x14xf32>
    %1823 = arith.addf %1821, %1822 : vector<8x14xf32>
    %cst_233 = arith.constant 0.000000e+00 : f32
    %1824 = vector.broadcast %cst_233 : f32 to vector<8x18xf32>
    %c0_234 = arith.constant 0 : index
    %c0_235 = arith.constant 0 : index
    %1825 = vector.load %arg39[%c0_234, %c0_235] : memref<8x18xf32, #tpu.memory_space<vmem>>, vector<8x18xf32>
    tpu.vector_store %arg39[%c0_234, %c0_235], %1824 {strides = array<i32>} : memref<8x18xf32, #tpu.memory_space<vmem>>, vector<8x18xf32>,
    %cst_236 = arith.constant 0.000000e+00 : f32
    %1826 = vector.broadcast %cst_236 : f32 to vector<8x18xf32>
    %c0_237 = arith.constant 0 : index
    %c0_238 = arith.constant 0 : index
    %1827 = vector.load %arg40[%c0_237, %c0_238] : memref<8x18xf32, #tpu.memory_space<vmem>>, vector<8x18xf32>
    tpu.vector_store %arg40[%c0_237, %c0_238], %1826 {strides = array<i32>} : memref<8x18xf32, #tpu.memory_space<vmem>>, vector<8x18xf32>,
    %c0_239 = arith.constant 0 : index
    %c2_240 = arith.constant 2 : index
    %1828 = vector.load %arg39[%c0_239, %c2_240] : memref<8x18xf32, #tpu.memory_space<vmem>>, vector<8x14xf32>
    tpu.vector_store %arg39[%c0_239, %c2_240], %1472 {strides = array<i32>} : memref<8x18xf32, #tpu.memory_space<vmem>>, vector<8x14xf32>,
    %c0_241 = arith.constant 0 : index
    %c2_242 = arith.constant 2 : index
    %1829 = vector.load %arg40[%c0_241, %c2_242] : memref<8x18xf32, #tpu.memory_space<vmem>>, vector<8x14xf32>
    tpu.vector_store %arg40[%c0_241, %c2_242], %1823 {strides = array<i32>} : memref<8x18xf32, #tpu.memory_space<vmem>>, vector<8x14xf32>,
    %cst_243 = arith.constant 0.000000e+00 : f32
    %1830 = vector.broadcast %cst_243 : f32 to vector<8x14xf32>
    %1831 = vector.extract_strided_slice %5 {offsets = [0, 0], sizes = [8, 1], strides = [1, 1]} : vector<8x3xf32> to vector<8x1xf32>
    %c0_244 = arith.constant 0 : index
    %c1_245 = arith.constant 1 : index
    %1832 = vector.load %arg40[%c0_244, %c1_245] : memref<8x18xf32, #tpu.memory_space<vmem>>, vector<8x14xf32>
    %1833 = vector.broadcast %1831 : vector<8x1xf32> to vector<8x14xf32>
    %1834 = arith.mulf %1833, %1832 : vector<8x14xf32>
    %1835 = arith.addf %1830, %1834 : vector<8x14xf32>
    %1836 = vector.extract_strided_slice %5 {offsets = [0, 1], sizes = [8, 1], strides = [1, 1]} : vector<8x3xf32> to vector<8x1xf32>
    %c0_246 = arith.constant 0 : index
    %c2_247 = arith.constant 2 : index
    %1837 = vector.load %arg39[%c0_246, %c2_247] : memref<8x18xf32, #tpu.memory_space<vmem>>, vector<8x14xf32>
    %1838 = vector.broadcast %1836 : vector<8x1xf32> to vector<8x14xf32>
    %1839 = arith.mulf %1838, %1837 : vector<8x14xf32>
    %1840 = arith.addf %1835, %1839 : vector<8x14xf32>
    %1841 = vector.extract_strided_slice %5 {offsets = [0, 2], sizes = [8, 1], strides = [1, 1]} : vector<8x3xf32> to vector<8x1xf32>
    %c0_248 = arith.constant 0 : index
    %c2_249 = arith.constant 2 : index
    %1842 = vector.load %arg40[%c0_248, %c2_249] : memref<8x18xf32, #tpu.memory_space<vmem>>, vector<8x14xf32>
    %1843 = vector.broadcast %1841 : vector<8x1xf32> to vector<8x14xf32>
    %1844 = arith.mulf %1843, %1842 : vector<8x14xf32>
    %1845 = arith.addf %1840, %1844 : vector<8x14xf32>
    %c0_250 = arith.constant 0 : index
    %c0_251 = arith.constant 0 : index
    %1846 = vector.load %arg41[%c0_250, %c0_251] : memref<32x14xf32, #tpu.memory_space<vmem>>, vector<8x14xf32>
    tpu.vector_store %arg41[%c0_250, %c0_251], %1845 {strides = array<i32>} : memref<32x14xf32, #tpu.memory_space<vmem>>, vector<8x14xf32>,
    %cst_252 = arith.constant 0.000000e+00 : f32
    %1847 = vector.broadcast %cst_252 : f32 to vector<8x14xf32>
    %1848 = vector.extract_strided_slice %6 {offsets = [0, 0], sizes = [8, 1], strides = [1, 1]} : vector<8x5xf32> to vector<8x1xf32>
    %c0_253 = arith.constant 0 : index
    %c1_254 = arith.constant 1 : index
    %1849 = vector.load %arg39[%c0_253, %c1_254] : memref<8x18xf32, #tpu.memory_space<vmem>>, vector<8x14xf32>
    %1850 = vector.broadcast %1848 : vector<8x1xf32> to vector<8x14xf32>
    %1851 = arith.mulf %1850, %1849 : vector<8x14xf32>
    %1852 = arith.addf %1847, %1851 : vector<8x14xf32>
    %1853 = vector.extract_strided_slice %6 {offsets = [0, 1], sizes = [8, 1], strides = [1, 1]} : vector<8x5xf32> to vector<8x1xf32>
    %c0_255 = arith.constant 0 : index
    %c1_256 = arith.constant 1 : index
    %1854 = vector.load %arg40[%c0_255, %c1_256] : memref<8x18xf32, #tpu.memory_space<vmem>>, vector<8x14xf32>
    %1855 = vector.broadcast %1853 : vector<8x1xf32> to vector<8x14xf32>
    %1856 = arith.mulf %1855, %1854 : vector<8x14xf32>
    %1857 = arith.addf %1852, %1856 : vector<8x14xf32>
    %1858 = vector.extract_strided_slice %6 {offsets = [0, 2], sizes = [8, 1], strides = [1, 1]} : vector<8x5xf32> to vector<8x1xf32>
    %c0_257 = arith.constant 0 : index
    %c2_258 = arith.constant 2 : index
    %1859 = vector.load %arg39[%c0_257, %c2_258] : memref<8x18xf32, #tpu.memory_space<vmem>>, vector<8x14xf32>
    %1860 = vector.broadcast %1858 : vector<8x1xf32> to vector<8x14xf32>
    %1861 = arith.mulf %1860, %1859 : vector<8x14xf32>
    %1862 = arith.addf %1857, %1861 : vector<8x14xf32>
    %1863 = vector.extract_strided_slice %6 {offsets = [0, 3], sizes = [8, 1], strides = [1, 1]} : vector<8x5xf32> to vector<8x1xf32>
    %c0_259 = arith.constant 0 : index
    %c2_260 = arith.constant 2 : index
    %1864 = vector.load %arg40[%c0_259, %c2_260] : memref<8x18xf32, #tpu.memory_space<vmem>>, vector<8x14xf32>
    %1865 = vector.broadcast %1863 : vector<8x1xf32> to vector<8x14xf32>
    %1866 = arith.mulf %1865, %1864 : vector<8x14xf32>
    %1867 = arith.addf %1862, %1866 : vector<8x14xf32>
    %1868 = vector.extract_strided_slice %6 {offsets = [0, 4], sizes = [8, 1], strides = [1, 1]} : vector<8x5xf32> to vector<8x1xf32>
    %c0_261 = arith.constant 0 : index
    %c3_262 = arith.constant 3 : index
    %1869 = vector.load %arg39[%c0_261, %c3_262] : memref<8x18xf32, #tpu.memory_space<vmem>>, vector<8x14xf32>
    %1870 = vector.broadcast %1868 : vector<8x1xf32> to vector<8x14xf32>
    %1871 = arith.mulf %1870, %1869 : vector<8x14xf32>
    %1872 = arith.addf %1867, %1871 : vector<8x14xf32>
    %c8_263 = arith.constant 8 : index
    %c0_264 = arith.constant 0 : index
    %1873 = vector.load %arg41[%c8_263, %c0_264] : memref<32x14xf32, #tpu.memory_space<vmem>>, vector<8x14xf32>
    tpu.vector_store %arg41[%c8_263, %c0_264], %1872 {strides = array<i32>} : memref<32x14xf32, #tpu.memory_space<vmem>>, vector<8x14xf32>,
    %cst_265 = arith.constant 0.000000e+00 : f32
    %1874 = vector.broadcast %cst_265 : f32 to vector<8x14xf32>
    %1875 = vector.extract_strided_slice %7 {offsets = [0, 0], sizes = [8, 1], strides = [1, 1]} : vector<8x7xf32> to vector<8x1xf32>
    %c0_266 = arith.constant 0 : index
    %c0_267 = arith.constant 0 : index
    %1876 = vector.load %arg40[%c0_266, %c0_267] : memref<8x18xf32, #tpu.memory_space<vmem>>, vector<8x14xf32>
    %1877 = vector.broadcast %1875 : vector<8x1xf32> to vector<8x14xf32>
    %1878 = arith.mulf %1877, %1876 : vector<8x14xf32>
    %1879 = arith.addf %1874, %1878 : vector<8x14xf32>
    %1880 = vector.extract_strided_slice %7 {offsets = [0, 1], sizes = [8, 1], strides = [1, 1]} : vector<8x7xf32> to vector<8x1xf32>
    %c0_268 = arith.constant 0 : index
    %c1_269 = arith.constant 1 : index
    %1881 = vector.load %arg39[%c0_268, %c1_269] : memref<8x18xf32, #tpu.memory_space<vmem>>, vector<8x14xf32>
    %1882 = vector.broadcast %1880 : vector<8x1xf32> to vector<8x14xf32>
    %1883 = arith.mulf %1882, %1881 : vector<8x14xf32>
    %1884 = arith.addf %1879, %1883 : vector<8x14xf32>
    %1885 = vector.extract_strided_slice %7 {offsets = [0, 2], sizes = [8, 1], strides = [1, 1]} : vector<8x7xf32> to vector<8x1xf32>
    %c0_270 = arith.constant 0 : index
    %c1_271 = arith.constant 1 : index
    %1886 = vector.load %arg40[%c0_270, %c1_271] : memref<8x18xf32, #tpu.memory_space<vmem>>, vector<8x14xf32>
    %1887 = vector.broadcast %1885 : vector<8x1xf32> to vector<8x14xf32>
    %1888 = arith.mulf %1887, %1886 : vector<8x14xf32>
    %1889 = arith.addf %1884, %1888 : vector<8x14xf32>
    %1890 = vector.extract_strided_slice %7 {offsets = [0, 3], sizes = [8, 1], strides = [1, 1]} : vector<8x7xf32> to vector<8x1xf32>
    %c0_272 = arith.constant 0 : index
    %c2_273 = arith.constant 2 : index
    %1891 = vector.load %arg39[%c0_272, %c2_273] : memref<8x18xf32, #tpu.memory_space<vmem>>, vector<8x14xf32>
    %1892 = vector.broadcast %1890 : vector<8x1xf32> to vector<8x14xf32>
    %1893 = arith.mulf %1892, %1891 : vector<8x14xf32>
    %1894 = arith.addf %1889, %1893 : vector<8x14xf32>
    %1895 = vector.extract_strided_slice %7 {offsets = [0, 4], sizes = [8, 1], strides = [1, 1]} : vector<8x7xf32> to vector<8x1xf32>
    %c0_274 = arith.constant 0 : index
    %c2_275 = arith.constant 2 : index
    %1896 = vector.load %arg40[%c0_274, %c2_275] : memref<8x18xf32, #tpu.memory_space<vmem>>, vector<8x14xf32>
    %1897 = vector.broadcast %1895 : vector<8x1xf32> to vector<8x14xf32>
    %1898 = arith.mulf %1897, %1896 : vector<8x14xf32>
    %1899 = arith.addf %1894, %1898 : vector<8x14xf32>
    %1900 = vector.extract_strided_slice %7 {offsets = [0, 5], sizes = [8, 1], strides = [1, 1]} : vector<8x7xf32> to vector<8x1xf32>
    %c0_276 = arith.constant 0 : index
    %c3_277 = arith.constant 3 : index
    %1901 = vector.load %arg39[%c0_276, %c3_277] : memref<8x18xf32, #tpu.memory_space<vmem>>, vector<8x14xf32>
    %1902 = vector.broadcast %1900 : vector<8x1xf32> to vector<8x14xf32>
    %1903 = arith.mulf %1902, %1901 : vector<8x14xf32>
    %1904 = arith.addf %1899, %1903 : vector<8x14xf32>
    %1905 = vector.extract_strided_slice %7 {offsets = [0, 6], sizes = [8, 1], strides = [1, 1]} : vector<8x7xf32> to vector<8x1xf32>
    %c0_278 = arith.constant 0 : index
    %c3_279 = arith.constant 3 : index
    %1906 = vector.load %arg40[%c0_278, %c3_279] : memref<8x18xf32, #tpu.memory_space<vmem>>, vector<8x14xf32>
    %1907 = vector.broadcast %1905 : vector<8x1xf32> to vector<8x14xf32>
    %1908 = arith.mulf %1907, %1906 : vector<8x14xf32>
    %1909 = arith.addf %1904, %1908 : vector<8x14xf32>
    %c16_280 = arith.constant 16 : index
    %c0_281 = arith.constant 0 : index
    %1910 = vector.load %arg41[%c16_280, %c0_281] : memref<32x14xf32, #tpu.memory_space<vmem>>, vector<8x14xf32>
    tpu.vector_store %arg41[%c16_280, %c0_281], %1909 {strides = array<i32>} : memref<32x14xf32, #tpu.memory_space<vmem>>, vector<8x14xf32>,
    %cst_282 = arith.constant 0.000000e+00 : f32
    %1911 = vector.broadcast %cst_282 : f32 to vector<8x14xf32>
    %1912 = vector.extract_strided_slice %8 {offsets = [0, 0], sizes = [8, 1], strides = [1, 1]} : vector<8x9xf32> to vector<8x1xf32>
    %c0_283 = arith.constant 0 : index
    %c0_284 = arith.constant 0 : index
    %1913 = vector.load %arg39[%c0_283, %c0_284] : memref<8x18xf32, #tpu.memory_space<vmem>>, vector<8x14xf32>
    %1914 = vector.broadcast %1912 : vector<8x1xf32> to vector<8x14xf32>
    %1915 = arith.mulf %1914, %1913 : vector<8x14xf32>
    %1916 = arith.addf %1911, %1915 : vector<8x14xf32>
    %1917 = vector.extract_strided_slice %8 {offsets = [0, 1], sizes = [8, 1], strides = [1, 1]} : vector<8x9xf32> to vector<8x1xf32>
    %c0_285 = arith.constant 0 : index
    %c0_286 = arith.constant 0 : index
    %1918 = vector.load %arg40[%c0_285, %c0_286] : memref<8x18xf32, #tpu.memory_space<vmem>>, vector<8x14xf32>
    %1919 = vector.broadcast %1917 : vector<8x1xf32> to vector<8x14xf32>
    %1920 = arith.mulf %1919, %1918 : vector<8x14xf32>
    %1921 = arith.addf %1916, %1920 : vector<8x14xf32>
    %1922 = vector.extract_strided_slice %8 {offsets = [0, 2], sizes = [8, 1], strides = [1, 1]} : vector<8x9xf32> to vector<8x1xf32>
    %c0_287 = arith.constant 0 : index
    %c1_288 = arith.constant 1 : index
    %1923 = vector.load %arg39[%c0_287, %c1_288] : memref<8x18xf32, #tpu.memory_space<vmem>>, vector<8x14xf32>
    %1924 = vector.broadcast %1922 : vector<8x1xf32> to vector<8x14xf32>
    %1925 = arith.mulf %1924, %1923 : vector<8x14xf32>
    %1926 = arith.addf %1921, %1925 : vector<8x14xf32>
    %1927 = vector.extract_strided_slice %8 {offsets = [0, 3], sizes = [8, 1], strides = [1, 1]} : vector<8x9xf32> to vector<8x1xf32>
    %c0_289 = arith.constant 0 : index
    %c1_290 = arith.constant 1 : index
    %1928 = vector.load %arg40[%c0_289, %c1_290] : memref<8x18xf32, #tpu.memory_space<vmem>>, vector<8x14xf32>
    %1929 = vector.broadcast %1927 : vector<8x1xf32> to vector<8x14xf32>
    %1930 = arith.mulf %1929, %1928 : vector<8x14xf32>
    %1931 = arith.addf %1926, %1930 : vector<8x14xf32>
    %1932 = vector.extract_strided_slice %8 {offsets = [0, 4], sizes = [8, 1], strides = [1, 1]} : vector<8x9xf32> to vector<8x1xf32>
    %c0_291 = arith.constant 0 : index
    %c2_292 = arith.constant 2 : index
    %1933 = vector.load %arg39[%c0_291, %c2_292] : memref<8x18xf32, #tpu.memory_space<vmem>>, vector<8x14xf32>
    %1934 = vector.broadcast %1932 : vector<8x1xf32> to vector<8x14xf32>
    %1935 = arith.mulf %1934, %1933 : vector<8x14xf32>
    %1936 = arith.addf %1931, %1935 : vector<8x14xf32>
    %1937 = vector.extract_strided_slice %8 {offsets = [0, 5], sizes = [8, 1], strides = [1, 1]} : vector<8x9xf32> to vector<8x1xf32>
    %c0_293 = arith.constant 0 : index
    %c2_294 = arith.constant 2 : index
    %1938 = vector.load %arg40[%c0_293, %c2_294] : memref<8x18xf32, #tpu.memory_space<vmem>>, vector<8x14xf32>
    %1939 = vector.broadcast %1937 : vector<8x1xf32> to vector<8x14xf32>
    %1940 = arith.mulf %1939, %1938 : vector<8x14xf32>
    %1941 = arith.addf %1936, %1940 : vector<8x14xf32>
    %1942 = vector.extract_strided_slice %8 {offsets = [0, 6], sizes = [8, 1], strides = [1, 1]} : vector<8x9xf32> to vector<8x1xf32>
    %c0_295 = arith.constant 0 : index
    %c3_296 = arith.constant 3 : index
    %1943 = vector.load %arg39[%c0_295, %c3_296] : memref<8x18xf32, #tpu.memory_space<vmem>>, vector<8x14xf32>
    %1944 = vector.broadcast %1942 : vector<8x1xf32> to vector<8x14xf32>
    %1945 = arith.mulf %1944, %1943 : vector<8x14xf32>
    %1946 = arith.addf %1941, %1945 : vector<8x14xf32>
    %1947 = vector.extract_strided_slice %8 {offsets = [0, 7], sizes = [8, 1], strides = [1, 1]} : vector<8x9xf32> to vector<8x1xf32>
    %c0_297 = arith.constant 0 : index
    %c3_298 = arith.constant 3 : index
    %1948 = vector.load %arg40[%c0_297, %c3_298] : memref<8x18xf32, #tpu.memory_space<vmem>>, vector<8x14xf32>
    %1949 = vector.broadcast %1947 : vector<8x1xf32> to vector<8x14xf32>
    %1950 = arith.mulf %1949, %1948 : vector<8x14xf32>
    %1951 = arith.addf %1946, %1950 : vector<8x14xf32>
    %1952 = vector.extract_strided_slice %8 {offsets = [0, 8], sizes = [8, 1], strides = [1, 1]} : vector<8x9xf32> to vector<8x1xf32>
    %c0_299 = arith.constant 0 : index
    %c4_300 = arith.constant 4 : index
    %1953 = vector.load %arg39[%c0_299, %c4_300] : memref<8x18xf32, #tpu.memory_space<vmem>>, vector<8x14xf32>
    %1954 = vector.broadcast %1952 : vector<8x1xf32> to vector<8x14xf32>
    %1955 = arith.mulf %1954, %1953 : vector<8x14xf32>
    %1956 = arith.addf %1951, %1955 : vector<8x14xf32>
    %c24_301 = arith.constant 24 : index
    %c0_302 = arith.constant 0 : index
    %1957 = vector.load %arg41[%c24_301, %c0_302] : memref<32x14xf32, #tpu.memory_space<vmem>>, vector<8x14xf32>
    tpu.vector_store %arg41[%c24_301, %c0_302], %1956 {strides = array<i32>} : memref<32x14xf32, #tpu.memory_space<vmem>>, vector<8x14xf32>,
    %c0_303 = arith.constant 0 : index
    %c0_304 = arith.constant 0 : index
    %1958 = vector.load %arg41[%c0_303, %c0_304] : memref<32x14xf32, #tpu.memory_space<vmem>>, vector<32x14xf32>
    %1959 = vector.broadcast %9 : vector<32x1xf32> to vector<32x14xf32>
    %1960 = arith.mulf %1958, %1959 : vector<32x14xf32>
    %1961 = vector.broadcast %10 : vector<32x1xf32> to vector<32x14xf32>
    %1962 = arith.addf %1960, %1961 : vector<32x14xf32>
    %cst_305 = arith.constant 5.000000e-01 : f32
    %1963 = vector.broadcast %cst_305 : f32 to vector<32x14xf32>
    %1964 = arith.mulf %1963, %1962 : vector<32x14xf32>
    %cst_306 = arith.constant 4.471500e-02 : f32
    %1965 = vector.broadcast %cst_306 : f32 to vector<32x14xf32>
    %1966 = arith.mulf %1965, %1962 : vector<32x14xf32>
    %1967 = arith.mulf %1966, %1962 : vector<32x14xf32>
    %1968 = arith.mulf %1967, %1962 : vector<32x14xf32>
    %1969 = arith.addf %1962, %1968 : vector<32x14xf32>
    %cst_307 = arith.constant 0.797884583 : f32
    %1970 = vector.broadcast %cst_307 : f32 to vector<32x14xf32>
    %1971 = arith.mulf %1970, %1969 : vector<32x14xf32>
    %1972 = math.tanh %1971 : vector<32x14xf32>
    %cst_308 = arith.constant 1.000000e+00 : f32
    %1973 = vector.broadcast %cst_308 : f32 to vector<32x14xf32>
    %1974 = arith.addf %1973, %1972 : vector<32x14xf32>
    %1975 = arith.mulf %1964, %1974 : vector<32x14xf32>
    %cst_309 = arith.constant dense<0.000000e+00> : vector<14xf32>
    %1976 = vector.multi_reduction <add>, %1975, %cst_309 [0] : vector<32x14xf32> to vector<14xf32>
    %1977 = vector.shape_cast %1976 : vector<14xf32> to vector<1x14xf32>
    %cst_310 = arith.constant 3.200000e+01 : f32
    %1978 = vector.broadcast %cst_310 : f32 to vector<1x14xf32>
    %1979 = arith.divf %1977, %1978 : vector<1x14xf32>
    %1980 = vector.broadcast %1979 : vector<1x14xf32> to vector<32x14xf32>
    %1981 = arith.subf %1975, %1980 : vector<32x14xf32>
    %1982 = arith.mulf %1981, %1981 : vector<32x14xf32>
    %cst_311 = arith.constant dense<0.000000e+00> : vector<14xf32>
    %1983 = vector.multi_reduction <add>, %1982, %cst_311 [0] : vector<32x14xf32> to vector<14xf32>
    %1984 = vector.shape_cast %1983 : vector<14xf32> to vector<1x14xf32>
    %cst_312 = arith.constant 3.200000e+01 : f32
    %1985 = vector.broadcast %cst_312 : f32 to vector<1x14xf32>
    %1986 = arith.divf %1984, %1985 : vector<1x14xf32>
    %cst_313 = arith.constant 9.99999974E-6 : f32
    %1987 = vector.broadcast %cst_313 : f32 to vector<1x14xf32>
    %1988 = arith.addf %1986, %1987 : vector<1x14xf32>
    %1989 = math.rsqrt %1988 : vector<1x14xf32>
    %1990 = vector.broadcast %1989 : vector<1x14xf32> to vector<32x14xf32>
    %1991 = arith.mulf %1981, %1990 : vector<32x14xf32>
    %1992 = vector.broadcast %11 : vector<32x1xf32> to vector<32x14xf32>
    %1993 = arith.mulf %1991, %1992 : vector<32x14xf32>
    %1994 = vector.broadcast %12 : vector<32x1xf32> to vector<32x14xf32>
    %1995 = arith.addf %1993, %1994 : vector<32x14xf32>
    %cst_314 = arith.constant dense<0.000000e+00> : vector<4x14xf32>
    %1996 = tpu.matmul %13, %1995, %cst_314 {dimension_numbers = #tpu.dot_dimension_numbers<[1], [0], [0], [1], [0, 0, 1, 1], [], []>} : vector<4x32xf32>, vector<32x14xf32>, vector<4x14xf32> -> vector<4x14xf32>
    %1997 = vector.broadcast %14 : vector<4x1xf32> to vector<4x14xf32>
    %1998 = arith.addf %1996, %1997 : vector<4x14xf32>
    %cst_315 = arith.constant dense<0.000000e+00> : vector<32x14xf32>
    %1999 = tpu.matmul %15, %1995, %cst_315 {dimension_numbers = #tpu.dot_dimension_numbers<[1], [0], [0], [1], [0, 0, 1, 1], [], []>} : vector<32x32xf32>, vector<32x14xf32>, vector<32x14xf32> -> vector<32x14xf32>
    %2000 = vector.broadcast %16 : vector<32x1xf32> to vector<32x14xf32>
    %2001 = arith.addf %1999, %2000 : vector<32x14xf32>
    %cst_316 = arith.constant dense<0.000000e+00> : vector<32x14xf32>
    %2002 = tpu.matmul %17, %1995, %cst_316 {dimension_numbers = #tpu.dot_dimension_numbers<[1], [0], [0], [1], [0, 0, 1, 1], [], []>} : vector<32x32xf32>, vector<32x14xf32>, vector<32x14xf32> -> vector<32x14xf32>
    %2003 = vector.broadcast %18 : vector<32x1xf32> to vector<32x14xf32>
    %2004 = arith.addf %2002, %2003 : vector<32x14xf32>
    %cst_317 = arith.constant dense<0xFF800000> : vector<4xf32>
    %2005 = vector.multi_reduction <maximumf>, %1998, %cst_317 [1] : vector<4x14xf32> to vector<4xf32>
    %2006 = vector.shape_cast %2005 : vector<4xf32> to vector<4x1xf32>
    %2007 = vector.broadcast %2006 : vector<4x1xf32> to vector<4x14xf32>
    %2008 = arith.subf %1998, %2007 : vector<4x14xf32>
    %2009 = math.exp %2008 : vector<4x14xf32>
    %cst_318 = arith.constant dense<0.000000e+00> : vector<4xf32>
    %2010 = vector.multi_reduction <add>, %2009, %cst_318 [1] : vector<4x14xf32> to vector<4xf32>
    %2011 = vector.shape_cast %2010 : vector<4xf32> to vector<4x1xf32>
    %2012 = vector.broadcast %2011 : vector<4x1xf32> to vector<4x14xf32>
    %2013 = arith.divf %2009, %2012 : vector<4x14xf32>
    %2014 = vector.extract_strided_slice %2013 {offsets = [0, 0], sizes = [1, 14], strides = [1, 1]} : vector<4x14xf32> to vector<1x14xf32>
    %2015 = vector.extract_strided_slice %2001 {offsets = [0, 0], sizes = [8, 14], strides = [1, 1]} : vector<32x14xf32> to vector<8x14xf32>
    %2016 = vector.extract_strided_slice %2004 {offsets = [0, 0], sizes = [8, 14], strides = [1, 1]} : vector<32x14xf32> to vector<8x14xf32>
    %2017 = vector.broadcast %2014 : vector<1x14xf32> to vector<8x14xf32>
    %2018 = arith.mulf %2015, %2017 : vector<8x14xf32>
    %cst_319 = arith.constant dense<0.000000e+00> : vector<8xf32>
    %2019 = vector.multi_reduction <add>, %2018, %cst_319 [1] : vector<8x14xf32> to vector<8xf32>
    %2020 = vector.shape_cast %2019 : vector<8xf32> to vector<8x1xf32>
    %cst_320 = arith.constant 0.000000e+00 : f32
    %2021 = vector.broadcast %cst_320 : f32 to vector<8x14xf32>
    %2022 = arith.maximumf %2016, %2021 : vector<8x14xf32>
    %2023 = vector.broadcast %2020 : vector<8x1xf32> to vector<8x14xf32>
    %2024 = arith.mulf %2022, %2023 : vector<8x14xf32>
    %c0_321 = arith.constant 0 : index
    %c0_322 = arith.constant 0 : index
    %2025 = vector.load %arg41[%c0_321, %c0_322] : memref<32x14xf32, #tpu.memory_space<vmem>>, vector<8x14xf32>
    tpu.vector_store %arg41[%c0_321, %c0_322], %2024 {strides = array<i32>} : memref<32x14xf32, #tpu.memory_space<vmem>>, vector<8x14xf32>,
    %2026 = vector.extract_strided_slice %2013 {offsets = [1, 0], sizes = [1, 14], strides = [1, 1]} : vector<4x14xf32> to vector<1x14xf32>
    %2027 = vector.extract_strided_slice %2001 {offsets = [8, 0], sizes = [8, 14], strides = [1, 1]} : vector<32x14xf32> to vector<8x14xf32>
    %2028 = vector.extract_strided_slice %2004 {offsets = [8, 0], sizes = [8, 14], strides = [1, 1]} : vector<32x14xf32> to vector<8x14xf32>
    %2029 = vector.broadcast %2026 : vector<1x14xf32> to vector<8x14xf32>
    %2030 = arith.mulf %2027, %2029 : vector<8x14xf32>
    %cst_323 = arith.constant dense<0.000000e+00> : vector<8xf32>
    %2031 = vector.multi_reduction <add>, %2030, %cst_323 [1] : vector<8x14xf32> to vector<8xf32>
    %2032 = vector.shape_cast %2031 : vector<8xf32> to vector<8x1xf32>
    %cst_324 = arith.constant 0.000000e+00 : f32
    %2033 = vector.broadcast %cst_324 : f32 to vector<8x14xf32>
    %2034 = arith.maximumf %2028, %2033 : vector<8x14xf32>
    %2035 = vector.broadcast %2032 : vector<8x1xf32> to vector<8x14xf32>
    %2036 = arith.mulf %2034, %2035 : vector<8x14xf32>
    %c8_325 = arith.constant 8 : index
    %c0_326 = arith.constant 0 : index
    %2037 = vector.load %arg41[%c8_325, %c0_326] : memref<32x14xf32, #tpu.memory_space<vmem>>, vector<8x14xf32>
    tpu.vector_store %arg41[%c8_325, %c0_326], %2036 {strides = array<i32>} : memref<32x14xf32, #tpu.memory_space<vmem>>, vector<8x14xf32>,
    %2038 = vector.extract_strided_slice %2013 {offsets = [2, 0], sizes = [1, 14], strides = [1, 1]} : vector<4x14xf32> to vector<1x14xf32>
    %2039 = vector.extract_strided_slice %2001 {offsets = [16, 0], sizes = [8, 14], strides = [1, 1]} : vector<32x14xf32> to vector<8x14xf32>
    %2040 = vector.extract_strided_slice %2004 {offsets = [16, 0], sizes = [8, 14], strides = [1, 1]} : vector<32x14xf32> to vector<8x14xf32>
    %2041 = vector.broadcast %2038 : vector<1x14xf32> to vector<8x14xf32>
    %2042 = arith.mulf %2039, %2041 : vector<8x14xf32>
    %cst_327 = arith.constant dense<0.000000e+00> : vector<8xf32>
    %2043 = vector.multi_reduction <add>, %2042, %cst_327 [1] : vector<8x14xf32> to vector<8xf32>
    %2044 = vector.shape_cast %2043 : vector<8xf32> to vector<8x1xf32>
    %cst_328 = arith.constant 0.000000e+00 : f32
    %2045 = vector.broadcast %cst_328 : f32 to vector<8x14xf32>
    %2046 = arith.maximumf %2040, %2045 : vector<8x14xf32>
    %2047 = vector.broadcast %2044 : vector<8x1xf32> to vector<8x14xf32>
    %2048 = arith.mulf %2046, %2047 : vector<8x14xf32>
    %c16_329 = arith.constant 16 : index
    %c0_330 = arith.constant 0 : index
    %2049 = vector.load %arg41[%c16_329, %c0_330] : memref<32x14xf32, #tpu.memory_space<vmem>>, vector<8x14xf32>
    tpu.vector_store %arg41[%c16_329, %c0_330], %2048 {strides = array<i32>} : memref<32x14xf32, #tpu.memory_space<vmem>>, vector<8x14xf32>,
    %2050 = vector.extract_strided_slice %2013 {offsets = [3, 0], sizes = [1, 14], strides = [1, 1]} : vector<4x14xf32> to vector<1x14xf32>
    %2051 = vector.extract_strided_slice %2001 {offsets = [24, 0], sizes = [8, 14], strides = [1, 1]} : vector<32x14xf32> to vector<8x14xf32>
    %2052 = vector.extract_strided_slice %2004 {offsets = [24, 0], sizes = [8, 14], strides = [1, 1]} : vector<32x14xf32> to vector<8x14xf32>
    %2053 = vector.broadcast %2050 : vector<1x14xf32> to vector<8x14xf32>
    %2054 = arith.mulf %2051, %2053 : vector<8x14xf32>
    %cst_331 = arith.constant dense<0.000000e+00> : vector<8xf32>
    %2055 = vector.multi_reduction <add>, %2054, %cst_331 [1] : vector<8x14xf32> to vector<8xf32>
    %2056 = vector.shape_cast %2055 : vector<8xf32> to vector<8x1xf32>
    %cst_332 = arith.constant 0.000000e+00 : f32
    %2057 = vector.broadcast %cst_332 : f32 to vector<8x14xf32>
    %2058 = arith.maximumf %2052, %2057 : vector<8x14xf32>
    %2059 = vector.broadcast %2056 : vector<8x1xf32> to vector<8x14xf32>
    %2060 = arith.mulf %2058, %2059 : vector<8x14xf32>
    %c24_333 = arith.constant 24 : index
    %c0_334 = arith.constant 0 : index
    %2061 = vector.load %arg41[%c24_333, %c0_334] : memref<32x14xf32, #tpu.memory_space<vmem>>, vector<8x14xf32>
    tpu.vector_store %arg41[%c24_333, %c0_334], %2060 {strides = array<i32>} : memref<32x14xf32, #tpu.memory_space<vmem>>, vector<8x14xf32>,
    %c0_335 = arith.constant 0 : index
    %c0_336 = arith.constant 0 : index
    %2062 = vector.load %arg41[%c0_335, %c0_336] : memref<32x14xf32, #tpu.memory_space<vmem>>, vector<32x14xf32>
    %cst_337 = arith.constant dense<0.000000e+00> : vector<32x14xf32>
    %2063 = tpu.matmul %19, %2062, %cst_337 {dimension_numbers = #tpu.dot_dimension_numbers<[1], [0], [0], [1], [0, 0, 1, 1], [], []>} : vector<32x32xf32>, vector<32x14xf32>, vector<32x14xf32> -> vector<32x14xf32>
    %2064 = vector.broadcast %20 : vector<32x1xf32> to vector<32x14xf32>
    %2065 = arith.addf %2063, %2064 : vector<32x14xf32>
    %2066 = vector.broadcast %35 : f32 to vector<32x14xf32>
    %2067 = arith.mulf %2066, %2065 : vector<32x14xf32>
    %2068 = vector.broadcast %36 : f32 to vector<32x14xf32>
    %2069 = arith.mulf %2068, %1975 : vector<32x14xf32>
    %2070 = arith.addf %2067, %2069 : vector<32x14xf32>
    %cst_338 = arith.constant dense<0.000000e+00> : vector<14xf32>
    %2071 = vector.multi_reduction <add>, %2070, %cst_338 [0] : vector<32x14xf32> to vector<14xf32>
    %2072 = vector.shape_cast %2071 : vector<14xf32> to vector<1x14xf32>
    %cst_339 = arith.constant 3.200000e+01 : f32
    %2073 = vector.broadcast %cst_339 : f32 to vector<1x14xf32>
    %2074 = arith.divf %2072, %2073 : vector<1x14xf32>
    %2075 = vector.broadcast %2074 : vector<1x14xf32> to vector<32x14xf32>
    %2076 = arith.subf %2070, %2075 : vector<32x14xf32>
    %2077 = arith.mulf %2076, %2076 : vector<32x14xf32>
    %cst_340 = arith.constant dense<0.000000e+00> : vector<14xf32>
    %2078 = vector.multi_reduction <add>, %2077, %cst_340 [0] : vector<32x14xf32> to vector<14xf32>
    %2079 = vector.shape_cast %2078 : vector<14xf32> to vector<1x14xf32>
    %cst_341 = arith.constant 3.200000e+01 : f32
    %2080 = vector.broadcast %cst_341 : f32 to vector<1x14xf32>
    %2081 = arith.divf %2079, %2080 : vector<1x14xf32>
    %cst_342 = arith.constant 9.99999974E-6 : f32
    %2082 = vector.broadcast %cst_342 : f32 to vector<1x14xf32>
    %2083 = arith.addf %2081, %2082 : vector<1x14xf32>
    %2084 = math.rsqrt %2083 : vector<1x14xf32>
    %2085 = vector.broadcast %2084 : vector<1x14xf32> to vector<32x14xf32>
    %2086 = arith.mulf %2076, %2085 : vector<32x14xf32>
    %2087 = vector.broadcast %21 : vector<32x1xf32> to vector<32x14xf32>
    %2088 = arith.mulf %2086, %2087 : vector<32x14xf32>
    %2089 = vector.broadcast %22 : vector<32x1xf32> to vector<32x14xf32>
    %2090 = arith.addf %2088, %2089 : vector<32x14xf32>
    %cst_343 = arith.constant dense<0.000000e+00> : vector<8x14xf32>
    %2091 = tpu.matmul %23, %2090, %cst_343 {dimension_numbers = #tpu.dot_dimension_numbers<[1], [0], [0], [1], [0, 0, 1, 1], [], []>} : vector<8x32xf32>, vector<32x14xf32>, vector<8x14xf32> -> vector<8x14xf32>
    %2092 = vector.broadcast %24 : vector<8x1xf32> to vector<8x14xf32>
    %2093 = arith.addf %2091, %2092 : vector<8x14xf32>
    %cst_344 = arith.constant 5.000000e-01 : f32
    %2094 = vector.broadcast %cst_344 : f32 to vector<8x14xf32>
    %2095 = arith.mulf %2094, %2093 : vector<8x14xf32>
    %cst_345 = arith.constant 4.471500e-02 : f32
    %2096 = vector.broadcast %cst_345 : f32 to vector<8x14xf32>
    %2097 = arith.mulf %2096, %2093 : vector<8x14xf32>
    %2098 = arith.mulf %2097, %2093 : vector<8x14xf32>
    %2099 = arith.mulf %2098, %2093 : vector<8x14xf32>
    %2100 = arith.addf %2093, %2099 : vector<8x14xf32>
    %cst_346 = arith.constant 0.797884583 : f32
    %2101 = vector.broadcast %cst_346 : f32 to vector<8x14xf32>
    %2102 = arith.mulf %2101, %2100 : vector<8x14xf32>
    %2103 = math.tanh %2102 : vector<8x14xf32>
    %cst_347 = arith.constant 1.000000e+00 : f32
    %2104 = vector.broadcast %cst_347 : f32 to vector<8x14xf32>
    %2105 = arith.addf %2104, %2103 : vector<8x14xf32>
    %2106 = arith.mulf %2095, %2105 : vector<8x14xf32>
    %cst_348 = arith.constant dense<0.000000e+00> : vector<32x14xf32>
    %2107 = tpu.matmul %25, %2106, %cst_348 {dimension_numbers = #tpu.dot_dimension_numbers<[1], [0], [0], [1], [0, 0, 1, 1], [], []>} : vector<32x8xf32>, vector<8x14xf32>, vector<32x14xf32> -> vector<32x14xf32>
    %2108 = vector.broadcast %26 : vector<32x1xf32> to vector<32x14xf32>
    %2109 = arith.addf %2107, %2108 : vector<32x14xf32>
    %2110 = vector.broadcast %37 : f32 to vector<32x14xf32>
    %2111 = arith.mulf %2110, %2109 : vector<32x14xf32>
    %2112 = vector.broadcast %38 : f32 to vector<32x14xf32>
    %2113 = arith.mulf %2112, %2070 : vector<32x14xf32>
    %2114 = arith.addf %2111, %2113 : vector<32x14xf32>
    %cst_349 = arith.constant dense<0.000000e+00> : vector<32xf32>
    %2115 = vector.multi_reduction <add>, %2114, %cst_349 [1] : vector<32x14xf32> to vector<32xf32>
    %2116 = vector.shape_cast %2115 : vector<32xf32> to vector<32x1xf32>
    %cst_350 = arith.constant 1.400000e+01 : f32
    %2117 = vector.broadcast %cst_350 : f32 to vector<32x1xf32>
    %2118 = arith.divf %2116, %2117 : vector<32x1xf32>
    %c1_351 = arith.constant 1 : index
    %c0_352 = arith.constant 0 : index
    %c0_353 = arith.constant 0 : index
    %2119 = vector.load %arg1[%c1_351, %c0_352, %c0_353] : memref<2x2x18xf32, #tpu.memory_space<vmem>>, vector<1x2x18xf32>
    %2120 = vector.shape_cast %2119 : vector<1x2x18xf32> to vector<2x18xf32>
    %cst_354 = arith.constant 0.000000e+00 : f32
    %2121 = vector.broadcast %cst_354 : f32 to vector<16x16xf32>
    %2122 = vector.extract_strided_slice %27 {offsets = [0, 0, 0], sizes = [1, 16, 2], strides = [1, 1, 1]} : vector<3x16x2xf32> to vector<1x16x2xf32>
    %2123 = vector.shape_cast %2122 : vector<1x16x2xf32> to vector<16x2xf32>
    %2124 = vector.extract_strided_slice %2120 {offsets = [0, 0], sizes = [2, 16], strides = [1, 1]} : vector<2x18xf32> to vector<2x16xf32>
    %2125 = vector.extract_strided_slice %2123 {offsets = [0, 0], sizes = [16, 1], strides = [1, 1]} : vector<16x2xf32> to vector<16x1xf32>
    %2126 = vector.extract_strided_slice %2124 {offsets = [0, 0], sizes = [1, 16], strides = [1, 1]} : vector<2x16xf32> to vector<1x16xf32>
    %2127 = vector.broadcast %2125 : vector<16x1xf32> to vector<16x16xf32>
    %2128 = vector.broadcast %2126 : vector<1x16xf32> to vector<16x16xf32>
    %2129 = arith.mulf %2127, %2128 : vector<16x16xf32>
    %2130 = vector.extract_strided_slice %2123 {offsets = [0, 1], sizes = [16, 1], strides = [1, 1]} : vector<16x2xf32> to vector<16x1xf32>
    %2131 = vector.extract_strided_slice %2124 {offsets = [1, 0], sizes = [1, 16], strides = [1, 1]} : vector<2x16xf32> to vector<1x16xf32>
    %2132 = vector.broadcast %2130 : vector<16x1xf32> to vector<16x16xf32>
    %2133 = vector.broadcast %2131 : vector<1x16xf32> to vector<16x16xf32>
    %2134 = arith.mulf %2132, %2133 : vector<16x16xf32>
    %2135 = arith.addf %2129, %2134 : vector<16x16xf32>
    %2136 = arith.addf %2121, %2135 : vector<16x16xf32>
    %2137 = vector.extract_strided_slice %27 {offsets = [1, 0, 0], sizes = [1, 16, 2], strides = [1, 1, 1]} : vector<3x16x2xf32> to vector<1x16x2xf32>
    %2138 = vector.shape_cast %2137 : vector<1x16x2xf32> to vector<16x2xf32>
    %2139 = vector.extract_strided_slice %2120 {offsets = [0, 1], sizes = [2, 16], strides = [1, 1]} : vector<2x18xf32> to vector<2x16xf32>
    %2140 = vector.extract_strided_slice %2138 {offsets = [0, 0], sizes = [16, 1], strides = [1, 1]} : vector<16x2xf32> to vector<16x1xf32>
    %2141 = vector.extract_strided_slice %2139 {offsets = [0, 0], sizes = [1, 16], strides = [1, 1]} : vector<2x16xf32> to vector<1x16xf32>
    %2142 = vector.broadcast %2140 : vector<16x1xf32> to vector<16x16xf32>
    %2143 = vector.broadcast %2141 : vector<1x16xf32> to vector<16x16xf32>
    %2144 = arith.mulf %2142, %2143 : vector<16x16xf32>
    %2145 = vector.extract_strided_slice %2138 {offsets = [0, 1], sizes = [16, 1], strides = [1, 1]} : vector<16x2xf32> to vector<16x1xf32>
    %2146 = vector.extract_strided_slice %2139 {offsets = [1, 0], sizes = [1, 16], strides = [1, 1]} : vector<2x16xf32> to vector<1x16xf32>
    %2147 = vector.broadcast %2145 : vector<16x1xf32> to vector<16x16xf32>
    %2148 = vector.broadcast %2146 : vector<1x16xf32> to vector<16x16xf32>
    %2149 = arith.mulf %2147, %2148 : vector<16x16xf32>
    %2150 = arith.addf %2144, %2149 : vector<16x16xf32>
    %2151 = arith.addf %2136, %2150 : vector<16x16xf32>
    %2152 = vector.extract_strided_slice %27 {offsets = [2, 0, 0], sizes = [1, 16, 2], strides = [1, 1, 1]} : vector<3x16x2xf32> to vector<1x16x2xf32>
    %2153 = vector.shape_cast %2152 : vector<1x16x2xf32> to vector<16x2xf32>
    %2154 = vector.extract_strided_slice %2120 {offsets = [0, 2], sizes = [2, 16], strides = [1, 1]} : vector<2x18xf32> to vector<2x16xf32>
    %2155 = vector.extract_strided_slice %2153 {offsets = [0, 0], sizes = [16, 1], strides = [1, 1]} : vector<16x2xf32> to vector<16x1xf32>
    %2156 = vector.extract_strided_slice %2154 {offsets = [0, 0], sizes = [1, 16], strides = [1, 1]} : vector<2x16xf32> to vector<1x16xf32>
    %2157 = vector.broadcast %2155 : vector<16x1xf32> to vector<16x16xf32>
    %2158 = vector.broadcast %2156 : vector<1x16xf32> to vector<16x16xf32>
    %2159 = arith.mulf %2157, %2158 : vector<16x16xf32>
    %2160 = vector.extract_strided_slice %2153 {offsets = [0, 1], sizes = [16, 1], strides = [1, 1]} : vector<16x2xf32> to vector<16x1xf32>
    %2161 = vector.extract_strided_slice %2154 {offsets = [1, 0], sizes = [1, 16], strides = [1, 1]} : vector<2x16xf32> to vector<1x16xf32>
    %2162 = vector.broadcast %2160 : vector<16x1xf32> to vector<16x16xf32>
    %2163 = vector.broadcast %2161 : vector<1x16xf32> to vector<16x16xf32>
    %2164 = arith.mulf %2162, %2163 : vector<16x16xf32>
    %2165 = arith.addf %2159, %2164 : vector<16x16xf32>
    %2166 = arith.addf %2151, %2165 : vector<16x16xf32>
    %2167 = vector.broadcast %28 : vector<16x1xf32> to vector<16x16xf32>
    %2168 = arith.addf %2166, %2167 : vector<16x16xf32>
    %cst_355 = arith.constant 0.000000e+00 : f32
    %2169 = vector.broadcast %cst_355 : f32 to vector<16x16xf32>
    %2170 = arith.maximumf %2168, %2169 : vector<16x16xf32>
    %cst_356 = arith.constant 0.000000e+00 : f32
    %2171 = vector.broadcast %cst_356 : f32 to vector<32x14xf32>
    %2172 = vector.extract_strided_slice %29 {offsets = [0, 0, 0], sizes = [1, 32, 16], strides = [1, 1, 1]} : vector<3x32x16xf32> to vector<1x32x16xf32>
    %2173 = vector.shape_cast %2172 : vector<1x32x16xf32> to vector<32x16xf32>
    %2174 = vector.extract_strided_slice %2170 {offsets = [0, 0], sizes = [16, 14], strides = [1, 1]} : vector<16x16xf32> to vector<16x14xf32>
    %cst_357 = arith.constant dense<0.000000e+00> : vector<32x14xf32>
    %2175 = tpu.matmul %2173, %2174, %cst_357 {dimension_numbers = #tpu.dot_dimension_numbers<[1], [0], [0], [1], [0, 0, 1, 1], [], []>} : vector<32x16xf32>, vector<16x14xf32>, vector<32x14xf32> -> vector<32x14xf32>
    %2176 = arith.addf %2171, %2175 : vector<32x14xf32>
    %2177 = vector.extract_strided_slice %29 {offsets = [1, 0, 0], sizes = [1, 32, 16], strides = [1, 1, 1]} : vector<3x32x16xf32> to vector<1x32x16xf32>
    %2178 = vector.shape_cast %2177 : vector<1x32x16xf32> to vector<32x16xf32>
    %2179 = vector.extract_strided_slice %2170 {offsets = [0, 1], sizes = [16, 14], strides = [1, 1]} : vector<16x16xf32> to vector<16x14xf32>
    %cst_358 = arith.constant dense<0.000000e+00> : vector<32x14xf32>
    %2180 = tpu.matmul %2178, %2179, %cst_358 {dimension_numbers = #tpu.dot_dimension_numbers<[1], [0], [0], [1], [0, 0, 1, 1], [], []>} : vector<32x16xf32>, vector<16x14xf32>, vector<32x14xf32> -> vector<32x14xf32>
    %2181 = arith.addf %2176, %2180 : vector<32x14xf32>
    %2182 = vector.extract_strided_slice %29 {offsets = [2, 0, 0], sizes = [1, 32, 16], strides = [1, 1, 1]} : vector<3x32x16xf32> to vector<1x32x16xf32>
    %2183 = vector.shape_cast %2182 : vector<1x32x16xf32> to vector<32x16xf32>
    %2184 = vector.extract_strided_slice %2170 {offsets = [0, 2], sizes = [16, 14], strides = [1, 1]} : vector<16x16xf32> to vector<16x14xf32>
    %cst_359 = arith.constant dense<0.000000e+00> : vector<32x14xf32>
    %2185 = tpu.matmul %2183, %2184, %cst_359 {dimension_numbers = #tpu.dot_dimension_numbers<[1], [0], [0], [1], [0, 0, 1, 1], [], []>} : vector<32x16xf32>, vector<16x14xf32>, vector<32x14xf32> -> vector<32x14xf32>
    %2186 = arith.addf %2181, %2185 : vector<32x14xf32>
    %2187 = vector.broadcast %30 : vector<32x1xf32> to vector<32x14xf32>
    %2188 = arith.addf %2186, %2187 : vector<32x14xf32>
    %cst_360 = arith.constant 0.000000e+00 : f32
    %2189 = vector.broadcast %cst_360 : f32 to vector<32x14xf32>
    %2190 = arith.maximumf %2188, %2189 : vector<32x14xf32>
    %cst_361 = arith.constant dense<0.000000e+00> : vector<32xf32>
    %2191 = vector.multi_reduction <add>, %2190, %cst_361 [1] : vector<32x14xf32> to vector<32xf32>
    %2192 = vector.shape_cast %2191 : vector<32xf32> to vector<32x1xf32>
    %cst_362 = arith.constant 1.400000e+01 : f32
    %2193 = vector.broadcast %cst_362 : f32 to vector<32x1xf32>
    %2194 = arith.divf %2192, %2193 : vector<32x1xf32>
    %2195 = arith.mulf %31, %2118 : vector<32x1xf32>
    %2196 = arith.mulf %32, %2194 : vector<32x1xf32>
    %2197 = arith.addf %2195, %2196 : vector<32x1xf32>
    %cst_363 = arith.constant dense<0.000000e+00> : vector<4x1xf32>
    %2198 = tpu.matmul %33, %2197, %cst_363 {dimension_numbers = #tpu.dot_dimension_numbers<[1], [0], [0], [1], [0, 0, 1, 1], [], []>} : vector<4x32xf32>, vector<32x1xf32>, vector<4x1xf32> -> vector<4x1xf32>
    %2199 = arith.addf %2198, %34 : vector<4x1xf32>
    %c0_364 = arith.constant 0 : index
    %c1_365 = arith.constant 1 : index
    %2200 = vector.load %arg38[%c0_364, %c1_365] : memref<4x2xf32, #tpu.memory_space<vmem>>, vector<4x1xf32>
    tpu.vector_store %arg38[%c0_364, %c1_365], %2199 {strides = array<i32>} : memref<4x2xf32, #tpu.memory_space<vmem>>, vector<4x1xf32>,
    return
  }
}

</mosaic_0001>

<bundles_post_ra>
// kernel: tpu_custom_call.1
= control target key start
LH: loop header
LB: loop body
LE: loop exit
PB: predicated region body
PF: predicated region fallthrough
CT: control target
= control target key end

     0   :  { %6 = vsyncpa [#allocation3], 0  ;;  %s127_s0 = inlined_call_operand.hbm [shape: f32[8,128], index: 0, kind: input, shape index: {}]   ;;  %s128_s1 = inlined_call_operand.hbm [shape: f32[8,128], index: 1, kind: output, shape index: {}]  }
   0x1   :  { %7 = vsyncpa [#allocation4], 0  ;;  %s91_s6 = smov [#allocation2]   ;;  %s43_s10 = scalar_lea.hbm %s127_s0, 128 }
   0x2   :  { %s14_s7 = sshll.u32 %s91_s6, 4  ;;  %p44_p0 = scmp.ne.s32.totalorder %s127_s0, %s43_s10  ;;  %s15_s7 = int_to_ptr.vmem [resolvable:$true] %s14_s7 }
   0x3   :  { %p47_p1 = scmp.lt.u32.totalorder %s43_s10, %s127_s0 }
   0x5   :  { %p49_p2 = pnand %p47_p1, %p44_p0 }
   0x7   :  { %52 = shalt.err (!%p49_p2)
}
   0x8   :  { %s53_s15 = scalar_lea.vmem %s15_s7, 128  ;;  %p58_p4 = scmp.lt.s32.totalorder %s15_s7, %s15_s7 }
   0x9   :  { %p54_p3 = scmp.ne.s32.totalorder %s15_s7, %s53_s15  ;;  %p59_p5 = scmp.lt.s32.totalorder %s53_s15, %s53_s15 }
   0xb   :  { %p60_p6 = por %p59_p5, %p58_p4 }
   0xd   :  { %p61_p7 = pnand %p60_p6, %p54_p3 }
   0xf   :  { %64 = shalt.err (!%p61_p7)
}
  0x10   :  { %17 = dma.hbm_to_vmem [thread:$0]  %s127_s0, 128, %s15_s7, [#allocation3]  }
  0x11   :  { %87 = dma.done.wait [#allocation3], 128  }
  0x12   :  { %88 = vsyncadd [#allocation3], 4294967168  ;;  %v21_v0 = vld [vmem:[#allocation2] sm:$0xff]  ;;  %s92_s18 = smov [#allocation5]  }
  0x13   :  { %41 = verf.f32 %v21_v0  ;;  %s30_s19 = sshll.u32 %s92_s18, 4  ;;  %s31_s19 = int_to_ptr.vmem [resolvable:$true] %s30_s19 }
  0x14   :  { %s65_s20 = scalar_lea.vmem %s31_s19, 128  ;;  %p70_p9 = scmp.lt.s32.totalorder %s31_s19, %s31_s19 }
  0x15   :  { %p66_p8 = scmp.ne.s32.totalorder %s31_s19, %s65_s20  ;;  %p71_p10 = scmp.lt.s32.totalorder %s65_s20, %s65_s20 }
  0x17   :  { %p72_p11 = por %p71_p10, %p70_p9 }
  0x19   :  { %p73_p12 = pnand %p72_p11, %p66_p8 }
  0x1d   :  { %v42_v1 = vpop.eup %41 }
  0x1e   :  { %23 = vst [vmem:[#allocation5] sm:$0xff] %v42_v1 }
  0x1f   :  { %76 = shalt.err (!%p73_p12)
}
  0x20   :  { %s77_s0 = scalar_lea.hbm %s128_s1, 128 }
  0x21   :  { %p78_p13 = scmp.ne.s32.totalorder %s128_s1, %s77_s0  ;;  %p81_p0 = scmp.lt.u32.totalorder %s77_s0, %s128_s1 }
  0x23   :  { %p83_p1 = pnand %p81_p0, %p78_p13 }
  0x25   :  { %86 = shalt.err (!%p83_p1)
}
  0x26   :  { %33 = dma.vmem_to_hbm [thread:$0]  %s31_s19, 128, %s128_s1, [#allocation4]  }
  0x27   :  { %89 = dma.done.wait [#allocation4], 128  }
  0x28   :  { %90 = vsyncadd [#allocation4], 4294967168 }
  0x29   :  { %37 = vsyncpa [#allocation3], 1 }
  0x2a   :  { %38 = vsyncpa [#allocation4], 1 }

// kernel: squeeze.23
= control target key start
LH: loop header
LB: loop body
LE: loop exit
PB: predicated region body
PF: predicated region fallthrough
CT: control target
= control target key end

     0   :  { %vm3_vm0 = vcmask 138240   ;;  %s399_s12 = smov 111   ;;  %s401_s15 = smov 77   ;;  %s552_s0 = inlined_call_operand.vmem [shape: f32[68,32], index: 0, kind: input, shape index: {}]   ;;  %s553_s1 = inlined_call_operand.vmem [shape: f32[4,17,32], index: 1, kind: output, shape index: {}]  }
   0x1   :  { %v357_v0 = vld [vmem:[%s552_s0 + $0x10] sm:$0xff]   ;;  %v27_v1 = vld [vmem:[%s552_s0] sm:$0xff]   ;;  %v358_v2 = vld [vmem:[%s552_s0 + $0x18] sm:$0xff]  }
   0x2   :  { %46 = vrot.lane.b32.xlu1 %v357_v0, %s399_s12  ;;  %28 = vrot.lane.b32.xlu0 %v27_v1, %s399_s12  ;;  %v356_v3 = vld [vmem:[%s552_s0 + $0x8] sm:$0xff]   ;;  %4 = vst.msk [vmem:[#allocation0] ss:$8 sm:$0xf] %vm3_vm0, %v27_v1   ;;  %s400_s0 = smov 94  }
   0x3   :  { %5 = vst.msk [vmem:[#allocation0] ss:$8 sm:$0xf0] %vm3_vm0, %v27_v1   ;;  %24 = vst.msk [vmem:[#allocation0 + $0xc0] ss:$8 sm:$0xf] %vm3_vm0, %v358_v2  }
   0x4   :  { %26 = vst.msk [vmem:[#allocation0 + $0xc0] ss:$8 sm:$0xf0] %vm3_vm0, %v358_v2   ;;  %17 = vst.msk [vmem:[#allocation0 + $0x80] ss:$8 sm:$0xf] %vm3_vm0, %v357_v0  }
   0x5   :  { %19 = vst.msk [vmem:[#allocation0 + $0x80] ss:$8 sm:$0xf0] %vm3_vm0, %v357_v0   ;;  %12 = vst.msk [vmem:[#allocation0 + $0x40] ss:$8 sm:$0xf0] %vm3_vm0, %v356_v3  }
   0x6   :  { %10 = vst.msk [vmem:[#allocation0 + $0x40] ss:$8 sm:$0xf] %vm3_vm0, %v356_v3   ;;  %55 = vrot.lane.b32.xlu1 %v358_v2, %s399_s12  ;;  %37 = vrot.lane.b32.xlu0 %v356_v3, %s399_s12 }
   0xa   :  { %72 = vrot.lane.b32.xlu1 %v356_v3, %s400_s0  ;;  %63 = vrot.lane.b32.xlu0 %v27_v1, %s400_s0 }
   0xe   :  { %90 = vrot.lane.b32.xlu1 %v358_v2, %s400_s0  ;;  %81 = vrot.lane.b32.xlu0 %v357_v0, %s400_s0 }
  0x12   :  { %107 = vrot.lane.b32.xlu1 %v356_v3, %s401_s15  ;;  %98 = vrot.lane.b32.xlu0 %v27_v1, %s401_s15 }
  0x16   :  { %125 = vrot.lane.b32.xlu1 %v358_v2, %s401_s15  ;;  %116 = vrot.lane.b32.xlu0 %v357_v0, %s401_s15 }
  0x74   :  { %v47_v4 = vpop.permute.xlu1 %46   ;;  %v29_v5 = vpop.permute.xlu0 %28  }
  0x75   :  { %50 = vst.msk [vmem:[#allocation0 + $0x81] ss:$8 sm:$0xf] %vm3_vm0, %v47_v4   ;;  %52 = vst.msk [vmem:[#allocation0 + $0x81] ss:$8 sm:$0xf0] %vm3_vm0, %v47_v4  }
  0x76   :  { %32 = vst.msk [vmem:[#allocation0 + $0x1] ss:$8 sm:$0xf] %vm3_vm0, %v29_v5   ;;  %34 = vst.msk [vmem:[#allocation0 + $0x1] ss:$8 sm:$0xf0] %vm3_vm0, %v29_v5  }
  0x78   :  { %v56_v6 = vpop.permute.xlu1 %55   ;;  %v38_v7 = vpop.permute.xlu0 %37  }
  0x79   :  { %59 = vst.msk [vmem:[#allocation0 + $0xc1] ss:$8 sm:$0xf] %vm3_vm0, %v56_v6   ;;  %61 = vst.msk [vmem:[#allocation0 + $0xc1] ss:$8 sm:$0xf0] %vm3_vm0, %v56_v6  }
  0x7a   :  { %41 = vst.msk [vmem:[#allocation0 + $0x41] ss:$8 sm:$0xf] %vm3_vm0, %v38_v7   ;;  %43 = vst.msk [vmem:[#allocation0 + $0x41] ss:$8 sm:$0xf0] %vm3_vm0, %v38_v7  }
  0x7c   :  { %v73_v8 = vpop.permute.xlu1 %72   ;;  %v64_v9 = vpop.permute.xlu0 %63  }
  0x7d   :  { %76 = vst.msk [vmem:[#allocation0 + $0x42] ss:$8 sm:$0xf] %vm3_vm0, %v73_v8   ;;  %78 = vst.msk [vmem:[#allocation0 + $0x42] ss:$8 sm:$0xf0] %vm3_vm0, %v73_v8  }
  0x7e   :  { %67 = vst.msk [vmem:[#allocation0 + $0x2] ss:$8 sm:$0xf] %vm3_vm0, %v64_v9   ;;  %69 = vst.msk [vmem:[#allocation0 + $0x2] ss:$8 sm:$0xf0] %vm3_vm0, %v64_v9  }
  0x80   :  { %v91_v10 = vpop.permute.xlu1 %90   ;;  %v82_v11 = vpop.permute.xlu0 %81  }
  0x81   :  { %94 = vst.msk [vmem:[#allocation0 + $0xc2] ss:$8 sm:$0xf] %vm3_vm0, %v91_v10   ;;  %96 = vst.msk [vmem:[#allocation0 + $0xc2] ss:$8 sm:$0xf0] %vm3_vm0, %v91_v10  }
  0x82   :  { %85 = vst.msk [vmem:[#allocation0 + $0x82] ss:$8 sm:$0xf] %vm3_vm0, %v82_v11   ;;  %87 = vst.msk [vmem:[#allocation0 + $0x82] ss:$8 sm:$0xf0] %vm3_vm0, %v82_v11  }
  0x84   :  { %v108_v12 = vpop.permute.xlu1 %107   ;;  %v99_v13 = vpop.permute.xlu0 %98  }
  0x85   :  { %111 = vst.msk [vmem:[#allocation0 + $0x43] ss:$8 sm:$0xf] %vm3_vm0, %v108_v12   ;;  %113 = vst.msk [vmem:[#allocation0 + $0x43] ss:$8 sm:$0xf0] %vm3_vm0, %v108_v12  }
  0x86   :  { %102 = vst.msk [vmem:[#allocation0 + $0x3] ss:$8 sm:$0xf] %vm3_vm0, %v99_v13   ;;  %104 = vst.msk [vmem:[#allocation0 + $0x3] ss:$8 sm:$0xf0] %vm3_vm0, %v99_v13  }
  0x88   :  { %v126_v14 = vpop.permute.xlu1 %125   ;;  %v117_v15 = vpop.permute.xlu0 %116  }
  0x89   :  { %129 = vst.msk [vmem:[#allocation0 + $0xc3] ss:$8 sm:$0xf] %vm3_vm0, %v126_v14   ;;  %131 = vst.msk [vmem:[#allocation0 + $0xc3] ss:$8 sm:$0xf0] %vm3_vm0, %v126_v14  }
  0x8a   :  { %120 = vst.msk [vmem:[#allocation0 + $0x83] ss:$8 sm:$0xf] %vm3_vm0, %v117_v15   ;;  %122 = vst.msk [vmem:[#allocation0 + $0x83] ss:$8 sm:$0xf0] %vm3_vm0, %v117_v15  }
  0x8c   :  { %v180_v16 = vld [vmem:[#allocation0 + $0x40] sm:$0xf]  ;;  %v186_v17 = vld [vmem:[#allocation0 + $0x48] sm:$0xf]  ;;  %v192_v18 = vld [vmem:[#allocation0 + $0x50] sm:$0xf] }
  0x8d   :  { %372 = vst [vmem:[%s553_s1 + $0x20] sm:$0xf] %v180_v16  ;;  %373 = vst [vmem:[%s553_s1 + $0x24] sm:$0xf] %v186_v17  ;;  %v198_v19 = vld [vmem:[#allocation0 + $0x58] sm:$0xf] }
  0x8e   :  { %374 = vst [vmem:[%s553_s1 + $0x28] sm:$0xf] %v192_v18  ;;  %v204_v20 = vld [vmem:[#allocation0 + $0x60] sm:$0xf]  ;;  %v210_v21 = vld [vmem:[#allocation0 + $0x68] sm:$0xf] }
  0x8f   :  { %375 = vst [vmem:[%s553_s1 + $0x2c] sm:$0xf] %v198_v19  ;;  %v216_v22 = vld [vmem:[#allocation0 + $0x70] sm:$0xf]  ;;  %v222_v23 = vld [vmem:[#allocation0 + $0x78] sm:$0xf] }
  0x90   :  { %v135_v24 = vld [vmem:[#allocation0] sm:$0xf]  ;;  %376 = vst [vmem:[%s553_s1 + $0x30] sm:$0xf] %v204_v20  ;;  %377 = vst [vmem:[%s553_s1 + $0x34] sm:$0xf] %v210_v21 }
  0x91   :  { %137 = vst [vmem:[%s553_s1] sm:$0xf] %v135_v24  ;;  %v139_v25 = vld [vmem:[#allocation0 + $0x8] sm:$0xf]  ;;  %v144_v26 = vld [vmem:[#allocation0 + $0x10] sm:$0xf] }
  0x92   :  { %v150_v27 = vld [vmem:[#allocation0 + $0x18] sm:$0xf]  ;;  %378 = vst [vmem:[%s553_s1 + $0x38] sm:$0xf] %v216_v22  ;;  %379 = vst [vmem:[%s553_s1 + $0x3c] sm:$0xf] %v222_v23 }
  0x93   :  { %365 = vst [vmem:[%s553_s1 + $0x4] sm:$0xf] %v139_v25  ;;  %366 = vst [vmem:[%s553_s1 + $0x8] sm:$0xf] %v144_v26  ;;  %v156_v28 = vld [vmem:[#allocation0 + $0x20] sm:$0xf] }
  0x94   :  { %367 = vst [vmem:[%s553_s1 + $0xc] sm:$0xf] %v150_v27  ;;  %v162_v29 = vld [vmem:[#allocation0 + $0x28] sm:$0xf]  ;;  %v168_v30 = vld [vmem:[#allocation0 + $0x30] sm:$0xf] }
  0x95   :  { %368 = vst [vmem:[%s553_s1 + $0x10] sm:$0xf] %v156_v28  ;;  %369 = vst [vmem:[%s553_s1 + $0x14] sm:$0xf] %v162_v29  ;;  %v174_v31 = vld [vmem:[#allocation0 + $0x38] sm:$0xf] }
  0x96   :  { %370 = vst [vmem:[%s553_s1 + $0x18] sm:$0xf] %v168_v30  ;;  %v276_v32 = vld [vmem:[#allocation0 + $0xc0] sm:$0xf]  ;;  %v282_v33 = vld [vmem:[#allocation0 + $0xc8] sm:$0xf] }
  0x97   :  { %371 = vst [vmem:[%s553_s1 + $0x1c] sm:$0xf] %v174_v31  ;;  %388 = vst [vmem:[%s553_s1 + $0x60] sm:$0xf] %v276_v32  ;;  %v288_v34 = vld [vmem:[#allocation0 + $0xd0] sm:$0xf] }
  0x98   :  { %389 = vst [vmem:[%s553_s1 + $0x64] sm:$0xf] %v282_v33  ;;  %v294_v35 = vld [vmem:[#allocation0 + $0xd8] sm:$0xf]  ;;  %v300_v36 = vld [vmem:[#allocation0 + $0xe0] sm:$0xf] }
  0x99   :  { %390 = vst [vmem:[%s553_s1 + $0x68] sm:$0xf] %v288_v34  ;;  %391 = vst [vmem:[%s553_s1 + $0x6c] sm:$0xf] %v294_v35  ;;  %v306_v37 = vld [vmem:[#allocation0 + $0xe8] sm:$0xf] }
  0x9a   :  { %392 = vst [vmem:[%s553_s1 + $0x70] sm:$0xf] %v300_v36  ;;  %v312_v38 = vld [vmem:[#allocation0 + $0xf0] sm:$0xf]  ;;  %v318_v39 = vld [vmem:[#allocation0 + $0xf8] sm:$0xf] }
  0x9b   :  { %393 = vst [vmem:[%s553_s1 + $0x74] sm:$0xf] %v306_v37  ;;  %394 = vst [vmem:[%s553_s1 + $0x78] sm:$0xf] %v312_v38  ;;  %v228_v40 = vld [vmem:[#allocation0 + $0x80] sm:$0xf] }
  0x9c   :  { %395 = vst [vmem:[%s553_s1 + $0x7c] sm:$0xf] %v318_v39  ;;  %v234_v41 = vld [vmem:[#allocation0 + $0x88] sm:$0xf]  ;;  %v240_v42 = vld [vmem:[#allocation0 + $0x90] sm:$0xf] }
  0x9d   :  { %380 = vst [vmem:[%s553_s1 + $0x40] sm:$0xf] %v228_v40  ;;  %381 = vst [vmem:[%s553_s1 + $0x44] sm:$0xf] %v234_v41  ;;  %v246_v43 = vld [vmem:[#allocation0 + $0x98] sm:$0xf] }
  0x9e   :  { %382 = vst [vmem:[%s553_s1 + $0x48] sm:$0xf] %v240_v42  ;;  %v252_v44 = vld [vmem:[#allocation0 + $0xa0] sm:$0xf]  ;;  %v258_v45 = vld [vmem:[#allocation0 + $0xa8] sm:$0xf] }
  0x9f   :  { %383 = vst [vmem:[%s553_s1 + $0x4c] sm:$0xf] %v246_v43  ;;  %384 = vst [vmem:[%s553_s1 + $0x50] sm:$0xf] %v252_v44  ;;  %v264_v46 = vld [vmem:[#allocation0 + $0xb0] sm:$0xf] }
  0xa0   :  { %385 = vst [vmem:[%s553_s1 + $0x54] sm:$0xf] %v258_v45  ;;  %v270_v47 = vld [vmem:[#allocation0 + $0xb8] sm:$0xf]  ;;  %386 = vst [vmem:[%s553_s1 + $0x58] sm:$0xf] %v264_v46 }
  0xa1   :  { %387 = vst [vmem:[%s553_s1 + $0x5c] sm:$0xf] %v270_v47 }

// kernel: net_forward.1
= control target key start
LH: loop header
LB: loop body
LE: loop exit
PB: predicated region body
PF: predicated region fallthrough
CT: control target
= control target key end

     0   :  { %s5492_s6 = smov 1   ;;  %s5493_s10 = smov 2   ;;  %s7402_s0 = inlined_call_operand.smem [shape: u32[39], index: -1, kind: input, shape index: {}] }
   0x1   :  { %s5557_s5 = sld [smem:[%s7402_s0]]   ;;  %s5494_s14 = smov 3  }
   0x2   :  { %s5562_s9 = sld [smem:[%s7402_s0 + %s5492_s6]]   ;;  %s5495_s18 = smov 4  }
   0x3   :  { %s5567_s13 = sld [smem:[%s7402_s0 + %s5493_s10]]   ;;  %s5496_s22 = smov 5  }
   0x4   :  { %s5572_s17 = sld [smem:[%s7402_s0 + %s5494_s14]]   ;;  %s5497_s26 = smov 6  }
   0x5   :  { %s5577_s21 = sld [smem:[%s7402_s0 + %s5495_s18]]   ;;  %s5498_s30 = smov 7  }
   0x6   :  { %s5582_s25 = sld [smem:[%s7402_s0 + %s5496_s22]]   ;;  %s5499_s4 = smov 8  }
   0x7   :  { %s5587_s29 = sld [smem:[%s7402_s0 + %s5497_s26]]   ;;  %s5500_s10 = smov 9  }
   0x8   :  { %7582 = sst [smem:[#allocation8_spill]] %s5562_s9  ;;  %s5501_s15 = smov 10  }
   0x9   :  { %s5592_s3 = sld [smem:[%s7402_s0 + %s5498_s30]]   ;;  %s5502_s20 = smov 11  }
   0xa   :  { %s5597_s8 = sld [smem:[%s7402_s0 + %s5499_s4]]   ;;  %s5503_s26 = smov 12  }
   0xb   :  { %s5602_s14 = sld [smem:[%s7402_s0 + %s5500_s10]]   ;;  %s5504_s1 = smov 13  }
   0xc   :  { %s5607_s19 = sld [smem:[%s7402_s0 + %s5501_s15]]   ;;  %s5505_s7 = smov 14  }
   0xd   :  { %s5612_s24 = sld [smem:[%s7402_s0 + %s5502_s20]]   ;;  %s5506_s15 = smov 15  }
   0xe   :  { %s5617_s30 = sld [smem:[%s7402_s0 + %s5503_s26]]   ;;  %s5507_s22 = smov 16  }
   0xf   :  { %s5622_s6 = sld [smem:[%s7402_s0 + %s5504_s1]]   ;;  %s5508_s28 = smov 17  }
  0x10   :  { %s5627_s12 = sld [smem:[%s7402_s0 + %s5505_s7]]   ;;  %s5509_s7 = smov 18  }
  0x11   :  { %s5632_s20 = sld [smem:[%s7402_s0 + %s5506_s15]]   ;;  %s5510_s15 = smov 19  }
  0x12   :  { %s5637_s27 = sld [smem:[%s7402_s0 + %s5507_s22]]   ;;  %s5511_s22 = smov 20  }
  0x13   :  { %s5642_s4 = sld [smem:[%s7402_s0 + %s5508_s28]]   ;;  %s5512_s28 = smov 21  }
  0x14   :  { %s5647_s9 = sld [smem:[%s7402_s0 + %s5509_s7]]   ;;  %s5513_s7 = smov 22  }
  0x15   :  { %s5529_s10 = smov 38  }
  0x17   :  { %7583 = sst [smem:[#allocation9_spill]] %s5632_s20 }
  0x18   :  { %7584 = sst [smem:[#allocation10_spill]] %s5637_s27 }
  0x19   :  { %7585 = sst [smem:[#allocation11_spill]] %s5642_s4 }
  0x1a   :  { %7586 = sst [smem:[#allocation12_spill]] %s5647_s9 }
  0x1b   :  { %s5652_s20 = sld [smem:[%s7402_s0 + %s5510_s15]]   ;;  %s5514_s15 = smov 23  }
  0x1c   :  { %s5657_s27 = sld [smem:[%s7402_s0 + %s5511_s22]]   ;;  %s5515_s22 = smov 24  }
  0x1d   :  { %s5662_s4 = sld [smem:[%s7402_s0 + %s5512_s28]]   ;;  %s5516_s28 = smov 25  }
  0x1e   :  { %s5667_s9 = sld [smem:[%s7402_s0 + %s5513_s7]]   ;;  %s5517_s7 = smov 26  }
  0x21   :  { %7587 = sst [smem:[#allocation13_spill]] %s5652_s20 }
  0x22   :  { %7588 = sst [smem:[#allocation14_spill]] %s5657_s27 }
  0x23   :  { %7589 = sst [smem:[#allocation15_spill]] %s5662_s4 }
  0x24   :  { %7590 = sst [smem:[#allocation16_spill]] %s5667_s9 }
  0x25   :  { %s5672_s20 = sld [smem:[%s7402_s0 + %s5514_s15]]   ;;  %s5518_s15 = smov 27  }
  0x26   :  { %s5677_s27 = sld [smem:[%s7402_s0 + %s5515_s22]]   ;;  %s5519_s22 = smov 28  }
  0x27   :  { %s5682_s4 = sld [smem:[%s7402_s0 + %s5516_s28]]   ;;  %s5520_s28 = smov 29  }
  0x28   :  { %s5687_s9 = sld [smem:[%s7402_s0 + %s5517_s7]]   ;;  %s5521_s7 = smov 30  }
  0x2b   :  { %7591 = sst [smem:[#allocation17_spill]] %s5672_s20 }
  0x2c   :  { %7592 = sst [smem:[#allocation18_spill]] %s5677_s27 }
  0x2d   :  { %7593 = sst [smem:[#allocation19_spill]] %s5682_s4 }
  0x2e   :  { %7594 = sst [smem:[#allocation20_spill]] %s5687_s9 }
  0x2f   :  { %s5692_s20 = sld [smem:[%s7402_s0 + %s5518_s15]]   ;;  %s5522_s15 = smov 31  }
  0x30   :  { %s5697_s27 = sld [smem:[%s7402_s0 + %s5519_s22]]   ;;  %s5523_s22 = smov 32  }
  0x31   :  { %s5702_s4 = sld [smem:[%s7402_s0 + %s5520_s28]]   ;;  %s5524_s28 = smov 33  }
  0x32   :  { %s5707_s9 = sld [smem:[%s7402_s0 + %s5521_s7]]   ;;  %s5525_s7 = smov 34  }
  0x35   :  { %7595 = sst [smem:[#allocation21_spill]] %s5692_s20 }
  0x36   :  { %7596 = sst [smem:[#allocation22_spill]] %s5697_s27 }
  0x37   :  { %7597 = sst [smem:[#allocation23_spill]] %s5702_s4 }
  0x38   :  { %7598 = sst [smem:[#allocation24_spill]] %s5707_s9 }
  0x39   :  { %s5712_s20 = sld [smem:[%s7402_s0 + %s5522_s15]]   ;;  %s5526_s15 = smov 35  }
  0x3a   :  { %s5717_s27 = sld [smem:[%s7402_s0 + %s5523_s22]]   ;;  %s5527_s22 = smov 36  }
  0x3b   :  { %s5722_s4 = sld [smem:[%s7402_s0 + %s5524_s28]]   ;;  %s5528_s28 = smov 37  }
  0x3c   :  { %s5727_s9 = sld [smem:[%s7402_s0 + %s5525_s7]]  }
  0x3f   :  { %7599 = sst [smem:[#allocation25_spill]] %s5712_s20 }
  0x40   :  { %7600 = sst [smem:[#allocation26_spill]] %s5717_s27 }
  0x41   :  { %7601 = sst [smem:[#allocation27_spill]] %s5722_s4 }
  0x42   :  { %7602 = sst [smem:[#allocation28_spill]] %s5727_s9 }
  0x43   :  { %s5732_s20 = sld [smem:[%s7402_s0 + %s5526_s15]]  }
  0x44   :  { %s5737_s27 = sld [smem:[%s7402_s0 + %s5527_s22]]  }
  0x45   :  { %s4676_s4 = sld [smem:[%s7402_s0 + %s5528_s28]]  }
  0x46   :  { %s5745_s9 = sld [smem:[%s7402_s0 + %s5529_s10]]  }
  0x47   :  { %82 = vsyncpa [#allocation6], 0 }
  0x4b   :  { %s163_s15 = sshll.u32 %s4676_s4, 4  ;;  %s164_s15 = int_to_ptr.vmem [resolvable:$true] %s163_s15 }
  0x4c   :  { %s5478_s16 = scalar_lea.vmem %s164_s15, 16  ;;  %p5483_p1 = scmp.lt.s32.totalorder %s164_s15, %s164_s15 }
  0x4d   :  { %p5479_p0 = scmp.ne.s32.totalorder %s164_s15, %s5478_s16  ;;  %p5484_p2 = scmp.lt.s32.totalorder %s5478_s16, %s5478_s16 }
  0x4f   :  { %p5485_p3 = por %p5484_p2, %p5483_p1 }
  0x51   :  { %p5486_p4 = pnand %p5485_p3, %p5479_p0 }
  0x53   :  { %5489 = shalt.err (!%p5486_p4)
}
  0x54   :  { %s5530_s18 = smov [#allocation5]  }
  0x55   :  { %166 = dma.vmem_to_smem %s164_s15, 16, %s5530_s18, [#allocation6]  }
  0x56   :  { %5490 = dma.done.wait [#allocation6], 16  }
  0x57   :  { %5491 = vsyncadd [#allocation6], 4294967280 }
  0x58   :  { %170 = sfence }
  0x59   :  { %v175_v0 = vld [vmem:[%s5567_s13 + $0x20] sm:$0xff]  ;;  %v173_v1 = vld [vmem:[%s5567_s13 + $0x10] sm:$0xff]  ;;  %v7426_v2 = vmov 2   ;;  %v176_v3 = vld [vmem:[%s5567_s13 + $0x28] sm:$0xff]  ;;  %v7422_v5 = vmov 0   ;;  %v7424_v7 = vmov 1   ;;  %v301_v20 = vlaneseq }
  0x5a   :  { %5315 = vset.pattern.permute.xlu0 %v7426_v2  ;;  %5311 = vset.pattern.permute.xlu1 %v7426_v2  ;;  %v174_v4 = vld [vmem:[%s5567_s13 + $0x18] sm:$0xff]  ;;  %v180_v6 = vld [vmem:[%s5567_s13 + $0x48] sm:$0xff]  ;;  %v181_v8 = vld [vmem:[%s5567_s13 + $0x50] sm:$0xff]  ;;  %s5534_s0 = smov 127   ;;  %s5536_s4 = smov 125   ;;  %vm5539_vm0 = vmmov 0  }
  0x5b   :  { %433 = vperm.xlu0 %5315, %v175_v0   ;;  %379 = vperm.xlu1 %5311, %v173_v1   ;;  %v177_v9 = vld [vmem:[%s5567_s13 + $0x30] sm:$0xff]  ;;  %v178_v10 = vld [vmem:[%s5567_s13 + $0x38] sm:$0xff]  ;;  %v183_v12 = vld [vmem:[%s5567_s13 + $0x60] sm:$0xff]  ;;  %v5801_v23 = vshrl.u32 %v301_v20, 7  ;;  %vm699_vm1 = vcmask 64512   ;;  %vm996_vm2 = vcmask 146432  }
  0x5c   :  { %v182_v11 = vld [vmem:[%s5567_s13 + $0x58] sm:$0xff]  ;;  %v179_v13 = vld [vmem:[%s5567_s13 + $0x40] sm:$0xff]  ;;  %v184_v14 = vld [vmem:[%s5567_s13 + $0x68] sm:$0xff]  ;;  %vm1003_vm3 = vcmask 130064   ;;  %vm1043_vm4 = vcmask 113664   ;;  %vm1435_vm5 = vcmask 261120  }
  0x5d   :  { %v185_v15 = vld [vmem:[%s5567_s13 + $0x70] sm:$0xff]  ;;  %v172_v16 = vld [vmem:[%s5567_s13 + $0x8] sm:$0xff]  ;;  %v171_v17 = vld [vmem:[%s5567_s13] sm:$0xff]  ;;  %7605 = vst [vmem:[#allocation31_spill] sm:$0xff] %v5801_v23  ;;  %v5806_v25 = vsub.s32 1, %v5801_v23  ;;  %v5809_v26 = vsub.s32 0, %v5801_v23 }
  0x5e   :  { %v293_v28 = vld [vmem:[%s5557_s5 + $0x4] sm:$0x7]  ;;  %v5825_v33 = vsub.s32 2, %v5801_v23  ;;  %v292_v49 = vld [vmem:[%s5557_s5] sm:$0x7]  ;;  %s5535_s13 = smov 126  }
  0x5f   :  { %456 = vperm.xlu0 %5315, %v176_v3   ;;  %5312 = vset.pattern.permute.xlu1 %v7422_v5  ;;  %v5817_v30 = vrot.slane %v293_v28, %v5806_v25  ;;  %v5822_v32 = vrot.slane %v293_v28, %v5809_v26  ;;  %v5857_v50 = vrot.slane %v292_v49, %v5809_v26  ;;  %v294_v53 = vld [vmem:[%s5557_s5 + $0x8] sm:$0x7]  ;;  %v295_v55 = vld [vmem:[%s5557_s5 + $0xc] sm:$0x7]  ;;  %vm1743_vm6 = vcmask 109568   ;;  %s7702_s22 = sld [smem:[#allocation15_spill]] }
  0x60   :  { %391 = vperm.xlu1 %5312, %v174_v4   ;;  %7609 = vst [vmem:[#allocation35_spill] sm:$0xff] %v5825_v33  ;;  %v5832_v36 = vrot.slane %v293_v28, %v5825_v33  ;;  %v5860_v51 = vrot.slane %v292_v49, %v5806_v25  ;;  %v5863_v52 = vrot.slane %v292_v49, %v5825_v33  ;;  %s7703_s23 = sld [smem:[#allocation23_spill]]  ;;  %s7704_s26 = sld [smem:[#allocation24_spill]]  ;;  %vm2384_vm7 = vcmask 130048  }
  0x61   :  { %v5870_v56 = vrot.slane %v294_v53, %v5806_v25  ;;  %v5879_v60 = vrot.slane %v295_v55, %v5806_v25  ;;  %v5882_v61 = vrot.slane %v294_v53, %v5809_v26  ;;  %s7711_s28 = sld [smem:[#allocation8_spill]]  ;;  %s7722_s1 = sld [smem:[#allocation20_spill]]  ;;  %vm2815_vm8 = vcmask 3072  }
  0x62   :  { %s7727_s2 = sld [smem:[#allocation22_spill]]  ;;  %s7729_s10 = sld [smem:[#allocation26_spill]]  ;;  %vm4633_vm9 = vcmask 11272  }
  0x63   :  { %548 = vperm.xlu0 %5315, %v180_v6   ;;  %s4678_s7 = sld [smem:[#allocation5 + $0x1]]  ;;  %s7751_s11 = sld [smem:[#allocation19_spill]] }
  0x64   :  { %5313 = vset.pattern.permute.xlu1 %v7424_v7  ;;  %s7752_s15 = sld [smem:[#allocation25_spill]]  ;;  %s7754_s16 = sld [smem:[#allocation21_spill]] }
  0x65   :  { %400 = vperm.xlu1 %5313, %v174_v4   ;;  %s4679_s18 = sld [smem:[#allocation5 + $0x2]] }
  0x67   :  { %571 = vperm.xlu0 %5315, %v181_v8  }
  0x69   :  { %427 = vperm.xlu1 %5313, %v175_v0  }
  0x6b   :  { %5327 = vset.pattern.permute.xlu0 %v7424_v7 }
  0x6c   :  { %369 = vperm.xlu0 %5327, %v173_v1  }
  0x6d   :  { %5314 = vset.pattern.permute.xlu1 %v7426_v2 }
  0x6e   :  { %410 = vperm.xlu1 %5314, %v174_v4  }
  0x70   :  { %473 = vperm.xlu0 %5327, %v177_v9  }
  0x72   :  { %5316 = vset.pattern.permute.xlu1 %v7422_v5 }
  0x73   :  { %445 = vperm.xlu1 %5316, %v176_v3  }
  0x74   :  { %496 = vperm.xlu0 %5327, %v178_v10  }
  0x77   :  { %5317 = vset.pattern.permute.xlu1 %v7424_v7 }
  0x78   :  { %588 = vperm.xlu0 %5327, %v182_v11   ;;  %450 = vperm.xlu1 %5317, %v176_v3  }
  0x7c   :  { %611 = vperm.xlu0 %5327, %v183_v12   ;;  %5318 = vset.pattern.permute.xlu1 %v7422_v5 }
  0x7d   :  { %468 = vperm.xlu1 %5318, %v177_v9  }
  0x80   :  { %5331 = vset.pattern.permute.xlu0 %v7422_v5 }
  0x81   :  { %360 = vperm.xlu0 %5331, %v173_v1   ;;  %5319 = vset.pattern.permute.xlu1 %v7426_v2  ;;  %v5890_v1 = vrot.slane %v295_v55, %v5809_v26 }
  0x82   :  { %479 = vperm.xlu1 %5319, %v177_v9  }
  0x85   :  { %422 = vperm.xlu0 %5331, %v175_v0   ;;  %v5887_v0 = vrot.slane %v294_v53, %v5825_v33 }
  0x86   :  { %5320 = vset.pattern.permute.xlu1 %v7422_v5 }
  0x87   :  { %491 = vperm.xlu1 %5320, %v178_v10  }
  0x89   :  { %514 = vperm.xlu0 %5331, %v179_v13  }
  0x8b   :  { %5321 = vset.pattern.permute.xlu1 %v7426_v2 }
  0x8c   :  { %502 = vperm.xlu1 %5321, %v178_v10  }
  0x8d   :  { %537 = vperm.xlu0 %5331, %v180_v6  }
  0x90   :  { %5322 = vset.pattern.permute.xlu1 %v7424_v7 }
  0x91   :  { %629 = vperm.xlu0 %5331, %v184_v14   ;;  %519 = vperm.xlu1 %5322, %v179_v13  }
  0x95   :  { %652 = vperm.xlu0 %5331, %v185_v15   ;;  %5323 = vset.pattern.permute.xlu1 %v7426_v2 }
  0x96   :  { %525 = vperm.xlu1 %5323, %v179_v13  }
  0x99   :  { %5336 = vset.pattern.permute.xlu0 %v7426_v2 }
  0x9a   :  { %5324 = vset.pattern.permute.xlu1 %v7424_v7  ;;  %663 = vperm.xlu0 %5336, %v185_v15  }
  0x9b   :  { %542 = vperm.xlu1 %5324, %v180_v6  }
  0x9e   :  { %348 = vperm.xlu0 %5336, %v172_v16  }
  0x9f   :  { %5325 = vset.pattern.permute.xlu1 %v7422_v5 }
  0xa0   :  { %560 = vperm.xlu1 %5325, %v181_v8  }
  0xa2   :  { %5340 = vset.pattern.permute.xlu0 %v7422_v5 }
  0xa3   :  { %329 = vperm.xlu0 %5340, %v172_v16  }
  0xa4   :  { %5326 = vset.pattern.permute.xlu1 %v7424_v7 }
  0xa5   :  { %565 = vperm.xlu1 %5326, %v181_v8  }
  0xa9   :  { %5328 = vset.pattern.permute.xlu1 %v7422_v5 }
  0xaa   :  { %583 = vperm.xlu1 %5328, %v182_v11  }
  0xae   :  { %5329 = vset.pattern.permute.xlu1 %v7426_v2 }
  0xaf   :  { %594 = vperm.xlu1 %5329, %v182_v11  }
  0xb3   :  { %5330 = vset.pattern.permute.xlu1 %v7422_v5 }
  0xb4   :  { %606 = vperm.xlu1 %5330, %v183_v12  }
  0xb8   :  { %5332 = vset.pattern.permute.xlu1 %v7426_v2 }
  0xb9   :  { %617 = vperm.xlu1 %5332, %v183_v12  }
  0xbd   :  { %5333 = vset.pattern.permute.xlu1 %v7424_v7 }
  0xbe   :  { %634 = vperm.xlu1 %5333, %v184_v14  }
  0xc2   :  { %5334 = vset.pattern.permute.xlu1 %v7426_v2 }
  0xc3   :  { %640 = vperm.xlu1 %5334, %v184_v14  }
  0xc7   :  { %5335 = vset.pattern.permute.xlu1 %v7424_v7 }
  0xc8   :  { %657 = vperm.xlu1 %5335, %v185_v15  }
  0xcc   :  { %5337 = vset.pattern.permute.xlu1 %v7422_v5 }
  0xcd   :  { %298 = vperm.xlu1 %5337, %v171_v17  }
  0xd1   :  { %5338 = vset.pattern.permute.xlu1 %v7424_v7 }
  0xd2   :  { %307 = vperm.xlu1 %5338, %v171_v17  }
  0xd6   :  { %338 = vperm.xlu1 %5338, %v172_v16   ;;  %v5912_v16 = vrot.slane %v295_v55, %v5825_v33 }
  0xda   :  { %v5791_v18 = vpop.permute.xlu0 %433  ;;  %v5793_v19 = vpop.permute.xlu1 %379  ;;  %5339 = vset.pattern.permute.xlu1 %v7426_v2 }
  0xdb   :  { %7603 = vst [vmem:[#allocation29_spill] sm:$0xff] %v5793_v19  ;;  %317 = vperm.xlu1 %5339, %v171_v17   ;;  %v788_v63 = vmul.f32 %v5793_v19, %v5863_v52  ;;  %v808_v15 = vmul.f32 %v5791_v18, %v5887_v0  ;;  %v436_v28 = vmul.f32 %v5791_v18, %v5863_v52 }
  0xde   :  { %v5796_v21 = vpop.permute.xlu0 %456 }
  0xdf   :  { %v5798_v22 = vpop.permute.xlu1 %391  ;;  %5341 = vset.pattern.permute.xlu1 %v7422_v5  ;;  %v818_v53 = vmul.f32 %v5796_v21, %v5912_v16 }
  0xe0   :  { %7604 = vst [vmem:[#allocation30_spill] sm:$0xff] %v5798_v22  ;;  %v795_v37 = vmul.f32 %v5798_v22, %v5822_v32 }
  0xe2   :  { %v5803_v24 = vpop.permute.xlu0 %548 }
  0xe3   :  { %7606 = vst [vmem:[#allocation32_spill] sm:$0xff] %v5803_v24 }
  0xe4   :  { %v5811_v27 = vpop.permute.xlu1 %400 }
  0xe5   :  { %7607 = vst [vmem:[#allocation33_spill] sm:$0xff] %v5811_v27  ;;  %v796_v34 = vmul.f32 %v5811_v27, %v5817_v30 }
  0xe6   :  { %v5814_v29 = vpop.permute.xlu0 %571 }
  0xe7   :  { %7608 = vst [vmem:[#allocation34_spill] sm:$0xff] %v5814_v29  ;;  %v797_v39 = vadd.f32 %v796_v34, %v795_v37 }
  0xe8   :  { %v5819_v31 = vpop.permute.xlu1 %427 }
  0xe9   :  { %v806_v8 = vmul.f32 %v5819_v31, %v5870_v56  ;;  %v430_v12 = vmul.f32 %v5819_v31, %v5860_v51 }
  0xeb   :  { %v5829_v35 = vpop.permute.xlu0 %369 }
  0xec   :  { %7610 = vst [vmem:[#allocation36_spill] sm:$0xff] %v5829_v35  ;;  %v786_v59 = vmul.f32 %v5829_v35, %v5860_v51 }
  0xed   :  { %v5836_v38 = vpop.permute.xlu1 %410 }
  0xee   :  { %7611 = vst [vmem:[#allocation37_spill] sm:$0xff] %v5836_v38  ;;  %v798_v40 = vmul.f32 %v5836_v38, %v5832_v36 }
  0xef   :  { %v5840_v41 = vpop.permute.xlu0 %473 }
  0xf0   :  { %v799_v42 = vadd.f32 %v798_v40, %v797_v39 }
  0xf2   :  { %v5842_v43 = vpop.permute.xlu1 %445  ;;  %801 = vrot.lane.b32.xlu0 %v799_v42, %s5534_s0 }
  0xf3   :  { %v5845_v44 = vpop.permute.xlu0 %496  ;;  %v815_v17 = vmul.f32 %v5842_v43, %v5890_v1  ;;  %v448_v34 = vmul.f32 %v5842_v43, %v5822_v32 }
  0xf7   :  { %v5847_v45 = vpop.permute.xlu0 %588  ;;  %v5849_v46 = vpop.permute.xlu1 %450 }
  0xf8   :  { %7612 = vst [vmem:[#allocation38_spill] sm:$0xff] %v5847_v45  ;;  %v816_v9 = vmul.f32 %v5849_v46, %v5879_v60  ;;  %v453_v13 = vmul.f32 %v5849_v46, %v5817_v30 }
  0xfa   :  { %v817_v39 = vadd.f32 %v816_v9, %v815_v17  ;;  %v454_v42 = vadd.f32 %v453_v13, %v448_v34  ;;  %v836_v17 = vmul.f32 %v5845_v44, %v5817_v30  ;;  %v499_v34 = vmul.f32 %v5845_v44, %v5879_v60 }
  0xfb   :  { %v5851_v47 = vpop.permute.xlu0 %611 }
  0xfc   :  { %7613 = vst [vmem:[#allocation39_spill] sm:$0xff] %v5851_v47  ;;  %v5853_v48 = vpop.permute.xlu1 %468 }
  0xfd   :  { %v825_v55 = vmul.f32 %v5853_v48, %v5857_v50 }
 0x100   :  { %v5866_v54 = vpop.permute.xlu0 %360 }
 0x101   :  { %7614 = vst [vmem:[#allocation40_spill] sm:$0xff] %v5866_v54  ;;  %v5872_v57 = vpop.permute.xlu1 %479  ;;  %v785_v58 = vmul.f32 %v5866_v54, %v5857_v50 }
 0x102   :  { %v482_v9 = vmul.f32 %v5872_v57, %v5887_v0 }
 0x103   :  { %v787_v62 = vadd.f32 %v786_v59, %v785_v58  ;;  %v459_v58 = vmul.f32 %v5796_v21, %v5832_v36  ;;  %v471_v59 = vmul.f32 %v5853_v48, %v5882_v61 }
 0x104   :  { %v5892_v3 = vpop.permute.xlu0 %422 }
 0x105   :  { %v789_v4 = vadd.f32 %v788_v63, %v787_v62  ;;  %v805_v6 = vmul.f32 %v5892_v3, %v5882_v61  ;;  %v425_v11 = vmul.f32 %v5892_v3, %v5857_v50  ;;  %v819_v62 = vadd.f32 %v818_v53, %v817_v39 }
 0x106   :  { %v5900_v10 = vpop.permute.xlu1 %491  ;;  %v826_v63 = vmul.f32 %v5840_v41, %v5860_v51 }
 0x107   :  { %791 = vrot.lane.b32.xlu1 %v789_v4, %s5534_s0  ;;  %v807_v14 = vadd.f32 %v806_v8, %v805_v6  ;;  %v431_v20 = vadd.f32 %v430_v12, %v425_v11  ;;  %v828_v4 = vmul.f32 %v5872_v57, %v5863_v52  ;;  %v460_v6 = vadd.f32 %v459_v58, %v454_v42 }
 0x108   :  { %v476_v8 = vmul.f32 %v5840_v41, %v5870_v56  ;;  %v827_v11 = vadd.f32 %v826_v63, %v825_v55  ;;  %v835_v12 = vmul.f32 %v5900_v10, %v5822_v32  ;;  %v494_v13 = vmul.f32 %v5900_v10, %v5890_v1  ;;  %v5956_v39 = vpop.permute.xlu0 %514 }
 0x109   :  { %v809_v37 = vadd.f32 %v808_v15, %v807_v14  ;;  %v437_v40 = vadd.f32 %v436_v28, %v431_v20  ;;  %7616 = vst [vmem:[#allocation42_spill] sm:$0xff] %v5956_v39 }
 0x10a   :  { %v477_v15 = vadd.f32 %v476_v8, %v471_v59  ;;  %v829_v20 = vadd.f32 %v828_v4, %v827_v11  ;;  %v837_v55 = vadd.f32 %v836_v17, %v835_v12  ;;  %v500_v58 = vadd.f32 %v499_v34, %v494_v13 }
 0x10b   :  { %v5920_v49 = vpop.permute.xlu1 %502  ;;  %811 = vrot.lane.b32.xlu0 %v809_v37, %s5534_s0  ;;  %439 = vrot.lane.b32.xlu1 %v437_v40, %s5534_s0  ;;  %v845_v59 = vmul.f32 %v5956_v39, %v5882_v61 }
 0x10c   :  { %v838_v28 = vmul.f32 %v5920_v49, %v5832_v36  ;;  %v505_v37 = vmul.f32 %v5920_v49, %v5912_v16  ;;  %v483_v40 = vadd.f32 %v482_v9, %v477_v15  ;;  %v5975_v13 = vpop.permute.xlu0 %537 }
 0x10d   :  { %7618 = vst [vmem:[#allocation44_spill] sm:$0xff] %v5975_v13 }
 0x10e   :  { %v839_v4 = vadd.f32 %v838_v28, %v837_v55  ;;  %v855_v28 = vmul.f32 %v5975_v13, %v5890_v1 }
 0x10f   :  { %821 = vrot.lane.b32.xlu0 %v819_v62, %s5534_s0  ;;  %462 = vrot.lane.b32.xlu1 %v460_v6, %s5534_s0  ;;  %v517_v62 = vmul.f32 %v5956_v39, %v5857_v50  ;;  %v506_v6 = vadd.f32 %v505_v37, %v500_v58  ;;  %v540_v37 = vmul.f32 %v5975_v13, %v5822_v32 }
 0x110   :  { %v5946_v14 = vpop.permute.xlu1 %519  ;;  %v551_v58 = vmul.f32 %v5803_v24, %v5832_v36 }
 0x111   :  { %7615 = vst [vmem:[#allocation41_spill] sm:$0xff] %v5946_v14  ;;  %v846_v42 = vmul.f32 %v5946_v14, %v5870_v56  ;;  %v522_v53 = vmul.f32 %v5946_v14, %v5860_v51 }
 0x113   :  { %831 = vrot.lane.b32.xlu0 %v829_v20, %s5535_s13  ;;  %485 = vrot.lane.b32.xlu1 %v483_v40, %s5534_s0  ;;  %v847_v8 = vadd.f32 %v846_v42, %v845_v59  ;;  %v523_v11 = vadd.f32 %v522_v53, %v517_v62  ;;  %v858_v53 = vmul.f32 %v5803_v24, %v5912_v16 }
 0x115   :  { %v5968_v63 = vpop.permute.xlu1 %525 }
 0x116   :  { %7617 = vst [vmem:[#allocation43_spill] sm:$0xff] %v5968_v63  ;;  %v848_v9 = vmul.f32 %v5968_v63, %v5887_v0  ;;  %v528_v12 = vmul.f32 %v5968_v63, %v5863_v52 }
 0x117   :  { %841 = vrot.lane.b32.xlu0 %v839_v4, %s5535_s13  ;;  %508 = vrot.lane.b32.xlu1 %v506_v6, %s5534_s0 }
 0x118   :  { %v849_v15 = vadd.f32 %v848_v9, %v847_v8  ;;  %v529_v17 = vadd.f32 %v528_v12, %v523_v11 }
 0x11a   :  { %v5978_v20 = vpop.permute.xlu1 %542 }
 0x11b   :  { %7619 = vst [vmem:[#allocation45_spill] sm:$0xff] %v5978_v20  ;;  %851 = vrot.lane.b32.xlu0 %v849_v15, %s5535_s13  ;;  %v856_v34 = vmul.f32 %v5978_v20, %v5879_v60  ;;  %v545_v40 = vmul.f32 %v5978_v20, %v5817_v30  ;;  %531 = vrot.lane.b32.xlu1 %v529_v17, %s5535_s13 }
 0x11c   :  { %v868_v17 = vmul.f32 %v5814_v29, %v5863_v52 }
 0x11d   :  { %v857_v42 = vadd.f32 %v856_v34, %v855_v28  ;;  %v546_v55 = vadd.f32 %v545_v40, %v540_v37  ;;  %v574_v34 = vmul.f32 %v5814_v29, %v5887_v0 }
 0x11f   :  { %v5994_v59 = vpop.permute.xlu1 %560  ;;  %v859_v62 = vadd.f32 %v858_v53, %v857_v42  ;;  %v552_v4 = vadd.f32 %v551_v58, %v546_v55  ;;  %v591_v55 = vmul.f32 %v5847_v45, %v5879_v60 }
 0x120   :  { %7620 = vst [vmem:[#allocation46_spill] sm:$0xff] %v5994_v59  ;;  %v865_v8 = vmul.f32 %v5994_v59, %v5857_v50  ;;  %v563_v11 = vmul.f32 %v5994_v59, %v5882_v61 }
 0x121   :  { %861 = vrot.lane.b32.xlu0 %v859_v62, %s5535_s13  ;;  %554 = vrot.lane.b32.xlu1 %v552_v4, %s5535_s13 }
 0x124   :  { %v5998_v6 = vpop.permute.xlu1 %565 }
 0x125   :  { %7621 = vst [vmem:[#allocation47_spill] sm:$0xff] %v5998_v6  ;;  %v866_v9 = vmul.f32 %v5998_v6, %v5860_v51  ;;  %v568_v12 = vmul.f32 %v5998_v6, %v5870_v56 }
 0x127   :  { %v867_v15 = vadd.f32 %v866_v9, %v865_v8  ;;  %v569_v28 = vadd.f32 %v568_v12, %v563_v11  ;;  %v186_v12 = vld [vmem:[%s5572_s17] sm:$0xff]  ;;  %s5537_s17 = smov 124  }
 0x129   :  { %v6012_v37 = vpop.permute.xlu1 %583  ;;  %v869_v40 = vadd.f32 %v868_v17, %v867_v15  ;;  %v575_v42 = vadd.f32 %v574_v34, %v569_v28  ;;  %v876_v15 = vmul.f32 %v5847_v45, %v5817_v30 }
 0x12a   :  { %7622 = vst [vmem:[#allocation48_spill] sm:$0xff] %v6012_v37  ;;  %v586_v53 = vmul.f32 %v6012_v37, %v5890_v1  ;;  %v875_v11 = vmul.f32 %v6012_v37, %v5822_v32 }
 0x12b   :  { %871 = vrot.lane.b32.xlu0 %v869_v40, %s5536_s4  ;;  %577 = vrot.lane.b32.xlu1 %v575_v42, %s5535_s13  ;;  %v614_v40 = vmul.f32 %v5851_v47, %v5860_v51 }
 0x12c   :  { %v592_v62 = vadd.f32 %v591_v55, %v586_v53  ;;  %v877_v34 = vadd.f32 %v876_v15, %v875_v11  ;;  %v187_v11 = vld [vmem:[%s5577_s21] sm:$0xff]  ;;  %s5545_s21 = smov 2  }
 0x12e   :  { %v6020_v58 = vpop.permute.xlu1 %594 }
 0x12f   :  { %7623 = vst [vmem:[#allocation49_spill] sm:$0xff] %v6020_v58  ;;  %v597_v4 = vmul.f32 %v6020_v58, %v5912_v16  ;;  %v878_v17 = vmul.f32 %v6020_v58, %v5832_v36 }
 0x131   :  { %v598_v8 = vadd.f32 %v597_v4, %v592_v62  ;;  %v879_v53 = vadd.f32 %v878_v17, %v877_v34  ;;  %v6042_v4 = vpop.permute.xlu0 %629 }
 0x132   :  { %7626 = vst [vmem:[#allocation52_spill] sm:$0xff] %v6042_v4  ;;  %v632_v17 = vmul.f32 %v6042_v4, %v5822_v32 }
 0x133   :  { %v6024_v9 = vpop.permute.xlu1 %606  ;;  %600 = vrot.lane.b32.xlu1 %v598_v8, %s5535_s13 }
 0x134   :  { %7624 = vst [vmem:[#allocation50_spill] sm:$0xff] %v6024_v9  ;;  %v609_v28 = vmul.f32 %v6024_v9, %v5857_v50 }
 0x135   :  { %v6051_v15 = vpop.permute.xlu0 %652 }
 0x136   :  { %v615_v55 = vadd.f32 %v614_v40, %v609_v28  ;;  %7628 = vst [vmem:[#allocation54_spill] sm:$0xff] %v6051_v15  ;;  %v655_v2 = vmul.f32 %v6051_v15, %v5882_v61 }
 0x137   :  { %675 = vperm.xlu1 %5341, %v186_v12  }
 0x138   :  { %v6038_v42 = vpop.permute.xlu1 %617 }
 0x139   :  { %7625 = vst [vmem:[#allocation51_spill] sm:$0xff] %v6038_v42  ;;  %v620_v62 = vmul.f32 %v6038_v42, %v5863_v52 }
 0x13b   :  { %881 = vrot.lane.b32.xlu1 %v879_v53, %s5536_s4  ;;  %v621_v8 = vadd.f32 %v620_v62, %v615_v55  ;;  %v885_v53 = vmul.f32 %v6024_v9, %v5882_v61  ;;  %v6061_v62 = vpop.permute.xlu0 %663 }
 0x13c   :  { %7630 = vst [vmem:[#allocation56_spill] sm:$0xff] %v6061_v62  ;;  %v908_v37 = vmul.f32 %v6061_v62, %v5863_v52 }
 0x13d   :  { %v6045_v5 = vpop.permute.xlu1 %634  ;;  %623 = vrot.lane.b32.xlu0 %v621_v8, %s5536_s4  ;;  %v886_v8 = vmul.f32 %v5851_v47, %v5870_v56 }
 0x13e   :  { %7627 = vst [vmem:[#allocation53_spill] sm:$0xff] %v6045_v5  ;;  %v637_v12 = vmul.f32 %v6045_v5, %v5817_v30 }
 0x140   :  { %v638_v34 = vadd.f32 %v637_v12, %v632_v17  ;;  %v887_v12 = vadd.f32 %v886_v8, %v885_v53  ;;  %v896_v17 = vmul.f32 %v6045_v5, %v5879_v60  ;;  %v895_v53 = vmul.f32 %v6042_v4, %v5890_v1 }
 0x141   :  { %681 = vperm.xlu0 %5340, %v187_v11   ;;  %v888_v11 = vmul.f32 %v6038_v42, %v5887_v0  ;;  %v905_v5 = vmul.f32 %v6051_v15, %v5857_v50  ;;  %v7465_v4 = vmov 5  }
 0x142   :  { %v6055_v28 = vpop.permute.xlu1 %640  ;;  %v897_v9 = vadd.f32 %v896_v17, %v895_v53 }
 0x143   :  { %7629 = vst [vmem:[#allocation55_spill] sm:$0xff] %v6055_v28  ;;  %v643_v40 = vmul.f32 %v6055_v28, %v5832_v36  ;;  %v889_v47 = vadd.f32 %v888_v11, %v887_v12 }
 0x145   :  { %v644_v55 = vadd.f32 %v643_v40, %v638_v34  ;;  %v666_v40 = vmul.f32 %v6061_v62, %v5887_v0 }
 0x147   :  { %v6067_v7 = vpop.permute.xlu1 %657  ;;  %646 = vrot.lane.b32.xlu1 %v644_v55, %s5536_s4  ;;  %v898_v55 = vmul.f32 %v6055_v28, %v5912_v16 }
 0x148   :  { %7631 = vst [vmem:[#allocation57_spill] sm:$0xff] %v6067_v7  ;;  %v660_v34 = vmul.f32 %v6067_v7, %v5870_v56  ;;  %v906_v42 = vmul.f32 %v6067_v7, %v5860_v51 }
 0x149   :  { %v899_v11 = vadd.f32 %v898_v55, %v897_v9  ;;  %v7633_v9 = vmov 1   ;;  %v7637_v55 = vmov 0  }
 0x14a   :  { %v661_v8 = vadd.f32 %v660_v34, %v655_v2  ;;  %v907_v45 = vadd.f32 %v906_v42, %v905_v5  ;;  %v189_v2 = vld [vmem:[%s5587_s29] sm:$0xff]  ;;  %v7632_v5 = vmov 2   ;;  %v5541_v34 = vmov 4   ;;  %s7668_s29 = sld [smem:[#allocation10_spill]] }
 0x14b   :  { %891 = vrot.lane.b32.xlu1 %v889_v47, %s5536_s4  ;;  %v7442_v47 = vmov 0.0  }
 0x14c   :  { %v667_v58 = vadd.f32 %v666_v40, %v661_v8  ;;  %v909_v12 = vadd.f32 %v908_v37, %v907_v45  ;;  %4884 = vmatprep.subr.mxu0 %v7442_v47  ;;  %4889 = vmatprep.subr.mxu1 %v7442_v47  ;;  %v6101_v45 = vld [vmem:[%s5597_s8] sm:$0xff]  ;;  %v7454_v37 = vmov 3   ;;  %v6110_v42 = vpop.permute.xlu1 %298  ;;  %s7687_s8 = sld [smem:[#allocation9_spill]] }
 0x14d   :  { %4886 = vmatprep.mubr.msk.f32.mxu0 %vm5539_vm0, %v7442_v47  ;;  %4891 = vmatprep.mubr.msk.f32.mxu1 %vm5539_vm0, %v7442_v47  ;;  %7634 = vst [vmem:[#allocation58_spill] sm:$0xff] %v6110_v42  ;;  %v6118_v40 = vld [vmem:[%s5607_s19] sm:$0xff]  ;;  %v773_v6 = vmul.f32 %v5882_v61, %v6110_v42  ;;  %s7692_s19 = sld [smem:[#allocation13_spill]] }
 0x14e   :  { %669 = vrot.lane.b32.xlu0 %v667_v58, %s5536_s4  ;;  %v6106_v58 = vld [vmem:[%s5592_s3] sm:$0xff]  ;;  %s7669_s3 = sld [smem:[#allocation12_spill]] }
 0x14f   :  { %901 = vrot.lane.b32.xlu1 %v899_v11, %s5536_s4  ;;  %5344 = vset.pattern.permute.xlu0 %v7454_v37  ;;  %v6129_v11 = vld [vmem:[%s5602_s14] sm:$0xff]  ;;  %s7688_s14 = sld [smem:[#allocation11_spill]] }
 0x151   :  { %v6114_v17 = vpop.permute.xlu1 %307 }
 0x152   :  { %911 = vrot.lane.b32.xlu0 %v909_v12, %s5537_s17  ;;  %7635 = vst [vmem:[#allocation59_spill] sm:$0xff] %v6114_v17  ;;  %v314_v29 = vmul.f32 %v5860_v51, %v6114_v17  ;;  %v5543_v51 = vmov 6  }
 0x153   :  { %696 = vperm.xlu1 %5341, %v189_v2   ;;  %v6133_v2 = vpop.permute.xlu0 %348 }
 0x154   :  { %7639 = vst [vmem:[#allocation62_spill] sm:$0xff] %v6133_v2 }
 0x155   :  { %v6121_v53 = vpop.permute.xlu1 %338 }
 0x156   :  { %7636 = vst [vmem:[#allocation60_spill] sm:$0xff] %v6121_v53  ;;  %v345_v59 = vmul.f32 %v5817_v30, %v6121_v53 }
 0x157   :  { %5342 = vset.pattern.permute.xlu1 %v7632_v5  ;;  %v6139_v62 = vpop.permute.xlu0 %329 }
 0x158   :  { %1061 = vperm.xlu1 %5342, %v6101_v45   ;;  %7640 = vst [vmem:[#allocation63_spill] sm:$0xff] %v6139_v62  ;;  %v779_v30 = vmul.f32 %v5890_v1, %v6139_v62 }
 0x15a   :  { %v6126_v8 = vpop.permute.xlu1 %317 }
 0x15b   :  { %7638 = vst [vmem:[#allocation61_spill] sm:$0xff] %v6126_v8 }
 0x15c   :  { %5343 = vset.pattern.permute.xlu1 %v7633_v9 }
 0x15d   :  { %1020 = vperm.xlu1 %5343, %v6106_v58  }
 0x161   :  { %5345 = vset.pattern.permute.xlu1 %v7632_v5 }
 0x162   :  { %1030 = vperm.xlu1 %5345, %v6106_v58  }
 0x164   :  { %v802_v15 = vpop.permute.xlu0 %801 }
 0x166   :  { %5346 = vset.pattern.permute.xlu1 %v5541_v34 }
 0x167   :  { %1081 = vperm.xlu1 %5346, %v6101_v45  }
 0x16b   :  { %5348 = vset.pattern.permute.xlu1 %v7632_v5 }
 0x16c   :  { %1181 = vperm.xlu1 %5348, %v6118_v40  }
 0x170   :  { %5349 = vset.pattern.permute.xlu1 %v7637_v55 }
 0x171   :  { %1048 = vperm.xlu1 %5349, %v6101_v45  }
 0x175   :  { %5350 = vset.pattern.permute.xlu1 %v7632_v5 }
 0x176   :  { %1115 = vperm.xlu1 %5350, %v6129_v11  }
 0x179   :  { %v792_v12 = vpop.permute.xlu1 %791 }
 0x17a   :  { %5352 = vset.pattern.permute.xlu1 %v7454_v37  ;;  %v305_v37 = vmul.f32 %v5857_v50, %v6110_v42  ;;  %v324_v50 = vmul.f32 %v5863_v52, %v6126_v8  ;;  %v355_v52 = vmul.f32 %v5832_v36, %v6133_v2  ;;  %v782_v36 = vmul.f32 %v5912_v16, %v6133_v2 }
 0x17b   :  { %1125 = vperm.xlu1 %5352, %v6129_v11  }
 0x17c   :  { %v315_v13 = vadd.f32 %v314_v29, %v305_v37  ;;  %v780_v29 = vmul.f32 %v5879_v60, %v6121_v53  ;;  %v376_v37 = vmul.f32 %v5870_v56, %v5829_v35 }
 0x17d   :  { %v6137_v47 = vpop.permute.xlu1 %439  ;;  %v812_v5 = vpop.permute.xlu0 %811 }
 0x17e   :  { %v325_v42 = vadd.f32 %v324_v50, %v315_v13  ;;  %v398_v13 = vmul.f32 %v5890_v1, %v5798_v22 }
 0x17f   :  { %5353 = vset.pattern.permute.xlu1 %v5541_v34  ;;  %v336_v34 = vmul.f32 %v5822_v32, %v6139_v62  ;;  %v367_v32 = vmul.f32 %v5882_v61, %v5866_v54  ;;  %v781_v61 = vadd.f32 %v780_v29, %v779_v30 }
 0x180   :  { %1201 = vperm.xlu1 %5353, %v6118_v40  }
 0x181   :  { %v463_v7 = vpop.permute.xlu1 %462  ;;  %v822_v24 = vpop.permute.xlu0 %821  ;;  %v346_v63 = vadd.f32 %v345_v59, %v336_v34  ;;  %v377_v59 = vadd.f32 %v376_v37, %v367_v32  ;;  %v386_v34 = vmul.f32 %v5887_v0, %v5793_v19  ;;  %v783_v50 = vadd.f32 %v782_v36, %v781_v61 }
 0x182   :  { %v417_v32 = vmul.f32 %v5912_v16, %v5836_v38 }
 0x183   :  { %v356_v62 = vadd.f32 %v355_v52, %v346_v63  ;;  %v387_v63 = vadd.f32 %v386_v34, %v377_v59 }
 0x184   :  { %1135 = vperm.xlu1 %5353, %v6129_v11  }
 0x185   :  { %v486_v28 = vpop.permute.xlu1 %485  ;;  %v832_v39 = vpop.permute.xlu0 %831 }
 0x188   :  { %5355 = vset.pattern.permute.xlu1 %v7465_v4  ;;  %v774_v4 = vmul.f32 %v5870_v56, %v6114_v17  ;;  %v776_v17 = vmul.f32 %v5887_v0, %v6126_v8  ;;  %v407_v56 = vmul.f32 %v5879_v60, %v5811_v27 }
 0x189   :  { %1211 = vperm.xlu1 %5355, %v6118_v40   ;;  %v509_v20 = vpop.permute.xlu1 %508  ;;  %v842_v0 = vpop.permute.xlu0 %841 }
 0x18a   :  { %v408_v29 = vadd.f32 %v407_v56, %v398_v13 }
 0x18c   :  { %v418_v52 = vadd.f32 %v417_v32, %v408_v29 }
 0x18d   :  { %5357 = vset.pattern.permute.xlu1 %v5543_v51  ;;  %v775_v51 = vadd.f32 %v774_v4, %v773_v6  ;;  %v532_v53 = vpop.permute.xlu1 %531  ;;  %v357_v6 = vadd.f32 %v356_v62, %v325_v42  ;;  %v5544_v4 = vmov 8  }
 0x18e   :  { %1221 = vperm.xlu1 %5357, %v6118_v40  }
 0x18f   :  { %v777_v14 = vadd.f32 %v776_v17, %v775_v51  ;;  %v388_v17 = vadd.f32 %v387_v63, %v357_v6  ;;  %v852_v51 = vpop.permute.xlu0 %851 }
 0x191   :  { %v784_v60 = vadd.f32 %v783_v50, %v777_v14  ;;  %v419_v42 = vadd.f32 %v418_v52, %v388_v17 }
 0x192   :  { %1155 = vperm.xlu1 %5357, %v6129_v11  }
 0x193   :  { %v555_v30 = vpop.permute.xlu1 %554  ;;  %v794_v37 = vadd.f32 %v792_v12, %v784_v60  ;;  %v442_v61 = vadd.f32 %v6137_v47, %v419_v42  ;;  %v862_v16 = vpop.permute.xlu0 %861 }
 0x195   :  { %v804_v1 = vadd.f32 %v802_v15, %v794_v37  ;;  %v465_v34 = vadd.f32 %v463_v7, %v442_v61 }
 0x196   :  { %5359 = vset.pattern.permute.xlu1 %v5544_v4 }
 0x197   :  { %1241 = vperm.xlu1 %5359, %v6118_v40   ;;  %v814_v36 = vadd.f32 %v812_v5, %v804_v1  ;;  %v488_v4 = vadd.f32 %v486_v28, %v465_v34 }
 0x199   :  { %v824_v14 = vadd.f32 %v822_v24, %v814_v36  ;;  %v511_v6 = vadd.f32 %v509_v20, %v488_v4 }
 0x19b   :  { %5361 = vset.pattern.permute.xlu1 %v7633_v9  ;;  %v834_v12 = vadd.f32 %v832_v39, %v824_v14  ;;  %v534_v13 = vadd.f32 %v532_v53, %v511_v6 }
 0x19d   :  { %v578_v62 = vpop.permute.xlu1 %577  ;;  %v872_v56 = vpop.permute.xlu0 %871  ;;  %v844_v63 = vadd.f32 %v842_v0, %v834_v12  ;;  %v557_v32 = vadd.f32 %v555_v30, %v534_v13 }
 0x19f   :  { %v854_v17 = vadd.f32 %v852_v51, %v844_v63  ;;  %v580_v15 = vadd.f32 %v578_v62, %v557_v32 }
 0x1a1   :  { %v864_v47 = vadd.f32 %v862_v16, %v854_v17 }
 0x1a3   :  { %v874_v5 = vadd.f32 %v872_v56, %v864_v47 }
 0x1a5   :  { %v601_v59 = vpop.permute.xlu1 %600 }
 0x1a6   :  { %v603_v37 = vadd.f32 %v601_v59, %v580_v15 }
 0x1af   :  { %v624_v60 = vpop.permute.xlu0 %623 }
 0x1b0   :  { %v626_v28 = vadd.f32 %v624_v60, %v603_v37 }
 0x1b6   :  { %v6186_v2 = vpop.permute.xlu1 %675 }
 0x1b7   :  { %7641 = vst [vmem:[#allocation64_spill] sm:$0xff] %v6186_v2 }
 0x1ba   :  { %v882_v50 = vpop.permute.xlu1 %881 }
 0x1bb   :  { %v884_v42 = vadd.f32 %v882_v50, %v874_v5 }
 0x1be   :  { %v647_v29 = vpop.permute.xlu1 %646 }
 0x1bf   :  { %v649_v24 = vadd.f32 %v647_v29, %v626_v28  ;;  %v188_v29 = vld [vmem:[%s5582_s25] sm:$0xff] }
 0x1c0   :  { %v6188_v7 = vpop.permute.xlu0 %681 }
 0x1c1   :  { %7642 = vst [vmem:[#allocation65_spill] sm:$0xff] %v6188_v7 }
 0x1c2   :  { %v892_v52 = vpop.permute.xlu1 %891 }
 0x1c3   :  { %v894_v1 = vadd.f32 %v892_v52, %v884_v42  ;;  %v7643_v52 = vmov 0.0  }
 0x1c4   :  { %v670_v20 = vpop.permute.xlu0 %669  ;;  %997 = vst.msk [vmem:[#allocation2] sm:$0xff] %vm996_vm2, %v7643_v52  ;;  %998 = vst.msk [vmem:[#allocation3] sm:$0xff] %vm996_vm2, %v7643_v52 }
 0x1c5   :  { %v672_v39 = vadd.f32 %v670_v20, %v649_v24 }
 0x1c6   :  { %v902_v53 = vpop.permute.xlu1 %901 }
 0x1c7   :  { %v678_v0 = vmul.f32 %v6186_v2, %v672_v39  ;;  %v904_v30 = vadd.f32 %v902_v53, %v894_v1 }
 0x1c8   :  { %v912_v61 = vpop.permute.xlu0 %911 }
 0x1c9   :  { %v684_v62 = vadd.f32 %v6188_v7, %v678_v0  ;;  %v914_v51 = vadd.f32 %v912_v61, %v904_v30  ;;  %v7645_v30 = vmov 3   ;;  %v7646_v61 = vmov 5  }
 0x1cb   :  { %v915_v59 = vmul.f32 %v914_v51, %v6186_v2  ;;  %v686_v34 = vmul.f32 0.044715, %v684_v62  ;;  %v685_v60 = vmul.f32 0.5, %v684_v62 }
 0x1cd   :  { %v916_v16 = vadd.f32 %v915_v59, %v6188_v7  ;;  %v687_v36 = vmul.f32 %v686_v34, %v684_v62 }
 0x1cf   :  { %v688_v4 = vmul.f32 %v687_v36, %v684_v62  ;;  %v918_v14 = vmul.f32 0.044715, %v916_v16  ;;  %v917_v37 = vmul.f32 0.5, %v916_v16 }
 0x1d1   :  { %v689_v6 = vadd.f32 %v688_v4, %v684_v62  ;;  %v919_v56 = vmul.f32 %v918_v14, %v916_v16  ;;  %v5546_v62 = vmov 7  }
 0x1d2   :  { %v6203_v42 = vpop.permute.xlu1 %696 }
 0x1d3   :  { %v690_v12 = vmul.f32 0.7978846, %v689_v6  ;;  %v920_v13 = vmul.f32 %v919_v56, %v916_v16  ;;  %7644 = vst [vmem:[#allocation66_spill] sm:$0xff] %v6203_v42 }
 0x1d5   :  { %5393 = vtanh.f32 %v690_v12  ;;  %v921_v50 = vadd.f32 %v920_v13, %v916_v16 }
 0x1d7   :  { %v922_v63 = vmul.f32 0.7978846, %v921_v50  ;;  %v6221_v51 = vpop.permute.xlu1 %1061 }
 0x1d8   :  { %7647 = vst [vmem:[#allocation67_spill] sm:$0xff] %v6221_v51 }
 0x1d9   :  { %5395 = vtanh.f32 %v922_v63 }
 0x1df   :  { %v5394_v32 = vpop.eup %5393 }
 0x1e0   :  { %v692_v17 = vadd.f32 1.0, %v5394_v32 }
 0x1e2   :  { %v693_v15 = vmul.f32 %v692_v17, %v685_v60 }
 0x1e3   :  { %v5396_v47 = vpop.eup %5395 }
 0x1e4   :  { %4885 = vmatpush3.msra.mxu0 %v693_v15  ;;  %v924_v5 = vadd.f32 1.0, %v5396_v47 }
 0x1e5   :  { %4887 = vmatmul.mubr.msk.f32.vlgmr.msra.gmra.mrb[0].mxu0 %vm699_vm1, %v188_v29 }
 0x1e6   :  { %v925_v28 = vmul.f32 %v924_v5, %v917_v37  ;;  %4902 = vmatprep.mubr.msk.f32.mxu0 %vm5539_vm0, %v7643_v52 }
 0x1e8   :  { %4890 = vmatpush3.msra.mxu1 %v925_v28 }
 0x1e9   :  { %4892 = vmatmul.mubr.msk.f32.vlgmr.msra.gmra.mrb[0].mxu1 %vm699_vm1, %v188_v29 }
 0x2b8   :  { %v769_v24 = vpop.f32.mrb[0].mxu0 }
 0x2b9   :  { %v770_v20 = vadd.f32 %v769_v24, %v6203_v42  ;;  %v4888_v1 = vpop.f32.mrb[1].mxu0 }
 0x2bb   :  { %1000 = vrot.lane.b32.xlu0 %v770_v20, %s5545_s21 }
 0x2bc   :  { %v992_v39 = vpop.f32.mrb[0].mxu1 }
 0x2bd   :  { %v993_v53 = vadd.f32 %v992_v39, %v6203_v42  ;;  %v4893_v0 = vpop.f32.mrb[1].mxu1 }
 0x2bf   :  { %1006 = vrot.lane.b32.xlu0 %v993_v53, %s5545_s21 }
 0x2c3   :  { %1071 = vperm.xlu0 %5344, %v6101_v45  }
 0x2c7   :  { %5347 = vset.pattern.permute.xlu0 %v7633_v9 }
 0x2c8   :  { %1105 = vperm.xlu0 %5347, %v6129_v11  }
 0x2cc   :  { %1055 = vperm.xlu0 %5347, %v6101_v45   ;;  %v6223_v45 = vpop.permute.xlu1 %1020 }
 0x2cd   :  { %7648 = vst [vmem:[#allocation68_spill] sm:$0xff] %v6223_v45 }
 0x2d0   :  { %5351 = vset.pattern.permute.xlu0 %v7645_v30  ;;  %v6225_v59 = vpop.permute.xlu1 %1030 }
 0x2d1   :  { %1191 = vperm.xlu0 %5351, %v6118_v40   ;;  %7649 = vst [vmem:[#allocation69_spill] sm:$0xff] %v6225_v59 }
 0x2d4   :  { %v6227_v34 = vpop.permute.xlu1 %1081 }
 0x2d5   :  { %5354 = vset.pattern.permute.xlu0 %v7637_v55  ;;  %7650 = vst [vmem:[#allocation70_spill] sm:$0xff] %v6227_v34 }
 0x2d6   :  { %1013 = vperm.xlu0 %5354, %v6106_v58  }
 0x2d8   :  { %v6229_v16 = vpop.permute.xlu1 %1181 }
 0x2d9   :  { %7651 = vst [vmem:[#allocation71_spill] sm:$0xff] %v6229_v16 }
 0x2da   :  { %5356 = vset.pattern.permute.xlu0 %v7646_v61 }
 0x2db   :  { %1145 = vperm.xlu0 %5356, %v6129_v11  }
 0x2dc   :  { %v6232_v36 = vpop.permute.xlu1 %1048 }
 0x2dd   :  { %7652 = vst [vmem:[#allocation72_spill] sm:$0xff] %v6232_v36 }
 0x2df   :  { %5358 = vset.pattern.permute.xlu0 %v5546_v62  ;;  %v194_v62 = vld [vmem:[%s5612_s24] sm:$0xff] }
 0x2e0   :  { %1231 = vperm.xlu0 %5358, %v6118_v40   ;;  %v6237_v6 = vpop.permute.xlu1 %1115 }
 0x2e1   :  { %7653 = vst [vmem:[#allocation73_spill] sm:$0xff] %v6237_v6 }
 0x2e4   :  { %5360 = vset.pattern.permute.xlu0 %v7637_v55  ;;  %v6253_v63 = vpop.permute.xlu1 %1125 }
 0x2e5   :  { %7654 = vst [vmem:[#allocation74_spill] sm:$0xff] %v6253_v63 }
 0x2e8   :  { %v6257_v32 = vpop.permute.xlu1 %1201 }
 0x2e9   :  { %7655 = vst [vmem:[#allocation75_spill] sm:$0xff] %v6257_v32 }
 0x2ec   :  { %v6268_v47 = vpop.permute.xlu1 %1135 }
 0x2ed   :  { %7658 = vst [vmem:[#allocation78_spill] sm:$0xff] %v6268_v47 }
 0x2f0   :  { %v6279_v24 = vpop.permute.xlu1 %1211 }
 0x2f1   :  { %7660 = vst [vmem:[#allocation80_spill] sm:$0xff] %v6279_v24 }
 0x2f4   :  { %v6286_v1 = vpop.permute.xlu1 %1221 }
 0x2f5   :  { %7662 = vst [vmem:[#allocation82_spill] sm:$0xff] %v6286_v1 }
 0x2f8   :  { %v6295_v0 = vpop.permute.xlu1 %1155 }
 0x2f9   :  { %7664 = vst [vmem:[#allocation84_spill] sm:$0xff] %v6295_v0 }
 0x32d   :  { %v1001_v58 = vpop.permute.xlu0 %1000 }
 0x32e   :  { %1004 = vst.msk [vmem:[#allocation2] sm:$0xff] %vm1003_vm3, %v1001_v58  ;;  %v195_v58 = vld [vmem:[%s5612_s24 + $0x8] sm:$0xff] }
 0x331   :  { %v1007_v4 = vpop.permute.xlu0 %1006 }
 0x332   :  { %1009 = vst.msk [vmem:[#allocation3] sm:$0xff] %vm1003_vm3, %v1007_v4  ;;  %v6308_v4 = vpop.permute.xlu1 %1241 }
 0x333   :  { %7666 = vst [vmem:[#allocation86_spill] sm:$0xff] %v6308_v4 }
 0x335   :  { %v6235_v14 = vld [vmem:[#allocation2] sm:$0xff] }
 0x336   :  { %v1064_v56 = vmul.f32 %v6235_v14, %v6221_v51  ;;  %v1023_v12 = vmul.f32 %v6235_v14, %v6223_v45  ;;  %3308 = vst.msk [vmem:[#allocation2] sm:$0xff] %vm996_vm2, %v7643_v52  ;;  %v1084_v29 = vmul.f32 %v6235_v14, %v6227_v34  ;;  %v1128_v28 = vmul.f32 %v6235_v14, %v6253_v63 }
 0x337   :  { %v1184_v39 = vmul.f32 %v6229_v16, %v6235_v14  ;;  %v1224_v61 = vmul.f32 %v6286_v1, %v6235_v14 }
 0x338   :  { %1066 = vrot.lane.b32.xlu1 %v1064_v56, %s5534_s0  ;;  %1025 = vrot.lane.b32.xlu0 %v1023_v12, %s5534_s0  ;;  %v1244_v56 = vmul.f32 %v6308_v4, %v6235_v14  ;;  %v196_v12 = vld [vmem:[%s5612_s24 + $0x10] sm:$0xff] }
 0x339   :  { %v6247_v13 = vld [vmem:[#allocation3] sm:$0xff] }
 0x33a   :  { %v1033_v50 = vmul.f32 %v6247_v13, %v6225_v59  ;;  %3309 = vst.msk [vmem:[#allocation3] sm:$0xff] %vm996_vm2, %v7643_v52 }
 0x33c   :  { %1035 = vrot.lane.b32.xlu0 %v1033_v50, %s5534_s0  ;;  %v198_v50 = vld [vmem:[%s5617_s30] sm:$0xff] }
 0x340   :  { %1168 = vperm.xlu0 %5360, %v6118_v40  }
 0x342   :  { %v6259_v60 = vpop.permute.xlu0 %1071 }
 0x343   :  { %7656 = vst [vmem:[#allocation76_spill] sm:$0xff] %v6259_v60  ;;  %v1074_v17 = vmul.f32 %v6247_v13, %v6259_v60 }
 0x345   :  { %1076 = vrot.lane.b32.xlu1 %v1074_v17, %s5534_s0 }
 0x347   :  { %v6264_v15 = vpop.permute.xlu0 %1105 }
 0x348   :  { %7657 = vst [vmem:[#allocation77_spill] sm:$0xff] %v6264_v15  ;;  %v1108_v37 = vmul.f32 %v6235_v14, %v6264_v15 }
 0x349   :  { %1086 = vrot.lane.b32.xlu1 %v1084_v29, %s5535_s13  ;;  %v1118_v29 = vmul.f32 %v6237_v6, %v6247_v13 }
 0x34a   :  { %1110 = vrot.lane.b32.xlu0 %v1108_v37, %s5534_s0  ;;  %v1214_v37 = vmul.f32 %v6279_v24, %v6247_v13 }
 0x34b   :  { %v6274_v5 = vpop.permute.xlu0 %1055 }
 0x34c   :  { %7659 = vst [vmem:[#allocation79_spill] sm:$0xff] %v6274_v5 }
 0x34d   :  { %1175 = vperm.xlu1 %5361, %v6118_v40   ;;  %v1204_v40 = vmul.f32 %v6257_v32, %v6235_v14 }
 0x34e   :  { %1130 = vrot.lane.b32.xlu0 %v1128_v28, %s5535_s13 }
 0x350   :  { %v6282_v20 = vpop.permute.xlu0 %1191 }
 0x351   :  { %7661 = vst [vmem:[#allocation81_spill] sm:$0xff] %v6282_v20  ;;  %5362 = vset.pattern.permute.xlu1 %v7637_v55  ;;  %v1194_v17 = vmul.f32 %v6282_v20, %v6247_v13 }
 0x352   :  { %1098 = vperm.xlu1 %5362, %v6129_v11  }
 0x355   :  { %v6290_v53 = vpop.permute.xlu0 %1013 }
 0x356   :  { %7663 = vst [vmem:[#allocation83_spill] sm:$0xff] %v6290_v53  ;;  %1186 = vrot.lane.b32.xlu1 %v1184_v39, %s5534_s0  ;;  %v1138_v39 = vmul.f32 %v6268_v47, %v6247_v13 }
 0x35a   :  { %v6297_v30 = vpop.permute.xlu0 %1145  ;;  %1206 = vrot.lane.b32.xlu1 %v1204_v40, %s5535_s13 }
 0x35b   :  { %7665 = vst [vmem:[#allocation85_spill] sm:$0xff] %v6297_v30  ;;  %v1148_v11 = vmul.f32 %v6235_v14, %v6297_v30 }
 0x35d   :  { %1150 = vrot.lane.b32.xlu0 %v1148_v11, %s5536_s4  ;;  %v1158_v11 = vmul.f32 %v6295_v0, %v6247_v13 }
 0x35e   :  { %1226 = vrot.lane.b32.xlu1 %v1224_v61, %s5536_s4 }
 0x35f   :  { %v6322_v28 = vpop.permute.xlu0 %1231 }
 0x360   :  { %7667 = vst [vmem:[#allocation87_spill] sm:$0xff] %v6322_v28  ;;  %v1234_v40 = vmul.f32 %v6322_v28, %v6247_v13  ;;  %v207_v28 = vld [vmem:[%s5627_s12 + $0x8] sm:$0xff] }
 0x361   :  { %1257 = vperm.xlu0 %5360, %v194_v62   ;;  %v1016_v62 = vmul.f32 %v6247_v13, %v6290_v53 }
 0x362   :  { %1262 = vperm.xlu1 %5362, %v195_v58  }
 0x365   :  { %1246 = vrot.lane.b32.xlu0 %v1244_v56, %s5537_s17 }
 0x366   :  { %1267 = vperm.xlu1 %5362, %v196_v12  }
 0x369   :  { %1281 = vperm.xlu0 %5360, %v198_v50   ;;  %v1058_v50 = vmul.f32 %v6247_v13, %v6274_v5 }
 0x36a   :  { %1196 = vrot.lane.b32.xlu1 %v1194_v17, %s5534_s0  ;;  %v197_v17 = vld [vmem:[%s5612_s24 + $0x18] sm:$0xff]  ;;  %s7694_s24 = sld [smem:[#allocation14_spill]] }
 0x36d   :  { %1120 = vrot.lane.b32.xlu0 %v1118_v29, %s5534_s0 }
 0x36e   :  { %1216 = vrot.lane.b32.xlu1 %v1214_v37, %s5535_s13  ;;  %v1051_v37 = vmul.f32 %v6235_v14, %v6232_v36 }
 0x371   :  { %1140 = vrot.lane.b32.xlu0 %v1138_v39, %s5535_s13  ;;  %v1059_v39 = vadd.f32 %v1058_v50, %v1051_v37  ;;  %v205_v50 = vld [vmem:[%s5622_s6 + $0x18] sm:$0xff]  ;;  %v200_v37 = vld [vmem:[%s5617_s30 + $0x10] sm:$0xff] }
 0x372   :  { %1236 = vrot.lane.b32.xlu1 %v1234_v40, %s5536_s4  ;;  %v201_v40 = vld [vmem:[%s5617_s30 + $0x18] sm:$0xff] }
 0x375   :  { %1160 = vrot.lane.b32.xlu0 %v1158_v11, %s5536_s4 }
 0x3aa   :  { %v1026_v61 = vpop.permute.xlu0 %1025  ;;  %v1067_v29 = vpop.permute.xlu1 %1066 }
 0x3ab   :  { %v1028_v58 = vadd.f32 %v1026_v61, %v1016_v62  ;;  %v1069_v61 = vadd.f32 %v1067_v29, %v1059_v39  ;;  %v209_v29 = vld [vmem:[%s5627_s12 + $0x18] sm:$0xff]  ;;  %v202_v39 = vld [vmem:[%s5622_s6] sm:$0xff] }
 0x3ae   :  { %v1036_v56 = vpop.permute.xlu0 %1035 }
 0x3af   :  { %v1038_v12 = vadd.f32 %v1036_v56, %v1028_v58  ;;  %v203_v58 = vld [vmem:[%s5622_s6 + $0x8] sm:$0xff] }
 0x3b1   :  { %1040 = vrot.lane.b32.xlu0 %v1038_v12, %s5534_s0 }
 0x3b5   :  { %1272 = vperm.xlu0 %5360, %v197_v17   ;;  %v199_v17 = vld [vmem:[%s5617_s30 + $0x8] sm:$0xff]  ;;  %s7699_s30 = sld [smem:[#allocation16_spill]] }
 0x3b7   :  { %v1077_v11 = vpop.permute.xlu1 %1076 }
 0x3b8   :  { %v1079_v62 = vadd.f32 %v1077_v11, %v1069_v61 }
 0x3b9   :  { %1296 = vperm.xlu0 %5360, %v201_v40   ;;  %v206_v40 = vld [vmem:[%s5627_s12] sm:$0xff] }
 0x3bb   :  { %v1087_v56 = vpop.permute.xlu1 %1086 }
 0x3bc   :  { %v1089_v12 = vadd.f32 %v1087_v56, %v1079_v62  ;;  %v204_v62 = vld [vmem:[%s5622_s6 + $0x10] sm:$0xff]  ;;  %s7700_s6 = sld [smem:[#allocation17_spill]] }
 0x3bd   :  { %1389 = vperm.xlu0 %5360, %v203_v58   ;;  %v208_v56 = vld [vmem:[%s5627_s12 + $0x10] sm:$0xff]  ;;  %s7701_s12 = sld [smem:[#allocation18_spill]] }
 0x3be   :  { %1091 = vrot.lane.b32.xlu1 %v1089_v12, %s5534_s0 }
 0x3bf   :  { %v6353_v11 = vpop.permute.xlu0 %1168 }
 0x3c0   :  { %7670 = vst [vmem:[#allocation88_spill] sm:$0xff] %v6353_v11 }
 0x3c1   :  { %1413 = vperm.xlu0 %5360, %v207_v28  }
 0x3c2   :  { %1286 = vperm.xlu1 %5362, %v199_v17   ;;  %v211_v17 = vld [vmem:[%s7668_s29] sm:$0xf]  ;;  %s4680_s29 = sld [smem:[#allocation5 + $0x3]] }
 0x3c3   :  { %v1111_v58 = vpop.permute.xlu0 %1110 }
 0x3c5   :  { %1399 = vperm.xlu0 %5360, %v205_v50  }
 0x3c6   :  { %1291 = vperm.xlu1 %5362, %v200_v37  }
 0x3c7   :  { %v1131_v50 = vpop.permute.xlu0 %1130 }
 0x3c9   :  { %1423 = vperm.xlu0 %5360, %v209_v29   ;;  %v217_v29 = vld [vmem:[%s7669_s3 + $0x8] sm:$0xff] }
 0x3ca   :  { %1384 = vperm.xlu1 %5362, %v202_v39  }
 0x3cc   :  { %v6355_v61 = vpop.permute.xlu1 %1175 }
 0x3cd   :  { %7671 = vst [vmem:[#allocation89_spill] sm:$0xff] %v6355_v61 }
 0x3ce   :  { %1408 = vperm.xlu1 %5362, %v206_v40   ;;  %v1178_v40 = vmul.f32 %v6355_v61, %v6247_v13 }
 0x3cf   :  { %v1151_v39 = vpop.permute.xlu0 %1150 }
 0x3d1   :  { %v6358_v28 = vpop.permute.xlu1 %1098 }
 0x3d2   :  { %7672 = vst [vmem:[#allocation90_spill] sm:$0xff] %v6358_v28  ;;  %1394 = vperm.xlu1 %5362, %v204_v62   ;;  %v1171_v62 = vmul.f32 %v6353_v11, %v6235_v14 }
 0x3d4   :  { %v1179_v47 = vadd.f32 %v1178_v40, %v1171_v62 }
 0x3d5   :  { %v1187_v12 = vpop.permute.xlu1 %1186 }
 0x3d6   :  { %1418 = vperm.xlu1 %5362, %v208_v56   ;;  %v1189_v20 = vadd.f32 %v1187_v12, %v1179_v47 }
 0x3d9   :  { %v1207_v37 = vpop.permute.xlu1 %1206 }
 0x3da   :  { %1432 = vperm.xlu1 %5362, %v211_v17   ;;  %v1101_v17 = vmul.f32 %v6358_v28, %v6247_v13 }
 0x3dc   :  { %v1113_v30 = vadd.f32 %v1111_v58, %v1101_v17 }
 0x3dd   :  { %v1227_v4 = vpop.permute.xlu1 %1226 }
 0x3de   :  { %1516 = vperm.xlu1 %5362, %v217_v29  }
 0x3e0   :  { %v6363_v53 = vpop.permute.xlu0 %1257 }
 0x3e1   :  { %7673 = vst [vmem:[#allocation91_spill] sm:$0xff] %v6363_v53  ;;  %v6365_v0 = vpop.permute.xlu1 %1262 }
 0x3e2   :  { %7674 = vst [vmem:[#allocation92_spill] sm:$0xff] %v6365_v0 }
 0x3e4   :  { %v1247_v24 = vpop.permute.xlu0 %1246 }
 0x3e5   :  { %v6371_v56 = vpop.permute.xlu1 %1267 }
 0x3e6   :  { %7675 = vst [vmem:[#allocation93_spill] sm:$0xff] %v6371_v56 }
 0x3e8   :  { %v6375_v6 = vpop.permute.xlu0 %1281 }
 0x3e9   :  { %7676 = vst [vmem:[#allocation94_spill] sm:$0xff] %v6375_v6  ;;  %v1197_v29 = vpop.permute.xlu1 %1196 }
 0x3ea   :  { %v1199_v1 = vadd.f32 %v1197_v29, %v1189_v20  ;;  %v7503_v20 = vmov 0.0|0.0  }
 0x3eb   :  { %5130 = vmatprep.subr.bf16.mxu0 %v7503_v20 }
 0x3ec   :  { %v1121_v32 = vpop.permute.xlu0 %1120  ;;  %v1209_v63 = vadd.f32 %v1207_v37, %v1199_v1 }
 0x3ed   :  { %v1123_v16 = vadd.f32 %v1121_v32, %v1113_v30  ;;  %v1217_v15 = vpop.permute.xlu1 %1216 }
 0x3ee   :  { %v1219_v34 = vadd.f32 %v1217_v15, %v1209_v63 }
 0x3ef   :  { %v1133_v61 = vadd.f32 %v1131_v50, %v1123_v16 }
 0x3f0   :  { %v1141_v14 = vpop.permute.xlu0 %1140  ;;  %v1229_v11 = vadd.f32 %v1227_v4, %v1219_v34 }
 0x3f1   :  { %v1143_v5 = vadd.f32 %v1141_v14, %v1133_v61  ;;  %v1237_v36 = vpop.permute.xlu1 %1236 }
 0x3f2   :  { %v1239_v40 = vadd.f32 %v1237_v36, %v1229_v11 }
 0x3f3   :  { %v1153_v62 = vadd.f32 %v1151_v39, %v1143_v5 }
 0x3f4   :  { %v1249_v13 = vadd.f32 %v1247_v24, %v1239_v40  ;;  %v1161_v47 = vpop.permute.xlu0 %1160 }
 0x3f5   :  { %v1163_v12 = vadd.f32 %v1161_v47, %v1153_v62 }
 0x3f6   :  { %1250 = vst.msk [vmem:[#allocation4 + $0x18] sm:$0xff] %vm1043_vm4, %v1249_v13 }
 0x3f7   :  { %1164 = vst.msk [vmem:[#allocation4 + $0x10] sm:$0xff] %vm1043_vm4, %v1163_v12 }
 0x3fd   :  { %v1254_v5 = vld [vmem:[#allocation4 + $0x18] sm:$0xff] }
 0x3fe   :  { %v1253_v14 = vld [vmem:[#allocation4 + $0x10] sm:$0xff] }
 0x3ff   :  { %v1277_v47 = vmul.f32 %v6371_v56, %v1253_v14 }
 0x423   :  { %v1041_v32 = vpop.permute.xlu0 %1040 }
 0x424   :  { %1044 = vst.msk [vmem:[#allocation4] sm:$0xff] %vm1043_vm4, %v1041_v32 }
 0x42b   :  { %v1251_v16 = vld [vmem:[#allocation4] sm:$0xff] }
 0x42c   :  { %v1275_v34 = vmul.f32 %v6363_v53, %v1251_v16 }
 0x42e   :  { %v1299_v36 = vadd.f32 %v6375_v6, %v1275_v34 }
 0x430   :  { %v1092_v63 = vpop.permute.xlu1 %1091  ;;  %v1307_v24 = vmul.f32 0.044715, %v1299_v36 }
 0x431   :  { %1094 = vst.msk [vmem:[#allocation4 + $0x8] sm:$0xff] %vm1043_vm4, %v1092_v63 }
 0x432   :  { %v1311_v11 = vmul.f32 %v1307_v24, %v1299_v36 }
 0x434   :  { %v6384_v15 = vpop.permute.xlu0 %1272  ;;  %v1315_v37 = vmul.f32 %v1311_v11, %v1299_v36 }
 0x435   :  { %7677 = vst [vmem:[#allocation95_spill] sm:$0xff] %v6384_v15  ;;  %v1278_v1 = vmul.f32 %v6384_v15, %v1254_v5 }
 0x436   :  { %v1319_v62 = vadd.f32 %v1315_v37, %v1299_v36 }
 0x438   :  { %v6387_v30 = vpop.permute.xlu0 %1296  ;;  %v1252_v50 = vld [vmem:[#allocation4 + $0x8] sm:$0xff]  ;;  %v1323_v63 = vmul.f32 0.7978846, %v1319_v62  ;;  %v1303_v62 = vmul.f32 0.5, %v1299_v36 }
 0x439   :  { %7678 = vst [vmem:[#allocation96_spill] sm:$0xff] %v6387_v30  ;;  %v1302_v4 = vadd.f32 %v6387_v30, %v1278_v1  ;;  %v1276_v39 = vmul.f32 %v6365_v0, %v1252_v50 }
 0x43a   :  { %5397 = vtanh.f32 %v1323_v63 }
 0x43b   :  { %v1310_v61 = vmul.f32 0.044715, %v1302_v4 }
 0x43c   :  { %v6422_v6 = vpop.permute.xlu0 %1389 }
 0x43d   :  { %v1314_v58 = vmul.f32 %v1310_v61, %v1302_v4  ;;  %7681 = vst [vmem:[#allocation99_spill] sm:$0xff] %v6422_v6 }
 0x43f   :  { %v1318_v17 = vmul.f32 %v1314_v58, %v1302_v4 }
 0x441   :  { %v6391_v29 = vpop.permute.xlu1 %1286  ;;  %v1322_v12 = vadd.f32 %v1318_v17, %v1302_v4 }
 0x442   :  { %7679 = vst [vmem:[#allocation97_spill] sm:$0xff] %v6391_v29  ;;  %v1300_v40 = vadd.f32 %v6391_v29, %v1276_v39 }
 0x443   :  { %v1326_v1 = vmul.f32 0.7978846, %v1322_v12 }
 0x444   :  { %v1308_v13 = vmul.f32 0.044715, %v1300_v40  ;;  %v5398_v17 = vpop.eup %5397  ;;  %v1304_v30 = vmul.f32 0.5, %v1300_v40 }
 0x445   :  { %v6395_v32 = vpop.permute.xlu1 %1291  ;;  %5399 = vtanh.f32 %v1326_v1  ;;  %v1331_v20 = vadd.f32 1.0, %v5398_v17 }
 0x446   :  { %7680 = vst [vmem:[#allocation98_spill] sm:$0xff] %v6395_v32  ;;  %v1312_v16 = vmul.f32 %v1308_v13, %v1300_v40  ;;  %v1301_v34 = vadd.f32 %v6395_v32, %v1277_v47 }
 0x447   :  { %v6400_v12 = vmul.f32 %v1331_v20, %v1303_v62 }
 0x448   :  { %v1316_v5 = vmul.f32 %v1312_v16, %v1300_v40  ;;  %v1309_v24 = vmul.f32 0.044715, %v1301_v34  ;;  %v1305_v1 = vmul.f32 0.5, %v1301_v34 }
 0x44a   :  { %v1320_v11 = vadd.f32 %v1316_v5, %v1300_v40  ;;  %v1313_v61 = vmul.f32 %v1309_v24, %v1301_v34 }
 0x44c   :  { %v1324_v58 = vmul.f32 0.7978846, %v1320_v11  ;;  %v1317_v50 = vmul.f32 %v1313_v61, %v1301_v34  ;;  %v1306_v61 = vmul.f32 0.5, %v1302_v4 }
 0x44e   :  { %5401 = vtanh.f32 %v1324_v58  ;;  %v1321_v37 = vadd.f32 %v1317_v50, %v1301_v34  ;;  %v1339_v50 = vsel %vm1043_vm4, %v6400_v12, 0.0 }
 0x44f   :  { %v5400_v14 = vpop.eup %5399 }
 0x450   :  { %v1325_v39 = vmul.f32 0.7978846, %v1321_v37  ;;  %v1334_v5 = vadd.f32 1.0, %v5400_v14 }
 0x452   :  { %5403 = vtanh.f32 %v1325_v39  ;;  %v6408_v40 = vmul.f32 %v1334_v5, %v1306_v61 }
 0x454   :  { %v1344_v37 = vsel %vm1043_vm4, %v6408_v40, 0.0 }
 0x458   :  { %v5402_v13 = vpop.eup %5401 }
 0x459   :  { %v1332_v47 = vadd.f32 1.0, %v5402_v13 }
 0x45b   :  { %v6398_v16 = vmul.f32 %v1332_v47, %v1304_v30 }
 0x45c   :  { %v5404_v63 = vpop.eup %5403 }
 0x45d   :  { %v1340_v24 = vsel %vm1043_vm4, %v6398_v16, 0.0  ;;  %v1333_v11 = vadd.f32 1.0, %v5404_v63 }
 0x45e   :  { %v1341_v36 = vadd.f32 %v1340_v24, %v1339_v50 }
 0x45f   :  { %v6404_v58 = vmul.f32 %v1333_v11, %v1305_v1 }
 0x461   :  { %v1342_v20 = vsel %vm1043_vm4, %v6404_v58, 0.0 }
 0x462   :  { %v1343_v30 = vadd.f32 %v1342_v20, %v1341_v36 }
 0x464   :  { %v1345_v39 = vadd.f32 %v1344_v37, %v1343_v30 }
 0x466   :  { %v1346_v17 = vrot.slane %v1345_v39, 4 }
 0x468   :  { %v1347_v34 = vadd.f32 %v1346_v17, %v1345_v39 }
 0x46a   :  { %v1348_v14 = vrot.slane %v1347_v34, 2 }
 0x46c   :  { %v1349_v4 = vadd.f32 %v1348_v14, %v1347_v34 }
 0x46e   :  { %v1350_v13 = vrot.slane %v1349_v4, 1 }
 0x470   :  { %v1351_v47 = vadd.f32 %v1350_v13, %v1349_v4 }
 0x472   :  { %v1353_v62 = vmul.f32 0.03125, %v1351_v47 }
 0x474   :  { %v1354_v63 = vsub.f32 %v6400_v12, %v1353_v62  ;;  %v1355_v5 = vsub.f32 %v6398_v16, %v1353_v62  ;;  %v1356_v24 = vsub.f32 %v6404_v58, %v1353_v62  ;;  %v1357_v1 = vsub.f32 %v6408_v40, %v1353_v62 }
 0x476   :  { %v1358_v11 = vmul.f32 %v1354_v63, %v1354_v63  ;;  %v1359_v61 = vmul.f32 %v1355_v5, %v1355_v5  ;;  %v1360_v50 = vmul.f32 %v1356_v24, %v1356_v24  ;;  %v1361_v36 = vmul.f32 %v1357_v1, %v1357_v1 }
 0x478   :  { %v1362_v20 = vsel %vm1043_vm4, %v1358_v11, 0.0  ;;  %v1363_v30 = vsel %vm1043_vm4, %v1359_v61, 0.0  ;;  %v1365_v39 = vsel %vm1043_vm4, %v1360_v50, 0.0  ;;  %v1367_v34 = vsel %vm1043_vm4, %v1361_v36, 0.0  ;;  %v6424_v11 = vpop.permute.xlu1 %1384  ;;  %v6426_v61 = vpop.permute.xlu0 %1413 }
 0x479   :  { %v1364_v37 = vadd.f32 %v1363_v30, %v1362_v20  ;;  %7682 = vst [vmem:[#allocation100_spill] sm:$0xff] %v6424_v11  ;;  %7683 = vst [vmem:[#allocation101_spill] sm:$0xff] %v6426_v61 }
 0x47b   :  { %v1366_v17 = vadd.f32 %v1365_v39, %v1364_v37 }
 0x47c   :  { %v6428_v50 = vpop.permute.xlu1 %1408  ;;  %v6430_v36 = vpop.permute.xlu0 %1399 }
 0x47d   :  { %v1368_v14 = vadd.f32 %v1367_v34, %v1366_v17  ;;  %7684 = vst [vmem:[#allocation102_spill] sm:$0xff] %v6428_v50  ;;  %7685 = vst [vmem:[#allocation103_spill] sm:$0xff] %v6430_v36 }
 0x47f   :  { %v1369_v4 = vrot.slane %v1368_v14, 4 }
 0x480   :  { %v6432_v30 = vpop.permute.xlu1 %1394 }
 0x481   :  { %v1370_v13 = vadd.f32 %v1369_v4, %v1368_v14  ;;  %7686 = vst [vmem:[#allocation104_spill] sm:$0xff] %v6432_v30 }
 0x483   :  { %v1371_v47 = vrot.slane %v1370_v13, 2 }
 0x485   :  { %v1372_v15 = vadd.f32 %v1371_v47, %v1370_v13  ;;  %v6440_v13 = vpop.permute.xlu0 %1423  ;;  %v7691_v47 = vmov 0.0|0.0  }
 0x486   :  { %7689 = vst [vmem:[#allocation105_spill] sm:$0xff] %v6440_v13 }
 0x487   :  { %v1373_v62 = vrot.slane %v1372_v15, 1 }
 0x489   :  { %v1374_v29 = vadd.f32 %v1373_v62, %v1372_v15 }
 0x48b   :  { %v1375_v0 = vmul.f32 0.03125, %v1374_v29 }
 0x48d   :  { %v1376_v53 = vadd.f32 1e-05, %v1375_v0 }
 0x48f   :  { %5405 = vrsqrt.f32 %v1376_v53 }
 0x499   :  { %v5406_v20 = vpop.eup %5405 }
 0x49a   :  { %v1381_v37 = vmul.f32 %v5406_v20, %v1357_v1  ;;  %v1378_v39 = vmul.f32 %v5406_v20, %v1354_v63  ;;  %v1379_v17 = vmul.f32 %v5406_v20, %v1355_v5  ;;  %v1380_v15 = vmul.f32 %v5406_v20, %v1356_v24  ;;  %v6442_v1 = vpop.permute.xlu1 %1418  ;;  %v210_v20 = vld [vmem:[%s7687_s8] sm:$0xf] }
 0x49b   :  { %7690 = vst [vmem:[#allocation106_spill] sm:$0xff] %v6442_v1 }
 0x49c   :  { %v1405_v29 = vmul.f32 %v6430_v36, %v1381_v37  ;;  %v1402_v0 = vmul.f32 %v6424_v11, %v1378_v39  ;;  %v1403_v53 = vmul.f32 %v6422_v6, %v1379_v17  ;;  %v1404_v34 = vmul.f32 %v6432_v30, %v1380_v15  ;;  %v212_v37 = vld [vmem:[%s7688_s14] sm:$0xff]  ;;  %v213_v39 = vld [vmem:[%s7688_s14 + $0x8] sm:$0xff]  ;;  %v214_v17 = vld [vmem:[%s7688_s14 + $0x10] sm:$0xff] }
 0x49d   :  { %v215_v15 = vld [vmem:[%s7688_s14 + $0x18] sm:$0xff] }
 0x49e   :  { %v1427_v14 = vadd.f32 %v6426_v61, %v1403_v53  ;;  %v1426_v4 = vadd.f32 %v6428_v50, %v1402_v0  ;;  %v1429_v63 = vadd.f32 %v6440_v13, %v1405_v29  ;;  %v1428_v24 = vadd.f32 %v6442_v1, %v1404_v34  ;;  %v220_v29 = vld [vmem:[%s7692_s19] sm:$0xff]  ;;  %v221_v0 = vld [vmem:[%s7692_s19 + $0x8] sm:$0xff]  ;;  %v6462_v53 = vpop.permute.xlu1 %1432  ;;  %v219_v13 = vld [vmem:[%s7669_s3 + $0x18] sm:$0xff] }
 0x49f   :  { %7693 = vst [vmem:[#allocation107_spill] sm:$0xff] %v6462_v53  ;;  %v7521_v61 = vsub.s32 3, %v5801_v23 }
 0x4a0   :  { %v5131_v5 = vpack.c.bf16 %v1427_v14, %v1426_v4  ;;  %v5134_v62 = vpack.c.bf16 %v1429_v63, %v1428_v24 }
 0x4a2   :  { %5132 = vmatpush3.bf16.msra.mxu0 %v5131_v5  ;;  %v6482_v1 = vpop.permute.xlu1 %1516 }
 0x4a3   :  { %5133 = vmatprep.subr.bf16.mxu0 %v7691_v47  ;;  %7695 = vst [vmem:[#allocation108_spill] sm:$0xff] %v6482_v1 }
 0x4a6   :  { %5135 = vmatpush3.bf16.msra.mxu0 %v5134_v62 }
 0x4a7   :  { %5137 = vmatprep.subr.bf16.mxu0 %v5131_v5 }
 0x4a9   :  { %4903 = vmatmul.mubr.msk.f32.vlgmr.msra.gmra.mrb[2].mxu0 %vm1435_vm5, %v210_v20 }
 0x4aa   :  { %5139 = vmatpush3.bf16.msra.mxu0 %v5131_v5  ;;  %4913 = vmatprep.mubr.msk.f32.mxu0 %vm1435_vm5, %v212_v37  ;;  %v218_v37 = vld [vmem:[%s7669_s3 + $0x10] sm:$0xff] }
 0x4ab   :  { %5141 = vmatprep.subr.bf16.mxu0 %v5134_v62 }
 0x4ae   :  { %5143 = vmatpush3.bf16.msra.mxu0 %v5134_v62 }
 0x4af   :  { %5145 = vmatprep.subr.bf16.mxu0 %v5131_v5 }
 0x4b1   :  { %4914 = vmatmul.mubr.msk.f32.vlgmr.msra.gmra.mrb[4].mxu0 %vm1435_vm5, %v213_v39 }
 0x4b2   :  { %5147 = vmatpush3.bf16.msra.mxu0 %v5131_v5  ;;  %4916 = vmatprep.mubr.msk.f32.mxu0 %vm1435_vm5, %v214_v17 }
 0x4b3   :  { %5149 = vmatprep.subr.bf16.mxu0 %v5134_v62 }
 0x4b5   :  { %4917 = vmatmul.mubr.msk.f32.gmra.mrb[6].mxu0 %vm1435_vm5, %v215_v15  ;;  %v224_v15 = vld [vmem:[%s7694_s24] sm:$0xff] }
 0x4b6   :  { %5151 = vmatpush3.bf16.msra.mxu0 %v5134_v62  ;;  %4927 = vmatprep.mubr.msk.f32.mxu0 %vm1435_vm5, %v220_v29  ;;  %v216_v62 = vld [vmem:[%s7669_s3] sm:$0xff]  ;;  %s7779_s3 = sld [smem:[#allocation28_spill]] }
 0x4b7   :  { %5160 = vmatprep.subr.bf16.mxu0 %v7691_v47 }
 0x4b9   :  { %4928 = vmatmul.mubr.msk.f32.vlgmr.msra.gmra.mrb[8].mxu0 %vm1435_vm5, %v221_v0  ;;  %v222_v0 = vld [vmem:[%s7692_s19 + $0x10] sm:$0xff] }
 0x4ba   :  { %4930 = vmatprep.mubr.msk.f32.mxu0 %vm1435_vm5, %v222_v0 }
 0x57c   :  { %v1505_v34 = vpop.f32.mrb[2].mxu0 }
 0x57d   :  { %v1506_v14 = vadd.f32 %v1505_v34, %v6462_v53  ;;  %v4904_v4 = vpop.f32.mrb[3].mxu0  ;;  %v223_v34 = vld [vmem:[%s7692_s19 + $0x18] sm:$0xff] }
 0x57e   :  { %4931 = vmatmul.mubr.msk.f32.gmra.mrb[10].mxu0 %vm1435_vm5, %v223_v34 }
 0x57f   :  { %v1744_v63 = vsel %vm1743_vm6, %v1506_v14, -inf  ;;  %4955 = vmatprep.mubr.msk.f32.mxu0 %vm5539_vm0, %v7643_v52 }
 0x580   :  { %1745 = vmax.xlane.f32.xlu0 %v1744_v63 }
 0x584   :  { %v4915_v5 = vpop.f32.mrb[4].mxu0 }
 0x585   :  { %v1607_v24 = vpop.f32.mrb[5].mxu0 }
 0x588   :  { %v4918_v20 = vpop.f32.mrb[6].mxu0 }
 0x589   :  { %v1617_v39 = vpop.f32.mrb[7].mxu0 }
 0x58c   :  { %v6468_v17 = vpop.f32.mrb[8].mxu0 }
 0x58d   :  { %v6471_v29 = vpop.f32.mrb[9].mxu0 }
 0x596   :  { %1511 = vperm.xlu0 %5360, %v216_v62  }
 0x59a   :  { %1521 = vperm.xlu0 %5360, %v218_v37  }
 0x59e   :  { %1628 = vperm.xlu0 %5360, %v224_v15   ;;  %v225_v15 = vld [vmem:[%s7694_s24 + $0x8] sm:$0xff] }
 0x60d   :  { %v1746_v4 = vpop.xlane.xlu0 %1745 }
 0x60e   :  { %v1747_v63 = vsub.f32 %v1506_v14, %v1746_v4  ;;  %v1613_v4 = vadd.f32 %v4915_v5, %v6482_v1 }
 0x610   :  { %v1748_v62 = vmul.f32 1.442695, %v1747_v63 }
 0x612   :  { %5407 = vpow2.f32 %v1748_v62 }
 0x615   :  { %v6484_v34 = vpop.permute.xlu0 %1511 }
 0x616   :  { %7696 = vst [vmem:[#allocation109_spill] sm:$0xff] %v6484_v34  ;;  %v1608_v63 = vadd.f32 %v1607_v24, %v6484_v34 }
 0x619   :  { %v6489_v62 = vpop.permute.xlu0 %1521 }
 0x61a   :  { %7697 = vst [vmem:[#allocation110_spill] sm:$0xff] %v6489_v62 }
 0x61c   :  { %v5408_v37 = vpop.eup %5407 }
 0x61d   :  { %v1750_v53 = vsel %vm1743_vm6, %v5408_v37, 0.0 }
 0x61e   :  { %1751 = vadd.xlane.f32.xlu1 %v1750_v53 }
 0x62f   :  { %1526 = vperm.xlu1 %5362, %v219_v13  }
 0x633   :  { %1633 = vperm.xlu1 %5362, %v225_v15  }
 0x6ab   :  { %v1752_v0 = vpop.xlane.xlu1 %1751 }
 0x6ac   :  { %5409 = vrcp.f32 %v1752_v0 }
 0x6af   :  { %v6491_v53 = vpop.permute.xlu1 %1526 }
 0x6b0   :  { %7698 = vst [vmem:[#allocation111_spill] sm:$0xff] %v6491_v53  ;;  %v1623_v5 = vadd.f32 %v4918_v20, %v6491_v53  ;;  %v6504_v20 = vpop.f32.mrb[10].mxu0  ;;  %v4738_v53 = vld [vmem:[%s7711_s28 + $0x2] sm:$0x3] }
 0x6b1   :  { %v6613_v28 = vrot.slane %v4738_v53, %v5809_v26 }
 0x6b3   :  { %7721 = vst [vmem:[#allocation127_spill] sm:$0xff] %v6613_v28 }
 0x6b6   :  { %v5410_v50 = vpop.eup %5409 }
 0x6b7   :  { %v1754_v14 = vmul.f32 %v5410_v50, %v5408_v37  ;;  %v1618_v50 = vadd.f32 %v1617_v39, %v6489_v62 }
 0x6b9   :  { %v1769_v13 = vrot.slane %v1754_v14, %v5806_v25  ;;  %v1758_v15 = vrot.slane %v1754_v14, %v5809_v26  ;;  %v1780_v0 = vrot.slane %v1754_v14, %v5825_v33  ;;  %v1791_v36 = vrot.slane %v1754_v14, %v7521_v61 }
 0x6bb   :  { %v1770_v24 = vmul.f32 %v1769_v13, %v1613_v4  ;;  %v1759_v37 = vmul.f32 %v1758_v15, %v1608_v63  ;;  %v1781_v30 = vmul.f32 %v1780_v0, %v1618_v50  ;;  %v1792_v6 = vmul.f32 %v1791_v36, %v1623_v5  ;;  %v227_v4 = vld [vmem:[%s7694_s24 + $0x18] sm:$0xff]  ;;  %v233_v63 = vld [vmem:[%s7699_s30 + $0x8] sm:$0xff]  ;;  %v226_v13 = vld [vmem:[%s7694_s24 + $0x10] sm:$0xff]  ;;  %s7780_s24 = sld [smem:[#allocation27_spill]] }
 0x6bc   :  { %v235_v36 = vld [vmem:[%s7699_s30 + $0x18] sm:$0xff]  ;;  %v241_v15 = vld [vmem:[%s7701_s12 + $0x8] sm:$0xff]  ;;  %v236_v0 = vld [vmem:[%s7700_s6] sm:$0xff] }
 0x6bd   :  { %v1771_v34 = vsel %vm1043_vm4, %v1770_v24, 0.0  ;;  %v1760_v1 = vsel %vm1043_vm4, %v1759_v37, 0.0  ;;  %v1782_v14 = vsel %vm1043_vm4, %v1781_v30, 0.0  ;;  %v1793_v39 = vsel %vm1043_vm4, %v1792_v6, 0.0  ;;  %v6510_v30 = vpop.f32.mrb[11].mxu0  ;;  %v232_v6 = vld [vmem:[%s7699_s30] sm:$0xff] }
 0x6be   :  { %1772 = vadd.xlane.f32.xlu1 %v1771_v34  ;;  %1761 = vadd.xlane.f32.xlu0 %v1760_v1  ;;  %v237_v1 = vld [vmem:[%s7700_s6 + $0x8] sm:$0xff]  ;;  %v234_v34 = vld [vmem:[%s7699_s30 + $0x10] sm:$0xff]  ;;  %v239_v50 = vld [vmem:[%s7700_s6 + $0x18] sm:$0xff] }
 0x6bf   :  { %v240_v5 = vld [vmem:[%s7701_s12] sm:$0xff]  ;;  %v243_v24 = vld [vmem:[%s7701_s12 + $0x18] sm:$0xff]  ;;  %v238_v37 = vld [vmem:[%s7700_s6 + $0x10] sm:$0xff] }
 0x6c2   :  { %1783 = vadd.xlane.f32.xlu0 %v1782_v14  ;;  %1794 = vadd.xlane.f32.xlu1 %v1793_v39  ;;  %v228_v14 = vld [vmem:[%s7702_s22] sm:$0xff]  ;;  %v257_v39 = vld [vmem:[%s7703_s23 + $0x18] sm:$0xff] }
 0x6c3   :  { %4941 = vmatprep.mubr.msk.f32.mxu1 %vm1435_vm5, %v228_v14 }
 0x6d3   :  { %1643 = vperm.xlu1 %5362, %v227_v4   ;;  %v242_v4 = vld [vmem:[%s7701_s12 + $0x10] sm:$0xff] }
 0x6d7   :  { %1810 = vperm.xlu1 %5362, %v233_v63   ;;  %v256_v63 = vld [vmem:[%s7703_s23 + $0x10] sm:$0xff] }
 0x6d8   :  { %1638 = vperm.xlu0 %5360, %v226_v13   ;;  %v258_v13 = vld [vmem:[%s7703_s23 + $0x20] sm:$0xff] }
 0x6db   :  { %1820 = vperm.xlu1 %5362, %v235_v36   ;;  %v259_v36 = vld [vmem:[%s7703_s23 + $0x28] sm:$0xff] }
 0x6dc   :  { %1805 = vperm.xlu0 %5360, %v232_v6   ;;  %v254_v6 = vld [vmem:[%s7703_s23] sm:$0xff] }
 0x6df   :  { %1983 = vperm.xlu1 %5362, %v237_v1   ;;  %v255_v1 = vld [vmem:[%s7703_s23 + $0x8] sm:$0xff] }
 0x6e0   :  { %1815 = vperm.xlu0 %5360, %v234_v34   ;;  %v261_v34 = vld [vmem:[%s7704_s26 + $0x8] sm:$0xff] }
 0x6e3   :  { %2007 = vperm.xlu1 %5362, %v241_v15   ;;  %v260_v15 = vld [vmem:[%s7704_s26] sm:$0xff] }
 0x6e4   :  { %1978 = vperm.xlu0 %5360, %v236_v0   ;;  %v6542_v0 = vpop.permute.xlu0 %1628 }
 0x6e5   :  { %7705 = vst [vmem:[#allocation112_spill] sm:$0xff] %v6542_v0 }
 0x6e7   :  { %1993 = vperm.xlu1 %5362, %v239_v50   ;;  %v6544_v50 = vpop.permute.xlu1 %1633 }
 0x6e8   :  { %2002 = vperm.xlu0 %5360, %v240_v5   ;;  %7706 = vst [vmem:[#allocation113_spill] sm:$0xff] %v6544_v50  ;;  %v1725_v5 = vadd.f32 %v6471_v29, %v6542_v0 }
 0x6eb   :  { %2017 = vperm.xlu1 %5362, %v243_v24   ;;  %v1730_v24 = vadd.f32 %v6468_v17, %v6544_v50 }
 0x6ec   :  { %1988 = vperm.xlu0 %5360, %v238_v37   ;;  %v1763_v37 = vmax.f32 %v1725_v5, 0.0 }
 0x6ef   :  { %2301 = vperm.xlu1 %5362, %v257_v39  }
 0x6f0   :  { %2012 = vperm.xlu0 %5360, %v242_v4  }
 0x6f3   :  { %5365 = vset.pattern.permute.xlu1 %v7633_v9 }
 0x6f4   :  { %5363 = vset.pattern.permute.xlu0 %v7633_v9  ;;  %2311 = vperm.xlu1 %5365, %v257_v39  }
 0x6f5   :  { %2307 = vperm.xlu0 %5363, %v256_v63  }
 0x6f8   :  { %5366 = vset.pattern.permute.xlu1 %v7637_v55 }
 0x6f9   :  { %5364 = vset.pattern.permute.xlu0 %v7637_v55  ;;  %2330 = vperm.xlu1 %5366, %v258_v13  }
 0x6fa   :  { %2296 = vperm.xlu0 %5364, %v256_v63  }
 0x6fd   :  { %5367 = vset.pattern.permute.xlu1 %v7633_v9 }
 0x6fe   :  { %2341 = vperm.xlu1 %5367, %v258_v13   ;;  %2335 = vperm.xlu0 %5364, %v259_v36  }
 0x702   :  { %2345 = vperm.xlu1 %5367, %v259_v36   ;;  %2262 = vperm.xlu0 %5364, %v254_v6  }
 0x706   :  { %5368 = vset.pattern.permute.xlu1 %v7637_v55  ;;  %5369 = vset.pattern.permute.xlu0 %v7633_v9 }
 0x707   :  { %2267 = vperm.xlu1 %5368, %v255_v1   ;;  %2277 = vperm.xlu0 %5369, %v254_v6  }
 0x70b   :  { %5370 = vset.pattern.permute.xlu1 %v7633_v9  ;;  %5372 = vset.pattern.permute.xlu0 %v7637_v55  ;;  %v1774_v9 = vmax.f32 %v1730_v24, 0.0 }
 0x70c   :  { %2281 = vperm.xlu1 %5370, %v255_v1   ;;  %2369 = vperm.xlu0 %5372, %v261_v34  }
 0x710   :  { %5371 = vset.pattern.permute.xlu1 %v7637_v55 }
 0x711   :  { %2364 = vperm.xlu1 %5371, %v260_v15  }
 0x74b   :  { %v1762_v14 = vpop.xlane.xlu0 %1761  ;;  %v1773_v39 = vpop.xlane.xlu1 %1772 }
 0x74c   :  { %v1764_v4 = vmul.f32 %v1763_v37, %v1762_v14  ;;  %v1775_v63 = vmul.f32 %v1774_v9, %v1773_v39 }
 0x74e   :  { %1765 = vst.msk [vmem:[#allocation4] sm:$0xff] %vm1043_vm4, %v1764_v4  ;;  %1776 = vst.msk [vmem:[#allocation4 + $0x8] sm:$0xff] %vm1043_vm4, %v1775_v63 }
 0x74f   :  { %v1795_v55 = vpop.xlane.xlu1 %1794  ;;  %v1784_v13 = vpop.xlane.xlu0 %1783 }
 0x753   :  { %v6552_v36 = vpop.permute.xlu1 %1643 }
 0x754   :  { %7707 = vst [vmem:[#allocation114_spill] sm:$0xff] %v6552_v36  ;;  %v1740_v29 = vadd.f32 %v6504_v20, %v6552_v36 }
 0x755   :  { %v1799_v6 = vld [vmem:[#allocation4] sm:$0xff]  ;;  %v1800_v1 = vld [vmem:[#allocation4 + $0x8] sm:$0xff] }
 0x756   :  { %v1796_v17 = vmax.f32 %v1740_v29, 0.0  ;;  %v5152_v34 = vpack.c.bf16 %v1800_v1, %v1799_v6 }
 0x757   :  { %v6556_v15 = vpop.permute.xlu0 %1638  ;;  %v6558_v5 = vpop.permute.xlu1 %1810 }
 0x758   :  { %7708 = vst [vmem:[#allocation115_spill] sm:$0xff] %v6556_v15  ;;  %v1797_v24 = vmul.f32 %v1796_v17, %v1795_v55  ;;  %v1735_v37 = vadd.f32 %v6510_v30, %v6556_v15  ;;  %5153 = vmatprep.subr.bf16.mxu1 %v5152_v34  ;;  %v2259_v15 = vld [vmem:[%s7711_s28] sm:$0x3] }
 0x759   :  { %5155 = vmatpush3.bf16.msra.mxu1 %v5152_v34  ;;  %v2287_v36 = vrot.slane %v2259_v15, %v5806_v25  ;;  %v2273_v0 = vrot.slane %v2259_v15, %v5809_v26 }
 0x75a   :  { %1798 = vst.msk [vmem:[#allocation4 + $0x18] sm:$0xff] %vm1043_vm4, %v1797_v24  ;;  %v1785_v9 = vmax.f32 %v1735_v37, 0.0  ;;  %v230_v24 = vld [vmem:[%s7702_s22 + $0x10] sm:$0xff] }
 0x75b   :  { %v6563_v14 = vpop.permute.xlu0 %1805  ;;  %v6565_v20 = vpop.permute.xlu1 %1820 }
 0x75c   :  { %v1786_v39 = vmul.f32 %v1785_v9, %v1784_v13  ;;  %v229_v13 = vld [vmem:[%s7702_s22 + $0x8] sm:$0xff] }
 0x75e   :  { %1787 = vst.msk [vmem:[#allocation4 + $0x10] sm:$0xff] %vm1043_vm4, %v1786_v39  ;;  %v231_v39 = vld [vmem:[%s7702_s22 + $0x18] sm:$0xff] }
 0x75f   :  { %v6568_v4 = vpop.permute.xlu0 %1815  ;;  %v6570_v63 = vpop.permute.xlu1 %1983 }
 0x761   :  { %v1802_v6 = vld [vmem:[#allocation4 + $0x18] sm:$0xff] }
 0x763   :  { %v6572_v30 = vpop.permute.xlu0 %1978  ;;  %v6574_v55 = vpop.permute.xlu1 %2007 }
 0x764   :  { %7709 = vst [vmem:[#allocation116_spill] sm:$0xff] %v6574_v55 }
 0x765   :  { %v1801_v29 = vld [vmem:[#allocation4 + $0x10] sm:$0xff] }
 0x766   :  { %v5156_v1 = vpack.c.bf16 %v1802_v6, %v1801_v29 }
 0x767   :  { %v6576_v17 = vpop.permute.xlu0 %2002  ;;  %v6578_v34 = vpop.permute.xlu1 %1993 }
 0x768   :  { %7710 = vst [vmem:[#allocation117_spill] sm:$0xff] %v6576_v17  ;;  %7712 = vst [vmem:[#allocation118_spill] sm:$0xff] %v6578_v34  ;;  %5157 = vmatprep.subr.bf16.mxu1 %v5156_v1 }
 0x769   :  { %5159 = vmatpush3.bf16.msra.mxu1 %v5156_v1 }
 0x76b   :  { %v6582_v37 = vpop.permute.xlu0 %1988  ;;  %v6584_v9 = vpop.permute.xlu1 %2017 }
 0x76c   :  { %7713 = vst [vmem:[#allocation119_spill] sm:$0xff] %v6584_v9  ;;  %4942 = vmatmul.mubr.msk.f32.vlgmr.msra.gmra.mrb[2].mxu1 %vm1435_vm5, %v229_v13 }
 0x76d   :  { %4944 = vmatprep.mubr.msk.f32.mxu1 %vm1435_vm5, %v230_v24 }
 0x76f   :  { %v6589_v29 = vpop.permute.xlu1 %2301  ;;  %v6591_v6 = vpop.permute.xlu0 %2012 }
 0x770   :  { %7714 = vst [vmem:[#allocation120_spill] sm:$0xff] %v6589_v29  ;;  %7715 = vst [vmem:[#allocation121_spill] sm:$0xff] %v6591_v6  ;;  %4945 = vmatmul.mubr.msk.f32.gmra.mrb[4].mxu1 %vm1435_vm5, %v231_v39  ;;  %v2305_v15 = vmul.f32 %v6589_v29, %v2273_v0 }
 0x773   :  { %v6594_v61 = vpop.permute.xlu1 %2311 }
 0x774   :  { %7716 = vst [vmem:[#allocation122_spill] sm:$0xff] %v6594_v61  ;;  %v6596_v1 = vpop.permute.xlu0 %2307  ;;  %v2315_v39 = vmul.f32 %v6594_v61, %v2287_v36 }
 0x775   :  { %7717 = vst [vmem:[#allocation123_spill] sm:$0xff] %v6596_v1  ;;  %v2314_v13 = vmul.f32 %v6596_v1, %v2287_v36 }
 0x776   :  { %v2317_v61 = vadd.f32 %v2315_v39, %v2305_v15 }
 0x778   :  { %v6602_v50 = vpop.permute.xlu1 %2330 }
 0x779   :  { %7718 = vst [vmem:[#allocation124_spill] sm:$0xff] %v6602_v50  ;;  %v6604_v24 = vpop.permute.xlu0 %2296  ;;  %v2338_v11 = vmul.f32 %v6602_v50, %v2273_v0 }
 0x77a   :  { %7719 = vst [vmem:[#allocation125_spill] sm:$0xff] %v6604_v24  ;;  %v2304_v62 = vmul.f32 %v6604_v24, %v2273_v0  ;;  %v6619_v24 = vrot.slane %v4738_v53, %v5806_v25 }
 0x77c   :  { %v2316_v23 = vadd.f32 %v2314_v13, %v2304_v62  ;;  %7723 = vst [vmem:[#allocation128_spill] sm:$0xff] %v6619_v24 }
 0x77d   :  { %v6610_v32 = vpop.permute.xlu1 %2341  ;;  %v2336_v56 = vpop.permute.xlu0 %2335 }
 0x77e   :  { %7720 = vst [vmem:[#allocation126_spill] sm:$0xff] %v6610_v32  ;;  %v2348_v1 = vmul.f32 %v6610_v32, %v2287_v36  ;;  %2320 = vrot.lane.b32.xlu1 %v2316_v23, %s5534_s0  ;;  %v2339_v13 = vmul.f32 %v2336_v56, %v2273_v0  ;;  %v4231_v50 = vmul.f32 %v6613_v28, %v2336_v56  ;;  %v245_v23 = vld [vmem:[%s7722_s1] sm:$0xff] }
 0x780   :  { %v2350_v62 = vadd.f32 %v2348_v1, %v2338_v11 }
 0x781   :  { %v2346_v59 = vpop.permute.xlu1 %2345  ;;  %v2263_v60 = vpop.permute.xlu0 %2262 }
 0x782   :  { %v2349_v51 = vmul.f32 %v2346_v59, %v2287_v36  ;;  %v4233_v45 = vmul.f32 %v6619_v24, %v2346_v59  ;;  %2322 = vrot.lane.b32.xlu1 %v2317_v61, %s5534_s0  ;;  %2354 = vrot.lane.b32.xlu0 %v2350_v62, %s5535_s13  ;;  %v4202_v32 = vmul.f32 %v6613_v28, %v2263_v60 }
 0x783   :  { %v2274_v39 = vmul.f32 %v2273_v0, %v2263_v60 }
 0x784   :  { %v2351_v29 = vadd.f32 %v2349_v51, %v2339_v13  ;;  %v6627_v53 = vadd.f32 %v4233_v45, %v4231_v50 }
 0x786   :  { %7724 = vst [vmem:[#allocation129_spill] sm:$0xff] %v6627_v53  ;;  %2356 = vrot.lane.b32.xlu1 %v2351_v29, %s5535_s13  ;;  %v2268_v11 = vpop.permute.xlu1 %2267  ;;  %v2278_v56 = vpop.permute.xlu0 %2277  ;;  %2026 = vperm.xlu0 %5372, %v245_v23  }
 0x787   :  { %v6631_v1 = vmul.f32 %v6613_v28, %v2268_v11  ;;  %v2288_v59 = vmul.f32 %v2287_v36, %v2278_v56  ;;  %v4208_v61 = vmul.f32 %v6619_v24, %v2278_v56  ;;  %v2275_v62 = vmul.f32 %v2273_v0, %v2268_v11 }
 0x789   :  { %v2290_v15 = vadd.f32 %v2288_v59, %v2274_v39  ;;  %v6641_v56 = vadd.f32 %v4208_v61, %v4202_v32  ;;  %v251_v32 = vld [vmem:[%s7727_s2 + $0x8] sm:$0xff]  ;;  %v274_v61 = vld [vmem:[%s7729_s10] sm:$0xff] }
 0x78b   :  { %v2282_v42 = vpop.permute.xlu1 %2281  ;;  %v6639_v50 = vpop.permute.xlu0 %2369  ;;  %7728 = vst [vmem:[#allocation132_spill] sm:$0xff] %v6641_v56 }
 0x78c   :  { %v2289_v7 = vmul.f32 %v2287_v36, %v2282_v42  ;;  %v6635_v51 = vmul.f32 %v6619_v24, %v2282_v42  ;;  %7726 = vst [vmem:[#allocation131_spill] sm:$0xff] %v6639_v50 }
 0x78e   :  { %v2291_v45 = vadd.f32 %v2289_v7, %v2275_v62 }
 0x790   :  { %v6637_v60 = vpop.permute.xlu1 %2364 }
 0x791   :  { %7725 = vst [vmem:[#allocation130_spill] sm:$0xff] %v6637_v60 }
 0x7f0   :  { %v2321_v29 = vpop.permute.xlu1 %2320 }
 0x7f1   :  { %v2326_v13 = vadd.f32 %v2321_v29, %v2290_v15 }
 0x7f4   :  { %v2323_v23 = vpop.permute.xlu1 %2322  ;;  %v2355_v53 = vpop.permute.xlu0 %2354 }
 0x7f5   :  { %v2360_v28 = vadd.f32 %v2355_v53, %v2326_v13  ;;  %v2327_v0 = vadd.f32 %v2323_v23, %v2291_v45  ;;  %v250_v53 = vld [vmem:[%s7727_s2] sm:$0xff]  ;;  %v4714_v45 = vld [vmem:[%s5557_s5 + $0x10] sm:$0x7]  ;;  %v253_v23 = vld [vmem:[%s7727_s2 + $0x18] sm:$0xff] }
 0x7f6   :  { %v6655_v29 = vrot.slane %v4714_v45, %v5806_v25  ;;  %v6658_v13 = vrot.slane %v4714_v45, %v5809_v26 }
 0x7f7   :  { %v2372_v42 = vadd.f32 %v6637_v60, %v2360_v28  ;;  %v275_v28 = vld [vmem:[%s7729_s10 + $0x8] sm:$0xff] }
 0x7f8   :  { %v2357_v7 = vpop.permute.xlu1 %2356 }
 0x7f9   :  { %v2361_v36 = vadd.f32 %v2357_v7, %v2327_v0  ;;  %v2374_v39 = vmax.f32 %v2372_v42, 0.0  ;;  %v252_v0 = vld [vmem:[%s7727_s2 + $0x10] sm:$0xff]  ;;  %v3097_v7 = vmul.f32 %v6658_v13, %v5866_v54 }
 0x7fa   :  { %v4715_v42 = vld [vmem:[%s5557_s5 + $0x14] sm:$0x7] }
 0x7fb   :  { %v2373_v11 = vadd.f32 %v6639_v50, %v2361_v36  ;;  %v2894_v36 = vmul.f32 %v6658_v13, %v5892_v3  ;;  %v6688_v24 = vrot.slane %v4715_v42, %v5825_v33 }
 0x7fd   :  { %v2375_v59 = vmax.f32 %v2373_v11, 0.0  ;;  %v6671_v11 = vrot.slane %v4715_v42, %v5806_v25 }
 0x7ff   :  { %v5378_v15 = vpack.i.bf16 %v2375_v59, %v2374_v39  ;;  %v6645_v62 = vpack.c.bf16 %v2375_v59, %v2374_v39  ;;  %v6668_v39 = vrot.slane %v4714_v45, %v5825_v33  ;;  %v2895_v59 = vmul.f32 %v6655_v29, %v5819_v31 }
 0x800   :  { %v2905_v45 = vmul.f32 %v6671_v11, %v5849_v46 }
 0x801   :  { %5379 = vrot.lane.b32.xlu0 %v5378_v15, %s5535_s13  ;;  %5374 = vrot.lane.b32.xlu1 %v5378_v15, %s5534_s0  ;;  %v3098_v15 = vmul.f32 %v6655_v29, %v5829_v35  ;;  %v2896_v60 = vadd.f32 %v2895_v59, %v2894_v36  ;;  %v2897_v56 = vmul.f32 %v6668_v39, %v5791_v18  ;;  %v4717_v59 = vld [vmem:[%s5557_s5 + $0x1c] sm:$0x7] }
 0x802   :  { %v3100_v2 = vmul.f32 %v6668_v39, %v5793_v19  ;;  %v3108_v35 = vmul.f32 %v6671_v11, %v5811_v27  ;;  %v3110_v36 = vmul.f32 %v6688_v24, %v5836_v38 }
 0x803   :  { %v3099_v50 = vadd.f32 %v3098_v15, %v3097_v7  ;;  %v2898_v19 = vadd.f32 %v2897_v56, %v2896_v60  ;;  %v6726_v60 = vrot.slane %v4717_v59, %v5809_v26 }
 0x805   :  { %2118 = vperm.xlu0 %5372, %v251_v32   ;;  %2113 = vperm.xlu1 %5371, %v250_v53   ;;  %v6678_v32 = vrot.slane %v4715_v42, %v5809_v26  ;;  %v277_v53 = vld [vmem:[%s7729_s10 + $0x18] sm:$0xff]  ;;  %v3101_v54 = vadd.f32 %v3100_v2, %v3099_v50 }
 0x807   :  { %v2904_v7 = vmul.f32 %v6678_v32, %v5842_v43  ;;  %v3107_v42 = vmul.f32 %v6678_v32, %v5798_v22 }
 0x809   :  { %2693 = vperm.xlu0 %5372, %v275_v28   ;;  %2688 = vperm.xlu1 %5371, %v274_v61   ;;  %v276_v28 = vld [vmem:[%s7729_s10 + $0x10] sm:$0xff]  ;;  %v4716_v61 = vld [vmem:[%s5557_s5 + $0x18] sm:$0x7]  ;;  %v2906_v8 = vadd.f32 %v2905_v45, %v2904_v7  ;;  %v2924_v7 = vmul.f32 %v6726_v60, %v5900_v10  ;;  %s288_s5 = sld [smem:[#allocation5]] }
 0x80a   :  { %v6710_v27 = vrot.slane %v4716_v61, %v5825_v33 }
 0x80d   :  { %2128 = vperm.xlu0 %5372, %v253_v23   ;;  %2123 = vperm.xlu1 %5371, %v252_v0   ;;  %v6691_v23 = vrot.slane %v4716_v61, %v5806_v25  ;;  %v6694_v0 = vrot.slane %v4716_v61, %v5809_v26 }
 0x80f   :  { %v3117_v15 = vmul.f32 %v6694_v0, %v5892_v3  ;;  %v3118_v22 = vmul.f32 %v6691_v23, %v5819_v31  ;;  %v2914_v38 = vmul.f32 %v6694_v0, %v5853_v48  ;;  %v3109_v3 = vadd.f32 %v3108_v35, %v3107_v42 }
 0x810   :  { %v2915_v2 = vmul.f32 %v6691_v23, %v5840_v41  ;;  %v2917_v31 = vmul.f32 %v6710_v27, %v5872_v57  ;;  %v3120_v35 = vmul.f32 %v6710_v27, %v5791_v18 }
 0x811   :  { %2703 = vperm.xlu0 %5372, %v277_v53   ;;  %2698 = vperm.xlu1 %5371, %v276_v28   ;;  %v2907_v53 = vmul.f32 %v6688_v24, %v5796_v21  ;;  %v6715_v28 = vrot.slane %v4717_v59, %v5806_v25  ;;  %v3111_v56 = vadd.f32 %v3110_v36, %v3109_v3 }
 0x812   :  { %v3119_v45 = vadd.f32 %v3118_v22, %v3117_v15  ;;  %v7730_v15 = vld [vmem:[#allocation41_spill] sm:$0xff]  ;;  %v3138_v3 = vmul.f32 %v6655_v29, %v5840_v41 }
 0x813   :  { %v3128_v50 = vmul.f32 %v6715_v28, %v5849_v46  ;;  %v2908_v61 = vadd.f32 %v2907_v53, %v2906_v8  ;;  %v2916_v46 = vadd.f32 %v2915_v2, %v2914_v38  ;;  %v2925_v22 = vmul.f32 %v6715_v28, %v5845_v44 }
 0x814   :  { %v3121_v36 = vadd.f32 %v3120_v35, %v3119_v45  ;;  %v2935_v53 = vmul.f32 %v6655_v29, %v7730_v15  ;;  %v3140_v2 = vmul.f32 %v6668_v39, %v5872_v57  ;;  %v3147_v35 = vmul.f32 %v6678_v32, %v5900_v10 }
 0x815   :  { %3103 = vrot.lane.b32.xlu0 %v3101_v54, %s5534_s0  ;;  %2900 = vrot.lane.b32.xlu1 %v2898_v19, %s5534_s0  ;;  %v6733_v54 = vrot.slane %v4717_v59, %v5825_v33  ;;  %v3127_v19 = vmul.f32 %v6726_v60, %v5842_v43  ;;  %v2918_v43 = vadd.f32 %v2917_v31, %v2916_v46  ;;  %v7731_v31 = vld [vmem:[#allocation42_spill] sm:$0xff]  ;;  %v7736_v33 = vld [vmem:[#allocation32_spill] sm:$0xff] }
 0x816   :  { %v3137_v59 = vmul.f32 %v6658_v13, %v5853_v48  ;;  %v2926_v38 = vadd.f32 %v2925_v22, %v2924_v7  ;;  %v7734_v7 = vld [vmem:[#allocation44_spill] sm:$0xff]  ;;  %v3150_v22 = vmul.f32 %v6688_v24, %v5920_v49 }
 0x817   :  { %v3129_v42 = vadd.f32 %v3128_v50, %v3127_v19  ;;  %v2927_v8 = vmul.f32 %v6733_v54, %v5920_v49  ;;  %v3130_v18 = vmul.f32 %v6733_v54, %v5796_v21  ;;  %v2934_v21 = vmul.f32 %v6658_v13, %v7731_v31 }
 0x818   :  { %v2944_v41 = vmul.f32 %v6678_v32, %v7734_v7  ;;  %v3139_v57 = vadd.f32 %v3138_v3, %v3137_v59  ;;  %v3158_v59 = vmul.f32 %v6691_v23, %v7730_v15  ;;  %v7738_v15 = vld [vmem:[#allocation34_spill] sm:$0xff] }
 0x819   :  { %3113 = vrot.lane.b32.xlu0 %v3111_v56, %s5534_s0  ;;  %2910 = vrot.lane.b32.xlu1 %v2908_v61, %s5534_s0  ;;  %v3131_v50 = vadd.f32 %v3130_v18, %v3129_v42  ;;  %v7732_v56 = vld [vmem:[#allocation43_spill] sm:$0xff]  ;;  %v7733_v61 = vld [vmem:[#allocation45_spill] sm:$0xff]  ;;  %v2928_v19 = vadd.f32 %v2927_v8, %v2926_v38  ;;  %v2936_v46 = vadd.f32 %v2935_v53, %v2934_v21  ;;  %v7737_v53 = vld [vmem:[#allocation46_spill] sm:$0xff] }
 0x81a   :  { %v2937_v48 = vmul.f32 %v6668_v39, %v7732_v56  ;;  %v2945_v45 = vmul.f32 %v6671_v11, %v7733_v61  ;;  %v3148_v42 = vmul.f32 %v6671_v11, %v5845_v44  ;;  %v2954_v3 = vmul.f32 %v6694_v0, %v7737_v53 }
 0x81b   :  { %v3157_v44 = vmul.f32 %v6694_v0, %v7731_v31  ;;  %v3168_v21 = vmul.f32 %v6715_v28, %v7733_v61 }
 0x81c   :  { %v2938_v10 = vadd.f32 %v2937_v48, %v2936_v46  ;;  %v2946_v18 = vadd.f32 %v2945_v45, %v2944_v41  ;;  %v3149_v38 = vadd.f32 %v3148_v42, %v3147_v35  ;;  %v3167_v35 = vmul.f32 %v6726_v60, %v7734_v7  ;;  %v7739_v41 = vld [vmem:[#allocation48_spill] sm:$0xff]  ;;  %v7741_v42 = vld [vmem:[#allocation49_spill] sm:$0xff] }
 0x81d   :  { %3123 = vrot.lane.b32.xlu0 %v3121_v36, %s5534_s0  ;;  %2920 = vrot.lane.b32.xlu1 %v2918_v43, %s5534_s0  ;;  %v7735_v36 = vld [vmem:[#allocation47_spill] sm:$0xff]  ;;  %v3141_v43 = vadd.f32 %v3140_v2, %v3139_v57  ;;  %v3160_v2 = vmul.f32 %v6710_v27, %v7732_v56  ;;  %v2964_v57 = vmul.f32 %v6726_v60, %v7739_v41  ;;  %v7740_v56 = vld [vmem:[#allocation38_spill] sm:$0xff] }
 0x81e   :  { %v2955_v8 = vmul.f32 %v6691_v23, %v7735_v36  ;;  %v3151_v49 = vadd.f32 %v3150_v22, %v3149_v38  ;;  %v3159_v31 = vadd.f32 %v3158_v59, %v3157_v44  ;;  %v2965_v46 = vmul.f32 %v6715_v28, %v7740_v56  ;;  %v7742_v38 = vld [vmem:[#allocation50_spill] sm:$0xff] }
 0x81f   :  { %v3178_v61 = vmul.f32 %v6655_v29, %v7735_v36  ;;  %v2967_v22 = vmul.f32 %v6733_v54, %v7741_v42  ;;  %v3169_v7 = vadd.f32 %v3168_v21, %v3167_v35 }
 0x820   :  { %v2956_v45 = vadd.f32 %v2955_v8, %v2954_v3  ;;  %v3161_v8 = vadd.f32 %v3160_v2, %v3159_v31  ;;  %v2966_v36 = vadd.f32 %v2965_v46, %v2964_v57  ;;  %v7743_v3 = vld [vmem:[#allocation39_spill] sm:$0xff]  ;;  %v3188_v57 = vmul.f32 %v6671_v11, %v7740_v56  ;;  %v7746_v31 = vld [vmem:[#allocation52_spill] sm:$0xff] }
 0x821   :  { %3133 = vrot.lane.b32.xlu0 %v3131_v50, %s5534_s0  ;;  %2930 = vrot.lane.b32.xlu1 %v2928_v19, %s5534_s0  ;;  %v2947_v50 = vmul.f32 %v6688_v24, %v7736_v33  ;;  %v2957_v19 = vmul.f32 %v6710_v27, %v7738_v15  ;;  %v2975_v44 = vmul.f32 %v6655_v29, %v7743_v3 }
 0x822   :  { %v2984_v46 = vmul.f32 %v6678_v32, %v7746_v31  ;;  %v3197_v56 = vmul.f32 %v6694_v0, %v7742_v38 }
 0x823   :  { %v2948_v48 = vadd.f32 %v2947_v50, %v2946_v18  ;;  %v3170_v18 = vmul.f32 %v6733_v54, %v7736_v33  ;;  %v2974_v50 = vmul.f32 %v6658_v13, %v7742_v38  ;;  %v3180_v33 = vmul.f32 %v6668_v39, %v7738_v15 }
 0x824   :  { %v3190_v15 = vmul.f32 %v6688_v24, %v7741_v42  ;;  %v3198_v42 = vmul.f32 %v6691_v23, %v7743_v3  ;;  %v3207_v3 = vmul.f32 %v6726_v60, %v7746_v31 }
 0x825   :  { %3143 = vrot.lane.b32.xlu0 %v3141_v43, %s5535_s13  ;;  %2940 = vrot.lane.b32.xlu1 %v2938_v10, %s5535_s13  ;;  %v2958_v43 = vadd.f32 %v2957_v19, %v2956_v45  ;;  %v3177_v10 = vmul.f32 %v6658_v13, %v7737_v53  ;;  %v3171_v21 = vadd.f32 %v3170_v18, %v3169_v7  ;;  %v7745_v45 = vld [vmem:[#allocation53_spill] sm:$0xff] }
 0x826   :  { %v2968_v53 = vadd.f32 %v2967_v22, %v2966_v36  ;;  %v2985_v19 = vmul.f32 %v6671_v11, %v7745_v45  ;;  %v2976_v35 = vadd.f32 %v2975_v44, %v2974_v50  ;;  %v7747_v22 = vld [vmem:[#allocation55_spill] sm:$0xff]  ;;  %v3208_v38 = vmul.f32 %v6715_v28, %v7745_v45 }
 0x827   :  { %v3179_v59 = vadd.f32 %v3178_v61, %v3177_v10  ;;  %v7749_v10 = vld [vmem:[#allocation54_spill] sm:$0xff]  ;;  %v6857_v45 = vstv %s288_s5 }
 0x828   :  { %v2994_v18 = vmul.f32 %v6694_v0, %v7749_v10  ;;  %v2986_v36 = vadd.f32 %v2985_v19, %v2984_v46  ;;  %v3210_v19 = vmul.f32 %v6733_v54, %v7747_v22 }
 0x829   :  { %3153 = vrot.lane.b32.xlu0 %v3151_v49, %s5535_s13  ;;  %2950 = vrot.lane.b32.xlu1 %v2948_v48, %s5535_s13  ;;  %v7744_v49 = vld [vmem:[#allocation51_spill] sm:$0xff]  ;;  %v3187_v48 = vmul.f32 %v6678_v32, %v7739_v41  ;;  %v3181_v61 = vadd.f32 %v3180_v33, %v3179_v59  ;;  %v2987_v41 = vmul.f32 %v6688_v24, %v7747_v22  ;;  %v7750_v59 = vld [vmem:[#allocation56_spill] sm:$0xff] }
 0x82a   :  { %v2977_v2 = vmul.f32 %v6668_v39, %v7744_v49  ;;  %v2997_v44 = vmul.f32 %v6710_v27, %v7750_v59 }
 0x82b   :  { %v3189_v50 = vadd.f32 %v3188_v57, %v3187_v48  ;;  %v3199_v48 = vadd.f32 %v3198_v42, %v3197_v56  ;;  %v3209_v57 = vadd.f32 %v3208_v38, %v3207_v3 }
 0x82c   :  { %v2978_v7 = vadd.f32 %v2977_v2, %v2976_v35  ;;  %v3200_v2 = vmul.f32 %v6710_v27, %v7744_v49 }
 0x82d   :  { %3163 = vrot.lane.b32.xlu0 %v3161_v8, %s5535_s13  ;;  %2960 = vrot.lane.b32.xlu1 %v2958_v43, %s5535_s13  ;;  %v7748_v8 = vld [vmem:[#allocation57_spill] sm:$0xff] }
 0x82e   :  { %v2995_v43 = vmul.f32 %v6691_v23, %v7748_v8  ;;  %v3201_v35 = vadd.f32 %v3200_v2, %v3199_v48 }
 0x830   :  { %v2996_v33 = vadd.f32 %v2995_v43, %v2994_v18 }
 0x831   :  { %3173 = vrot.lane.b32.xlu0 %v3171_v21, %s5535_s13  ;;  %2970 = vrot.lane.b32.xlu1 %v2968_v53, %s5535_s13  ;;  %v3191_v21 = vadd.f32 %v3190_v15, %v3189_v50  ;;  %v2988_v53 = vadd.f32 %v2987_v41, %v2986_v36  ;;  %v6860_v41 = vstv %s4678_s7 }
 0x832   :  { %v2998_v49 = vadd.f32 %v2997_v44, %v2996_v33  ;;  %v1926_v56 = vmul.f32 %v6860_v41, %v6400_v12  ;;  %v1929_v33 = vmul.f32 %v6860_v41, %v6408_v40  ;;  %v1928_v48 = vmul.f32 %v6860_v41, %v6404_v58 }
 0x835   :  { %3183 = vrot.lane.b32.xlu0 %v3181_v61, %s5536_s4  ;;  %2980 = vrot.lane.b32.xlu1 %v2978_v7, %s5536_s4  ;;  %v3211_v61 = vadd.f32 %v3210_v19, %v3209_v57  ;;  %v1927_v7 = vmul.f32 %v6860_v41, %v6398_v16 }
 0x839   :  { %3193 = vrot.lane.b32.xlu0 %v3191_v21, %s5536_s4  ;;  %2990 = vrot.lane.b32.xlu1 %v2988_v53, %s5536_s4 }
 0x83d   :  { %3000 = vrot.lane.b32.xlu0 %v2998_v49, %s5536_s4  ;;  %3203 = vrot.lane.b32.xlu1 %v3201_v35, %s5536_s4 }
 0x83f   :  { %v4943_v46 = vpop.f32.mrb[2].mxu1 }
 0x840   :  { %v1907_v15 = vadd.f32 %v4943_v46, %v6558_v5  ;;  %v1901_v43 = vpop.f32.mrb[3].mxu1 }
 0x841   :  { %v1902_v31 = vadd.f32 %v1901_v43, %v6563_v14  ;;  %3213 = vrot.lane.b32.xlu1 %v3211_v61, %s5536_s4 }
 0x842   :  { %v1922_v22 = vmul.f32 %v6857_v45, %v1907_v15 }
 0x843   :  { %v1921_v18 = vmul.f32 %v6857_v45, %v1902_v31  ;;  %v4946_v50 = vpop.f32.mrb[4].mxu1 }
 0x844   :  { %v6870_v36 = vadd.f32 %v1927_v7, %v1922_v22  ;;  %v1917_v42 = vadd.f32 %v4946_v50, %v6565_v20  ;;  %v1911_v44 = vpop.f32.mrb[5].mxu1 }
 0x845   :  { %v6873_v2 = vadd.f32 %v1926_v56, %v1921_v18  ;;  %v1912_v21 = vadd.f32 %v1911_v44, %v6568_v4  ;;  %v6900_v44 = vadd.f32 %v6635_v51, %v6631_v1 }
 0x846   :  { %v1935_v53 = vsel %vm1043_vm4, %v6870_v36, 0.0  ;;  %v1924_v16 = vmul.f32 %v6857_v45, %v1917_v42 }
 0x847   :  { %v1934_v12 = vsel %vm1043_vm4, %v6873_v2, 0.0  ;;  %v1923_v38 = vmul.f32 %v6857_v45, %v1912_v21 }
 0x848   :  { %v1936_v3 = vadd.f32 %v1935_v53, %v1934_v12  ;;  %v6886_v19 = vadd.f32 %v1929_v33, %v1924_v16 }
 0x849   :  { %v6888_v49 = vadd.f32 %v1928_v48, %v1923_v38 }
 0x84a   :  { %v1939_v40 = vsel %vm1043_vm4, %v6886_v19, 0.0 }
 0x84b   :  { %v1937_v35 = vsel %vm1043_vm4, %v6888_v49, 0.0 }
 0x84c   :  { %v1938_v57 = vadd.f32 %v1937_v35, %v1936_v3 }
 0x84e   :  { %v1940_v46 = vadd.f32 %v1939_v40, %v1938_v57 }
 0x850   :  { %v1941_v61 = vrot.slane %v1940_v46, 4 }
 0x852   :  { %v1942_v15 = vadd.f32 %v1941_v61, %v1940_v46 }
 0x854   :  { %v1943_v43 = vrot.slane %v1942_v15, 2 }
 0x856   :  { %v1944_v31 = vadd.f32 %v1943_v43, %v1942_v15 }
 0x858   :  { %v1945_v22 = vrot.slane %v1944_v31, 1 }
 0x85a   :  { %v1946_v7 = vadd.f32 %v1945_v22, %v1944_v31 }
 0x85c   :  { %v1947_v58 = vmul.f32 0.03125, %v1946_v7 }
 0x85e   :  { %v1948_v18 = vsub.f32 %v6873_v2, %v1947_v58  ;;  %v1949_v56 = vsub.f32 %v6870_v36, %v1947_v58  ;;  %v1950_v50 = vsub.f32 %v6888_v49, %v1947_v58  ;;  %v1951_v42 = vsub.f32 %v6886_v19, %v1947_v58 }
 0x860   :  { %v1952_v21 = vmul.f32 %v1948_v18, %v1948_v18  ;;  %v1953_v53 = vmul.f32 %v1949_v56, %v1949_v56  ;;  %v1954_v16 = vmul.f32 %v1950_v50, %v1950_v50  ;;  %v1955_v33 = vmul.f32 %v1951_v42, %v1951_v42 }
 0x862   :  { %v1956_v12 = vsel %vm1043_vm4, %v1952_v21, 0.0  ;;  %v1957_v38 = vsel %vm1043_vm4, %v1953_v53, 0.0  ;;  %v1959_v3 = vsel %vm1043_vm4, %v1954_v16, 0.0  ;;  %v1961_v57 = vsel %vm1043_vm4, %v1955_v33, 0.0 }
 0x863   :  { %v1958_v48 = vadd.f32 %v1957_v38, %v1956_v12 }
 0x865   :  { %v1960_v35 = vadd.f32 %v1959_v3, %v1958_v48 }
 0x867   :  { %v1962_v40 = vadd.f32 %v1961_v57, %v1960_v35 }
 0x869   :  { %v1963_v46 = vrot.slane %v1962_v40, 4 }
 0x86b   :  { %v1964_v61 = vadd.f32 %v1963_v46, %v1962_v40 }
 0x86d   :  { %v1965_v15 = vrot.slane %v1964_v61, 2 }
 0x86f   :  { %v1966_v1 = vadd.f32 %v1965_v15, %v1964_v61 }
 0x871   :  { %v1967_v51 = vrot.slane %v1966_v1, 1 }
 0x873   :  { %v1968_v43 = vadd.f32 %v1967_v51, %v1966_v1  ;;  %v5375_v3 = vpop.permute.xlu1 %5374  ;;  %v244_v51 = vld [vmem:[%s7751_s11] sm:$0xff] }
 0x874   :  { %v5377_v46 = vunpack.i.h.bf16 %v5375_v3  ;;  %v5376_v61 = vunpack.i.l.bf16 %v5375_v3  ;;  %v272_v3 = vld [vmem:[%s7752_s15 + $0x50] sm:$0xff] }
 0x875   :  { %v1969_v31 = vmul.f32 0.03125, %v1968_v43  ;;  %v266_v43 = vld [vmem:[%s7752_s15 + $0x20] sm:$0xff] }
 0x876   :  { %v5166_v15 = vpack.c.bf16 %v5377_v46, %v5376_v61 }
 0x877   :  { %v1970_v22 = vadd.f32 1e-05, %v1969_v31 }
 0x879   :  { %5411 = vrsqrt.f32 %v1970_v22 }
 0x883   :  { %v5412_v7 = vpop.eup %5411 }
 0x884   :  { %v1974_v58 = vmul.f32 %v5412_v7, %v1950_v50  ;;  %v1972_v21 = vmul.f32 %v5412_v7, %v1948_v18  ;;  %v1973_v53 = vmul.f32 %v5412_v7, %v1949_v56  ;;  %v1975_v12 = vmul.f32 %v5412_v7, %v1951_v42  ;;  %v6914_v56 = vpop.permute.xlu0 %2026  ;;  %v267_v7 = vld [vmem:[%s7752_s15 + $0x28] sm:$0xff] }
 0x885   :  { %7753 = vst [vmem:[#allocation41_spill] sm:$0xff] %v6914_v56 }
 0x886   :  { %v1996_v16 = vmul.f32 %v6572_v30, %v1972_v21  ;;  %v1997_v38 = vmul.f32 %v6570_v63, %v1973_v53  ;;  %v1998_v33 = vmul.f32 %v6582_v37, %v1974_v58  ;;  %v1999_v48 = vmul.f32 %v6578_v34, %v1975_v12  ;;  %v268_v58 = vld [vmem:[%s7752_s15 + $0x30] sm:$0xff]  ;;  %v269_v53 = vld [vmem:[%s7752_s15 + $0x38] sm:$0xff]  ;;  %v262_v12 = vld [vmem:[%s7752_s15] sm:$0xff] }
 0x888   :  { %v2020_v35 = vadd.f32 %v6576_v17, %v1996_v16  ;;  %v2021_v57 = vadd.f32 %v6574_v55, %v1997_v38  ;;  %v2022_v50 = vadd.f32 %v6591_v6, %v1998_v33  ;;  %v2023_v18 = vadd.f32 %v6584_v9, %v1999_v48  ;;  %v5380_v1 = vpop.permute.xlu0 %5379  ;;  %v263_v16 = vld [vmem:[%s7752_s15 + $0x8] sm:$0xff]  ;;  %v264_v38 = vld [vmem:[%s7752_s15 + $0x10] sm:$0xff]  ;;  %v270_v33 = vld [vmem:[%s7752_s15 + $0x40] sm:$0xff] }
 0x889   :  { %v5382_v31 = vunpack.i.h.bf16 %v5380_v1  ;;  %v5381_v22 = vunpack.i.l.bf16 %v5380_v1  ;;  %v271_v48 = vld [vmem:[%s7752_s15 + $0x48] sm:$0xff] }
 0x88a   :  { %v5161_v42 = vpack.c.bf16 %v2021_v57, %v2020_v35  ;;  %v5164_v40 = vpack.c.bf16 %v2023_v18, %v2022_v50  ;;  %v273_v35 = vld [vmem:[%s7752_s15 + $0x58] sm:$0xff]  ;;  %v5437_v57 = vld [vmem:[%s7688_s14] sm:$0xff] }
 0x88b   :  { %v5174_v21 = vpack.c.bf16 %v5382_v31, %v5381_v22  ;;  %v246_v50 = vld [vmem:[%s7754_s16] sm:$0xff] }
 0x88c   :  { %5162 = vmatpush3.bf16.msra.mxu0 %v5161_v42  ;;  %4960 = vmatprep.mubr.msk.f32.mxu1 %vm699_vm1, %v246_v50  ;;  %v6954_v22 = vpop.permute.xlu0 %2118 }
 0x88d   :  { %5163 = vmatprep.subr.bf16.mxu0 %v7691_v47  ;;  %7757 = vst [vmem:[#allocation45_spill] sm:$0xff] %v6954_v22 }
 0x890   :  { %5165 = vmatpush3.bf16.msra.mxu0 %v5164_v40 }
 0x891   :  { %5167 = vmatprep.subr.bf16.mxu0 %v5166_v15 }
 0x893   :  { %4956 = vmatmul.mubr.msk.f32.vlgmr.msra.gmra.mrb[12].mxu0 %vm1435_vm5, %v244_v51 }
 0x894   :  { %5169 = vmatpush3.bf16.msra.mxu0 %v5166_v15  ;;  %4970 = vmatprep.mubr.msk.f32.mxu0 %vm2384_vm7, %v266_v43  ;;  %v6950_v15 = vpop.permute.xlu1 %2113 }
 0x895   :  { %5171 = vmatprep.subr.bf16.mxu0 %v6645_v62  ;;  %7755 = vst [vmem:[#allocation42_spill] sm:$0xff] %v6950_v15 }
 0x897   :  { %4971 = vmatmul.mubr.msk.f32.vlgmr.msra.gmra.mrb[14].mxu0 %vm2384_vm7, %v267_v7 }
 0x898   :  { %5173 = vmatpush3.bf16.msra.mxu0 %v6645_v62  ;;  %4973 = vmatprep.mubr.msk.f32.mxu0 %vm2384_vm7, %v268_v58  ;;  %v265_v62 = vld [vmem:[%s7752_s15 + $0x18] sm:$0xff]  ;;  %v6952_v31 = vpop.permute.xlu1 %2688  ;;  %v6958_v58 = vpop.permute.xlu0 %2693 }
 0x899   :  { %5175 = vmatprep.subr.bf16.mxu0 %v5174_v21  ;;  %7756 = vst [vmem:[#allocation43_spill] sm:$0xff] %v6952_v31  ;;  %7759 = vst [vmem:[#allocation47_spill] sm:$0xff] %v6958_v58 }
 0x89b   :  { %4974 = vmatmul.mubr.msk.f32.gmra.mrb[16].mxu0 %vm2384_vm7, %v269_v53 }
 0x89c   :  { %4980 = vmatprep.mubr.msk.f32.mxu0 %vm2384_vm7, %v262_v12  ;;  %v6956_v7 = vpop.permute.xlu1 %2123 }
 0x89d   :  { %7758 = vst [vmem:[#allocation44_spill] sm:$0xff] %v6956_v7 }
 0x89f   :  { %4981 = vmatmul.mubr.msk.f32.vlgmr.msra.gmra.mrb[14].mxu0 %vm2384_vm7, %v263_v16 }
 0x8a0   :  { %5177 = vmatpush3.bf16.msra.mxu0 %v5174_v21  ;;  %4983 = vmatprep.mubr.msk.f32.mxu0 %vm2384_vm7, %v264_v38 }
 0x8a3   :  { %4984 = vmatmul.mubr.msk.f32.gmra.mrb[16].mxu0 %vm2384_vm7, %v265_v62 }
 0x8a4   :  { %4990 = vmatprep.mubr.msk.f32.mxu0 %vm2384_vm7, %v270_v33 }
 0x8a7   :  { %4991 = vmatmul.mubr.msk.f32.vlgmr.msra.gmra.mrb[14].mxu0 %vm2384_vm7, %v271_v48 }
 0x8a8   :  { %4993 = vmatprep.mubr.msk.f32.mxu0 %vm2384_vm7, %v272_v3 }
 0x8ab   :  { %4994 = vmatmul.mubr.msk.f32.gmra.mrb[16].mxu0 %vm2384_vm7, %v273_v35 }
 0x8ac   :  { %5036 = vmatprep.mubr.msk.f32.mxu0 %vm1435_vm5, %v5437_v57  ;;  %v6962_v57 = vpop.permute.xlu1 %2698 }
 0x8ad   :  { %7760 = vst [vmem:[#allocation32_spill] sm:$0xff] %v6962_v57 }
 0x966   :  { %v2098_v18 = vpop.f32.mrb[12].mxu0 }
 0x967   :  { %v2099_v42 = vadd.f32 %v2098_v18, %v6914_v56  ;;  %v4957_v40 = vpop.f32.mrb[13].mxu0 }
 0x969   :  { %v2103_v46 = vmul.f32 0.044715, %v2099_v42  ;;  %v2102_v3 = vmul.f32 0.5, %v2099_v42 }
 0x96b   :  { %v2104_v61 = vmul.f32 %v2103_v46, %v2099_v42 }
 0x96d   :  { %v2105_v1 = vmul.f32 %v2104_v61, %v2099_v42 }
 0x96f   :  { %v2106_v51 = vadd.f32 %v2105_v1, %v2099_v42  ;;  %v247_v1 = vld [vmem:[%s7754_s16 + $0x8] sm:$0xff] }
 0x971   :  { %v2107_v43 = vmul.f32 0.7978846, %v2106_v51 }
 0x973   :  { %5413 = vtanh.f32 %v2107_v43  ;;  %v248_v43 = vld [vmem:[%s7754_s16 + $0x10] sm:$0xff] }
 0x97a   :  { %v4992_v21 = vpop.f32.mrb[14].mxu0 }
 0x97b   :  { %v2707_v53 = vadd.f32 %v4992_v21, %v6958_v58  ;;  %v2663_v12 = vpop.f32.mrb[15].mxu0  ;;  %v249_v21 = vld [vmem:[%s7754_s16 + $0x18] sm:$0xff] }
 0x97c   :  { %v2706_v16 = vadd.f32 %v6952_v31, %v2663_v12  ;;  %v6977_v12 = vstv %s4679_s18 }
 0x97d   :  { %v5414_v38 = vpop.eup %5413  ;;  %v2711_v62 = vmax.f32 %v2707_v53, 0.0  ;;  %7761 = vst [vmem:[#allocation46_spill] sm:$0xff] %v6977_v12 }
 0x97e   :  { %v2710_v33 = vmax.f32 %v2706_v16, 0.0  ;;  %v4995_v48 = vpop.f32.mrb[16].mxu0  ;;  %v2109_v35 = vadd.f32 1.0, %v5414_v38  ;;  %v6979_v16 = vstv %s4680_s29  ;;  %v6981_v38 = vpop.permute.xlu0 %2128 }
 0x97f   :  { %v2673_v50 = vpop.f32.mrb[17].mxu0  ;;  %v2717_v18 = vsel %vm1043_vm4, %v2711_v62, 0.0  ;;  %7762 = vst [vmem:[#allocation34_spill] sm:$0xff] %v6979_v16  ;;  %7763 = vst [vmem:[#allocation48_spill] sm:$0xff] %v6981_v38 }
 0x980   :  { %v2708_v40 = vadd.f32 %v6962_v57, %v2673_v50  ;;  %2718 = vadd.xlane.f32.xlu1 %v2717_v18  ;;  %v2714_v46 = vsel %vm1043_vm4, %v2710_v33, 0.0  ;;  %v2110_v61 = vmul.f32 %v2109_v35, %v2102_v3  ;;  %v2235_v50 = vmul.f32 %v6979_v16, %v6870_v36 }
 0x981   :  { %2715 = vadd.xlane.f32.xlu0 %v2714_v46  ;;  %v2234_v46 = vmul.f32 %v6979_v16, %v6873_v2  ;;  %v2237_v36 = vmul.f32 %v6979_v16, %v6886_v19 }
 0x982   :  { %v2712_v51 = vmax.f32 %v2708_v40, 0.0  ;;  %4958 = vmatprep.subr.mxu1 %v2110_v61 }
 0x983   :  { %4959 = vmatpush3.msra.mxu1 %v2110_v61 }
 0x984   :  { %4961 = vmatmul.mubr.msk.f32.vlgmr.msra.gmra.mrb[6].mxu1 %vm699_vm1, %v247_v1  ;;  %v2720_v42 = vsel %vm1043_vm4, %v2712_v51, 0.0  ;;  %5178 = vmatprep.subr.bf16.mxu1 %v7691_v47 }
 0x985   :  { %2721 = vadd.xlane.f32.xlu0 %v2720_v42  ;;  %4963 = vmatprep.mubr.msk.f32.mxu1 %vm699_vm1, %v248_v43 }
 0x988   :  { %4964 = vmatmul.mubr.msk.f32.gmra.mrb[8].mxu1 %vm699_vm1, %v249_v21  ;;  %v6993_v21 = vpop.permute.xlu0 %2703 }
 0x989   :  { %5004 = vmatprep.mubr.msk.f32.mxu1 %vm5539_vm0, %v7643_v52  ;;  %7764 = vst [vmem:[#allocation38_spill] sm:$0xff] %v6993_v21 }
 0xa57   :  { %v4962_v53 = vpop.f32.mrb[6].mxu1 }
 0xa58   :  { %v2215_v62 = vadd.f32 %v4962_v53, %v6954_v22  ;;  %v2209_v33 = vpop.f32.mrb[7].mxu1  ;;  %v7773_v22 = vld [vmem:[#allocation29_spill] sm:$0xff] }
 0xa59   :  { %v2210_v3 = vadd.f32 %v2209_v33, %v6950_v15  ;;  %v2709_v33 = vadd.f32 %v4995_v48, %v6993_v21  ;;  %v3218_v48 = vmul.f32 %v6655_v29, %v7748_v8  ;;  %v7771_v21 = vld [vmem:[#allocation36_spill] sm:$0xff] }
 0xa5a   :  { %v2230_v35 = vmul.f32 %v6977_v12, %v2215_v62 }
 0xa5b   :  { %v2229_v18 = vmul.f32 %v6977_v12, %v2210_v3  ;;  %v4965_v40 = vpop.f32.mrb[8].mxu1 }
 0xa5c   :  { %v2225_v61 = vadd.f32 %v4965_v40, %v6981_v38  ;;  %v2219_v1 = vpop.f32.mrb[9].mxu1  ;;  %v2239_v51 = vadd.f32 %v2235_v50, %v2230_v35  ;;  %v2236_v35 = vmul.f32 %v6979_v16, %v6888_v49  ;;  %v3220_v49 = vmul.f32 %v6668_v39, %v7750_v59 }
 0xa5d   :  { %v2220_v43 = vadd.f32 %v2219_v1, %v6956_v7  ;;  %v2238_v42 = vadd.f32 %v2234_v46, %v2229_v18  ;;  %v2713_v46 = vmax.f32 %v2709_v33, 0.0  ;;  %v3217_v1 = vmul.f32 %v6658_v13, %v7749_v10  ;;  %v7772_v7 = vld [vmem:[#allocation62_spill] sm:$0xff] }
 0xa5e   :  { %v2232_v53 = vmul.f32 %v6977_v12, %v2225_v61  ;;  %v2245_v62 = vsel %vm1043_vm4, %v2239_v51, 0.0 }
 0xa5f   :  { %v2231_v2 = vmul.f32 %v6977_v12, %v2220_v43  ;;  %2246 = vadd.xlane.f32.xlu0 %v2245_v62  ;;  %v2242_v3 = vsel %vm1043_vm4, %v2238_v42, 0.0  ;;  %v2723_v19 = vsel %vm1043_vm4, %v2713_v46, 0.0  ;;  %v3219_v51 = vadd.f32 %v3218_v48, %v3217_v1  ;;  %v7014_v42 = vpop.permute.xlu0 %3103  ;;  %v7768_v46 = vld [vmem:[#allocation60_spill] sm:$0xff]  ;;  %v7769_v48 = vld [vmem:[#allocation61_spill] sm:$0xff] }
 0xa60   :  { %2243 = vadd.xlane.f32.xlu1 %v2242_v3  ;;  %v2241_v50 = vadd.f32 %v2237_v36, %v2232_v53  ;;  %v2901_v53 = vpop.permute.xlu1 %2900  ;;  %v7765_v3 = vld [vmem:[#allocation58_spill] sm:$0xff]  ;;  %v2837_v1 = vmul.f32 %v6668_v39, %v7769_v48  ;;  %v2873_v39 = vmul.f32 %v6710_v27, %v7773_v22 }
 0xa61   :  { %v2240_v18 = vadd.f32 %v2236_v35, %v2231_v2  ;;  %v3221_v43 = vadd.f32 %v3220_v49, %v3219_v51  ;;  %v2826_v10 = vmul.f32 %v6658_v13, %v7765_v3  ;;  %v7766_v35 = vld [vmem:[#allocation59_spill] sm:$0xff]  ;;  %v7770_v51 = vld [vmem:[#allocation40_spill] sm:$0xff] }
 0xa62   :  { %v2251_v40 = vsel %vm1043_vm4, %v2241_v50, 0.0  ;;  %v2831_v59 = vmul.f32 %v6655_v29, %v7766_v35  ;;  %v2867_v29 = vmul.f32 %v6691_v23, %v7771_v21  ;;  %v7776_v21 = vld [vmem:[#allocation37_spill] sm:$0xff] }
 0xa63   :  { %v2248_v61 = vsel %vm1043_vm4, %v2240_v18, 0.0  ;;  %v7016_v62 = vpop.permute.xlu0 %3113  ;;  %v7767_v18 = vld [vmem:[#allocation63_spill] sm:$0xff]  ;;  %v2891_v58 = vmul.f32 %v6733_v54, %v7776_v21 }
 0xa64   :  { %2252 = vadd.xlane.f32.xlu1 %v2251_v40  ;;  %2249 = vadd.xlane.f32.xlu0 %v2248_v61  ;;  %v2911_v36 = vpop.permute.xlu1 %2910  ;;  %v2844_v40 = vmul.f32 %v6678_v32, %v7767_v18  ;;  %v2849_v61 = vmul.f32 %v6671_v11, %v7768_v46  ;;  %v2832_v49 = vadd.f32 %v2831_v59, %v2826_v10  ;;  %v7774_v10 = vld [vmem:[#allocation33_spill] sm:$0xff] }
 0xa65   :  { %v2855_v32 = vmul.f32 %v6688_v24, %v7772_v7  ;;  %v2885_v59 = vmul.f32 %v6715_v28, %v7774_v10 }
 0xa66   :  { %v2850_v13 = vadd.f32 %v2849_v61, %v2844_v40  ;;  %v2838_v38 = vadd.f32 %v2837_v1, %v2832_v49  ;;  %v7775_v61 = vld [vmem:[#allocation30_spill] sm:$0xff] }
 0xa67   :  { %v7018_v33 = vpop.permute.xlu0 %3123  ;;  %v2880_v31 = vmul.f32 %v6726_v60, %v7775_v61 }
 0xa68   :  { %2724 = vadd.xlane.f32.xlu0 %v2723_v19  ;;  %v2921_v2 = vpop.permute.xlu1 %2920  ;;  %v2856_v11 = vadd.f32 %v2855_v32, %v2850_v13 }
 0xa69   :  { %v2886_v49 = vadd.f32 %v2885_v59, %v2880_v31  ;;  %v3085_v59 = vmul.f32 %v6694_v0, %v7765_v3 }
 0xa6a   :  { %v2857_v15 = vadd.f32 %v2856_v11, %v2838_v38 }
 0xa6b   :  { %v7020_v8 = vpop.permute.xlu0 %3133  ;;  %v2892_v13 = vadd.f32 %v2891_v58, %v2886_v49 }
 0xa6c   :  { %v2931_v50 = vpop.permute.xlu1 %2930 }
 0xa6f   :  { %v7030_v19 = vpop.permute.xlu0 %3143 }
 0xa70   :  { %v2941_v57 = vpop.permute.xlu1 %2940 }
 0xa73   :  { %v3154_v16 = vpop.permute.xlu0 %3153 }
 0xa75   :  { %3223 = vrot.lane.b32.xlu1 %v3221_v43, %s5537_s17  ;;  %v2862_v43 = vmul.f32 %v6694_v0, %v7770_v51  ;;  %v2951_v51 = vpop.permute.xlu1 %2950 }
 0xa77   :  { %v2868_v12 = vadd.f32 %v2867_v29, %v2862_v43  ;;  %v3164_v24 = vpop.permute.xlu0 %3163 }
 0xa79   :  { %v2874_v40 = vadd.f32 %v2873_v39, %v2868_v12  ;;  %v2961_v43 = vpop.permute.xlu1 %2960 }
 0xa7b   :  { %v2875_v1 = vadd.f32 %v2874_v40, %v2857_v15  ;;  %v3174_v29 = vpop.permute.xlu0 %3173 }
 0xa7d   :  { %v2893_v38 = vadd.f32 %v2892_v13, %v2875_v1  ;;  %v2971_v11 = vpop.permute.xlu1 %2970 }
 0xa7f   :  { %v2903_v32 = vadd.f32 %v2901_v53, %v2893_v38  ;;  %v3184_v10 = vpop.permute.xlu0 %3183  ;;  %v3086_v53 = vmul.f32 %v6691_v23, %v7766_v35  ;;  %v3094_v23 = vmul.f32 %v6733_v54, %v7772_v7 }
 0xa81   :  { %v2913_v22 = vadd.f32 %v2911_v36, %v2903_v32  ;;  %v2981_v39 = vpop.permute.xlu1 %2980  ;;  %v7778_v36 = vld [vmem:[#allocation65_spill] sm:$0xff]  ;;  %v283_v32 = vld [vmem:[%s7779_s3 + $0x8] sm:$0xff] }
 0xa83   :  { %v2923_v56 = vadd.f32 %v2921_v2, %v2913_v22  ;;  %v3194_v61 = vpop.permute.xlu0 %3193 }
 0xa85   :  { %v2933_v9 = vadd.f32 %v2931_v50, %v2923_v56  ;;  %v2991_v21 = vpop.permute.xlu1 %2990  ;;  %v3091_v56 = vmul.f32 %v6726_v60, %v7767_v18 }
 0xa87   :  { %v2943_v12 = vadd.f32 %v2941_v57, %v2933_v9  ;;  %v3001_v15 = vpop.permute.xlu0 %3000  ;;  %v3092_v9 = vmul.f32 %v6715_v28, %v7768_v46  ;;  %v7777_v57 = vld [vmem:[#allocation64_spill] sm:$0xff] }
 0xa89   :  { %v2953_v6 = vadd.f32 %v2951_v51, %v2943_v12  ;;  %v3204_v50 = vpop.permute.xlu1 %3203 }
 0xa8b   :  { %v2963_v55 = vadd.f32 %v2961_v43, %v2953_v6 }
 0xa8d   :  { %v2973_v17 = vadd.f32 %v2971_v11, %v2963_v55  ;;  %v3087_v55 = vadd.f32 %v3086_v53, %v3085_v59  ;;  %v3214_v7 = vpop.permute.xlu1 %3213  ;;  %v279_v11 = vld [vmem:[%s7780_s24 + $0x8] sm:$0xff] }
 0xa8f   :  { %v2983_v34 = vadd.f32 %v2981_v39, %v2973_v17  ;;  %v3088_v17 = vmul.f32 %v6710_v27, %v7769_v48  ;;  %v2716_v48 = vpop.xlane.xlu0 %2715  ;;  %v282_v39 = vld [vmem:[%s7779_s3] sm:$0xff] }
 0xa90   :  { %v2726_v22 = vmul.f32 0.071428575, %v2716_v48 }
 0xa91   :  { %v2993_v31 = vadd.f32 %v2991_v21, %v2983_v34  ;;  %v3093_v34 = vadd.f32 %v3092_v9, %v3091_v56  ;;  %v3089_v0 = vadd.f32 %v3088_v17, %v3087_v55  ;;  %v2719_v49 = vpop.xlane.xlu1 %2718 }
 0xa93   :  { %v3003_v58 = vadd.f32 %v3001_v15, %v2993_v31  ;;  %v3095_v3 = vadd.f32 %v3094_v23, %v3093_v34  ;;  %v2722_v13 = vpop.xlane.xlu0 %2721  ;;  %v280_v34 = vld [vmem:[%s7780_s24 + $0x10] sm:$0xff] }
 0xa94   :  { %v2728_v23 = vmul.f32 0.071428575, %v2722_v13 }
 0xa95   :  { %v3004_v6 = vmul.f32 %v3003_v58, %v7777_v57  ;;  %v3096_v35 = vadd.f32 %v3095_v3, %v3089_v0 }
 0xa97   :  { %v7060_v2 = vadd.f32 %v3004_v6, %v7778_v36  ;;  %v3106_v28 = vadd.f32 %v7014_v42, %v3096_v35  ;;  %v281_v35 = vld [vmem:[%s7780_s24 + $0x18] sm:$0xff] }
 0xa99   :  { %v3007_v60 = vmul.f32 0.044715, %v7060_v2  ;;  %v3116_v27 = vadd.f32 %v7016_v62, %v3106_v28  ;;  %v2727_v62 = vmul.f32 0.071428575, %v2719_v49 }
 0xa9b   :  { %v3008_v18 = vmul.f32 %v3007_v60, %v7060_v2  ;;  %v3126_v46 = vadd.f32 %v7018_v33, %v3116_v27  ;;  %v2735_v58 = vmul.f32 %v2727_v62, %v283_v32  ;;  %v284_v60 = vld [vmem:[%s7779_s3 + $0x10] sm:$0xff]  ;;  %v3006_v32 = vmul.f32 0.5, %v7060_v2 }
 0xa9d   :  { %v3009_v51 = vmul.f32 %v3008_v18, %v7060_v2  ;;  %v3136_v54 = vadd.f32 %v7020_v8, %v3126_v46  ;;  %v278_v8 = vld [vmem:[%s7780_s24] sm:$0xff]  ;;  %v285_v18 = vld [vmem:[%s7779_s3 + $0x18] sm:$0xff] }
 0xa9f   :  { %v3146_v40 = vadd.f32 %v7030_v19, %v3136_v54  ;;  %v3010_v42 = vadd.f32 %v3009_v51, %v7060_v2 }
 0xaa1   :  { %v3156_v1 = vadd.f32 %v3154_v16, %v3146_v40  ;;  %v3011_v38 = vmul.f32 0.7978846, %v3010_v42 }
 0xaa3   :  { %v3166_v43 = vadd.f32 %v3164_v24, %v3156_v1  ;;  %5415 = vtanh.f32 %v3011_v38  ;;  %v2734_v24 = vmul.f32 %v2726_v22, %v282_v39 }
 0xaa5   :  { %v3176_v33 = vadd.f32 %v3174_v29, %v3166_v43 }
 0xaa7   :  { %v3186_v31 = vadd.f32 %v3184_v10, %v3176_v33  ;;  %v286_v33 = vld [vmem:[%s5732_s20] sm:$0xf] }
 0xaa9   :  { %v3196_v16 = vadd.f32 %v3194_v61, %v3186_v31 }
 0xaab   :  { %v3206_v6 = vadd.f32 %v3204_v50, %v3196_v16  ;;  %v2736_v50 = vmul.f32 %v2728_v23, %v284_v60  ;;  %v7781_v16 = vld [vmem:[#allocation66_spill] sm:$0xff]  ;;  %v7784_v60 = vld [vmem:[#allocation76_spill] sm:$0xff] }
 0xaad   :  { %v3216_v0 = vadd.f32 %v3214_v7, %v3206_v6  ;;  %v5416_v40 = vpop.eup %5415 }
 0xaae   :  { %v3013_v62 = vadd.f32 1.0, %v5416_v40  ;;  %v7790_v40 = vld [vmem:[#allocation70_spill] sm:$0xff] }
 0xab0   :  { %v3014_v22 = vmul.f32 %v3013_v62, %v3006_v32  ;;  %v7792_v62 = vld [vmem:[#allocation71_spill] sm:$0xff] }
 0xaec   :  { %v2247_v12 = vpop.xlane.xlu0 %2246 }
 0xaed   :  { %v2256_v21 = vmul.f32 0.071428575, %v2247_v12  ;;  %v2244_v15 = vpop.xlane.xlu1 %2243  ;;  %v5438_v12 = vld [vmem:[%s5582_s25] sm:$0xff]  ;;  %s5548_s25 = smov 1  }
 0xaee   :  { %v2255_v19 = vmul.f32 0.071428575, %v2244_v15  ;;  %v287_v15 = vld [vmem:[%s5737_s27] sm:$0xf] }
 0xaef   :  { %v2731_v59 = vmul.f32 %v2256_v21, %v279_v11 }
 0xaf0   :  { %v2730_v29 = vmul.f32 %v2255_v19, %v278_v8 }
 0xaf1   :  { %v2739_v53 = vadd.f32 %v2735_v58, %v2731_v59  ;;  %v2253_v56 = vpop.xlane.xlu1 %2252  ;;  %v2250_v9 = vpop.xlane.xlu0 %2249 }
 0xaf2   :  { %v2738_v55 = vadd.f32 %v2734_v24, %v2730_v29  ;;  %v2257_v17 = vmul.f32 0.071428575, %v2250_v9  ;;  %v2258_v3 = vmul.f32 0.071428575, %v2253_v56 }
 0xaf4   :  { %v5179_v10 = vpack.c.bf16 %v2739_v53, %v2738_v55  ;;  %v2732_v61 = vmul.f32 %v2257_v17, %v280_v34  ;;  %v2733_v51 = vmul.f32 %v2258_v3, %v281_v35  ;;  %v7782_v17 = vld [vmem:[#allocation68_spill] sm:$0xff] }
 0xaf5   :  { %v3224_v28 = vpop.permute.xlu1 %3223  ;;  %v2725_v27 = vpop.xlane.xlu0 %2724 }
 0xaf6   :  { %v3226_v46 = vadd.f32 %v3224_v28, %v3216_v0  ;;  %v2729_v48 = vmul.f32 0.071428575, %v2725_v27  ;;  %5180 = vmatpush3.bf16.msra.mxu1 %v5179_v10  ;;  %v2740_v42 = vadd.f32 %v2736_v50, %v2732_v61  ;;  %v7783_v0 = vld [vmem:[#allocation67_spill] sm:$0xff]  ;;  %v7785_v28 = vld [vmem:[#allocation69_spill] sm:$0xff]  ;;  %v7786_v27 = vld [vmem:[#allocation72_spill] sm:$0xff] }
 0xaf7   :  { %5181 = vmatprep.subr.bf16.mxu1 %v7691_v47  ;;  %v7788_v50 = vld [vmem:[#allocation88_spill] sm:$0xff] }
 0xaf8   :  { %v3227_v54 = vmul.f32 %v3226_v46, %v7777_v57  ;;  %v2737_v7 = vmul.f32 %v2729_v48, %v285_v18  ;;  %v7787_v46 = vld [vmem:[#allocation79_spill] sm:$0xff] }
 0xafa   :  { %v3228_v1 = vadd.f32 %v3227_v54, %v7778_v36  ;;  %v2741_v49 = vadd.f32 %v2737_v7, %v2733_v51  ;;  %v7789_v54 = vld [vmem:[#allocation89_spill] sm:$0xff] }
 0xafc   :  { %v3230_v13 = vmul.f32 0.044715, %v3228_v1  ;;  %v5182_v43 = vpack.c.bf16 %v2741_v49, %v2740_v42  ;;  %v3229_v39 = vmul.f32 0.5, %v3228_v1 }
 0xafe   :  { %v3231_v38 = vmul.f32 %v3230_v13, %v3228_v1  ;;  %5183 = vmatpush3.bf16.msra.mxu1 %v5182_v43 }
 0xaff   :  { %5007 = vmatprep.subr.mxu1 %v7643_v52 }
 0xb00   :  { %v3232_v11 = vmul.f32 %v3231_v38, %v3228_v1 }
 0xb01   :  { %5005 = vmatmul.mubr.msk.f32.vlgmr.msra.gmra.mrb[10].mxu1 %vm1435_vm5, %v286_v33  ;;  %v7793_v33 = vld [vmem:[#allocation74_spill] sm:$0xff] }
 0xb02   :  { %5008 = vmatpush3.msra.mxu1 %v3014_v22  ;;  %5009 = vmatprep.mubr.msk.f32.mxu1 %vm5539_vm0, %v7643_v52  ;;  %v3233_v57 = vadd.f32 %v3232_v11, %v3228_v1  ;;  %v7791_v1 = vld [vmem:[#allocation77_spill] sm:$0xff]  ;;  %v7794_v22 = vld [vmem:[#allocation75_spill] sm:$0xff] }
 0xb03   :  { %5012 = vmatprep.subr.mxu1 %v7643_v52 }
 0xb04   :  { %v3234_v36 = vmul.f32 0.7978846, %v3233_v57  ;;  %v7795_v57 = vld [vmem:[#allocation85_spill] sm:$0xff] }
 0xb05   :  { %5010 = vmatmul.mubr.msk.f32.vlgmr.msra.gmra.mrb[12].mxu1 %vm699_vm1, %v5438_v12 }
 0xb06   :  { %5417 = vtanh.f32 %v3234_v36  ;;  %5014 = vmatprep.mubr.msk.f32.mxu1 %vm5539_vm0, %v7643_v52 }
 0xb10   :  { %v5418_v2 = vpop.eup %5417 }
 0xb11   :  { %v3236_v21 = vadd.f32 1.0, %v5418_v2 }
 0xb13   :  { %v3237_v8 = vmul.f32 %v3236_v21, %v3229_v39  ;;  %v7797_v39 = vld [vmem:[#allocation73_spill] sm:$0xff] }
 0xb15   :  { %5013 = vmatpush3.msra.mxu1 %v3237_v8  ;;  %v7798_v8 = vld [vmem:[#allocation81_spill] sm:$0xff] }
 0xb16   :  { %5015 = vmatmul.mubr.msk.f32.vlgmr.msra.gmra.mrb[14].mxu1 %vm699_vm1, %v5438_v12  ;;  %5184 = vmatprep.subr.bf16.mxu1 %v7691_v47  ;;  %v7796_v12 = vld [vmem:[#allocation82_spill] sm:$0xff] }
 0xb17   :  { %5025 = vmatprep.mubr.msk.f32.mxu1 %vm5539_vm0, %v7643_v52 }
 0xbd4   :  { %v2811_v31 = vpop.f32.mrb[10].mxu1 }
 0xbd5   :  { %v2812_v19 = vadd.f32 %v2811_v31, %v287_v15  ;;  %v5006_v58 = vpop.f32.mrb[11].mxu1  ;;  %v7799_v31 = vld [vmem:[#allocation78_spill] sm:$0xff] }
 0xbd6   :  { %v7800_v58 = vld [vmem:[#allocation80_spill] sm:$0xff] }
 0xbd7   :  { %2816 = vst.msk [vmem:[%s5745_s9] sm:$0xf] %vm2815_vm8, %v2812_v19 }
 0xbd8   :  { %v3081_v59 = vpop.f32.mrb[12].mxu1 }
 0xbd9   :  { %v3082_v24 = vadd.f32 %v3081_v59, %v7781_v16  ;;  %v5011_v29 = vpop.f32.mrb[13].mxu1 }
 0xbdb   :  { %3311 = vrot.lane.b32.xlu0 %v3082_v24, %s5545_s21 }
 0xbe9   :  { %v3304_v53 = vpop.f32.mrb[14].mxu1 }
 0xbea   :  { %v3305_v56 = vadd.f32 %v3304_v53, %v7781_v16  ;;  %v5016_v9 = vpop.f32.mrb[15].mxu1  ;;  %v7801_v16 = vld [vmem:[#allocation84_spill] sm:$0xff] }
 0xbec   :  { %3316 = vrot.lane.b32.xlu1 %v3305_v56, %s5545_s21  ;;  %v7802_v56 = vld [vmem:[#allocation83_spill] sm:$0xff] }
 0xc4d   :  { %v3312_v6 = vpop.permute.xlu0 %3311 }
 0xc4e   :  { %3314 = vst.msk [vmem:[#allocation2] sm:$0xff] %vm1003_vm3, %v3312_v6 }
 0xc55   :  { %v3323_v55 = vld [vmem:[#allocation2] sm:$0xff] }
 0xc56   :  { %v3324_v34 = vmul.f32 %v3323_v55, %v7782_v17  ;;  %v3347_v23 = vmul.f32 %v3323_v55, %v7783_v0  ;;  %v3342_v61 = vmul.f32 %v3323_v55, %v7786_v27  ;;  %v3412_v51 = vmul.f32 %v3323_v55, %v7788_v50 }
 0xc57   :  { %v3359_v42 = vmul.f32 %v3323_v55, %v7790_v40  ;;  %v3374_v49 = vmul.f32 %v3323_v55, %v7791_v1  ;;  %v3417_v38 = vmul.f32 %v3323_v55, %v7792_v62  ;;  %v3386_v32 = vmul.f32 %v3323_v55, %v7793_v33 }
 0xc58   :  { %3326 = vrot.lane.b32.xlu0 %v3324_v34, %s5534_s0  ;;  %3349 = vrot.lane.b32.xlu1 %v3347_v23, %s5534_s0  ;;  %v3429_v11 = vmul.f32 %v3323_v55, %v7794_v22  ;;  %v3398_v36 = vmul.f32 %v3323_v55, %v7795_v57  ;;  %v3441_v2 = vmul.f32 %v3323_v55, %v7796_v12 }
 0xc5e   :  { %v3317_v10 = vpop.permute.xlu1 %3316 }
 0xc5f   :  { %3319 = vst.msk [vmem:[#allocation3] sm:$0xff] %vm1003_vm3, %v3317_v10 }
 0xc66   :  { %v3344_v3 = vld [vmem:[#allocation3] sm:$0xff] }
 0xc67   :  { %v3353_v35 = vmul.f32 %v3344_v3, %v7784_v60  ;;  %v3330_v18 = vmul.f32 %v3344_v3, %v7785_v28  ;;  %v3345_v48 = vmul.f32 %v3344_v3, %v7787_v46  ;;  %v3415_v7 = vmul.f32 %v3344_v3, %v7789_v54  ;;  %v7804_v46 = vld [vmem:[#allocation87_spill] sm:$0xff] }
 0xc68   :  { %v3380_v21 = vmul.f32 %v3344_v3, %v7797_v39  ;;  %v3423_v15 = vmul.f32 %v3344_v3, %v7798_v8  ;;  %v3392_v19 = vmul.f32 %v3344_v3, %v7799_v31  ;;  %v3435_v59 = vmul.f32 %v3344_v3, %v7800_v58 }
 0xc69   :  { %3355 = vrot.lane.b32.xlu1 %v3353_v35, %s5534_s0  ;;  %3332 = vrot.lane.b32.xlu0 %v3330_v18, %s5534_s0  ;;  %v3346_v13 = vadd.f32 %v3345_v48, %v3342_v61  ;;  %v3416_v43 = vadd.f32 %v3415_v7, %v3412_v51  ;;  %v3404_v24 = vmul.f32 %v3344_v3, %v7801_v16  ;;  %v7803_v18 = vld [vmem:[#allocation86_spill] sm:$0xff] }
 0xc6a   :  { %v3321_v9 = vmul.f32 %v3344_v3, %v7802_v56  ;;  %v3453_v27 = vmul.f32 %v3323_v55, %v7803_v18  ;;  %v3447_v48 = vmul.f32 %v3344_v3, %v7804_v46  ;;  %v7805_v51 = vld [vmem:[#allocation90_spill] sm:$0xff]  ;;  %v7811_v18 = vld [vmem:[#allocation97_spill] sm:$0xff] }
 0xc6b   :  { %v3371_v54 = vmul.f32 %v3344_v3, %v7805_v51 }
 0xc6d   :  { %3361 = vrot.lane.b32.xlu1 %v3359_v42, %s5535_s13  ;;  %3376 = vrot.lane.b32.xlu0 %v3374_v49, %s5534_s0 }
 0xc71   :  { %3419 = vrot.lane.b32.xlu1 %v3417_v38, %s5534_s0  ;;  %3388 = vrot.lane.b32.xlu0 %v3386_v32, %s5535_s13 }
 0xc75   :  { %3431 = vrot.lane.b32.xlu1 %v3429_v11, %s5535_s13  ;;  %3400 = vrot.lane.b32.xlu0 %v3398_v36, %s5536_s4 }
 0xc79   :  { %3443 = vrot.lane.b32.xlu1 %v3441_v2, %s5536_s4  ;;  %3382 = vrot.lane.b32.xlu0 %v3380_v21, %s5534_s0  ;;  %v7806_v2 = vld [vmem:[#allocation93_spill] sm:$0xff] }
 0xc7d   :  { %3425 = vrot.lane.b32.xlu1 %v3423_v15, %s5534_s0  ;;  %3394 = vrot.lane.b32.xlu0 %v3392_v19, %s5535_s13  ;;  %v7807_v15 = vld [vmem:[#allocation98_spill] sm:$0xff] }
 0xc81   :  { %3437 = vrot.lane.b32.xlu1 %v3435_v59, %s5535_s13  ;;  %3406 = vrot.lane.b32.xlu0 %v3404_v24, %s5536_s4 }
 0xcca   :  { %v3327_v29 = vpop.permute.xlu0 %3326  ;;  %v3350_v53 = vpop.permute.xlu1 %3349 }
 0xccb   :  { %v3329_v6 = vadd.f32 %v3327_v29, %v3321_v9  ;;  %v3352_v0 = vadd.f32 %v3350_v53, %v3346_v13 }
 0xcdb   :  { %v3333_v17 = vpop.permute.xlu0 %3332  ;;  %v3356_v34 = vpop.permute.xlu1 %3355 }
 0xcdc   :  { %v3335_v23 = vadd.f32 %v3333_v17, %v3329_v6  ;;  %v3358_v10 = vadd.f32 %v3356_v34, %v3352_v0  ;;  %v7809_v17 = vld [vmem:[#allocation94_spill] sm:$0xff] }
 0xcde   :  { %3337 = vrot.lane.b32.xlu0 %v3335_v23, %s5534_s0 }
 0xcdf   :  { %v3377_v60 = vpop.permute.xlu0 %3376  ;;  %v3362_v35 = vpop.permute.xlu1 %3361 }
 0xce0   :  { %v3364_v28 = vadd.f32 %v3362_v35, %v3358_v10  ;;  %v3379_v7 = vadd.f32 %v3377_v60, %v3371_v54  ;;  %v7810_v10 = vld [vmem:[#allocation92_spill] sm:$0xff] }
 0xce2   :  { %3455 = vrot.lane.b32.xlu0 %v3453_v27, %s5537_s17  ;;  %3366 = vrot.lane.b32.xlu1 %v3364_v28, %s5534_s0 }
 0xce3   :  { %v3389_v61 = vpop.permute.xlu0 %3388  ;;  %v3420_v33 = vpop.permute.xlu1 %3419 }
 0xce4   :  { %v3422_v57 = vadd.f32 %v3420_v33, %v3416_v43  ;;  %v7808_v43 = vld [vmem:[#allocation91_spill] sm:$0xff] }
 0xce6   :  { %3449 = vrot.lane.b32.xlu1 %v3447_v48, %s5536_s4 }
 0xce7   :  { %v3401_v50 = vpop.permute.xlu0 %3400  ;;  %v3432_v32 = vpop.permute.xlu1 %3431 }
 0xceb   :  { %v3383_v40 = vpop.permute.xlu0 %3382  ;;  %v3444_v22 = vpop.permute.xlu1 %3443 }
 0xcec   :  { %v3385_v42 = vadd.f32 %v3383_v40, %v3379_v7  ;;  %v7812_v40 = vld [vmem:[#allocation95_spill] sm:$0xff] }
 0xcee   :  { %v3391_v1 = vadd.f32 %v3389_v61, %v3385_v42 }
 0xcef   :  { %v3395_v49 = vpop.permute.xlu0 %3394  ;;  %v3426_v11 = vpop.permute.xlu1 %3425 }
 0xcf0   :  { %v3397_v13 = vadd.f32 %v3395_v49, %v3391_v1  ;;  %v3428_v36 = vadd.f32 %v3426_v11, %v3422_v57 }
 0xcf2   :  { %v3403_v62 = vadd.f32 %v3401_v50, %v3397_v13  ;;  %v3434_v39 = vadd.f32 %v3432_v32, %v3428_v36 }
 0xcf3   :  { %v3407_v55 = vpop.permute.xlu0 %3406  ;;  %v3438_v21 = vpop.permute.xlu1 %3437 }
 0xcf4   :  { %v3409_v38 = vadd.f32 %v3407_v55, %v3403_v62  ;;  %v3440_v19 = vadd.f32 %v3438_v21, %v3434_v39  ;;  %v7813_v62 = vld [vmem:[#allocation96_spill] sm:$0xff] }
 0xcf6   :  { %3410 = vst.msk [vmem:[#allocation4 + $0x10] sm:$0xff] %vm1043_vm4, %v3409_v38  ;;  %v3446_v16 = vadd.f32 %v3444_v22, %v3440_v19 }
 0xcfd   :  { %v3462_v12 = vld [vmem:[#allocation4 + $0x10] sm:$0xff] }
 0xcfe   :  { %v3466_v3 = vmul.f32 %v3462_v12, %v7806_v2 }
 0xd00   :  { %v3470_v31 = vadd.f32 %v3466_v3, %v7807_v15 }
 0xd02   :  { %v3478_v59 = vmul.f32 0.044715, %v3470_v31 }
 0xd04   :  { %v3482_v6 = vmul.f32 %v3478_v59, %v3470_v31 }
 0xd06   :  { %v3486_v28 = vmul.f32 %v3482_v6, %v3470_v31 }
 0xd08   :  { %v3490_v50 = vadd.f32 %v3486_v28, %v3470_v31 }
 0xd0a   :  { %v3494_v13 = vmul.f32 0.7978846, %v3490_v50 }
 0xd50   :  { %v3338_v8 = vpop.permute.xlu0 %3337 }
 0xd51   :  { %3340 = vst.msk [vmem:[#allocation4] sm:$0xff] %vm1043_vm4, %v3338_v8 }
 0xd54   :  { %v3367_v58 = vpop.permute.xlu1 %3366  ;;  %v3456_v9 = vpop.permute.xlu0 %3455 }
 0xd55   :  { %3369 = vst.msk [vmem:[#allocation4 + $0x8] sm:$0xff] %vm1043_vm4, %v3367_v58 }
 0xd58   :  { %v3460_v24 = vld [vmem:[#allocation4] sm:$0xff]  ;;  %v3450_v29 = vpop.permute.xlu1 %3449 }
 0xd59   :  { %v3464_v53 = vmul.f32 %v3460_v24, %v7808_v43  ;;  %v3452_v56 = vadd.f32 %v3450_v29, %v3446_v16  ;;  %v3474_v16 = vmul.f32 0.5, %v3470_v31 }
 0xd5b   :  { %v3468_v34 = vadd.f32 %v3464_v53, %v7809_v17  ;;  %v3458_v0 = vadd.f32 %v3456_v9, %v3452_v56 }
 0xd5c   :  { %v3461_v23 = vld [vmem:[#allocation4 + $0x8] sm:$0xff] }
 0xd5d   :  { %v3465_v60 = vmul.f32 %v3461_v23, %v7810_v10  ;;  %3459 = vst.msk [vmem:[#allocation4 + $0x18] sm:$0xff] %vm1043_vm4, %v3458_v0  ;;  %v3476_v35 = vmul.f32 0.044715, %v3468_v34  ;;  %v3472_v21 = vmul.f32 0.5, %v3468_v34 }
 0xd5f   :  { %v3469_v27 = vadd.f32 %v3465_v60, %v7811_v18  ;;  %v3480_v61 = vmul.f32 %v3476_v35, %v3468_v34 }
 0xd61   :  { %v3477_v46 = vmul.f32 0.044715, %v3469_v27  ;;  %v3484_v48 = vmul.f32 %v3480_v61, %v3468_v34  ;;  %v3473_v8 = vmul.f32 0.5, %v3469_v27 }
 0xd63   :  { %v3481_v51 = vmul.f32 %v3477_v46, %v3469_v27  ;;  %v3488_v54 = vadd.f32 %v3484_v48, %v3468_v34 }
 0xd64   :  { %v3463_v7 = vld [vmem:[#allocation4 + $0x18] sm:$0xff] }
 0xd65   :  { %v3467_v42 = vmul.f32 %v3463_v7, %v7812_v40  ;;  %v3485_v1 = vmul.f32 %v3481_v51, %v3469_v27  ;;  %v3492_v49 = vmul.f32 0.7978846, %v3488_v54 }
 0xd67   :  { %v3471_v55 = vadd.f32 %v3467_v42, %v7813_v62  ;;  %v3489_v38 = vadd.f32 %v3485_v1, %v3469_v27  ;;  %5419 = vtanh.f32 %v3492_v49 }
 0xd68   :  { %5421 = vtanh.f32 %v3494_v13 }
 0xd69   :  { %v3479_v33 = vmul.f32 0.044715, %v3471_v55  ;;  %v3493_v32 = vmul.f32 0.7978846, %v3489_v38  ;;  %v3475_v9 = vmul.f32 0.5, %v3471_v55 }
 0xd6b   :  { %v3483_v22 = vmul.f32 %v3479_v33, %v3471_v55  ;;  %5423 = vtanh.f32 %v3493_v32 }
 0xd6d   :  { %v3487_v11 = vmul.f32 %v3483_v22, %v3471_v55 }
 0xd6f   :  { %v3491_v57 = vadd.f32 %v3487_v11, %v3471_v55 }
 0xd71   :  { %v5420_v36 = vpop.eup %5419  ;;  %v3495_v12 = vmul.f32 0.7978846, %v3491_v57 }
 0xd72   :  { %v5422_v2 = vpop.eup %5421  ;;  %v3500_v3 = vadd.f32 1.0, %v5420_v36 }
 0xd73   :  { %5425 = vtanh.f32 %v3495_v12  ;;  %v3502_v19 = vadd.f32 1.0, %v5422_v2 }
 0xd74   :  { %v7163_v58 = vmul.f32 %v3500_v3, %v3472_v21 }
 0xd75   :  { %v5424_v39 = vpop.eup %5423  ;;  %v7169_v29 = vmul.f32 %v3502_v19, %v3474_v16  ;;  %v7814_v16 = vld [vmem:[#allocation100_spill] sm:$0xff] }
 0xd76   :  { %v3501_v15 = vadd.f32 1.0, %v5424_v39  ;;  %v3508_v43 = vsel %vm1043_vm4, %v7163_v58, 0.0 }
 0xd77   :  { %v3511_v34 = vsel %vm1043_vm4, %v7169_v29, 0.0 }
 0xd78   :  { %v7165_v59 = vmul.f32 %v3501_v15, %v3473_v8 }
 0xd7a   :  { %v3509_v24 = vsel %vm1043_vm4, %v7165_v59, 0.0 }
 0xd7b   :  { %v3510_v56 = vadd.f32 %v3509_v24, %v3508_v43  ;;  %v7815_v43 = vld [vmem:[#allocation99_spill] sm:$0xff] }
 0xd7d   :  { %v5426_v53 = vpop.eup %5425  ;;  %v3512_v0 = vadd.f32 %v3511_v34, %v3510_v56  ;;  %v7816_v56 = vld [vmem:[#allocation104_spill] sm:$0xff] }
 0xd7e   :  { %v3503_v6 = vadd.f32 1.0, %v5426_v53 }
 0xd80   :  { %v7173_v17 = vmul.f32 %v3503_v6, %v3475_v9  ;;  %v7817_v6 = vld [vmem:[#allocation103_spill] sm:$0xff] }
 0xd82   :  { %v3513_v31 = vsel %vm1043_vm4, %v7173_v17, 0.0 }
 0xd83   :  { %v3514_v23 = vadd.f32 %v3513_v31, %v3512_v0  ;;  %v7818_v0 = vld [vmem:[#allocation102_spill] sm:$0xff] }
 0xd85   :  { %v3515_v10 = vrot.slane %v3514_v23, 4 }
 0xd87   :  { %v3516_v60 = vadd.f32 %v3515_v10, %v3514_v23  ;;  %v7819_v23 = vld [vmem:[#allocation101_spill] sm:$0xff] }
 0xd89   :  { %v3517_v35 = vrot.slane %v3516_v60, 2 }
 0xd8b   :  { %v3518_v28 = vadd.f32 %v3517_v35, %v3516_v60  ;;  %v7820_v60 = vld [vmem:[#allocation106_spill] sm:$0xff] }
 0xd8d   :  { %v3519_v18 = vrot.slane %v3518_v28, 1 }
 0xd8f   :  { %v3520_v27 = vadd.f32 %v3519_v18, %v3518_v28  ;;  %v7821_v28 = vld [vmem:[#allocation105_spill] sm:$0xff] }
 0xd91   :  { %v3521_v61 = vmul.f32 0.03125, %v3520_v27 }
 0xd93   :  { %v3522_v46 = vsub.f32 %v7163_v58, %v3521_v61  ;;  %v3523_v48 = vsub.f32 %v7165_v59, %v3521_v61  ;;  %v3524_v50 = vsub.f32 %v7169_v29, %v3521_v61  ;;  %v3525_v51 = vsub.f32 %v7173_v17, %v3521_v61 }
 0xd95   :  { %v3526_v54 = vmul.f32 %v3522_v46, %v3522_v46  ;;  %v3527_v7 = vmul.f32 %v3523_v48, %v3523_v48  ;;  %v3528_v40 = vmul.f32 %v3524_v50, %v3524_v50  ;;  %v3529_v42 = vmul.f32 %v3525_v51, %v3525_v51 }
 0xd97   :  { %v3530_v1 = vsel %vm1043_vm4, %v3526_v54, 0.0  ;;  %v3531_v49 = vsel %vm1043_vm4, %v3527_v7, 0.0  ;;  %v3533_v62 = vsel %vm1043_vm4, %v3528_v40, 0.0  ;;  %v3535_v38 = vsel %vm1043_vm4, %v3529_v42, 0.0  ;;  %v5443_v54 = vld [vmem:[%s7688_s14 + $0x18] sm:$0xff]  ;;  %v5444_v7 = vld [vmem:[%s7702_s22] sm:$0xff] }
 0xd98   :  { %v3532_v13 = vadd.f32 %v3531_v49, %v3530_v1  ;;  %v5445_v40 = vld [vmem:[%s7692_s19 + $0x8] sm:$0xff]  ;;  %v5446_v42 = vld [vmem:[%s7692_s19 + $0x10] sm:$0xff]  ;;  %v5447_v1 = vld [vmem:[%s7692_s19 + $0x18] sm:$0xff] }
 0xd9a   :  { %v3534_v55 = vadd.f32 %v3533_v62, %v3532_v13  ;;  %v7822_v13 = vld [vmem:[#allocation107_spill] sm:$0xff] }
 0xd9c   :  { %v3536_v33 = vadd.f32 %v3535_v38, %v3534_v55 }
 0xd9e   :  { %v3537_v32 = vrot.slane %v3536_v33, 4 }
 0xda0   :  { %v3538_v22 = vadd.f32 %v3537_v32, %v3536_v33 }
 0xda2   :  { %v3539_v11 = vrot.slane %v3538_v22, 2 }
 0xda4   :  { %v3540_v57 = vadd.f32 %v3539_v11, %v3538_v22 }
 0xda6   :  { %v3541_v36 = vrot.slane %v3540_v57, 1 }
 0xda8   :  { %v3542_v12 = vadd.f32 %v3541_v36, %v3540_v57 }
 0xdaa   :  { %v3543_v2 = vmul.f32 0.03125, %v3542_v12 }
 0xdac   :  { %v3544_v3 = vadd.f32 1e-05, %v3543_v2 }
 0xdae   :  { %5427 = vrsqrt.f32 %v3544_v3 }
 0xdb8   :  { %v5428_v39 = vpop.eup %5427 }
 0xdb9   :  { %v3546_v21 = vmul.f32 %v5428_v39, %v3522_v46  ;;  %v3547_v8 = vmul.f32 %v5428_v39, %v3523_v48  ;;  %v3548_v15 = vmul.f32 %v5428_v39, %v3524_v50  ;;  %v3549_v19 = vmul.f32 %v5428_v39, %v3525_v51  ;;  %v5439_v46 = vld [vmem:[%s7687_s8] sm:$0xf]  ;;  %v5440_v48 = vld [vmem:[%s7688_s14 + $0x8] sm:$0xff]  ;;  %v5441_v50 = vld [vmem:[%s7688_s14 + $0x10] sm:$0xff] }
 0xdba   :  { %v5442_v51 = vld [vmem:[%s7692_s19] sm:$0xff] }
 0xdbb   :  { %v3550_v24 = vmul.f32 %v3546_v21, %v7814_v16  ;;  %v3551_v53 = vmul.f32 %v3547_v8, %v7815_v43  ;;  %v3552_v9 = vmul.f32 %v3548_v15, %v7816_v56  ;;  %v3553_v34 = vmul.f32 %v3549_v19, %v7817_v6  ;;  %v7823_v43 = vld [vmem:[#allocation108_spill] sm:$0xff]  ;;  %v7824_v56 = vld [vmem:[#allocation109_spill] sm:$0xff] }
 0xdbd   :  { %v3554_v31 = vadd.f32 %v3550_v24, %v7818_v0  ;;  %v3555_v10 = vadd.f32 %v3551_v53, %v7819_v23  ;;  %v3556_v35 = vadd.f32 %v3552_v9, %v7820_v60  ;;  %v3557_v18 = vadd.f32 %v3553_v34, %v7821_v28  ;;  %v7825_v0 = vld [vmem:[#allocation31_spill] sm:$0xff] }
 0xdbf   :  { %v5185_v27 = vpack.c.bf16 %v3555_v10, %v3554_v31  ;;  %v5188_v61 = vpack.c.bf16 %v3557_v18, %v3556_v35  ;;  %v7826_v31 = vsub.s32 3, %v7825_v0  ;;  %v7827_v10 = vld [vmem:[#allocation35_spill] sm:$0xff]  ;;  %v7829_v18 = vld [vmem:[#allocation110_spill] sm:$0xff] }
 0xdc0   :  { %v7828_v35 = vld [vmem:[#allocation111_spill] sm:$0xff] }
 0xdc1   :  { %5186 = vmatpush3.bf16.msra.mxu1 %v5185_v27  ;;  %5191 = vmatprep.subr.bf16.mxu0 %v5185_v27 }
 0xdc2   :  { %5193 = vmatpush3.bf16.msra.mxu0 %v5185_v27  ;;  %5187 = vmatprep.subr.bf16.mxu1 %v7691_v47 }
 0xdc3   :  { %5195 = vmatprep.subr.bf16.mxu0 %v5188_v61 }
 0xdc5   :  { %5189 = vmatpush3.bf16.msra.mxu1 %v5188_v61 }
 0xdc6   :  { %5197 = vmatpush3.bf16.msra.mxu0 %v5188_v61  ;;  %5199 = vmatprep.subr.bf16.mxu1 %v5185_v27 }
 0xdc8   :  { %5026 = vmatmul.mubr.msk.f32.vlgmr.msra.gmra.mrb[16].mxu1 %vm1435_vm5, %v5439_v46 }
 0xdc9   :  { %5037 = vmatmul.mubr.msk.f32.vlgmr.msra.gmra.mrb[18].mxu0 %vm1435_vm5, %v5440_v48  ;;  %5201 = vmatpush3.bf16.msra.mxu1 %v5185_v27 }
 0xdca   :  { %5203 = vmatprep.subr.bf16.mxu1 %v5188_v61  ;;  %5039 = vmatprep.mubr.msk.f32.mxu0 %vm1435_vm5, %v5441_v50 }
 0xdcb   :  { %5050 = vmatprep.mubr.msk.f32.mxu1 %vm1435_vm5, %v5442_v51 }
 0xdcd   :  { %5040 = vmatmul.mubr.msk.f32.gmra.mrb[20].mxu0 %vm1435_vm5, %v5443_v54  ;;  %5205 = vmatpush3.bf16.msra.mxu1 %v5188_v61 }
 0xdce   :  { %5064 = vmatprep.mubr.msk.f32.mxu0 %vm1435_vm5, %v5444_v7  ;;  %5214 = vmatprep.subr.bf16.mxu1 %v7691_v47  ;;  %v7830_v7 = vld [vmem:[#allocation122_spill] sm:$0xff] }
 0xdd0   :  { %5051 = vmatmul.mubr.msk.f32.vlgmr.msra.gmra.mrb[18].mxu1 %vm1435_vm5, %v5445_v40  ;;  %v7831_v40 = vld [vmem:[#allocation128_spill] sm:$0xff] }
 0xdd1   :  { %5053 = vmatprep.mubr.msk.f32.mxu1 %vm1435_vm5, %v5446_v42  ;;  %v4217_v42 = vmul.f32 %v7831_v40, %v7830_v7 }
 0xdd4   :  { %5054 = vmatmul.mubr.msk.f32.gmra.mrb[20].mxu1 %vm1435_vm5, %v5447_v1  ;;  %v7832_v1 = vld [vmem:[#allocation120_spill] sm:$0xff] }
 0xdd5   :  { %5078 = vmatprep.mubr.msk.f32.mxu1 %vm5539_vm0, %v7643_v52 }
 0xe9b   :  { %v3624_v49 = vpop.f32.mrb[16].mxu1 }
 0xe9c   :  { %v3625_v62 = vadd.f32 %v3624_v49, %v7822_v13  ;;  %v5027_v55 = vpop.f32.mrb[17].mxu1  ;;  %v5038_v38 = vpop.f32.mrb[18].mxu0  ;;  %v7833_v49 = vld [vmem:[#allocation127_spill] sm:$0xff] }
 0xe9d   :  { %v3694_v33 = vpop.f32.mrb[19].mxu0  ;;  %v3700_v53 = vadd.f32 %v5038_v38, %v7823_v43  ;;  %v4215_v13 = vmul.f32 %v7833_v49, %v7832_v1  ;;  %v7834_v55 = vld [vmem:[#allocation124_spill] sm:$0xff] }
 0xe9e   :  { %v3798_v32 = vsel %vm1743_vm6, %v3625_v62, -inf  ;;  %v3695_v9 = vadd.f32 %v3694_v33, %v7824_v56  ;;  %v4230_v38 = vmul.f32 %v7833_v49, %v7834_v55  ;;  %v7835_v33 = vld [vmem:[#allocation126_spill] sm:$0xff] }
 0xe9f   :  { %3799 = vmax.xlane.f32.xlu1 %v3798_v32  ;;  %v4232_v32 = vmul.f32 %v7831_v40, %v7835_v33 }
 0xea0   :  { %v5041_v22 = vpop.f32.mrb[20].mxu0 }
 0xea1   :  { %v3704_v11 = vpop.f32.mrb[21].mxu0  ;;  %v3710_v28 = vadd.f32 %v5041_v22, %v7828_v35  ;;  %v7836_v22 = vld [vmem:[#allocation123_spill] sm:$0xff] }
 0xea2   :  { %v3705_v27 = vadd.f32 %v3704_v11, %v7829_v18  ;;  %v4216_v11 = vmul.f32 %v7831_v40, %v7836_v22 }
 0xea3   :  { %v5052_v57 = vpop.f32.mrb[18].mxu1 }
 0xea4   :  { %v3779_v36 = vpop.f32.mrb[19].mxu1 }
 0xea7   :  { %v5055_v12 = vpop.f32.mrb[20].mxu1 }
 0xea8   :  { %v3789_v2 = vpop.f32.mrb[21].mxu1 }
 0xf2c   :  { %v3800_v3 = vpop.xlane.xlu1 %3799 }
 0xf2d   :  { %v3801_v39 = vsub.f32 %v3625_v62, %v3800_v3  ;;  %v4219_v62 = vadd.f32 %v4217_v42, %v4215_v13  ;;  %v7837_v3 = vld [vmem:[#allocation125_spill] sm:$0xff] }
 0xf2f   :  { %v3802_v21 = vmul.f32 1.442695, %v3801_v39  ;;  %v4214_v39 = vmul.f32 %v7833_v49, %v7837_v3  ;;  %v7844_v49 = vld [vmem:[#allocation130_spill] sm:$0xff]  ;;  %v5449_v3 = vld [vmem:[%s7702_s22 + $0x10] sm:$0xff] }
 0xf31   :  { %5429 = vpow2.f32 %v3802_v21  ;;  %v4234_v21 = vadd.f32 %v4232_v32, %v4230_v38 }
 0xf3b   :  { %v5430_v8 = vpop.eup %5429 }
 0xf3c   :  { %v3804_v15 = vsel %vm1743_vm6, %v5430_v8, 0.0 }
 0xf3d   :  { %3805 = vadd.xlane.f32.xlu0 %v3804_v15  ;;  %v7838_v15 = vld [vmem:[#allocation129_spill] sm:$0xff] }
 0xfca   :  { %v3806_v19 = vpop.xlane.xlu0 %3805 }
 0xfcb   :  { %5431 = vrcp.f32 %v3806_v19  ;;  %v7839_v19 = vld [vmem:[#allocation113_spill] sm:$0xff] }
 0xfd5   :  { %v5432_v16 = vpop.eup %5431 }
 0xfd6   :  { %v3808_v24 = vmul.f32 %v5432_v16, %v5430_v8  ;;  %v4218_v8 = vadd.f32 %v4216_v11, %v4214_v39  ;;  %v3785_v16 = vadd.f32 %v5052_v57, %v7839_v19  ;;  %v5448_v11 = vld [vmem:[%s7702_s22 + $0x8] sm:$0xff]  ;;  %v5450_v39 = vld [vmem:[%s7702_s22 + $0x18] sm:$0xff] }
 0xfd8   :  { %v3823_v6 = vrot.slane %v3808_v24, %v5806_v25  ;;  %v3812_v34 = vrot.slane %v3808_v24, %v5809_v26  ;;  %v3845_v23 = vrot.slane %v3808_v24, %v7826_v31  ;;  %v3834_v60 = vrot.slane %v3808_v24, %v7827_v10  ;;  %v7840_v24 = vld [vmem:[#allocation112_spill] sm:$0xff] }
 0xfd9   :  { %v3780_v43 = vadd.f32 %v3779_v36, %v7840_v24 }
 0xfda   :  { %v3824_v61 = vmul.f32 %v3823_v6, %v3700_v53  ;;  %v3813_v46 = vmul.f32 %v3812_v34, %v3695_v9  ;;  %v3846_v51 = vmul.f32 %v3845_v23, %v3710_v28  ;;  %v3835_v54 = vmul.f32 %v3834_v60, %v3705_v27  ;;  %v7841_v9 = vld [vmem:[#allocation114_spill] sm:$0xff]  ;;  %v7842_v34 = vld [vmem:[#allocation115_spill] sm:$0xff] }
 0xfdb   :  { %v3828_v53 = vmax.f32 %v3785_v16, 0.0  ;;  %v3817_v56 = vmax.f32 %v3780_v43, 0.0  ;;  %v3795_v6 = vadd.f32 %v5055_v12, %v7841_v9  ;;  %v3790_v0 = vadd.f32 %v3789_v2, %v7842_v34 }
 0xfdc   :  { %v3825_v48 = vsel %vm1043_vm4, %v3824_v61, 0.0  ;;  %v3814_v50 = vsel %vm1043_vm4, %v3813_v46, 0.0  ;;  %v3847_v25 = vsel %vm1043_vm4, %v3846_v51, 0.0  ;;  %v3836_v26 = vsel %vm1043_vm4, %v3835_v54, 0.0 }
 0xfdd   :  { %3826 = vadd.xlane.f32.xlu1 %v3825_v48  ;;  %3815 = vadd.xlane.f32.xlu0 %v3814_v50  ;;  %v3850_v35 = vmax.f32 %v3795_v6, 0.0  ;;  %v3839_v28 = vmax.f32 %v3790_v0, 0.0  ;;  %v7843_v50 = vld [vmem:[#allocation132_spill] sm:$0xff]  ;;  %v3947_v43 = vmul.f32 %v7165_v59, %v6860_v41 }
 0xfe1   :  { %3848 = vadd.xlane.f32.xlu1 %v3847_v25  ;;  %3837 = vadd.xlane.f32.xlu0 %v3836_v26 }
 0xff2   :  { %4224 = vrot.lane.b32.xlu1 %v4219_v62, %s5534_s0  ;;  %v7845_v62 = vld [vmem:[#allocation131_spill] sm:$0xff] }
 0xff6   :  { %4238 = vrot.lane.b32.xlu1 %v4234_v21, %s5535_s13  ;;  %v5451_v21 = vld [vmem:[%s7754_s16] sm:$0xff] }
 0xff7   :  { %4222 = vrot.lane.b32.xlu0 %v4218_v8, %s5534_s0 }
 0xffb   :  { %4240 = vrot.lane.b32.xlu0 %v7838_v15, %s5535_s13 }
0x106a   :  { %v3827_v31 = vpop.xlane.xlu1 %3826  ;;  %v3816_v23 = vpop.xlane.xlu0 %3815 }
0x106b   :  { %v3829_v10 = vmul.f32 %v3828_v53, %v3827_v31  ;;  %v3818_v60 = vmul.f32 %v3817_v56, %v3816_v23  ;;  %v3946_v56 = vmul.f32 %v7163_v58, %v6860_v41  ;;  %v3949_v23 = vmul.f32 %v7173_v17, %v6860_v41 }
0x106d   :  { %3830 = vst.msk [vmem:[#allocation4 + $0x8] sm:$0xff] %vm1043_vm4, %v3829_v10  ;;  %3819 = vst.msk [vmem:[#allocation4] sm:$0xff] %vm1043_vm4, %v3818_v60 }
0x106e   :  { %v3849_v18 = vpop.xlane.xlu1 %3848  ;;  %v3838_v57 = vpop.xlane.xlu0 %3837 }
0x106f   :  { %v3851_v27 = vmul.f32 %v3850_v35, %v3849_v18  ;;  %v3840_v36 = vmul.f32 %v3839_v28, %v3838_v57 }
0x1071   :  { %3852 = vst.msk [vmem:[#allocation4 + $0x18] sm:$0xff] %vm1043_vm4, %v3851_v27  ;;  %3841 = vst.msk [vmem:[#allocation4 + $0x10] sm:$0xff] %vm1043_vm4, %v3840_v36 }
0x1072   :  { %v4225_v12 = vpop.permute.xlu1 %4224  ;;  %v4223_v2 = vpop.permute.xlu0 %4222 }
0x1073   :  { %v4229_v48 = vadd.f32 %v4225_v12, %v6900_v44  ;;  %v4228_v51 = vadd.f32 %v4223_v2, %v7843_v50 }
0x1074   :  { %v3853_v61 = vld [vmem:[#allocation4] sm:$0xff]  ;;  %v3854_v46 = vld [vmem:[#allocation4 + $0x8] sm:$0xff] }
0x1075   :  { %v5206_v54 = vpack.c.bf16 %v3854_v46, %v3853_v61 }
0x1076   :  { %v4239_v25 = vpop.permute.xlu1 %4238  ;;  %v4241_v26 = vpop.permute.xlu0 %4240 }
0x1077   :  { %v4244_v7 = vadd.f32 %v4239_v25, %v4228_v51  ;;  %v4245_v40 = vadd.f32 %v4241_v26, %v4229_v48  ;;  %5207 = vmatprep.subr.bf16.mxu0 %v5206_v54 }
0x1078   :  { %5209 = vmatpush3.bf16.msra.mxu0 %v5206_v54  ;;  %v3855_v42 = vld [vmem:[#allocation4 + $0x10] sm:$0xff]  ;;  %v3856_v1 = vld [vmem:[#allocation4 + $0x18] sm:$0xff] }
0x1079   :  { %v4246_v13 = vadd.f32 %v4244_v7, %v7844_v49  ;;  %v4247_v55 = vadd.f32 %v4245_v40, %v7845_v62  ;;  %v5210_v44 = vpack.c.bf16 %v3856_v1, %v3855_v42 }
0x107b   :  { %v4248_v38 = vmax.f32 %v4246_v13, 0.0  ;;  %v4249_v33 = vmax.f32 %v4247_v55, 0.0  ;;  %5211 = vmatprep.subr.bf16.mxu0 %v5210_v44 }
0x107c   :  { %5213 = vmatpush3.bf16.msra.mxu0 %v5210_v44 }
0x107d   :  { %v5388_v32 = vpack.i.bf16 %v4249_v33, %v4248_v38  ;;  %v7262_v22 = vpack.c.bf16 %v4249_v33, %v4248_v38 }
0x107f   :  { %5389 = vrot.lane.b32.xlu0 %v5388_v32, %s5535_s13  ;;  %5384 = vrot.lane.b32.xlu1 %v5388_v32, %s5534_s0 }
0x1080   :  { %5065 = vmatmul.mubr.msk.f32.vlgmr.msra.gmra.mrb[22].mxu0 %vm1435_vm5, %v5448_v11 }
0x1081   :  { %5067 = vmatprep.mubr.msk.f32.mxu0 %vm1435_vm5, %v5449_v3 }
0x1084   :  { %5068 = vmatmul.mubr.msk.f32.gmra.mrb[24].mxu0 %vm1435_vm5, %v5450_v39 }
0x1085   :  { %5083 = vmatprep.mubr.msk.f32.mxu0 %vm699_vm1, %v5451_v21 }
0x1153   :  { %v5066_v8 = vpop.f32.mrb[22].mxu0 }
0x1154   :  { %v3929_v15 = vadd.f32 %v5066_v8, %v6558_v5  ;;  %v3923_v19 = vpop.f32.mrb[23].mxu0 }
0x1155   :  { %v3924_v16 = vadd.f32 %v3923_v19, %v6563_v14 }
0x1156   :  { %v3943_v24 = vmul.f32 %v3929_v15, %v6857_v45 }
0x1157   :  { %v3942_v53 = vmul.f32 %v3924_v16, %v6857_v45  ;;  %v5069_v9 = vpop.f32.mrb[24].mxu0 }
0x1158   :  { %v7282_v6 = vadd.f32 %v3947_v43, %v3943_v24  ;;  %v3939_v34 = vadd.f32 %v5069_v9, %v6565_v20  ;;  %v3933_v0 = vpop.f32.mrb[25].mxu0  ;;  %v3948_v20 = vmul.f32 %v7169_v29, %v6860_v41 }
0x1159   :  { %v7285_v5 = vadd.f32 %v3946_v56, %v3942_v53  ;;  %v3934_v14 = vadd.f32 %v3933_v0, %v6568_v4  ;;  %v7846_v56 = vld [vmem:[#allocation118_spill] sm:$0xff]  ;;  %v7847_v0 = vld [vmem:[#allocation117_spill] sm:$0xff] }
0x115a   :  { %v3955_v31 = vsel %vm1043_vm4, %v7282_v6, 0.0  ;;  %v3945_v59 = vmul.f32 %v3939_v34, %v6857_v45  ;;  %v5385_v34 = vpop.permute.xlu1 %5384 }
0x115b   :  { %v3954_v58 = vsel %vm1043_vm4, %v7285_v5, 0.0  ;;  %v3944_v10 = vmul.f32 %v3934_v14, %v6857_v45 }
0x115c   :  { %v3956_v60 = vadd.f32 %v3955_v31, %v3954_v58  ;;  %v7298_v35 = vadd.f32 %v3949_v23, %v3945_v59  ;;  %v7848_v31 = vld [vmem:[#allocation116_spill] sm:$0xff]  ;;  %v7849_v23 = vld [vmem:[#allocation121_spill] sm:$0xff] }
0x115d   :  { %v7300_v4 = vadd.f32 %v3948_v20, %v3944_v10  ;;  %v7850_v10 = vld [vmem:[#allocation119_spill] sm:$0xff] }
0x115e   :  { %v3959_v17 = vsel %vm1043_vm4, %v7298_v35, 0.0 }
0x115f   :  { %v3957_v28 = vsel %vm1043_vm4, %v7300_v4, 0.0 }
0x1160   :  { %v3958_v18 = vadd.f32 %v3957_v28, %v3956_v60 }
0x1162   :  { %v3960_v57 = vadd.f32 %v3959_v17, %v3958_v18  ;;  %v5386_v18 = vunpack.i.l.bf16 %v5385_v34 }
0x1164   :  { %v3961_v27 = vrot.slane %v3960_v57, 4 }
0x1166   :  { %v3962_v36 = vadd.f32 %v3961_v27, %v3960_v57  ;;  %v5452_v27 = vld [vmem:[%s7751_s11] sm:$0xff] }
0x1168   :  { %v3963_v12 = vrot.slane %v3962_v36, 2 }
0x116a   :  { %v3964_v45 = vadd.f32 %v3963_v12, %v3962_v36  ;;  %v5453_v36 = vld [vmem:[%s7752_s15 + $0x20] sm:$0xff] }
0x116c   :  { %v3965_v2 = vrot.slane %v3964_v45, 1 }
0x116e   :  { %v3966_v61 = vadd.f32 %v3965_v2, %v3964_v45  ;;  %v5454_v45 = vld [vmem:[%s7752_s15 + $0x28] sm:$0xff]  ;;  %v5455_v2 = vld [vmem:[%s7752_s15 + $0x30] sm:$0xff] }
0x1170   :  { %v3967_v41 = vmul.f32 0.03125, %v3966_v61  ;;  %v5456_v61 = vld [vmem:[%s7752_s15 + $0x38] sm:$0xff] }
0x1172   :  { %v3968_v29 = vsub.f32 %v7285_v5, %v3967_v41  ;;  %v3969_v46 = vsub.f32 %v7282_v6, %v3967_v41  ;;  %v3970_v48 = vsub.f32 %v7300_v4, %v3967_v41  ;;  %v3971_v50 = vsub.f32 %v7298_v35, %v3967_v41  ;;  %v5457_v41 = vld [vmem:[%s7752_s15] sm:$0xff] }
0x1174   :  { %v3972_v51 = vmul.f32 %v3968_v29, %v3968_v29  ;;  %v3973_v54 = vmul.f32 %v3969_v46, %v3969_v46  ;;  %v3974_v25 = vmul.f32 %v3970_v48, %v3970_v48  ;;  %v3975_v26 = vmul.f32 %v3971_v50, %v3971_v50 }
0x1176   :  { %v3976_v7 = vsel %vm1043_vm4, %v3972_v51, 0.0  ;;  %v3977_v40 = vsel %vm1043_vm4, %v3973_v54, 0.0  ;;  %v3979_v1 = vsel %vm1043_vm4, %v3974_v25, 0.0  ;;  %v3981_v13 = vsel %vm1043_vm4, %v3975_v26, 0.0  ;;  %v5463_v51 = vld [vmem:[%s7752_s15 + $0x50] sm:$0xff]  ;;  %v5464_v54 = vld [vmem:[%s7752_s15 + $0x58] sm:$0xff] }
0x1177   :  { %v3978_v42 = vadd.f32 %v3977_v40, %v3976_v7  ;;  %v7851_v26 = vld [vmem:[#allocation41_spill] sm:$0xff] }
0x1179   :  { %v3980_v49 = vadd.f32 %v3979_v1, %v3978_v42 }
0x117b   :  { %v3982_v62 = vadd.f32 %v3981_v13, %v3980_v49 }
0x117d   :  { %v3983_v55 = vrot.slane %v3982_v62, 4 }
0x117f   :  { %v3984_v44 = vadd.f32 %v3983_v55, %v3982_v62 }
0x1181   :  { %v3985_v38 = vrot.slane %v3984_v44, 2 }
0x1183   :  { %v3986_v33 = vadd.f32 %v3985_v38, %v3984_v44  ;;  %v7852_v44 = vld [vmem:[#allocation47_spill] sm:$0xff] }
0x1185   :  { %v3987_v32 = vrot.slane %v3986_v33, 1 }
0x1187   :  { %v3988_v11 = vadd.f32 %v3987_v32, %v3986_v33  ;;  %v7853_v32 = vld [vmem:[#allocation43_spill] sm:$0xff] }
0x1189   :  { %v3989_v3 = vmul.f32 0.03125, %v3988_v11 }
0x118b   :  { %v3990_v39 = vadd.f32 1e-05, %v3989_v3 }
0x118d   :  { %5433 = vrsqrt.f32 %v3990_v39 }
0x1197   :  { %v5434_v21 = vpop.eup %5433 }
0x1198   :  { %v3994_v8 = vmul.f32 %v5434_v21, %v3970_v48  ;;  %v3992_v15 = vmul.f32 %v5434_v21, %v3968_v29  ;;  %v3993_v19 = vmul.f32 %v5434_v21, %v3969_v46  ;;  %v3995_v16 = vmul.f32 %v5434_v21, %v3971_v50  ;;  %v5458_v29 = vld [vmem:[%s7752_s15 + $0x8] sm:$0xff]  ;;  %v5459_v46 = vld [vmem:[%s7752_s15 + $0x10] sm:$0xff]  ;;  %v5461_v48 = vld [vmem:[%s7752_s15 + $0x40] sm:$0xff] }
0x1199   :  { %v5462_v50 = vld [vmem:[%s7752_s15 + $0x48] sm:$0xff] }
0x119a   :  { %v3996_v24 = vmul.f32 %v3992_v15, %v6572_v30  ;;  %v3997_v43 = vmul.f32 %v3993_v19, %v6570_v63  ;;  %v3998_v53 = vmul.f32 %v3994_v8, %v6582_v37  ;;  %v3999_v9 = vmul.f32 %v3995_v16, %v7846_v56  ;;  %v5390_v37 = vpop.permute.xlu0 %5389  ;;  %v5465_v56 = vld [vmem:[%s7754_s16 + $0x8] sm:$0xff] }
0x119b   :  { %v5387_v30 = vunpack.i.h.bf16 %v5385_v34  ;;  %v5392_v17 = vunpack.i.h.bf16 %v5390_v37  ;;  %v5391_v57 = vunpack.i.l.bf16 %v5390_v37  ;;  %v5467_v34 = vld [vmem:[%s7754_s16 + $0x18] sm:$0xff]  ;;  %v7858_v37 = vld [vmem:[#allocation48_spill] sm:$0xff] }
0x119c   :  { %v4000_v14 = vadd.f32 %v3996_v24, %v7847_v0  ;;  %v4001_v59 = vadd.f32 %v3997_v43, %v7848_v31  ;;  %v4002_v58 = vadd.f32 %v3998_v53, %v7849_v23  ;;  %v4003_v20 = vadd.f32 %v3999_v9, %v7850_v10  ;;  %v5466_v9 = vld [vmem:[%s7754_s16 + $0x10] sm:$0xff]  ;;  %v7855_v23 = vld [vmem:[#allocation42_spill] sm:$0xff] }
0x119d   :  { %v5220_v63 = vpack.c.bf16 %v5387_v30, %v5386_v18  ;;  %v5228_v12 = vpack.c.bf16 %v5392_v17, %v5391_v57  ;;  %v7856_v10 = vld [vmem:[#allocation46_spill] sm:$0xff] }
0x119e   :  { %v5215_v60 = vpack.c.bf16 %v4001_v59, %v4000_v14  ;;  %v5218_v28 = vpack.c.bf16 %v4003_v20, %v4002_v58  ;;  %v7854_v14 = vld [vmem:[#allocation45_spill] sm:$0xff] }
0x11a0   :  { %5216 = vmatpush3.bf16.msra.mxu1 %v5215_v60  ;;  %v7857_v60 = vld [vmem:[#allocation34_spill] sm:$0xff] }
0x11a1   :  { %5217 = vmatprep.subr.bf16.mxu1 %v7691_v47 }
0x11a4   :  { %5219 = vmatpush3.bf16.msra.mxu1 %v5218_v28  ;;  %v4173_v28 = vmul.f32 %v7282_v6, %v7857_v60  ;;  %v4175_v6 = vmul.f32 %v7298_v35, %v7857_v60 }
0x11a5   :  { %5221 = vmatprep.subr.bf16.mxu1 %v5220_v63 }
0x11a7   :  { %5079 = vmatmul.mubr.msk.f32.vlgmr.msra.gmra.mrb[22].mxu1 %vm1435_vm5, %v5452_v27  ;;  %v7859_v27 = vld [vmem:[#allocation44_spill] sm:$0xff] }
0x11a8   :  { %5223 = vmatpush3.bf16.msra.mxu1 %v5220_v63  ;;  %5093 = vmatprep.mubr.msk.f32.mxu1 %vm2384_vm7, %v5453_v36  ;;  %v4172_v63 = vmul.f32 %v7285_v5, %v7857_v60  ;;  %v7861_v5 = vld [vmem:[#allocation32_spill] sm:$0xff] }
0x11a9   :  { %5225 = vmatprep.subr.bf16.mxu1 %v7262_v22 }
0x11ab   :  { %5094 = vmatmul.mubr.msk.f32.vlgmr.msra.gmra.mrb[24].mxu1 %vm2384_vm7, %v5454_v45 }
0x11ac   :  { %5227 = vmatpush3.bf16.msra.mxu1 %v7262_v22  ;;  %5096 = vmatprep.mubr.msk.f32.mxu1 %vm2384_vm7, %v5455_v2  ;;  %v5460_v22 = vld [vmem:[%s7752_s15 + $0x18] sm:$0xff] }
0x11ad   :  { %5229 = vmatprep.subr.bf16.mxu1 %v5228_v12 }
0x11af   :  { %5097 = vmatmul.mubr.msk.f32.gmra.mrb[26].mxu1 %vm2384_vm7, %v5456_v61  ;;  %v4174_v61 = vmul.f32 %v7300_v4, %v7857_v60  ;;  %v5475_v60 = vld [vmem:[%s7779_s3 + $0x10] sm:$0xff] }
0x11b0   :  { %5103 = vmatprep.mubr.msk.f32.mxu1 %vm2384_vm7, %v5457_v41  ;;  %v7860_v41 = vld [vmem:[#allocation38_spill] sm:$0xff] }
0x11b3   :  { %5104 = vmatmul.mubr.msk.f32.vlgmr.msra.gmra.mrb[24].mxu1 %vm2384_vm7, %v5458_v29 }
0x11b4   :  { %5231 = vmatpush3.bf16.msra.mxu1 %v5228_v12  ;;  %5106 = vmatprep.mubr.msk.f32.mxu1 %vm2384_vm7, %v5459_v46 }
0x11b7   :  { %5107 = vmatmul.mubr.msk.f32.gmra.mrb[26].mxu1 %vm2384_vm7, %v5460_v22 }
0x11b8   :  { %5113 = vmatprep.mubr.msk.f32.mxu1 %vm2384_vm7, %v5461_v48 }
0x11bb   :  { %5114 = vmatmul.mubr.msk.f32.vlgmr.msra.gmra.mrb[24].mxu1 %vm2384_vm7, %v5462_v50 }
0x11bc   :  { %5116 = vmatprep.mubr.msk.f32.mxu1 %vm2384_vm7, %v5463_v51 }
0x11bf   :  { %5117 = vmatmul.mubr.msk.f32.gmra.mrb[26].mxu1 %vm2384_vm7, %v5464_v54 }
0x127a   :  { %v4070_v25 = vpop.f32.mrb[22].mxu1 }
0x127b   :  { %v4071_v7 = vadd.f32 %v4070_v25, %v7851_v26  ;;  %v5080_v40 = vpop.f32.mrb[23].mxu1 }
0x127d   :  { %v4075_v42 = vmul.f32 0.044715, %v4071_v7  ;;  %v4074_v15 = vmul.f32 0.5, %v4071_v7 }
0x127f   :  { %v4076_v1 = vmul.f32 %v4075_v42, %v4071_v7 }
0x1281   :  { %v4077_v49 = vmul.f32 %v4076_v1, %v4071_v7 }
0x1283   :  { %v4078_v13 = vadd.f32 %v4077_v49, %v4071_v7 }
0x1285   :  { %v4079_v62 = vmul.f32 0.7978846, %v4078_v13 }
0x1287   :  { %5435 = vtanh.f32 %v4079_v62 }
0x128e   :  { %v5115_v55 = vpop.f32.mrb[24].mxu1 }
0x128f   :  { %v4524_v38 = vadd.f32 %v5115_v55, %v7852_v44  ;;  %v4500_v33 = vpop.f32.mrb[25].mxu1 }
0x1290   :  { %v4523_v11 = vadd.f32 %v4500_v33, %v7853_v32  ;;  %v5469_v32 = vld [vmem:[%s7780_s24 + $0x8] sm:$0xff] }
0x1291   :  { %v5436_v3 = vpop.eup %5435  ;;  %v4528_v39 = vmax.f32 %v4524_v38, 0.0  ;;  %v5468_v38 = vld [vmem:[%s7779_s3 + $0x8] sm:$0xff] }
0x1292   :  { %v4527_v21 = vmax.f32 %v4523_v11, 0.0  ;;  %v5118_v8 = vpop.f32.mrb[26].mxu1  ;;  %v4081_v19 = vadd.f32 1.0, %v5436_v3  ;;  %v5470_v3 = vld [vmem:[%s7779_s3] sm:$0xff] }
0x1293   :  { %v4510_v16 = vpop.f32.mrb[27].mxu1  ;;  %v4534_v24 = vsel %vm1043_vm4, %v4528_v39, 0.0  ;;  %v4526_v29 = vadd.f32 %v5118_v8, %v7860_v41 }
0x1294   :  { %4535 = vadd.xlane.f32.xlu1 %v4534_v24  ;;  %v4531_v43 = vsel %vm1043_vm4, %v4527_v21, 0.0  ;;  %v4082_v53 = vmul.f32 %v4081_v19, %v4074_v15  ;;  %v4525_v46 = vadd.f32 %v4510_v16, %v7861_v5  ;;  %v5471_v21 = vld [vmem:[%s7780_s24] sm:$0xff] }
0x1295   :  { %4532 = vadd.xlane.f32.xlu0 %v4531_v43  ;;  %v4530_v25 = vmax.f32 %v4526_v29, 0.0 }
0x1296   :  { %5081 = vmatprep.subr.mxu0 %v4082_v53  ;;  %v4529_v26 = vmax.f32 %v4525_v46, 0.0 }
0x1297   :  { %5082 = vmatpush3.msra.mxu0 %v4082_v53  ;;  %v4540_v4 = vsel %vm1043_vm4, %v4530_v25, 0.0 }
0x1298   :  { %5084 = vmatmul.mubr.msk.f32.vlgmr.msra.gmra.mrb[26].mxu0 %vm699_vm1, %v5465_v56  ;;  %5232 = vmatprep.subr.bf16.mxu0 %v7691_v47  ;;  %v4537_v7 = vsel %vm1043_vm4, %v4529_v26, 0.0 }
0x1299   :  { %5086 = vmatprep.mubr.msk.f32.mxu0 %vm699_vm1, %v5466_v9 }
0x129c   :  { %5087 = vmatmul.mubr.msk.f32.gmra.mrb[28].mxu0 %vm699_vm1, %v5467_v34 }
0x129d   :  { %5127 = vmatprep.mubr.msk.f32.mxu0 %vm5539_vm0, %v7643_v52 }
0x1321   :  { %v4536_v40 = vpop.xlane.xlu1 %4535 }
0x1322   :  { %v4533_v42 = vpop.xlane.xlu0 %4532  ;;  %v4544_v1 = vmul.f32 0.071428575, %v4536_v40 }
0x1323   :  { %v4543_v49 = vmul.f32 0.071428575, %v4533_v42 }
0x1324   :  { %v4552_v33 = vmul.f32 %v5468_v38, %v4544_v1 }
0x1325   :  { %v4551_v39 = vmul.f32 %v5470_v3, %v4543_v49 }
0x136b   :  { %v5085_v0 = vpop.f32.mrb[26].mxu0 }
0x136c   :  { %v4155_v31 = vadd.f32 %v5085_v0, %v7854_v14  ;;  %v4149_v59 = vpop.f32.mrb[27].mxu0 }
0x136d   :  { %v4150_v58 = vadd.f32 %v4149_v59, %v7855_v23  ;;  %v5473_v23 = vld [vmem:[%s7780_s24 + $0x10] sm:$0xff] }
0x136e   :  { %v4169_v20 = vmul.f32 %v4155_v31, %v7856_v10  ;;  %v5472_v31 = vld [vmem:[%s7780_s24 + $0x18] sm:$0xff] }
0x136f   :  { %v4168_v30 = vmul.f32 %v4150_v58, %v7856_v10  ;;  %v5088_v18 = vpop.f32.mrb[28].mxu0 }
0x1370   :  { %v4165_v17 = vadd.f32 %v5088_v18, %v7858_v37  ;;  %v4159_v52 = vpop.f32.mrb[29].mxu0  ;;  %v4177_v57 = vadd.f32 %v4173_v28, %v4169_v20  ;;  %v5476_v37 = vld [vmem:[%s5732_s20] sm:$0xf] }
0x1371   :  { %v4160_v36 = vadd.f32 %v4159_v52, %v7859_v27  ;;  %v4176_v12 = vadd.f32 %v4172_v63, %v4168_v30  ;;  %v5477_v52 = vld [vmem:[%s5737_s27] sm:$0xf] }
0x1372   :  { %v4171_v45 = vmul.f32 %v4165_v17, %v7856_v10  ;;  %v4183_v2 = vsel %vm1043_vm4, %v4177_v57, 0.0 }
0x1373   :  { %v4170_v22 = vmul.f32 %v4160_v36, %v7856_v10  ;;  %4184 = vadd.xlane.f32.xlu0 %v4183_v2  ;;  %v4180_v48 = vsel %vm1043_vm4, %v4176_v12, 0.0  ;;  %v5474_v10 = vld [vmem:[%s7779_s3 + $0x18] sm:$0xff] }
0x1374   :  { %4181 = vadd.xlane.f32.xlu1 %v4180_v48  ;;  %v4179_v50 = vadd.f32 %v4175_v6, %v4171_v45 }
0x1375   :  { %v4178_v51 = vadd.f32 %v4174_v61, %v4170_v22 }
0x1376   :  { %v4189_v54 = vsel %vm1043_vm4, %v4179_v50, 0.0 }
0x1377   :  { %v4186_v35 = vsel %vm1043_vm4, %v4178_v51, 0.0 }
0x1378   :  { %4190 = vadd.xlane.f32.xlu1 %v4189_v54  ;;  %4187 = vadd.xlane.f32.xlu0 %v4186_v35 }
0x137c   :  { %4541 = vadd.xlane.f32.xlu1 %v4540_v4  ;;  %4538 = vadd.xlane.f32.xlu0 %v4537_v7 }
0x1400   :  { %v4185_v13 = vpop.xlane.xlu0 %4184 }
0x1401   :  { %v4193_v62 = vmul.f32 0.071428575, %v4185_v13  ;;  %v4182_v55 = vpop.xlane.xlu1 %4181 }
0x1402   :  { %v4192_v44 = vmul.f32 0.071428575, %v4182_v55 }
0x1403   :  { %v4548_v11 = vmul.f32 %v5469_v32, %v4193_v62 }
0x1404   :  { %v4547_v8 = vmul.f32 %v5471_v21, %v4192_v44 }
0x1405   :  { %v4556_v15 = vadd.f32 %v4552_v33, %v4548_v11  ;;  %v4191_v19 = vpop.xlane.xlu1 %4190  ;;  %v4188_v16 = vpop.xlane.xlu0 %4187 }
0x1406   :  { %v4555_v24 = vadd.f32 %v4551_v39, %v4547_v8  ;;  %v4195_v53 = vmul.f32 0.071428575, %v4191_v19  ;;  %v4194_v56 = vmul.f32 0.071428575, %v4188_v16 }
0x1408   :  { %v5233_v43 = vpack.c.bf16 %v4556_v15, %v4555_v24  ;;  %v4550_v59 = vmul.f32 %v5472_v31, %v4195_v53  ;;  %v4549_v58 = vmul.f32 %v5473_v23, %v4194_v56 }
0x1409   :  { %v4542_v9 = vpop.xlane.xlu1 %4541  ;;  %v4539_v34 = vpop.xlane.xlu0 %4538 }
0x140a   :  { %v4546_v0 = vmul.f32 0.071428575, %v4542_v9  ;;  %v4545_v14 = vmul.f32 0.071428575, %v4539_v34  ;;  %5234 = vmatpush3.bf16.msra.mxu0 %v5233_v43 }
0x140b   :  { %5235 = vmatprep.subr.bf16.mxu0 %v7691_v47 }
0x140c   :  { %v4554_v20 = vmul.f32 %v5474_v10, %v4546_v0  ;;  %v4553_v28 = vmul.f32 %v5475_v60, %v4545_v14 }
0x140e   :  { %v4558_v30 = vadd.f32 %v4554_v20, %v4550_v59  ;;  %v4557_v18 = vadd.f32 %v4553_v28, %v4549_v58 }
0x1410   :  { %v5236_v63 = vpack.c.bf16 %v4558_v30, %v4557_v18 }
0x1412   :  { %5237 = vmatpush3.bf16.msra.mxu0 %v5236_v63 }
0x1415   :  { %5128 = vmatmul.mubr.msk.f32.vlgmr.msra.gmra.mrb[30].mxu0 %vm1435_vm5, %v5476_v37 }
0x14e8   :  { %v4625_v17 = vpop.f32.mrb[30].mxu0 }
0x14e9   :  { %v4626_v47 = vadd.f32 %v5477_v52, %v4625_v17  ;;  %v5129_v57 = vpop.f32.mrb[31].mxu0 }
0x14eb   :  { %4630 = vrot.lane.b32.xlu0 %v4626_v47, %s5548_s25 }
0x155d   :  { %v4631_v27 = vpop.permute.xlu0 %4630 }
0x155e   :  { %4634 = vst.msk [vmem:[%s5745_s9] sm:$0xf] %vm4633_vm9, %v4631_v27 }
0x155f   :  { %4639 = vsyncpa [#allocation6], 1 }

</bundles_post_ra>
